<compile_context>
chip_gen: v7x
topology: tpu7x:2x2x1
jax: 0.10.0
libtpu: 0.0.40
codegen_flags: <defaults>
</compile_context>

<pallas_src>
import functools

import jax
import jax.numpy as jnp
from jax import lax
from jax.experimental import pallas as pl
from jax.experimental.pallas import tpu as pltpu

EPS = 1e-5
LANE = 128          # channel axes of intermediates padded to multiples of this
ROW_TILE = 512      # rows per block for the 2-D (row, channel) kernels


def _default_vmem_limit():
    # Generation-aware scoped-VMEM limit: ~3/4 of physical VMEM, capped at 96 MiB
    # (v5e/v6e: 128 MiB physical -> 96 MiB; v7x: 64 MiB physical -> 48 MiB).
    try:
        cap = int(pltpu.get_tpu_info().vmem_capacity_bytes)
    except Exception:
        cap = 128 * 1024 * 1024
    return max(32 * 1024 * 1024, min(96 * 1024 * 1024, (cap * 3) // 4))


VMEM_LIMIT = _default_vmem_limit()


def _round_up(x, m=LANE):
    return ((x + m - 1) // m) * m


def _row_tile(m, cap=ROW_TILE):
    """Largest sublane-aligned divisor of m that is <= cap (whole m if m <= cap)."""
    if m <= cap:
        return m
    for t in range(cap, 7, -1):
        if m % t == 0 and t % 8 == 0:
            return t
    # TODO(synk): cdiv grid + masked tail tile for awkward (e.g. prime) row counts.
    return m


def _conv_strip(ho, wo, cap_rows=128):
    """Largest divisor of ho keeping strip*wo <= cap_rows (bounded accumulator)."""
    best = 1
    for t in range(1, ho + 1):
        if ho % t == 0 and t * wo <= cap_rows:
            best = t
    return best


def _split_w(w):
    """Split an f32 weight into (hi, lo) bf16 parts: w ~= hi + lo."""
    w = w.astype(jnp.float32)
    hi = w.astype(jnp.bfloat16)
    lo = (w - hi.astype(jnp.float32)).astype(jnp.bfloat16)
    return hi, lo


def _split_dot(a_f32, w_hi, w_lo):
    """3-pass split-bf16 matmul (hi*hi + lo*hi + hi*lo), f32 accumulation."""
    a_hi = a_f32.astype(jnp.bfloat16)
    a_lo = (a_f32 - a_hi.astype(jnp.float32)).astype(jnp.bfloat16)
    return (jnp.dot(a_hi, w_hi, preferred_element_type=jnp.float32)
            + jnp.dot(a_lo, w_hi, preferred_element_type=jnp.float32)
            + jnp.dot(a_hi, w_lo, preferred_element_type=jnp.float32))


# ------------------------------ Pallas kernels -------------------------------

def _colstats_kernel(x_ref, sum_ref, sq_ref):
    """Per-channel sum / sum-of-squares, accumulated across the row-tile grid."""
    @pl.when(pl.program_id(0) == 0)
    def _():
        sum_ref[...] = jnp.zeros_like(sum_ref)
        sq_ref[...] = jnp.zeros_like(sq_ref)

    x = x_ref[...]
    sum_ref[...] += jnp.sum(x, axis=0, keepdims=True)
    sq_ref[...] += jnp.sum(x * x, axis=0, keepdims=True)


def _bn_relu_matmul_stats_kernel(x_ref, scale_ref, shift_ref, whi_ref, wlo_ref,
                                 o_ref, sum_ref, sq_ref):
    """o = relu(x*scale+shift) @ w  (split-bf16), plus column stats of o (fused bn2)."""
    @pl.when(pl.program_id(0) == 0)
    def _():
        sum_ref[...] = jnp.zeros_like(sum_ref)
        sq_ref[...] = jnp.zeros_like(sq_ref)

    a = jnp.maximum(x_ref[...] * scale_ref[...] + shift_ref[...], 0.0)
    y = _split_dot(a, whi_ref[...], wlo_ref[...])
    o_ref[...] = y
    sum_ref[...] += jnp.sum(y, axis=0, keepdims=True)
    sq_ref[...] += jnp.sum(y * y, axis=0, keepdims=True)


def _bn_relu_conv3x3_stats_kernel(stride, h, w, ho, wo, strip,
                                  x_ref, scale_ref, shift_ref, whi_ref, wlo_ref,
                                  o_ref, sum_ref, sq_ref, buf_ref):
    """Fused bn2+relu + 3x3 conv (pad=1, stride), row-strip outputs, fused bn3 stats.

    Grid = (image, output-row-strip).  The zero-padded activation lives in a VMEM
    scratch filled once per image; the zero border is written only once overall.
    The 3 kw taps of each kh are folded into one K=3*C matmul.
    """
    c = x_ref.shape[-1]
    img = pl.program_id(0)
    s = pl.program_id(1)

    @pl.when(jnp.logical_and(img == 0, s == 0))
    def _():
        buf_ref[...] = jnp.zeros_like(buf_ref)      # border stays zero forever
        sum_ref[...] = jnp.zeros_like(sum_ref)
        sq_ref[...] = jnp.zeros_like(sq_ref)

    @pl.when(s == 0)
    def _():
        scale = scale_ref[...].reshape(1, 1, c)
        shift = shift_ref[...].reshape(1, 1, c)
        buf_ref[1:h + 1, 1:w + 1, :] = jnp.maximum(x_ref[0] * scale + shift, 0.0)

    r0 = s * (strip * stride)                       # first input row of this strip
    acc = jnp.zeros((strip * wo, c), jnp.float32)
    for kh in range(3):
        wins = []
        for kw in range(3):
            if stride == 1:
                win = buf_ref[pl.ds(kh + r0, strip), kw:kw + wo, :]
            else:
                win = buf_ref[pl.ds(kh + r0, strip, stride),
                              pl.ds(kw, wo, stride), :]
            wins.append(win)
        wide = jnp.concatenate(wins, axis=-1).reshape(strip * wo, 3 * c)
        acc = acc + _split_dot(wide, whi_ref[kh], wlo_ref[kh])

    o_ref[...] = acc.reshape(1, strip, wo, c)
    sum_ref[...] += jnp.sum(acc, axis=0, keepdims=True)
    sq_ref[...] += jnp.sum(acc * acc, axis=0, keepdims=True)


def _bn_relu_matmul_residual_proj_kernel(t_ref, s3_ref, h3_ref, w3hi_ref, w3lo_ref,
                                         xs_ref, s1_ref, h1_ref,
                                         wschi_ref, wsclo_ref, o_ref):
    """o = relu(t*s3+h3) @ w3 + relu(xs*s1+h1) @ wsc  (projection shortcut)."""
    a = jnp.maximum(t_ref[...] * s3_ref[...] + h3_ref[...], 0.0)
    sc = jnp.maximum(xs_ref[...] * s1_ref[...] + h1_ref[...], 0.0)
    o_ref[...] = (_split_dot(a, w3hi_ref[...], w3lo_ref[...])
                  + _split_dot(sc, wschi_ref[...], wsclo_ref[...]))


def _bn_relu_matmul_residual_id_kernel(t_ref, s3_ref, h3_ref, w3hi_ref, w3lo_ref,
                                       xs_ref, s1_ref, h1_ref, o_ref):
    """o = relu(t*s3+h3) @ w3 + relu(xs*s1+h1)  (identity shortcut, no dummy weight)."""
    a = jnp.maximum(t_ref[...] * s3_ref[...] + h3_ref[...], 0.0)
    sc = jnp.maximum(xs_ref[...] * s1_ref[...] + h1_ref[...], 0.0)
    y = _split_dot(a, w3hi_ref[...], w3lo_ref[...])
    cin = sc.shape[-1]
    coutp = y.shape[-1]
    if coutp > cin:     # pad shortcut channels up to the lane-padded output width
        sc = jnp.concatenate(
            [sc, jnp.zeros((sc.shape[0], coutp - cin), sc.dtype)], axis=-1)
    o_ref[...] = y + sc


# ----------------------------- pallas_call wrappers ---------------------------

def bn_column_stats(x2d):
    m, c = x2d.shape
    tm = _row_tile(m)
    return pl.pallas_call(
        _colstats_kernel,
        grid=(m // tm,),
        in_specs=[pl.BlockSpec((tm, c), lambda i: (i, 0))],
        out_specs=(pl.BlockSpec((1, c), lambda i: (0, 0)),
                   pl.BlockSpec((1, c), lambda i: (0, 0))),
        out_shape=(jax.ShapeDtypeStruct((1, c), jnp.float32),
                   jax.ShapeDtypeStruct((1, c), jnp.float32)),
        compiler_params=pltpu.CompilerParams(
            dimension_semantics=("arbitrary",), vmem_limit_bytes=VMEM_LIMIT),
    )(x2d)


def bn_relu_matmul_stats(x2d, scale, shift, w_hi, w_lo):
    m, cin = x2d.shape
    cout = w_hi.shape[1]
    tm = _row_tile(m)
    return pl.pallas_call(
        _bn_relu_matmul_stats_kernel,
        grid=(m // tm,),
        in_specs=[pl.BlockSpec((tm, cin), lambda i: (i, 0)),
                  pl.BlockSpec((1, cin), lambda i: (0, 0)),
                  pl.BlockSpec((1, cin), lambda i: (0, 0)),
                  pl.BlockSpec((cin, cout), lambda i: (0, 0)),
                  pl.BlockSpec((cin, cout), lambda i: (0, 0))],
        out_specs=(pl.BlockSpec((tm, cout), lambda i: (i, 0)),
                   pl.BlockSpec((1, cout), lambda i: (0, 0)),
                   pl.BlockSpec((1, cout), lambda i: (0, 0))),
        out_shape=(jax.ShapeDtypeStruct((m, cout), jnp.float32),
                   jax.ShapeDtypeStruct((1, cout), jnp.float32),
                   jax.ShapeDtypeStruct((1, cout), jnp.float32)),
        compiler_params=pltpu.CompilerParams(
            dimension_semantics=("arbitrary",), vmem_limit_bytes=VMEM_LIMIT),
    )(x2d, scale, shift, w_hi, w_lo)


def bn_relu_conv3x3_stats(x4d, scale, shift, w_hi, w_lo, stride):
    n, h, wd, c = x4d.shape
    ho = (h - 1) // stride + 1
    wo = (wd - 1) // stride + 1
    strip = _conv_strip(ho, wo)
    kernel = functools.partial(_bn_relu_conv3x3_stats_kernel,
                               stride, h, wd, ho, wo, strip)
    return pl.pallas_call(
        kernel,
        grid=(n, ho // strip),
        in_specs=[pl.BlockSpec((1, h, wd, c), lambda i, s: (i, 0, 0, 0)),
                  pl.BlockSpec((1, c), lambda i, s: (0, 0)),
                  pl.BlockSpec((1, c), lambda i, s: (0, 0)),
                  pl.BlockSpec((3, 3 * c, c), lambda i, s: (0, 0, 0)),
                  pl.BlockSpec((3, 3 * c, c), lambda i, s: (0, 0, 0))],
        out_specs=(pl.BlockSpec((1, strip, wo, c), lambda i, s: (i, s, 0, 0)),
                   pl.BlockSpec((1, c), lambda i, s: (0, 0)),
                   pl.BlockSpec((1, c), lambda i, s: (0, 0))),
        out_shape=(jax.ShapeDtypeStruct((n, ho, wo, c), jnp.float32),
                   jax.ShapeDtypeStruct((1, c), jnp.float32),
                   jax.ShapeDtypeStruct((1, c), jnp.float32)),
        scratch_shapes=[pltpu.VMEM((h + 2, wd + 2, c), jnp.float32)],
        compiler_params=pltpu.CompilerParams(
            dimension_semantics=("arbitrary", "arbitrary"),
            vmem_limit_bytes=VMEM_LIMIT),
    )(x4d, scale, shift, w_hi, w_lo)


def bn_relu_matmul_residual(t2d, s3, h3, w3_hi, w3_lo, xs2d, s1, h1,
                            wsc_hi=None, wsc_lo=None):
    m, cp = t2d.shape
    cin = xs2d.shape[1]
    coutp = w3_hi.shape[1]
    tm = _row_tile(m)
    in_specs = [pl.BlockSpec((tm, cp), lambda i: (i, 0)),
                pl.BlockSpec((1, cp), lambda i: (0, 0)),
                pl.BlockSpec((1, cp), lambda i: (0, 0)),
                pl.BlockSpec((cp, coutp), lambda i: (0, 0)),
                pl.BlockSpec((cp, coutp), lambda i: (0, 0)),
                pl.BlockSpec((tm, cin), lambda i: (i, 0)),
                pl.BlockSpec((1, cin), lambda i: (0, 0)),
                pl.BlockSpec((1, cin), lambda i: (0, 0))]
    args = [t2d, s3, h3, w3_hi, w3_lo, xs2d, s1, h1]
    if wsc_hi is not None:
        kernel = _bn_relu_matmul_residual_proj_kernel
        in_specs += [pl.BlockSpec((cin, coutp), lambda i: (0, 0)),
                     pl.BlockSpec((cin, coutp), lambda i: (0, 0))]
        args += [wsc_hi, wsc_lo]
    else:
        kernel = _bn_relu_matmul_residual_id_kernel
    return pl.pallas_call(
        kernel,
        grid=(m // tm,),
        in_specs=in_specs,
        out_specs=pl.BlockSpec((tm, coutp), lambda i: (i, 0)),
        out_shape=jax.ShapeDtypeStruct((m, coutp), jnp.float32),
        compiler_params=pltpu.CompilerParams(
            dimension_semantics=("parallel",), vmem_limit_bytes=VMEM_LIMIT),
    )(*args)


# ------------------------------- glue (JAX) -----------------------------------

def _bn_scale_shift(col_sum, col_sq, count, gamma, beta):
    # Single-pass batch statistics (training-mode BN, biased variance).
    # NOTE: E[x^2]-E[x]^2 is fine for normalized-scale activations (this block);
    # a two-pass / shifted scheme would be needed for huge-magnitude inputs.
    mean = col_sum / count
    var = jnp.maximum(col_sq / count - mean * mean, 0.0)
    scale = gamma[None, :] * lax.rsqrt(var + EPS)
    shift = beta[None, :] - mean * scale
    return scale, shift


def preact_bottleneck(x_nchw, params, stride):
    """Forward pass matching PreActBottleneck.forward (training-mode BN)."""
    x = jnp.transpose(x_nchw, (0, 2, 3, 1)).astype(jnp.float32)   # NCHW -> NHWC
    n, h, w, cin = x.shape
    planes = params["conv1_w"].shape[1]
    cout = params["conv3_w"].shape[1]                              # 4*planes
    pp, coutp = _round_up(planes), _round_up(cout)

    x2d = x.reshape(n * h * w, cin)                                # no channel pad in HBM

    # BN params (intermediate channels padded: gamma pad=1, beta pad=0 keeps the
    # zero-valued padded lanes exactly 0 through normalize+relu+matmul).
    g1, b1 = params["bn1_gamma"], params["bn1_beta"]
    g2 = jnp.pad(params["bn2_gamma"], (0, pp - planes), constant_values=1.0)
    b2 = jnp.pad(params["bn2_beta"], (0, pp - planes))
    g3 = jnp.pad(params["bn3_gamma"], (0, pp - planes), constant_values=1.0)
    b3 = jnp.pad(params["bn3_beta"], (0, pp - planes))

    # Weights: pad intermediate/output channels, fold conv2's kw into K, split bf16.
    w1 = jnp.pad(params["conv1_w"], ((0, 0), (0, pp - planes)))               # (cin, pp)
    w2 = jnp.pad(params["conv2_w"],
                 ((0, 0), (0, 0), (0, pp - planes), (0, pp - planes)))
    w2 = w2.reshape(3, 3 * pp, pp)                                            # kh, kw*cin, cout
    w3 = jnp.pad(params["conv3_w"], ((0, pp - planes), (0, coutp - cout)))    # (pp, coutp)
    w1_hi, w1_lo = _split_w(w1)
    w2_hi, w2_lo = _split_w(w2)
    w3_hi, w3_lo = _split_w(w3)
    has_proj = "shortcut_w" in params
    if has_proj:
        wsc = jnp.pad(params["shortcut_w"], ((0, 0), (0, coutp - cout)))      # (cin, coutp)
        wsc_hi, wsc_lo = _split_w(wsc)

    # --- bn1 statistics (single pass over x) ---
    s_sum, s_sq = bn_column_stats(x2d)
    scale1, shift1 = _bn_scale_shift(s_sum, s_sq, n * h * w, g1, b1)

    # --- conv1(relu(bn1(x))), fused; also emits bn2 column stats of its output ---
    t1, t1_sum, t1_sq = bn_relu_matmul_stats(x2d, scale1, shift1, w1_hi, w1_lo)
    scale2, shift2 = _bn_scale_shift(t1_sum, t1_sq, n * h * w, g2, b2)

    # --- conv2(relu(bn2(.))) 3x3/stride/pad=1, row-strip outputs, fused bn3 stats ---
    t2, t2_sum, t2_sq = bn_relu_conv3x3_stats(
        t1.reshape(n, h, w, pp), scale2, shift2, w2_hi, w2_lo, stride)
    ho, wo = t2.shape[1], t2.shape[2]
    scale3, shift3 = _bn_scale_shift(t2_sum, t2_sq, n * ho * wo, g3, b3)

    # --- conv3(relu(bn3(.))) + shortcut, fused (shortcut re-normalizes the strided
    #     rows of the *original* input; no relu(bn1(x)) round trip to HBM) ---
    xs2d = x[:, ::stride, ::stride, :].reshape(n * ho * wo, cin)
    t2_2d = t2.reshape(n * ho * wo, pp)
    if has_proj:
        out2d = bn_relu_matmul_residual(t2_2d, scale3, shift3, w3_hi, w3_lo,
                                        xs2d, scale1, shift1, wsc_hi, wsc_lo)
    else:
        out2d = bn_relu_matmul_residual(t2_2d, scale3, shift3, w3_hi, w3_lo,
                                        xs2d, scale1, shift1)

    out = out2d.reshape(n, ho, wo, coutp)[..., :cout]
    return jnp.transpose(out, (0, 3, 1, 2))                        # back to NCHW


# --------------------------- reference (pure JAX) -----------------------------

def reference(x_nchw, params, stride):
    x = jnp.transpose(x_nchw, (0, 2, 3, 1)).astype(jnp.float32)
    dn = ("NHWC", "HWIO", "NHWC")

    def bn_relu_ref(v, g, b):
        m = jnp.mean(v, axis=(0, 1, 2), keepdims=True)
        var = jnp.mean((v - m) ** 2, axis=(0, 1, 2), keepdims=True)
        return jnp.maximum((v - m) * lax.rsqrt(var + EPS) * g + b, 0.0)

    cin = x.shape[-1]
    planes = params["conv1_w"].shape[1]
    cout = params["conv3_w"].shape[1]

    out1 = bn_relu_ref(x, params["bn1_gamma"], params["bn1_beta"])
    if "shortcut_w" in params:
        sw = params["shortcut_w"].reshape(1, 1, cin, cout)
        shortcut = lax.conv_general_dilated(out1, sw, (stride, stride), "VALID",
                                            dimension_numbers=dn)
    else:
        shortcut = out1   # empty nn.Sequential applied to relu(bn1(x))

    w1 = params["conv1_w"].reshape(1, 1, cin, planes)
    t = lax.conv_general_dilated(out1, w1, (1, 1), "VALID", dimension_numbers=dn)
    t = bn_relu_ref(t, params["bn2_gamma"], params["bn2_beta"])
    t = lax.conv_general_dilated(t, params["conv2_w"], (stride, stride),
                                 ((1, 1), (1, 1)), dimension_numbers=dn)
    t = bn_relu_ref(t, params["bn3_gamma"], params["bn3_beta"])
    w3 = params["conv3_w"].reshape(1, 1, planes, cout)
    t = lax.conv_general_dilated(t, w3, (1, 1), "VALID", dimension_numbers=dn)
    return jnp.transpose(t + shortcut, (0, 3, 1, 2))


# ---------------------------------- params ------------------------------------

def make_params(key, in_planes, planes, stride):
    expansion = 4
    ks = jax.random.split(key, 4)
    params = {
        "bn1_gamma": jnp.ones((in_planes,), jnp.float32),
        "bn1_beta": jnp.zeros((in_planes,), jnp.float32),
        "bn2_gamma": jnp.ones((planes,), jnp.float32),
        "bn2_beta": jnp.zeros((planes,), jnp.float32),
        "bn3_gamma": jnp.ones((planes,), jnp.float32),
        "bn3_beta": jnp.zeros((planes,), jnp.float32),
        # conv weights: 1x1 convs as (Cin, Cout); 3x3 conv in HWIO (3,3,Cin,Cout)
        "conv1_w": 0.1 * jax.random.normal(ks[0], (in_planes, planes), jnp.float32),
        "conv2_w": 0.1 * jax.random.normal(ks[1], (3, 3, planes, planes), jnp.float32),
        "conv3_w": 0.1 * jax.random.normal(ks[2], (planes, expansion * planes), jnp.float32),
    }
    if stride != 1 or in_planes != expansion * planes:
        params["shortcut_w"] = 0.1 * jax.random.normal(
            ks[3], (in_planes, expansion * planes), jnp.float32)
    return params


# ----------------------------------- main --------------------------------------

if __name__ == "__main__":
    key = jax.random.PRNGKey(0)
    fwd = jax.jit(preact_bottleneck, static_argnums=(2,))

    configs = [
        # (N, in_planes, H, W, planes, stride)
        (2, 4, 16, 16, 4, 2),   # downsampling block (1x1 projection shortcut)
        (2, 16, 8, 8, 4, 1),    # identity shortcut (in_planes == 4*planes)
    ]
    for idx, (n, cin, h, w, planes, stride) in enumerate(configs):
        kx, kp = jax.random.split(jax.random.fold_in(key, idx))
        x = jax.random.normal(kx, (n, cin, h, w), jnp.float32)
        params = make_params(kp, cin, planes, stride)

        out = jax.block_until_ready(fwd(x, params, stride))
        ref = jax.block_until_ready(reference(x, params, stride))

        ho = (h - 1) // stride + 1
        wo = (w - 1) // stride + 1
        assert out.shape == (n, 4 * planes, ho, wo), (out.shape, (n, 4 * planes, ho, wo))
        err = float(jnp.max(jnp.abs(out - ref)))
        assert jnp.allclose(out, ref, atol=1e-4, rtol=1e-4), \
            f"mismatch vs JAX reference (config {idx}, max abs err {err})"

    print("KERNEL_OK")
</pallas_src>

<mosaic_0001>
module attributes {stable_mosaic.version = 11 : i64} {
  func.func @_colstats_kernel(%arg0: i32, %arg1: memref<512x4xf32, #tpu.memory_space<vmem>>, %arg2: memref<1x4xf32, #tpu.memory_space<vmem>>, %arg3: memref<1x4xf32, #tpu.memory_space<vmem>>) attributes {dimension_semantics = [#tpu.dimension_semantics<arbitrary>], iteration_bounds = array<i64: 1>, scalar_prefetch = 0 : i64, scratch_operands = 0 : i64, tpu.core_type = #tpu.core_type<tc>, window_params = [{transform_indices = @transform_0, window_bounds = array<i64: 512, 4>}, {pipeline_mode = #tpu.pipeline_mode<synchronous>, transform_indices = @transform_1, window_bounds = array<i64: 1, 4>}, {pipeline_mode = #tpu.pipeline_mode<synchronous>, transform_indices = @transform_2, window_bounds = array<i64: 1, 4>}]} {
    %c0_i32 = arith.constant 0 : i32
    %0 = arith.cmpi eq, %arg0, %c0_i32 : i32
    %1 = arith.extui %0 : i1 to i32
    %c0_i32_0 = arith.constant 0 : i32
    %2 = arith.cmpi ne, %1, %c0_i32_0 : i32
    scf.if %2 {
      %cst_11 = arith.constant 0.000000e+00 : f32
      %15 = vector.broadcast %cst_11 : f32 to vector<1x4xf32>
      %c0_12 = arith.constant 0 : index
      %c0_13 = arith.constant 0 : index
      %16 = vector.load %arg2[%c0_12, %c0_13] : memref<1x4xf32, #tpu.memory_space<vmem>>, vector<1x4xf32>
      tpu.vector_store %arg2[%c0_12, %c0_13], %15 {strides = array<i32>} : memref<1x4xf32, #tpu.memory_space<vmem>>, vector<1x4xf32>,
      %cst_14 = arith.constant 0.000000e+00 : f32
      %17 = vector.broadcast %cst_14 : f32 to vector<1x4xf32>
      %c0_15 = arith.constant 0 : index
      %c0_16 = arith.constant 0 : index
      %18 = vector.load %arg3[%c0_15, %c0_16] : memref<1x4xf32, #tpu.memory_space<vmem>>, vector<1x4xf32>
      tpu.vector_store %arg3[%c0_15, %c0_16], %17 {strides = array<i32>} : memref<1x4xf32, #tpu.memory_space<vmem>>, vector<1x4xf32>,
    } else {
    }
    %c0 = arith.constant 0 : index
    %c0_1 = arith.constant 0 : index
    %3 = vector.load %arg1[%c0, %c0_1] : memref<512x4xf32, #tpu.memory_space<vmem>>, vector<512x4xf32>
    %c0_2 = arith.constant 0 : index
    %c0_3 = arith.constant 0 : index
    %4 = vector.load %arg2[%c0_2, %c0_3] : memref<1x4xf32, #tpu.memory_space<vmem>>, vector<1x4xf32>
    %cst = arith.constant dense<0.000000e+00> : vector<4xf32>
    %5 = vector.multi_reduction <add>, %3, %cst [0] : vector<512x4xf32> to vector<4xf32>
    %6 = vector.shape_cast %5 : vector<4xf32> to vector<1x4xf32>
    %7 = arith.addf %4, %6 : vector<1x4xf32>
    %c0_4 = arith.constant 0 : index
    %c0_5 = arith.constant 0 : index
    %8 = vector.load %arg2[%c0_4, %c0_5] : memref<1x4xf32, #tpu.memory_space<vmem>>, vector<1x4xf32>
    tpu.vector_store %arg2[%c0_4, %c0_5], %7 {strides = array<i32>} : memref<1x4xf32, #tpu.memory_space<vmem>>, vector<1x4xf32>,
    %c0_6 = arith.constant 0 : index
    %c0_7 = arith.constant 0 : index
    %9 = vector.load %arg3[%c0_6, %c0_7] : memref<1x4xf32, #tpu.memory_space<vmem>>, vector<1x4xf32>
    %10 = arith.mulf %3, %3 : vector<512x4xf32>
    %cst_8 = arith.constant dense<0.000000e+00> : vector<4xf32>
    %11 = vector.multi_reduction <add>, %10, %cst_8 [0] : vector<512x4xf32> to vector<4xf32>
    %12 = vector.shape_cast %11 : vector<4xf32> to vector<1x4xf32>
    %13 = arith.addf %9, %12 : vector<1x4xf32>
    %c0_9 = arith.constant 0 : index
    %c0_10 = arith.constant 0 : index
    %14 = vector.load %arg3[%c0_9, %c0_10] : memref<1x4xf32, #tpu.memory_space<vmem>>, vector<1x4xf32>
    tpu.vector_store %arg3[%c0_9, %c0_10], %13 {strides = array<i32>} : memref<1x4xf32, #tpu.memory_space<vmem>>, vector<1x4xf32>,
    return
  }
  func.func @transform_0(%arg0: i32) -> (i32, i32) {
    %c0_i32 = arith.constant 0 : i32
    %c0_i32_0 = arith.constant 0 : i32
    return %arg0, %c0_i32 : i32, i32
  }
  func.func @transform_1(%arg0: i32) -> (i32, i32) {
    %c0_i32 = arith.constant 0 : i32
    %c0_i32_0 = arith.constant 0 : i32
    %c0_i32_1 = arith.constant 0 : i32
    return %c0_i32, %c0_i32_0 : i32, i32
  }
  func.func @transform_2(%arg0: i32) -> (i32, i32) {
    %c0_i32 = arith.constant 0 : i32
    %c0_i32_0 = arith.constant 0 : i32
    %c0_i32_1 = arith.constant 0 : i32
    return %c0_i32, %c0_i32_0 : i32, i32
  }
}

module attributes {stable_mosaic.version = 11 : i64} {
  func.func @_bn_relu_matmul_stats_kernel(%arg0: i32, %arg1: memref<512x4xf32, #tpu.memory_space<vmem>>, %arg2: memref<1x4xf32, #tpu.memory_space<vmem>>, %arg3: memref<1x4xf32, #tpu.memory_space<vmem>>, %arg4: memref<4x128xbf16, #tpu.memory_space<vmem>>, %arg5: memref<4x128xbf16, #tpu.memory_space<vmem>>, %arg6: memref<512x128xf32, #tpu.memory_space<vmem>>, %arg7: memref<1x128xf32, #tpu.memory_space<vmem>>, %arg8: memref<1x128xf32, #tpu.memory_space<vmem>>) attributes {dimension_semantics = [#tpu.dimension_semantics<arbitrary>], iteration_bounds = array<i64: 1>, scalar_prefetch = 0 : i64, scratch_operands = 0 : i64, tpu.core_type = #tpu.core_type<tc>, window_params = [{transform_indices = @transform_0, window_bounds = array<i64: 512, 4>}, {pipeline_mode = #tpu.pipeline_mode<synchronous>, transform_indices = @transform_1, window_bounds = array<i64: 1, 4>}, {pipeline_mode = #tpu.pipeline_mode<synchronous>, transform_indices = @transform_2, window_bounds = array<i64: 1, 4>}, {pipeline_mode = #tpu.pipeline_mode<synchronous>, transform_indices = @transform_3, window_bounds = array<i64: 4, 128>}, {pipeline_mode = #tpu.pipeline_mode<synchronous>, transform_indices = @transform_4, window_bounds = array<i64: 4, 128>}, {transform_indices = @transform_5, window_bounds = array<i64: 512, 128>}, {pipeline_mode = #tpu.pipeline_mode<synchronous>, transform_indices = @transform_6, window_bounds = array<i64: 1, 128>}, {pipeline_mode = #tpu.pipeline_mode<synchronous>, transform_indices = @transform_7, window_bounds = array<i64: 1, 128>}]} {
    %c0_i32 = arith.constant 0 : i32
    %0 = arith.cmpi eq, %arg0, %c0_i32 : i32
    %1 = arith.extui %0 : i1 to i32
    %c0_i32_0 = arith.constant 0 : i32
    %2 = arith.cmpi ne, %1, %c0_i32_0 : i32
    scf.if %2 {
      %cst_25 = arith.constant 0.000000e+00 : f32
      %35 = vector.broadcast %cst_25 : f32 to vector<1x128xf32>
      %c0_26 = arith.constant 0 : index
      %c0_27 = arith.constant 0 : index
      %36 = vector.load %arg7[%c0_26, %c0_27] : memref<1x128xf32, #tpu.memory_space<vmem>>, vector<1x128xf32>
      tpu.vector_store %arg7[%c0_26, %c0_27], %35 {strides = array<i32>} : memref<1x128xf32, #tpu.memory_space<vmem>>, vector<1x128xf32>,
      %cst_28 = arith.constant 0.000000e+00 : f32
      %37 = vector.broadcast %cst_28 : f32 to vector<1x128xf32>
      %c0_29 = arith.constant 0 : index
      %c0_30 = arith.constant 0 : index
      %38 = vector.load %arg8[%c0_29, %c0_30] : memref<1x128xf32, #tpu.memory_space<vmem>>, vector<1x128xf32>
      tpu.vector_store %arg8[%c0_29, %c0_30], %37 {strides = array<i32>} : memref<1x128xf32, #tpu.memory_space<vmem>>, vector<1x128xf32>,
    } else {
    }
    %c0 = arith.constant 0 : index
    %c0_1 = arith.constant 0 : index
    %3 = vector.load %arg1[%c0, %c0_1] : memref<512x4xf32, #tpu.memory_space<vmem>>, vector<512x4xf32>
    %c0_2 = arith.constant 0 : index
    %c0_3 = arith.constant 0 : index
    %4 = vector.load %arg2[%c0_2, %c0_3] : memref<1x4xf32, #tpu.memory_space<vmem>>, vector<1x4xf32>
    %5 = vector.broadcast %4 : vector<1x4xf32> to vector<512x4xf32>
    %6 = arith.mulf %3, %5 : vector<512x4xf32>
    %c0_4 = arith.constant 0 : index
    %c0_5 = arith.constant 0 : index
    %7 = vector.load %arg3[%c0_4, %c0_5] : memref<1x4xf32, #tpu.memory_space<vmem>>, vector<1x4xf32>
    %8 = vector.broadcast %7 : vector<1x4xf32> to vector<512x4xf32>
    %9 = arith.addf %6, %8 : vector<512x4xf32>
    %cst = arith.constant 0.000000e+00 : f32
    %10 = vector.broadcast %cst : f32 to vector<512x4xf32>
    %11 = arith.maximumf %9, %10 : vector<512x4xf32>
    %c0_6 = arith.constant 0 : index
    %c0_7 = arith.constant 0 : index
    %12 = vector.load %arg4[%c0_6, %c0_7] : memref<4x128xbf16, #tpu.memory_space<vmem>>, vector<4x128xbf16>
    %c0_8 = arith.constant 0 : index
    %c0_9 = arith.constant 0 : index
    %13 = vector.load %arg5[%c0_8, %c0_9] : memref<4x128xbf16, #tpu.memory_space<vmem>>, vector<4x128xbf16>
    %14 = arith.truncf %11 : vector<512x4xf32> to vector<512x4xbf16>
    %15 = arith.extf %14 : vector<512x4xbf16> to vector<512x4xf32>
    %16 = arith.subf %11, %15 : vector<512x4xf32>
    %17 = arith.truncf %16 : vector<512x4xf32> to vector<512x4xbf16>
    %cst_10 = arith.constant dense<0.000000e+00> : vector<512x128xf32>
    %18 = tpu.matmul %14, %12, %cst_10 {dimension_numbers = #tpu.dot_dimension_numbers<[1], [0], [0], [1], [0, 0, 1, 1], [], []>} : vector<512x4xbf16>, vector<4x128xbf16>, vector<512x128xf32> -> vector<512x128xf32>
    %cst_11 = arith.constant dense<0.000000e+00> : vector<512x128xf32>
    %19 = tpu.matmul %17, %12, %cst_11 {dimension_numbers = #tpu.dot_dimension_numbers<[1], [0], [0], [1], [0, 0, 1, 1], [], []>} : vector<512x4xbf16>, vector<4x128xbf16>, vector<512x128xf32> -> vector<512x128xf32>
    %20 = arith.addf %18, %19 : vector<512x128xf32>
    %cst_12 = arith.constant dense<0.000000e+00> : vector<512x128xf32>
    %21 = tpu.matmul %14, %13, %cst_12 {dimension_numbers = #tpu.dot_dimension_numbers<[1], [0], [0], [1], [0, 0, 1, 1], [], []>} : vector<512x4xbf16>, vector<4x128xbf16>, vector<512x128xf32> -> vector<512x128xf32>
    %22 = arith.addf %20, %21 : vector<512x128xf32>
    %c0_13 = arith.constant 0 : index
    %c0_14 = arith.constant 0 : index
    %23 = vector.load %arg6[%c0_13, %c0_14] : memref<512x128xf32, #tpu.memory_space<vmem>>, vector<512x128xf32>
    tpu.vector_store %arg6[%c0_13, %c0_14], %22 {strides = array<i32>} : memref<512x128xf32, #tpu.memory_space<vmem>>, vector<512x128xf32>,
    %c0_15 = arith.constant 0 : index
    %c0_16 = arith.constant 0 : index
    %24 = vector.load %arg7[%c0_15, %c0_16] : memref<1x128xf32, #tpu.memory_space<vmem>>, vector<1x128xf32>
    %cst_17 = arith.constant dense<0.000000e+00> : vector<128xf32>
    %25 = vector.multi_reduction <add>, %22, %cst_17 [0] : vector<512x128xf32> to vector<128xf32>
    %26 = vector.shape_cast %25 : vector<128xf32> to vector<1x128xf32>
    %27 = arith.addf %24, %26 : vector<1x128xf32>
    %c0_18 = arith.constant 0 : index
    %c0_19 = arith.constant 0 : index
    %28 = vector.load %arg7[%c0_18, %c0_19] : memref<1x128xf32, #tpu.memory_space<vmem>>, vector<1x128xf32>
    tpu.vector_store %arg7[%c0_18, %c0_19], %27 {strides = array<i32>} : memref<1x128xf32, #tpu.memory_space<vmem>>, vector<1x128xf32>,
    %c0_20 = arith.constant 0 : index
    %c0_21 = arith.constant 0 : index
    %29 = vector.load %arg8[%c0_20, %c0_21] : memref<1x128xf32, #tpu.memory_space<vmem>>, vector<1x128xf32>
    %30 = arith.mulf %22, %22 : vector<512x128xf32>
    %cst_22 = arith.constant dense<0.000000e+00> : vector<128xf32>
    %31 = vector.multi_reduction <add>, %30, %cst_22 [0] : vector<512x128xf32> to vector<128xf32>
    %32 = vector.shape_cast %31 : vector<128xf32> to vector<1x128xf32>
    %33 = arith.addf %29, %32 : vector<1x128xf32>
    %c0_23 = arith.constant 0 : index
    %c0_24 = arith.constant 0 : index
    %34 = vector.load %arg8[%c0_23, %c0_24] : memref<1x128xf32, #tpu.memory_space<vmem>>, vector<1x128xf32>
    tpu.vector_store %arg8[%c0_23, %c0_24], %33 {strides = array<i32>} : memref<1x128xf32, #tpu.memory_space<vmem>>, vector<1x128xf32>,
    return
  }
  func.func @transform_0(%arg0: i32) -> (i32, i32) {
    %c0_i32 = arith.constant 0 : i32
    %c0_i32_0 = arith.constant 0 : i32
    return %arg0, %c0_i32 : i32, i32
  }
  func.func @transform_1(%arg0: i32) -> (i32, i32) {
    %c0_i32 = arith.constant 0 : i32
    %c0_i32_0 = arith.constant 0 : i32
    %c0_i32_1 = arith.constant 0 : i32
    return %c0_i32, %c0_i32_0 : i32, i32
  }
  func.func @transform_2(%arg0: i32) -> (i32, i32) {
    %c0_i32 = arith.constant 0 : i32
    %c0_i32_0 = arith.constant 0 : i32
    %c0_i32_1 = arith.constant 0 : i32
    return %c0_i32, %c0_i32_0 : i32, i32
  }
  func.func @transform_3(%arg0: i32) -> (i32, i32) {
    %c0_i32 = arith.constant 0 : i32
    %c0_i32_0 = arith.constant 0 : i32
    %c0_i32_1 = arith.constant 0 : i32
    return %c0_i32, %c0_i32_0 : i32, i32
  }
  func.func @transform_4(%arg0: i32) -> (i32, i32) {
    %c0_i32 = arith.constant 0 : i32
    %c0_i32_0 = arith.constant 0 : i32
    %c0_i32_1 = arith.constant 0 : i32
    return %c0_i32, %c0_i32_0 : i32, i32
  }
  func.func @transform_5(%arg0: i32) -> (i32, i32) {
    %c0_i32 = arith.constant 0 : i32
    %c0_i32_0 = arith.constant 0 : i32
    return %arg0, %c0_i32 : i32, i32
  }
  func.func @transform_6(%arg0: i32) -> (i32, i32) {
    %c0_i32 = arith.constant 0 : i32
    %c0_i32_0 = arith.constant 0 : i32
    %c0_i32_1 = arith.constant 0 : i32
    return %c0_i32, %c0_i32_0 : i32, i32
  }
  func.func @transform_7(%arg0: i32) -> (i32, i32) {
    %c0_i32 = arith.constant 0 : i32
    %c0_i32_0 = arith.constant 0 : i32
    %c0_i32_1 = arith.constant 0 : i32
    return %c0_i32, %c0_i32_0 : i32, i32
  }
}

module attributes {stable_mosaic.version = 11 : i64} {
  func.func @_bn_relu_conv3x3_stats_kernel(%arg0: i32, %arg1: i32, %arg2: memref<1x16x16x128xf32, #tpu.memory_space<vmem>>, %arg3: memref<1x128xf32, #tpu.memory_space<vmem>>, %arg4: memref<1x128xf32, #tpu.memory_space<vmem>>, %arg5: memref<3x384x128xbf16, #tpu.memory_space<vmem>>, %arg6: memref<3x384x128xbf16, #tpu.memory_space<vmem>>, %arg7: memref<1x8x8x128xf32, #tpu.memory_space<vmem>>, %arg8: memref<1x128xf32, #tpu.memory_space<vmem>>, %arg9: memref<1x128xf32, #tpu.memory_space<vmem>>, %arg10: memref<18x18x128xf32, #tpu.memory_space<vmem>>) attributes {dimension_semantics = [#tpu.dimension_semantics<arbitrary>, #tpu.dimension_semantics<arbitrary>], iteration_bounds = array<i64: 2, 1>, scalar_prefetch = 0 : i64, scratch_operands = 1 : i64, tpu.core_type = #tpu.core_type<tc>, window_params = [{transform_indices = @transform_0, window_bounds = array<i64: 1, 16, 16, 128>}, {pipeline_mode = #tpu.pipeline_mode<synchronous>, transform_indices = @transform_1, window_bounds = array<i64: 1, 128>}, {pipeline_mode = #tpu.pipeline_mode<synchronous>, transform_indices = @transform_2, window_bounds = array<i64: 1, 128>}, {pipeline_mode = #tpu.pipeline_mode<synchronous>, transform_indices = @transform_3, window_bounds = array<i64: 3, 384, 128>}, {pipeline_mode = #tpu.pipeline_mode<synchronous>, transform_indices = @transform_4, window_bounds = array<i64: 3, 384, 128>}, {transform_indices = @transform_5, window_bounds = array<i64: 1, 8, 8, 128>}, {pipeline_mode = #tpu.pipeline_mode<synchronous>, transform_indices = @transform_6, window_bounds = array<i64: 1, 128>}, {pipeline_mode = #tpu.pipeline_mode<synchronous>, transform_indices = @transform_7, window_bounds = array<i64: 1, 128>}]} {
    %c0_i32 = arith.constant 0 : i32
    %0 = arith.cmpi eq, %arg0, %c0_i32 : i32
    %c0_i32_0 = arith.constant 0 : i32
    %1 = arith.cmpi eq, %arg1, %c0_i32_0 : i32
    %2 = arith.andi %0, %1 : i1
    %3 = arith.extui %2 : i1 to i32
    %c0_i32_1 = arith.constant 0 : i32
    %4 = arith.cmpi ne, %3, %c0_i32_1 : i32
    scf.if %4 {
      %cst_67 = arith.constant 0.000000e+00 : f32
      %98 = vector.broadcast %cst_67 : f32 to vector<18x18x128xf32>
      %c0_68 = arith.constant 0 : index
      %c0_69 = arith.constant 0 : index
      %c0_70 = arith.constant 0 : index
      %99 = vector.load %arg10[%c0_68, %c0_69, %c0_70] : memref<18x18x128xf32, #tpu.memory_space<vmem>>, vector<18x18x128xf32>
      tpu.vector_store %arg10[%c0_68, %c0_69, %c0_70], %98 {strides = array<i32>} : memref<18x18x128xf32, #tpu.memory_space<vmem>>, vector<18x18x128xf32>,
      %cst_71 = arith.constant 0.000000e+00 : f32
      %100 = vector.broadcast %cst_71 : f32 to vector<1x128xf32>
      %c0_72 = arith.constant 0 : index
      %c0_73 = arith.constant 0 : index
      %101 = vector.load %arg8[%c0_72, %c0_73] : memref<1x128xf32, #tpu.memory_space<vmem>>, vector<1x128xf32>
      tpu.vector_store %arg8[%c0_72, %c0_73], %100 {strides = array<i32>} : memref<1x128xf32, #tpu.memory_space<vmem>>, vector<1x128xf32>,
      %cst_74 = arith.constant 0.000000e+00 : f32
      %102 = vector.broadcast %cst_74 : f32 to vector<1x128xf32>
      %c0_75 = arith.constant 0 : index
      %c0_76 = arith.constant 0 : index
      %103 = vector.load %arg9[%c0_75, %c0_76] : memref<1x128xf32, #tpu.memory_space<vmem>>, vector<1x128xf32>
      tpu.vector_store %arg9[%c0_75, %c0_76], %102 {strides = array<i32>} : memref<1x128xf32, #tpu.memory_space<vmem>>, vector<1x128xf32>,
    } else {
    }
    %c0_i32_2 = arith.constant 0 : i32
    %5 = arith.cmpi eq, %arg1, %c0_i32_2 : i32
    %6 = arith.extui %5 : i1 to i32
    %c0_i32_3 = arith.constant 0 : i32
    %7 = arith.cmpi ne, %6, %c0_i32_3 : i32
    scf.if %7 {
      %c0_67 = arith.constant 0 : index
      %c0_68 = arith.constant 0 : index
      %98 = vector.load %arg3[%c0_67, %c0_68] : memref<1x128xf32, #tpu.memory_space<vmem>>, vector<1x128xf32>
      %99 = vector.shape_cast %98 : vector<1x128xf32> to vector<1x1x128xf32>
      %c0_69 = arith.constant 0 : index
      %c0_70 = arith.constant 0 : index
      %100 = vector.load %arg4[%c0_69, %c0_70] : memref<1x128xf32, #tpu.memory_space<vmem>>, vector<1x128xf32>
      %101 = vector.shape_cast %100 : vector<1x128xf32> to vector<1x1x128xf32>
      %c0_71 = arith.constant 0 : index
      %c0_72 = arith.constant 0 : index
      %c0_73 = arith.constant 0 : index
      %c0_74 = arith.constant 0 : index
      %102 = vector.load %arg2[%c0_71, %c0_72, %c0_73, %c0_74] : memref<1x16x16x128xf32, #tpu.memory_space<vmem>>, vector<1x16x16x128xf32>
      %103 = vector.shape_cast %102 : vector<1x16x16x128xf32> to vector<16x16x128xf32>
      %104 = vector.broadcast %99 : vector<1x1x128xf32> to vector<16x16x128xf32>
      %105 = arith.mulf %103, %104 : vector<16x16x128xf32>
      %106 = vector.broadcast %101 : vector<1x1x128xf32> to vector<16x16x128xf32>
      %107 = arith.addf %105, %106 : vector<16x16x128xf32>
      %cst_75 = arith.constant 0.000000e+00 : f32
      %108 = vector.broadcast %cst_75 : f32 to vector<16x16x128xf32>
      %109 = arith.maximumf %107, %108 : vector<16x16x128xf32>
      %c1_76 = arith.constant 1 : index
      %c1_77 = arith.constant 1 : index
      %c0_78 = arith.constant 0 : index
      %110 = vector.load %arg10[%c1_76, %c1_77, %c0_78] : memref<18x18x128xf32, #tpu.memory_space<vmem>>, vector<16x16x128xf32>
      tpu.vector_store %arg10[%c1_76, %c1_77, %c0_78], %109 {strides = array<i32>} : memref<18x18x128xf32, #tpu.memory_space<vmem>>, vector<16x16x128xf32>,
    } else {
    }
    %c16_i32 = arith.constant 16 : i32
    %8 = arith.muli %arg1, %c16_i32 : i32
    %cst = arith.constant 0.000000e+00 : f32
    %9 = vector.broadcast %cst : f32 to vector<64x128xf32>
    %c0_i32_4 = arith.constant 0 : i32
    %10 = arith.addi %c0_i32_4, %8 : i32
    %11 = arith.index_cast %10 : i32 to index
    %c0 = arith.constant 0 : index
    %c0_5 = arith.constant 0 : index
    %12 = tpu.strided_load %arg10[%11, %c0, %c0_5] {strides = array<i32: 2, 2, 1>} : memref<18x18x128xf32, #tpu.memory_space<vmem>>, vector<8x8x128xf32>
    %c0_i32_6 = arith.constant 0 : i32
    %13 = arith.addi %c0_i32_6, %8 : i32
    %14 = arith.index_cast %13 : i32 to index
    %c1 = arith.constant 1 : index
    %c0_7 = arith.constant 0 : index
    %15 = tpu.strided_load %arg10[%14, %c1, %c0_7] {strides = array<i32: 2, 2, 1>} : memref<18x18x128xf32, #tpu.memory_space<vmem>>, vector<8x8x128xf32>
    %c0_i32_8 = arith.constant 0 : i32
    %16 = arith.addi %c0_i32_8, %8 : i32
    %17 = arith.index_cast %16 : i32 to index
    %c2 = arith.constant 2 : index
    %c0_9 = arith.constant 0 : index
    %18 = tpu.strided_load %arg10[%17, %c2, %c0_9] {strides = array<i32: 2, 2, 1>} : memref<18x18x128xf32, #tpu.memory_space<vmem>>, vector<8x8x128xf32>
    %19 = tpu.concatenate %12, %15, %18 in 2 : vector<8x8x128xf32>, vector<8x8x128xf32>, vector<8x8x128xf32> -> vector<8x8x384xf32>
    %20 = vector.shape_cast %19 : vector<8x8x384xf32> to vector<64x384xf32>
    %c0_10 = arith.constant 0 : index
    %c0_11 = arith.constant 0 : index
    %c0_12 = arith.constant 0 : index
    %21 = vector.load %arg5[%c0_10, %c0_11, %c0_12] : memref<3x384x128xbf16, #tpu.memory_space<vmem>>, vector<1x384x128xbf16>
    %22 = vector.shape_cast %21 : vector<1x384x128xbf16> to vector<384x128xbf16>
    %c0_13 = arith.constant 0 : index
    %c0_14 = arith.constant 0 : index
    %c0_15 = arith.constant 0 : index
    %23 = vector.load %arg6[%c0_13, %c0_14, %c0_15] : memref<3x384x128xbf16, #tpu.memory_space<vmem>>, vector<1x384x128xbf16>
    %24 = vector.shape_cast %23 : vector<1x384x128xbf16> to vector<384x128xbf16>
    %25 = arith.truncf %20 : vector<64x384xf32> to vector<64x384xbf16>
    %26 = arith.extf %25 : vector<64x384xbf16> to vector<64x384xf32>
    %27 = arith.subf %20, %26 : vector<64x384xf32>
    %28 = arith.truncf %27 : vector<64x384xf32> to vector<64x384xbf16>
    %cst_16 = arith.constant dense<0.000000e+00> : vector<64x128xf32>
    %29 = tpu.matmul %25, %22, %cst_16 {dimension_numbers = #tpu.dot_dimension_numbers<[1], [0], [0], [1], [0, 0, 1, 1], [], []>} : vector<64x384xbf16>, vector<384x128xbf16>, vector<64x128xf32> -> vector<64x128xf32>
    %cst_17 = arith.constant dense<0.000000e+00> : vector<64x128xf32>
    %30 = tpu.matmul %28, %22, %cst_17 {dimension_numbers = #tpu.dot_dimension_numbers<[1], [0], [0], [1], [0, 0, 1, 1], [], []>} : vector<64x384xbf16>, vector<384x128xbf16>, vector<64x128xf32> -> vector<64x128xf32>
    %31 = arith.addf %29, %30 : vector<64x128xf32>
    %cst_18 = arith.constant dense<0.000000e+00> : vector<64x128xf32>
    %32 = tpu.matmul %25, %24, %cst_18 {dimension_numbers = #tpu.dot_dimension_numbers<[1], [0], [0], [1], [0, 0, 1, 1], [], []>} : vector<64x384xbf16>, vector<384x128xbf16>, vector<64x128xf32> -> vector<64x128xf32>
    %33 = arith.addf %31, %32 : vector<64x128xf32>
    %34 = arith.addf %9, %33 : vector<64x128xf32>
    %c1_i32 = arith.constant 1 : i32
    %35 = arith.addi %c1_i32, %8 : i32
    %36 = arith.index_cast %35 : i32 to index
    %c0_19 = arith.constant 0 : index
    %c0_20 = arith.constant 0 : index
    %37 = tpu.strided_load %arg10[%36, %c0_19, %c0_20] {strides = array<i32: 2, 2, 1>} : memref<18x18x128xf32, #tpu.memory_space<vmem>>, vector<8x8x128xf32>
    %c1_i32_21 = arith.constant 1 : i32
    %38 = arith.addi %c1_i32_21, %8 : i32
    %39 = arith.index_cast %38 : i32 to index
    %c1_22 = arith.constant 1 : index
    %c0_23 = arith.constant 0 : index
    %40 = tpu.strided_load %arg10[%39, %c1_22, %c0_23] {strides = array<i32: 2, 2, 1>} : memref<18x18x128xf32, #tpu.memory_space<vmem>>, vector<8x8x128xf32>
    %c1_i32_24 = arith.constant 1 : i32
    %41 = arith.addi %c1_i32_24, %8 : i32
    %42 = arith.index_cast %41 : i32 to index
    %c2_25 = arith.constant 2 : index
    %c0_26 = arith.constant 0 : index
    %43 = tpu.strided_load %arg10[%42, %c2_25, %c0_26] {strides = array<i32: 2, 2, 1>} : memref<18x18x128xf32, #tpu.memory_space<vmem>>, vector<8x8x128xf32>
    %44 = tpu.concatenate %37, %40, %43 in 2 : vector<8x8x128xf32>, vector<8x8x128xf32>, vector<8x8x128xf32> -> vector<8x8x384xf32>
    %45 = vector.shape_cast %44 : vector<8x8x384xf32> to vector<64x384xf32>
    %c1_27 = arith.constant 1 : index
    %c0_28 = arith.constant 0 : index
    %c0_29 = arith.constant 0 : index
    %46 = vector.load %arg5[%c1_27, %c0_28, %c0_29] : memref<3x384x128xbf16, #tpu.memory_space<vmem>>, vector<1x384x128xbf16>
    %47 = vector.shape_cast %46 : vector<1x384x128xbf16> to vector<384x128xbf16>
    %c1_30 = arith.constant 1 : index
    %c0_31 = arith.constant 0 : index
    %c0_32 = arith.constant 0 : index
    %48 = vector.load %arg6[%c1_30, %c0_31, %c0_32] : memref<3x384x128xbf16, #tpu.memory_space<vmem>>, vector<1x384x128xbf16>
    %49 = vector.shape_cast %48 : vector<1x384x128xbf16> to vector<384x128xbf16>
    %50 = arith.truncf %45 : vector<64x384xf32> to vector<64x384xbf16>
    %51 = arith.extf %50 : vector<64x384xbf16> to vector<64x384xf32>
    %52 = arith.subf %45, %51 : vector<64x384xf32>
    %53 = arith.truncf %52 : vector<64x384xf32> to vector<64x384xbf16>
    %cst_33 = arith.constant dense<0.000000e+00> : vector<64x128xf32>
    %54 = tpu.matmul %50, %47, %cst_33 {dimension_numbers = #tpu.dot_dimension_numbers<[1], [0], [0], [1], [0, 0, 1, 1], [], []>} : vector<64x384xbf16>, vector<384x128xbf16>, vector<64x128xf32> -> vector<64x128xf32>
    %cst_34 = arith.constant dense<0.000000e+00> : vector<64x128xf32>
    %55 = tpu.matmul %53, %47, %cst_34 {dimension_numbers = #tpu.dot_dimension_numbers<[1], [0], [0], [1], [0, 0, 1, 1], [], []>} : vector<64x384xbf16>, vector<384x128xbf16>, vector<64x128xf32> -> vector<64x128xf32>
    %56 = arith.addf %54, %55 : vector<64x128xf32>
    %cst_35 = arith.constant dense<0.000000e+00> : vector<64x128xf32>
    %57 = tpu.matmul %50, %49, %cst_35 {dimension_numbers = #tpu.dot_dimension_numbers<[1], [0], [0], [1], [0, 0, 1, 1], [], []>} : vector<64x384xbf16>, vector<384x128xbf16>, vector<64x128xf32> -> vector<64x128xf32>
    %58 = arith.addf %56, %57 : vector<64x128xf32>
    %59 = arith.addf %34, %58 : vector<64x128xf32>
    %c2_i32 = arith.constant 2 : i32
    %60 = arith.addi %c2_i32, %8 : i32
    %61 = arith.index_cast %60 : i32 to index
    %c0_36 = arith.constant 0 : index
    %c0_37 = arith.constant 0 : index
    %62 = tpu.strided_load %arg10[%61, %c0_36, %c0_37] {strides = array<i32: 2, 2, 1>} : memref<18x18x128xf32, #tpu.memory_space<vmem>>, vector<8x8x128xf32>
    %c2_i32_38 = arith.constant 2 : i32
    %63 = arith.addi %c2_i32_38, %8 : i32
    %64 = arith.index_cast %63 : i32 to index
    %c1_39 = arith.constant 1 : index
    %c0_40 = arith.constant 0 : index
    %65 = tpu.strided_load %arg10[%64, %c1_39, %c0_40] {strides = array<i32: 2, 2, 1>} : memref<18x18x128xf32, #tpu.memory_space<vmem>>, vector<8x8x128xf32>
    %c2_i32_41 = arith.constant 2 : i32
    %66 = arith.addi %c2_i32_41, %8 : i32
    %67 = arith.index_cast %66 : i32 to index
    %c2_42 = arith.constant 2 : index
    %c0_43 = arith.constant 0 : index
    %68 = tpu.strided_load %arg10[%67, %c2_42, %c0_43] {strides = array<i32: 2, 2, 1>} : memref<18x18x128xf32, #tpu.memory_space<vmem>>, vector<8x8x128xf32>
    %69 = tpu.concatenate %62, %65, %68 in 2 : vector<8x8x128xf32>, vector<8x8x128xf32>, vector<8x8x128xf32> -> vector<8x8x384xf32>
    %70 = vector.shape_cast %69 : vector<8x8x384xf32> to vector<64x384xf32>
    %c2_44 = arith.constant 2 : index
    %c0_45 = arith.constant 0 : index
    %c0_46 = arith.constant 0 : index
    %71 = vector.load %arg5[%c2_44, %c0_45, %c0_46] : memref<3x384x128xbf16, #tpu.memory_space<vmem>>, vector<1x384x128xbf16>
    %72 = vector.shape_cast %71 : vector<1x384x128xbf16> to vector<384x128xbf16>
    %c2_47 = arith.constant 2 : index
    %c0_48 = arith.constant 0 : index
    %c0_49 = arith.constant 0 : index
    %73 = vector.load %arg6[%c2_47, %c0_48, %c0_49] : memref<3x384x128xbf16, #tpu.memory_space<vmem>>, vector<1x384x128xbf16>
    %74 = vector.shape_cast %73 : vector<1x384x128xbf16> to vector<384x128xbf16>
    %75 = arith.truncf %70 : vector<64x384xf32> to vector<64x384xbf16>
    %76 = arith.extf %75 : vector<64x384xbf16> to vector<64x384xf32>
    %77 = arith.subf %70, %76 : vector<64x384xf32>
    %78 = arith.truncf %77 : vector<64x384xf32> to vector<64x384xbf16>
    %cst_50 = arith.constant dense<0.000000e+00> : vector<64x128xf32>
    %79 = tpu.matmul %75, %72, %cst_50 {dimension_numbers = #tpu.dot_dimension_numbers<[1], [0], [0], [1], [0, 0, 1, 1], [], []>} : vector<64x384xbf16>, vector<384x128xbf16>, vector<64x128xf32> -> vector<64x128xf32>
    %cst_51 = arith.constant dense<0.000000e+00> : vector<64x128xf32>
    %80 = tpu.matmul %78, %72, %cst_51 {dimension_numbers = #tpu.dot_dimension_numbers<[1], [0], [0], [1], [0, 0, 1, 1], [], []>} : vector<64x384xbf16>, vector<384x128xbf16>, vector<64x128xf32> -> vector<64x128xf32>
    %81 = arith.addf %79, %80 : vector<64x128xf32>
    %cst_52 = arith.constant dense<0.000000e+00> : vector<64x128xf32>
    %82 = tpu.matmul %75, %74, %cst_52 {dimension_numbers = #tpu.dot_dimension_numbers<[1], [0], [0], [1], [0, 0, 1, 1], [], []>} : vector<64x384xbf16>, vector<384x128xbf16>, vector<64x128xf32> -> vector<64x128xf32>
    %83 = arith.addf %81, %82 : vector<64x128xf32>
    %84 = arith.addf %59, %83 : vector<64x128xf32>
    %85 = vector.shape_cast %84 : vector<64x128xf32> to vector<1x8x8x128xf32>
    %c0_53 = arith.constant 0 : index
    %c0_54 = arith.constant 0 : index
    %c0_55 = arith.constant 0 : index
    %c0_56 = arith.constant 0 : index
    %86 = vector.load %arg7[%c0_53, %c0_54, %c0_55, %c0_56] : memref<1x8x8x128xf32, #tpu.memory_space<vmem>>, vector<1x8x8x128xf32>
    tpu.vector_store %arg7[%c0_53, %c0_54, %c0_55, %c0_56], %85 {strides = array<i32>} : memref<1x8x8x128xf32, #tpu.memory_space<vmem>>, vector<1x8x8x128xf32>,
    %c0_57 = arith.constant 0 : index
    %c0_58 = arith.constant 0 : index
    %87 = vector.load %arg8[%c0_57, %c0_58] : memref<1x128xf32, #tpu.memory_space<vmem>>, vector<1x128xf32>
    %cst_59 = arith.constant dense<0.000000e+00> : vector<128xf32>
    %88 = vector.multi_reduction <add>, %84, %cst_59 [0] : vector<64x128xf32> to vector<128xf32>
    %89 = vector.shape_cast %88 : vector<128xf32> to vector<1x128xf32>
    %90 = arith.addf %87, %89 : vector<1x128xf32>
    %c0_60 = arith.constant 0 : index
    %c0_61 = arith.constant 0 : index
    %91 = vector.load %arg8[%c0_60, %c0_61] : memref<1x128xf32, #tpu.memory_space<vmem>>, vector<1x128xf32>
    tpu.vector_store %arg8[%c0_60, %c0_61], %90 {strides = array<i32>} : memref<1x128xf32, #tpu.memory_space<vmem>>, vector<1x128xf32>,
    %c0_62 = arith.constant 0 : index
    %c0_63 = arith.constant 0 : index
    %92 = vector.load %arg9[%c0_62, %c0_63] : memref<1x128xf32, #tpu.memory_space<vmem>>, vector<1x128xf32>
    %93 = arith.mulf %84, %84 : vector<64x128xf32>
    %cst_64 = arith.constant dense<0.000000e+00> : vector<128xf32>
    %94 = vector.multi_reduction <add>, %93, %cst_64 [0] : vector<64x128xf32> to vector<128xf32>
    %95 = vector.shape_cast %94 : vector<128xf32> to vector<1x128xf32>
    %96 = arith.addf %92, %95 : vector<1x128xf32>
    %c0_65 = arith.constant 0 : index
    %c0_66 = arith.constant 0 : index
    %97 = vector.load %arg9[%c0_65, %c0_66] : memref<1x128xf32, #tpu.memory_space<vmem>>, vector<1x128xf32>
    tpu.vector_store %arg9[%c0_65, %c0_66], %96 {strides = array<i32>} : memref<1x128xf32, #tpu.memory_space<vmem>>, vector<1x128xf32>,
    return
  }
  func.func @transform_0(%arg0: i32, %arg1: i32) -> (i32, i32, i32, i32) {
    %c0_i32 = arith.constant 0 : i32
    %c0_i32_0 = arith.constant 0 : i32
    %c0_i32_1 = arith.constant 0 : i32
    %c0_i32_2 = arith.constant 0 : i32
    return %arg0, %c0_i32, %c0_i32_0, %c0_i32_1 : i32, i32, i32, i32
  }
  func.func @transform_1(%arg0: i32, %arg1: i32) -> (i32, i32) {
    %c0_i32 = arith.constant 0 : i32
    %c0_i32_0 = arith.constant 0 : i32
    %c0_i32_1 = arith.constant 0 : i32
    return %c0_i32, %c0_i32_0 : i32, i32
  }
  func.func @transform_2(%arg0: i32, %arg1: i32) -> (i32, i32) {
    %c0_i32 = arith.constant 0 : i32
    %c0_i32_0 = arith.constant 0 : i32
    %c0_i32_1 = arith.constant 0 : i32
    return %c0_i32, %c0_i32_0 : i32, i32
  }
  func.func @transform_3(%arg0: i32, %arg1: i32) -> (i32, i32, i32) {
    %c0_i32 = arith.constant 0 : i32
    %c0_i32_0 = arith.constant 0 : i32
    %c0_i32_1 = arith.constant 0 : i32
    %c0_i32_2 = arith.constant 0 : i32
    return %c0_i32, %c0_i32_0, %c0_i32_1 : i32, i32, i32
  }
  func.func @transform_4(%arg0: i32, %arg1: i32) -> (i32, i32, i32) {
    %c0_i32 = arith.constant 0 : i32
    %c0_i32_0 = arith.constant 0 : i32
    %c0_i32_1 = arith.constant 0 : i32
    %c0_i32_2 = arith.constant 0 : i32
    return %c0_i32, %c0_i32_0, %c0_i32_1 : i32, i32, i32
  }
  func.func @transform_5(%arg0: i32, %arg1: i32) -> (i32, i32, i32, i32) {
    %c0_i32 = arith.constant 0 : i32
    %c0_i32_0 = arith.constant 0 : i32
    %c0_i32_1 = arith.constant 0 : i32
    return %arg0, %arg1, %c0_i32, %c0_i32_0 : i32, i32, i32, i32
  }
  func.func @transform_6(%arg0: i32, %arg1: i32) -> (i32, i32) {
    %c0_i32 = arith.constant 0 : i32
    %c0_i32_0 = arith.constant 0 : i32
    %c0_i32_1 = arith.constant 0 : i32
    return %c0_i32, %c0_i32_0 : i32, i32
  }
  func.func @transform_7(%arg0: i32, %arg1: i32) -> (i32, i32) {
    %c0_i32 = arith.constant 0 : i32
    %c0_i32_0 = arith.constant 0 : i32
    %c0_i32_1 = arith.constant 0 : i32
    return %c0_i32, %c0_i32_0 : i32, i32
  }
}

module attributes {stable_mosaic.version = 11 : i64} {
  func.func @_bn_relu_matmul_residual_proj_kernel(%arg0: i32, %arg1: memref<128x128xf32, #tpu.memory_space<vmem>>, %arg2: memref<1x128xf32, #tpu.memory_space<vmem>>, %arg3: memref<1x128xf32, #tpu.memory_space<vmem>>, %arg4: memref<128x128xbf16, #tpu.memory_space<vmem>>, %arg5: memref<128x128xbf16, #tpu.memory_space<vmem>>, %arg6: memref<128x4xf32, #tpu.memory_space<vmem>>, %arg7: memref<1x4xf32, #tpu.memory_space<vmem>>, %arg8: memref<1x4xf32, #tpu.memory_space<vmem>>, %arg9: memref<4x128xbf16, #tpu.memory_space<vmem>>, %arg10: memref<4x128xbf16, #tpu.memory_space<vmem>>, %arg11: memref<128x128xf32, #tpu.memory_space<vmem>>) attributes {dimension_semantics = [#tpu.dimension_semantics<parallel>], iteration_bounds = array<i64: 1>, scalar_prefetch = 0 : i64, scratch_operands = 0 : i64, tpu.core_type = #tpu.core_type<tc>, window_params = [{transform_indices = @transform_0, window_bounds = array<i64: 128, 128>}, {pipeline_mode = #tpu.pipeline_mode<synchronous>, transform_indices = @transform_1, window_bounds = array<i64: 1, 128>}, {pipeline_mode = #tpu.pipeline_mode<synchronous>, transform_indices = @transform_2, window_bounds = array<i64: 1, 128>}, {pipeline_mode = #tpu.pipeline_mode<synchronous>, transform_indices = @transform_3, window_bounds = array<i64: 128, 128>}, {pipeline_mode = #tpu.pipeline_mode<synchronous>, transform_indices = @transform_4, window_bounds = array<i64: 128, 128>}, {transform_indices = @transform_5, window_bounds = array<i64: 128, 4>}, {pipeline_mode = #tpu.pipeline_mode<synchronous>, transform_indices = @transform_6, window_bounds = array<i64: 1, 4>}, {pipeline_mode = #tpu.pipeline_mode<synchronous>, transform_indices = @transform_7, window_bounds = array<i64: 1, 4>}, {pipeline_mode = #tpu.pipeline_mode<synchronous>, transform_indices = @transform_8, window_bounds = array<i64: 4, 128>}, {pipeline_mode = #tpu.pipeline_mode<synchronous>, transform_indices = @transform_9, window_bounds = array<i64: 4, 128>}, {transform_indices = @transform_10, window_bounds = array<i64: 128, 128>}]} {
    %c0 = arith.constant 0 : index
    %c0_0 = arith.constant 0 : index
    %0 = vector.load %arg1[%c0, %c0_0] : memref<128x128xf32, #tpu.memory_space<vmem>>, vector<128x128xf32>
    %c0_1 = arith.constant 0 : index
    %c0_2 = arith.constant 0 : index
    %1 = vector.load %arg2[%c0_1, %c0_2] : memref<1x128xf32, #tpu.memory_space<vmem>>, vector<1x128xf32>
    %2 = vector.broadcast %1 : vector<1x128xf32> to vector<128x128xf32>
    %3 = arith.mulf %0, %2 : vector<128x128xf32>
    %c0_3 = arith.constant 0 : index
    %c0_4 = arith.constant 0 : index
    %4 = vector.load %arg3[%c0_3, %c0_4] : memref<1x128xf32, #tpu.memory_space<vmem>>, vector<1x128xf32>
    %5 = vector.broadcast %4 : vector<1x128xf32> to vector<128x128xf32>
    %6 = arith.addf %3, %5 : vector<128x128xf32>
    %cst = arith.constant 0.000000e+00 : f32
    %7 = vector.broadcast %cst : f32 to vector<128x128xf32>
    %8 = arith.maximumf %6, %7 : vector<128x128xf32>
    %c0_5 = arith.constant 0 : index
    %c0_6 = arith.constant 0 : index
    %9 = vector.load %arg6[%c0_5, %c0_6] : memref<128x4xf32, #tpu.memory_space<vmem>>, vector<128x4xf32>
    %c0_7 = arith.constant 0 : index
    %c0_8 = arith.constant 0 : index
    %10 = vector.load %arg7[%c0_7, %c0_8] : memref<1x4xf32, #tpu.memory_space<vmem>>, vector<1x4xf32>
    %11 = vector.broadcast %10 : vector<1x4xf32> to vector<128x4xf32>
    %12 = arith.mulf %9, %11 : vector<128x4xf32>
    %c0_9 = arith.constant 0 : index
    %c0_10 = arith.constant 0 : index
    %13 = vector.load %arg8[%c0_9, %c0_10] : memref<1x4xf32, #tpu.memory_space<vmem>>, vector<1x4xf32>
    %14 = vector.broadcast %13 : vector<1x4xf32> to vector<128x4xf32>
    %15 = arith.addf %12, %14 : vector<128x4xf32>
    %cst_11 = arith.constant 0.000000e+00 : f32
    %16 = vector.broadcast %cst_11 : f32 to vector<128x4xf32>
    %17 = arith.maximumf %15, %16 : vector<128x4xf32>
    %c0_12 = arith.constant 0 : index
    %c0_13 = arith.constant 0 : index
    %18 = vector.load %arg4[%c0_12, %c0_13] : memref<128x128xbf16, #tpu.memory_space<vmem>>, vector<128x128xbf16>
    %c0_14 = arith.constant 0 : index
    %c0_15 = arith.constant 0 : index
    %19 = vector.load %arg5[%c0_14, %c0_15] : memref<128x128xbf16, #tpu.memory_space<vmem>>, vector<128x128xbf16>
    %20 = arith.truncf %8 : vector<128x128xf32> to vector<128x128xbf16>
    %21 = arith.extf %20 : vector<128x128xbf16> to vector<128x128xf32>
    %22 = arith.subf %8, %21 : vector<128x128xf32>
    %23 = arith.truncf %22 : vector<128x128xf32> to vector<128x128xbf16>
    %cst_16 = arith.constant dense<0.000000e+00> : vector<128x128xf32>
    %24 = tpu.matmul %20, %18, %cst_16 {dimension_numbers = #tpu.dot_dimension_numbers<[1], [0], [0], [1], [0, 0, 1, 1], [], []>} : vector<128x128xbf16>, vector<128x128xbf16>, vector<128x128xf32> -> vector<128x128xf32>
    %cst_17 = arith.constant dense<0.000000e+00> : vector<128x128xf32>
    %25 = tpu.matmul %23, %18, %cst_17 {dimension_numbers = #tpu.dot_dimension_numbers<[1], [0], [0], [1], [0, 0, 1, 1], [], []>} : vector<128x128xbf16>, vector<128x128xbf16>, vector<128x128xf32> -> vector<128x128xf32>
    %26 = arith.addf %24, %25 : vector<128x128xf32>
    %cst_18 = arith.constant dense<0.000000e+00> : vector<128x128xf32>
    %27 = tpu.matmul %20, %19, %cst_18 {dimension_numbers = #tpu.dot_dimension_numbers<[1], [0], [0], [1], [0, 0, 1, 1], [], []>} : vector<128x128xbf16>, vector<128x128xbf16>, vector<128x128xf32> -> vector<128x128xf32>
    %28 = arith.addf %26, %27 : vector<128x128xf32>
    %c0_19 = arith.constant 0 : index
    %c0_20 = arith.constant 0 : index
    %29 = vector.load %arg9[%c0_19, %c0_20] : memref<4x128xbf16, #tpu.memory_space<vmem>>, vector<4x128xbf16>
    %c0_21 = arith.constant 0 : index
    %c0_22 = arith.constant 0 : index
    %30 = vector.load %arg10[%c0_21, %c0_22] : memref<4x128xbf16, #tpu.memory_space<vmem>>, vector<4x128xbf16>
    %31 = arith.truncf %17 : vector<128x4xf32> to vector<128x4xbf16>
    %32 = arith.extf %31 : vector<128x4xbf16> to vector<128x4xf32>
    %33 = arith.subf %17, %32 : vector<128x4xf32>
    %34 = arith.truncf %33 : vector<128x4xf32> to vector<128x4xbf16>
    %cst_23 = arith.constant dense<0.000000e+00> : vector<128x128xf32>
    %35 = tpu.matmul %31, %29, %cst_23 {dimension_numbers = #tpu.dot_dimension_numbers<[1], [0], [0], [1], [0, 0, 1, 1], [], []>} : vector<128x4xbf16>, vector<4x128xbf16>, vector<128x128xf32> -> vector<128x128xf32>
    %cst_24 = arith.constant dense<0.000000e+00> : vector<128x128xf32>
    %36 = tpu.matmul %34, %29, %cst_24 {dimension_numbers = #tpu.dot_dimension_numbers<[1], [0], [0], [1], [0, 0, 1, 1], [], []>} : vector<128x4xbf16>, vector<4x128xbf16>, vector<128x128xf32> -> vector<128x128xf32>
    %37 = arith.addf %35, %36 : vector<128x128xf32>
    %cst_25 = arith.constant dense<0.000000e+00> : vector<128x128xf32>
    %38 = tpu.matmul %31, %30, %cst_25 {dimension_numbers = #tpu.dot_dimension_numbers<[1], [0], [0], [1], [0, 0, 1, 1], [], []>} : vector<128x4xbf16>, vector<4x128xbf16>, vector<128x128xf32> -> vector<128x128xf32>
    %39 = arith.addf %37, %38 : vector<128x128xf32>
    %40 = arith.addf %28, %39 : vector<128x128xf32>
    %c0_26 = arith.constant 0 : index
    %c0_27 = arith.constant 0 : index
    %41 = vector.load %arg11[%c0_26, %c0_27] : memref<128x128xf32, #tpu.memory_space<vmem>>, vector<128x128xf32>
    tpu.vector_store %arg11[%c0_26, %c0_27], %40 {strides = array<i32>} : memref<128x128xf32, #tpu.memory_space<vmem>>, vector<128x128xf32>,
    return
  }
  func.func @transform_0(%arg0: i32) -> (i32, i32) {
    %c0_i32 = arith.constant 0 : i32
    %c0_i32_0 = arith.constant 0 : i32
    return %arg0, %c0_i32 : i32, i32
  }
  func.func @transform_1(%arg0: i32) -> (i32, i32) {
    %c0_i32 = arith.constant 0 : i32
    %c0_i32_0 = arith.constant 0 : i32
    %c0_i32_1 = arith.constant 0 : i32
    return %c0_i32, %c0_i32_0 : i32, i32
  }
  func.func @transform_2(%arg0: i32) -> (i32, i32) {
    %c0_i32 = arith.constant 0 : i32
    %c0_i32_0 = arith.constant 0 : i32
    %c0_i32_1 = arith.constant 0 : i32
    return %c0_i32, %c0_i32_0 : i32, i32
  }
  func.func @transform_3(%arg0: i32) -> (i32, i32) {
    %c0_i32 = arith.constant 0 : i32
    %c0_i32_0 = arith.constant 0 : i32
    %c0_i32_1 = arith.constant 0 : i32
    return %c0_i32, %c0_i32_0 : i32, i32
  }
  func.func @transform_4(%arg0: i32) -> (i32, i32) {
    %c0_i32 = arith.constant 0 : i32
    %c0_i32_0 = arith.constant 0 : i32
    %c0_i32_1 = arith.constant 0 : i32
    return %c0_i32, %c0_i32_0 : i32, i32
  }
  func.func @transform_5(%arg0: i32) -> (i32, i32) {
    %c0_i32 = arith.constant 0 : i32
    %c0_i32_0 = arith.constant 0 : i32
    return %arg0, %c0_i32 : i32, i32
  }
  func.func @transform_6(%arg0: i32) -> (i32, i32) {
    %c0_i32 = arith.constant 0 : i32
    %c0_i32_0 = arith.constant 0 : i32
    %c0_i32_1 = arith.constant 0 : i32
    return %c0_i32, %c0_i32_0 : i32, i32
  }
  func.func @transform_7(%arg0: i32) -> (i32, i32) {
    %c0_i32 = arith.constant 0 : i32
    %c0_i32_0 = arith.constant 0 : i32
    %c0_i32_1 = arith.constant 0 : i32
    return %c0_i32, %c0_i32_0 : i32, i32
  }
  func.func @transform_8(%arg0: i32) -> (i32, i32) {
    %c0_i32 = arith.constant 0 : i32
    %c0_i32_0 = arith.constant 0 : i32
    %c0_i32_1 = arith.constant 0 : i32
    return %c0_i32, %c0_i32_0 : i32, i32
  }
  func.func @transform_9(%arg0: i32) -> (i32, i32) {
    %c0_i32 = arith.constant 0 : i32
    %c0_i32_0 = arith.constant 0 : i32
    %c0_i32_1 = arith.constant 0 : i32
    return %c0_i32, %c0_i32_0 : i32, i32
  }
  func.func @transform_10(%arg0: i32) -> (i32, i32) {
    %c0_i32 = arith.constant 0 : i32
    %c0_i32_0 = arith.constant 0 : i32
    return %arg0, %c0_i32 : i32, i32
  }
}

</mosaic_0001>

<bundles_post_ra>
// kernel: preact_bottleneck.4
= control target key start
LH: loop header
LB: loop body
LE: loop exit
PB: predicated region body
PF: predicated region fallthrough
CT: control target
= control target key end

     0   :  { %8 = vsyncpa [#allocation3], 0  ;;  %s1021_s0 = inlined_call_operand.hbm [shape: f32[512,4], index: 0, kind: input, shape index: {}]   ;;  %s1022_s1 = inlined_call_operand.hbm [shape: f32[1,4], index: 1, kind: output, shape index: {0}]   ;;  %s1023_s2 = inlined_call_operand.hbm [shape: f32[1,4], index: 2, kind: output, shape index: {1}]  }
   0x1   :  { %9 = vsyncpa [#allocation4], 0 }
   0x2   :  { %10 = vsyncpa [#allocation7], 0  ;;  %s542_s9 = smov [#allocation2]   ;;  %s470_s13 = scalar_lea.hbm %s1021_s0, 8192 }
   0x3   :  { %s16_s10 = sshll.u32 %s542_s9, 4  ;;  %p471_p0 = scmp.ne.s32.totalorder %s1021_s0, %s470_s13  ;;  %s17_s10 = int_to_ptr.vmem [resolvable:$true] %s16_s10 }
   0x4   :  { %p474_p1 = scmp.lt.u32.totalorder %s470_s13, %s1021_s0 }
   0x6   :  { %p476_p2 = pnand %p474_p1, %p471_p0 }
   0x8   :  { %479 = shalt.err (!%p476_p2)
}
   0x9   :  { %s480_s18 = scalar_lea.vmem %s17_s10, 8192  ;;  %p485_p4 = scmp.lt.s32.totalorder %s17_s10, %s17_s10 }
   0xa   :  { %p481_p3 = scmp.ne.s32.totalorder %s17_s10, %s480_s18  ;;  %p486_p5 = scmp.lt.s32.totalorder %s480_s18, %s480_s18 }
   0xc   :  { %p487_p6 = por %p486_p5, %p485_p4 }
   0xe   :  { %p488_p7 = pnand %p487_p6, %p481_p3 }
  0x10   :  { %491 = shalt.err (!%p488_p7)
}
  0x11   :  { %s543_s19 = smov 128   ;;  %s544_s20 = smov 8  }
  0x12   :  { %22 = dma.hbm_to_vmem [thread:$0]  %s1021_s0, 8192, %s17_s10, [#allocation3], %s543_s19, %s543_s19, %s544_s20  }
  0x13   :  { %536 = dma.done.wait [#allocation3], 8192  }
  0x14   :  { %537 = vsyncadd [#allocation3], 4294959104  ;;  %vm30_vm0 = vcmask 24576   ;;  %v545_v0 = vmov 0.0   ;;  %vm98_vm1 = vcmask 31744   ;;  %v33_v1 = vld [vmem:[#allocation2] sm:$0xff] }
  0x15   :  { %31 = vst.msk [vmem:[#allocation5] sm:$0x1] %vm30_vm0, %v545_v0  ;;  %32 = vst.msk [vmem:[#allocation6] sm:$0x1] %vm30_vm0, %v545_v0  ;;  %v34_v2 = vld [vmem:[#allocation2 + $0x8] sm:$0xff]  ;;  %v35_v3 = vld [vmem:[#allocation2 + $0x10] sm:$0xff]  ;;  %v236_v55 = vmul.f32 %v33_v1, %v33_v1 }
  0x16   :  { %v99_v4 = vsel %vm98_vm1, %v33_v1, 0.0  ;;  %v100_v5 = vsel %vm98_vm1, %v34_v2, 0.0  ;;  %v102_v6 = vsel %vm98_vm1, %v35_v3, 0.0  ;;  %v36_v7 = vld [vmem:[#allocation2 + $0x18] sm:$0xff]  ;;  %v37_v10 = vld [vmem:[#allocation2 + $0x20] sm:$0xff]  ;;  %v38_v13 = vld [vmem:[#allocation2 + $0x28] sm:$0xff]  ;;  %v237_v56 = vmul.f32 %v34_v2, %v34_v2 }
  0x17   :  { %v101_v8 = vadd.f32 %v100_v5, %v99_v4  ;;  %v104_v9 = vsel %vm98_vm1, %v36_v7, 0.0  ;;  %v106_v12 = vsel %vm98_vm1, %v37_v10, 0.0  ;;  %v108_v15 = vsel %vm98_vm1, %v38_v13, 0.0  ;;  %v583_v16 = vld [vmem:[#allocation2 + $0x30] sm:$0xff]  ;;  %v587_v19 = vld [vmem:[#allocation2 + $0x38] sm:$0xff]  ;;  %v591_v22 = vld [vmem:[#allocation2 + $0x40] sm:$0xff] }
  0x18   :  { %v110_v18 = vsel %vm98_vm1, %v583_v16, 0.0  ;;  %v112_v21 = vsel %vm98_vm1, %v587_v19, 0.0  ;;  %v114_v24 = vsel %vm98_vm1, %v591_v22, 0.0  ;;  %v595_v25 = vld [vmem:[#allocation2 + $0x48] sm:$0xff]  ;;  %v599_v28 = vld [vmem:[#allocation2 + $0x50] sm:$0xff]  ;;  %v603_v31 = vld [vmem:[#allocation2 + $0x58] sm:$0xff]  ;;  %v238_v59 = vmul.f32 %v35_v3, %v35_v3 }
  0x19   :  { %v103_v11 = vadd.f32 %v102_v6, %v101_v8  ;;  %v116_v27 = vsel %vm98_vm1, %v595_v25, 0.0  ;;  %v118_v30 = vsel %vm98_vm1, %v599_v28, 0.0  ;;  %v120_v33 = vsel %vm98_vm1, %v603_v31, 0.0  ;;  %v607_v34 = vld [vmem:[#allocation2 + $0x60] sm:$0xff]  ;;  %v611_v37 = vld [vmem:[#allocation2 + $0x68] sm:$0xff]  ;;  %v615_v40 = vld [vmem:[#allocation2 + $0x70] sm:$0xff] }
  0x1a   :  { %v122_v36 = vsel %vm98_vm1, %v607_v34, 0.0  ;;  %v124_v39 = vsel %vm98_vm1, %v611_v37, 0.0  ;;  %v126_v42 = vsel %vm98_vm1, %v615_v40, 0.0  ;;  %v619_v43 = vld [vmem:[#allocation2 + $0x78] sm:$0xff]  ;;  %v623_v46 = vld [vmem:[#allocation2 + $0x80] sm:$0xff]  ;;  %v627_v49 = vld [vmem:[#allocation2 + $0x88] sm:$0xff]  ;;  %v239_v61 = vmul.f32 %v36_v7, %v36_v7 }
  0x1b   :  { %v105_v14 = vadd.f32 %v104_v9, %v103_v11  ;;  %v128_v45 = vsel %vm98_vm1, %v619_v43, 0.0  ;;  %v130_v48 = vsel %vm98_vm1, %v623_v46, 0.0  ;;  %v132_v51 = vsel %vm98_vm1, %v627_v49, 0.0  ;;  %v631_v52 = vld [vmem:[#allocation2 + $0x90] sm:$0xff]  ;;  %v635_v57 = vld [vmem:[#allocation2 + $0x98] sm:$0xff]  ;;  %v639_v62 = vld [vmem:[#allocation2 + $0xa0] sm:$0xff] }
  0x1c   :  { %v134_v54 = vsel %vm98_vm1, %v631_v52, 0.0  ;;  %v136_v60 = vsel %vm98_vm1, %v635_v57, 0.0  ;;  %v138_v0 = vsel %vm98_vm1, %v639_v62, 0.0  ;;  %v240_v4 = vmul.f32 %v37_v10, %v37_v10  ;;  %v645_v2 = vld [vmem:[#allocation2 + $0xa8] sm:$0xff]  ;;  %s546_s0 = smov [#allocation5]  }
  0x1d   :  { %v107_v17 = vadd.f32 %v106_v12, %v105_v14  ;;  %v300_v5 = vsel %vm98_vm1, %v236_v55, 0.0  ;;  %v301_v1 = vsel %vm98_vm1, %v237_v56, 0.0  ;;  %v303_v3 = vsel %vm98_vm1, %v238_v59, 0.0  ;;  %v651_v12 = vld [vmem:[#allocation2 + $0xb0] sm:$0xff]  ;;  %v693_v56 = vld [vmem:[#allocation2 + $0xe0] sm:$0xff]  ;;  %s441_s23 = sshll.u32 %s546_s0, 4  ;;  %s442_s23 = int_to_ptr.vmem [resolvable:$true] %s441_s23 }
  0x1e   :  { %v302_v8 = vadd.f32 %v301_v1, %v300_v5  ;;  %v140_v7 = vsel %vm98_vm1, %v645_v2, 0.0  ;;  %v241_v9 = vmul.f32 %v38_v13, %v38_v13  ;;  %v305_v11 = vsel %vm98_vm1, %v239_v61, 0.0  ;;  %s492_s24 = scalar_lea.vmem %s442_s23, 16  ;;  %s496_s25 = scalar_lea.vmem %s442_s23, 32 }
  0x1f   :  { %v109_v20 = vadd.f32 %v108_v15, %v107_v17  ;;  %v142_v15 = vsel %vm98_vm1, %v651_v12, 0.0  ;;  %v242_v17 = vmul.f32 %v583_v16, %v583_v16  ;;  %v249_v5 = vmul.f32 %v611_v37, %v611_v37  ;;  %p493_p8 = scmp.ne.s32.totalorder %s442_s23, %s492_s24  ;;  %p497_p9 = scmp.lt.s32.totalorder %s442_s23, %s442_s23 }
  0x20   :  { %v304_v10 = vadd.f32 %v303_v3, %v302_v8  ;;  %p498_p10 = scmp.lt.s32.totalorder %s496_s25, %s492_s24 }
  0x21   :  { %v111_v23 = vadd.f32 %v110_v18, %v109_v20  ;;  %v307_v18 = vsel %vm98_vm1, %v240_v4, 0.0  ;;  %v658_v20 = vld [vmem:[#allocation2 + $0xb8] sm:$0xff] }
  0x22   :  { %v144_v13 = vsel %vm98_vm1, %v658_v20, 0.0  ;;  %p499_p11 = por %p498_p10, %p497_p9 }
  0x23   :  { %v113_v26 = vadd.f32 %v112_v21, %v111_v23  ;;  %v306_v23 = vadd.f32 %v305_v11, %v304_v10  ;;  %v714_v11 = vld [vmem:[#allocation2 + $0xf8] sm:$0xff] }
  0x24   :  { %v160_v37 = vsel %vm98_vm1, %v714_v11, 0.0  ;;  %p500_p12 = pnand %p499_p11, %p493_p8 }
  0x25   :  { %v115_v29 = vadd.f32 %v114_v24, %v113_v26  ;;  %v243_v24 = vmul.f32 %v587_v19, %v587_v19  ;;  %v309_v26 = vsel %vm98_vm1, %v241_v9, 0.0 }
  0x27   :  { %v117_v32 = vadd.f32 %v116_v27, %v115_v29  ;;  %v665_v27 = vld [vmem:[#allocation2 + $0xc0] sm:$0xff] }
  0x28   :  { %v146_v16 = vsel %vm98_vm1, %v665_v27, 0.0 }
  0x29   :  { %v119_v35 = vadd.f32 %v118_v30, %v117_v32  ;;  %v308_v30 = vadd.f32 %v307_v18, %v306_v23  ;;  %v244_v32 = vmul.f32 %v591_v22, %v591_v22  ;;  %v721_v18 = vld [vmem:[#allocation2 + $0x100] sm:$0xff] }
  0x2b   :  { %v121_v38 = vadd.f32 %v120_v33, %v119_v35  ;;  %v311_v33 = vsel %vm98_vm1, %v242_v17, 0.0  ;;  %v672_v35 = vld [vmem:[#allocation2 + $0xc8] sm:$0xff]  ;;  %v325_v17 = vsel %vm98_vm1, %v249_v5, 0.0 }
  0x2c   :  { %v148_v19 = vsel %vm98_vm1, %v672_v35, 0.0 }
  0x2d   :  { %v123_v41 = vadd.f32 %v122_v36, %v121_v38  ;;  %v310_v38 = vadd.f32 %v309_v26, %v308_v30  ;;  %v728_v26 = vld [vmem:[#allocation2 + $0x108] sm:$0xff] }
  0x2f   :  { %v125_v44 = vadd.f32 %v124_v39, %v123_v41  ;;  %v245_v39 = vmul.f32 %v595_v25, %v595_v25  ;;  %v313_v41 = vsel %vm98_vm1, %v243_v24, 0.0 }
  0x31   :  { %v127_v47 = vadd.f32 %v126_v42, %v125_v44  ;;  %v679_v42 = vld [vmem:[#allocation2 + $0xd0] sm:$0xff]  ;;  %v317_v55 = vsel %vm98_vm1, %v245_v39, 0.0 }
  0x32   :  { %v150_v22 = vsel %vm98_vm1, %v679_v42, 0.0 }
  0x33   :  { %v129_v50 = vadd.f32 %v128_v45, %v127_v47  ;;  %v312_v45 = vadd.f32 %v311_v33, %v310_v38  ;;  %v246_v47 = vmul.f32 %v599_v28, %v599_v28  ;;  %v154_v28 = vsel %vm98_vm1, %v693_v56, 0.0  ;;  %v735_v33 = vld [vmem:[#allocation2 + $0x110] sm:$0xff] }
  0x35   :  { %v131_v53 = vadd.f32 %v130_v48, %v129_v50  ;;  %v315_v48 = vsel %vm98_vm1, %v244_v32, 0.0  ;;  %v686_v50 = vld [vmem:[#allocation2 + $0xd8] sm:$0xff]  ;;  %v319_v61 = vsel %vm98_vm1, %v246_v47, 0.0 }
  0x36   :  { %v152_v25 = vsel %vm98_vm1, %v686_v50, 0.0 }
  0x37   :  { %v133_v58 = vadd.f32 %v132_v51, %v131_v53  ;;  %v314_v53 = vadd.f32 %v313_v41, %v312_v45  ;;  %v742_v41 = vld [vmem:[#allocation2 + $0x118] sm:$0xff] }
  0x39   :  { %v135_v63 = vadd.f32 %v134_v54, %v133_v58  ;;  %v247_v54 = vmul.f32 %v603_v31, %v603_v31  ;;  %v316_v59 = vadd.f32 %v315_v48, %v314_v53  ;;  %v749_v48 = vld [vmem:[#allocation2 + $0x120] sm:$0xff] }
  0x3b   :  { %v137_v6 = vadd.f32 %v136_v60, %v135_v63  ;;  %v248_v60 = vmul.f32 %v607_v34, %v607_v34  ;;  %v700_v63 = vld [vmem:[#allocation2 + $0xe8] sm:$0xff]  ;;  %v318_v4 = vadd.f32 %v317_v55, %v316_v59  ;;  %v321_v1 = vsel %vm98_vm1, %v247_v54, 0.0 }
  0x3c   :  { %v156_v31 = vsel %vm98_vm1, %v700_v63, 0.0  ;;  %v756_v55 = vld [vmem:[#allocation2 + $0x128] sm:$0xff] }
  0x3d   :  { %v139_v14 = vadd.f32 %v138_v0, %v137_v6  ;;  %v707_v6 = vld [vmem:[#allocation2 + $0xf0] sm:$0xff]  ;;  %v320_v3 = vadd.f32 %v319_v61, %v318_v4  ;;  %v323_v9 = vsel %vm98_vm1, %v248_v60, 0.0 }
  0x3e   :  { %v158_v34 = vsel %vm98_vm1, %v707_v6, 0.0  ;;  %v763_v61 = vld [vmem:[#allocation2 + $0x130] sm:$0xff] }
  0x3f   :  { %v141_v21 = vadd.f32 %v140_v7, %v139_v14  ;;  %v250_v7 = vmul.f32 %v615_v40, %v615_v40  ;;  %v322_v10 = vadd.f32 %v321_v1, %v320_v3  ;;  %v162_v40 = vsel %vm98_vm1, %v721_v18, 0.0  ;;  %v770_v1 = vld [vmem:[#allocation2 + $0x138] sm:$0xff] }
  0x41   :  { %v143_v29 = vadd.f32 %v142_v15, %v141_v21  ;;  %v251_v15 = vmul.f32 %v619_v43, %v619_v43  ;;  %v324_v23 = vadd.f32 %v323_v9, %v322_v10  ;;  %v327_v24 = vsel %vm98_vm1, %v250_v7, 0.0  ;;  %v777_v9 = vld [vmem:[#allocation2 + $0x140] sm:$0xff] }
  0x42   :  { %v164_v43 = vsel %vm98_vm1, %v728_v26, 0.0 }
  0x43   :  { %v145_v36 = vadd.f32 %v144_v13, %v143_v29  ;;  %v252_v13 = vmul.f32 %v623_v46, %v623_v46  ;;  %v326_v30 = vadd.f32 %v325_v17, %v324_v23  ;;  %v329_v32 = vsel %vm98_vm1, %v251_v15, 0.0  ;;  %v784_v17 = vld [vmem:[#allocation2 + $0x148] sm:$0xff] }
  0x44   :  { %v166_v46 = vsel %vm98_vm1, %v735_v33, 0.0 }
  0x45   :  { %v147_v44 = vadd.f32 %v146_v16, %v145_v36  ;;  %v253_v16 = vmul.f32 %v627_v49, %v627_v49  ;;  %v328_v38 = vadd.f32 %v327_v24, %v326_v30  ;;  %v331_v39 = vsel %vm98_vm1, %v252_v13, 0.0  ;;  %v791_v24 = vld [vmem:[#allocation2 + $0x150] sm:$0xff] }
  0x46   :  { %v168_v49 = vsel %vm98_vm1, %v742_v41, 0.0 }
  0x47   :  { %v149_v51 = vadd.f32 %v148_v19, %v147_v44  ;;  %v254_v19 = vmul.f32 %v631_v52, %v631_v52  ;;  %v330_v45 = vadd.f32 %v329_v32, %v328_v38  ;;  %v333_v47 = vsel %vm98_vm1, %v253_v16, 0.0  ;;  %v798_v32 = vld [vmem:[#allocation2 + $0x158] sm:$0xff] }
  0x48   :  { %v170_v52 = vsel %vm98_vm1, %v749_v48, 0.0 }
  0x49   :  { %v151_v58 = vadd.f32 %v150_v22, %v149_v51  ;;  %v255_v22 = vmul.f32 %v635_v57, %v635_v57  ;;  %v332_v53 = vadd.f32 %v331_v39, %v330_v45  ;;  %v335_v54 = vsel %vm98_vm1, %v254_v19, 0.0  ;;  %v805_v39 = vld [vmem:[#allocation2 + $0x160] sm:$0xff] }
  0x4a   :  { %v172_v57 = vsel %vm98_vm1, %v756_v55, 0.0 }
  0x4b   :  { %v153_v0 = vadd.f32 %v152_v25, %v151_v58  ;;  %v256_v25 = vmul.f32 %v639_v62, %v639_v62  ;;  %v334_v59 = vadd.f32 %v333_v47, %v332_v53  ;;  %v337_v60 = vsel %vm98_vm1, %v255_v22, 0.0  ;;  %v812_v47 = vld [vmem:[#allocation2 + $0x168] sm:$0xff] }
  0x4c   :  { %v174_v62 = vsel %vm98_vm1, %v763_v61, 0.0 }
  0x4d   :  { %v155_v8 = vadd.f32 %v154_v28, %v153_v0  ;;  %v257_v28 = vmul.f32 %v645_v2, %v645_v2  ;;  %v336_v4 = vadd.f32 %v335_v54, %v334_v59  ;;  %v339_v5 = vsel %vm98_vm1, %v256_v25, 0.0  ;;  %v819_v54 = vld [vmem:[#allocation2 + $0x170] sm:$0xff] }
  0x4e   :  { %v176_v2 = vsel %vm98_vm1, %v770_v1, 0.0 }
  0x4f   :  { %v157_v14 = vadd.f32 %v156_v31, %v155_v8  ;;  %v258_v31 = vmul.f32 %v651_v12, %v651_v12  ;;  %v338_v3 = vadd.f32 %v337_v60, %v336_v4  ;;  %v341_v7 = vsel %vm98_vm1, %v257_v28, 0.0  ;;  %v826_v60 = vld [vmem:[#allocation2 + $0x178] sm:$0xff] }
  0x50   :  { %v178_v12 = vsel %vm98_vm1, %v777_v9, 0.0 }
  0x51   :  { %v159_v21 = vadd.f32 %v158_v34, %v157_v14  ;;  %v259_v34 = vmul.f32 %v658_v20, %v658_v20  ;;  %v340_v10 = vadd.f32 %v339_v5, %v338_v3  ;;  %v343_v15 = vsel %vm98_vm1, %v258_v31, 0.0  ;;  %v833_v5 = vld [vmem:[#allocation2 + $0x180] sm:$0xff] }
  0x52   :  { %v180_v20 = vsel %vm98_vm1, %v784_v17, 0.0 }
  0x53   :  { %v161_v29 = vadd.f32 %v160_v37, %v159_v21  ;;  %v260_v37 = vmul.f32 %v665_v27, %v665_v27  ;;  %v342_v23 = vadd.f32 %v341_v7, %v340_v10  ;;  %v345_v13 = vsel %vm98_vm1, %v259_v34, 0.0  ;;  %v840_v7 = vld [vmem:[#allocation2 + $0x188] sm:$0xff] }
  0x54   :  { %v182_v27 = vsel %vm98_vm1, %v791_v24, 0.0 }
  0x55   :  { %v163_v36 = vadd.f32 %v162_v40, %v161_v29  ;;  %v261_v40 = vmul.f32 %v672_v35, %v672_v35  ;;  %v344_v30 = vadd.f32 %v343_v15, %v342_v23  ;;  %v347_v16 = vsel %vm98_vm1, %v260_v37, 0.0  ;;  %v847_v15 = vld [vmem:[#allocation2 + $0x190] sm:$0xff] }
  0x56   :  { %v184_v35 = vsel %vm98_vm1, %v798_v32, 0.0 }
  0x57   :  { %v165_v44 = vadd.f32 %v164_v43, %v163_v36  ;;  %v262_v43 = vmul.f32 %v679_v42, %v679_v42  ;;  %v346_v38 = vadd.f32 %v345_v13, %v344_v30  ;;  %v349_v19 = vsel %vm98_vm1, %v261_v40, 0.0  ;;  %v854_v13 = vld [vmem:[#allocation2 + $0x198] sm:$0xff] }
  0x58   :  { %v186_v42 = vsel %vm98_vm1, %v805_v39, 0.0 }
  0x59   :  { %v167_v51 = vadd.f32 %v166_v46, %v165_v44  ;;  %v263_v46 = vmul.f32 %v686_v50, %v686_v50  ;;  %v348_v45 = vadd.f32 %v347_v16, %v346_v38  ;;  %v351_v22 = vsel %vm98_vm1, %v262_v43, 0.0  ;;  %v861_v16 = vld [vmem:[#allocation2 + $0x1a0] sm:$0xff] }
  0x5a   :  { %v188_v50 = vsel %vm98_vm1, %v812_v47, 0.0 }
  0x5b   :  { %v169_v58 = vadd.f32 %v168_v49, %v167_v51  ;;  %v264_v49 = vmul.f32 %v693_v56, %v693_v56  ;;  %v350_v53 = vadd.f32 %v349_v19, %v348_v45  ;;  %v353_v25 = vsel %vm98_vm1, %v263_v46, 0.0  ;;  %v868_v19 = vld [vmem:[#allocation2 + $0x1a8] sm:$0xff] }
  0x5c   :  { %v190_v56 = vsel %vm98_vm1, %v819_v54, 0.0 }
  0x5d   :  { %v171_v0 = vadd.f32 %v170_v52, %v169_v58  ;;  %v265_v52 = vmul.f32 %v700_v63, %v700_v63  ;;  %v352_v59 = vadd.f32 %v351_v22, %v350_v53  ;;  %v355_v28 = vsel %vm98_vm1, %v264_v49, 0.0  ;;  %v875_v22 = vld [vmem:[#allocation2 + $0x1b0] sm:$0xff] }
  0x5e   :  { %v192_v63 = vsel %vm98_vm1, %v826_v60, 0.0 }
  0x5f   :  { %v173_v8 = vadd.f32 %v172_v57, %v171_v0  ;;  %v266_v57 = vmul.f32 %v707_v6, %v707_v6  ;;  %v354_v4 = vadd.f32 %v353_v25, %v352_v59  ;;  %v357_v31 = vsel %vm98_vm1, %v265_v52, 0.0  ;;  %v882_v25 = vld [vmem:[#allocation2 + $0x1b8] sm:$0xff] }
  0x60   :  { %v194_v6 = vsel %vm98_vm1, %v833_v5, 0.0 }
  0x61   :  { %v175_v14 = vadd.f32 %v174_v62, %v173_v8  ;;  %v267_v62 = vmul.f32 %v714_v11, %v714_v11  ;;  %v356_v3 = vadd.f32 %v355_v28, %v354_v4  ;;  %v359_v34 = vsel %vm98_vm1, %v266_v57, 0.0  ;;  %v889_v28 = vld [vmem:[#allocation2 + $0x1c0] sm:$0xff] }
  0x62   :  { %v196_v11 = vsel %vm98_vm1, %v840_v7, 0.0 }
  0x63   :  { %v177_v21 = vadd.f32 %v176_v2, %v175_v14  ;;  %v268_v2 = vmul.f32 %v721_v18, %v721_v18  ;;  %v358_v10 = vadd.f32 %v357_v31, %v356_v3  ;;  %v361_v37 = vsel %vm98_vm1, %v267_v62, 0.0  ;;  %v896_v31 = vld [vmem:[#allocation2 + $0x1c8] sm:$0xff] }
  0x64   :  { %v198_v18 = vsel %vm98_vm1, %v847_v15, 0.0 }
  0x65   :  { %v179_v29 = vadd.f32 %v178_v12, %v177_v21  ;;  %v269_v12 = vmul.f32 %v728_v26, %v728_v26  ;;  %v360_v23 = vadd.f32 %v359_v34, %v358_v10  ;;  %v363_v40 = vsel %vm98_vm1, %v268_v2, 0.0  ;;  %v903_v34 = vld [vmem:[#allocation2 + $0x1d0] sm:$0xff] }
  0x66   :  { %v200_v26 = vsel %vm98_vm1, %v854_v13, 0.0 }
  0x67   :  { %v181_v36 = vadd.f32 %v180_v20, %v179_v29  ;;  %v270_v20 = vmul.f32 %v735_v33, %v735_v33  ;;  %v362_v30 = vadd.f32 %v361_v37, %v360_v23  ;;  %v365_v43 = vsel %vm98_vm1, %v269_v12, 0.0  ;;  %v910_v37 = vld [vmem:[#allocation2 + $0x1d8] sm:$0xff] }
  0x68   :  { %v202_v33 = vsel %vm98_vm1, %v861_v16, 0.0 }
  0x69   :  { %v183_v44 = vadd.f32 %v182_v27, %v181_v36  ;;  %v271_v27 = vmul.f32 %v742_v41, %v742_v41  ;;  %v364_v38 = vadd.f32 %v363_v40, %v362_v30  ;;  %v367_v46 = vsel %vm98_vm1, %v270_v20, 0.0  ;;  %v917_v40 = vld [vmem:[#allocation2 + $0x1e0] sm:$0xff] }
  0x6a   :  { %v204_v41 = vsel %vm98_vm1, %v868_v19, 0.0 }
  0x6b   :  { %v185_v51 = vadd.f32 %v184_v35, %v183_v44  ;;  %v272_v35 = vmul.f32 %v749_v48, %v749_v48  ;;  %v366_v45 = vadd.f32 %v365_v43, %v364_v38  ;;  %v369_v49 = vsel %vm98_vm1, %v271_v27, 0.0  ;;  %v924_v43 = vld [vmem:[#allocation2 + $0x1e8] sm:$0xff] }
  0x6c   :  { %v206_v48 = vsel %vm98_vm1, %v875_v22, 0.0 }
  0x6d   :  { %v187_v58 = vadd.f32 %v186_v42, %v185_v51  ;;  %v273_v42 = vmul.f32 %v756_v55, %v756_v55  ;;  %v368_v53 = vadd.f32 %v367_v46, %v366_v45  ;;  %v371_v52 = vsel %vm98_vm1, %v272_v35, 0.0  ;;  %v931_v46 = vld [vmem:[#allocation2 + $0x1f0] sm:$0xff] }
  0x6e   :  { %v208_v55 = vsel %vm98_vm1, %v882_v25, 0.0 }
  0x6f   :  { %v189_v0 = vadd.f32 %v188_v50, %v187_v58  ;;  %v274_v50 = vmul.f32 %v763_v61, %v763_v61  ;;  %v370_v59 = vadd.f32 %v369_v49, %v368_v53  ;;  %v373_v57 = vsel %vm98_vm1, %v273_v42, 0.0  ;;  %v938_v49 = vld [vmem:[#allocation2 + $0x1f8] sm:$0xff] }
  0x70   :  { %v210_v61 = vsel %vm98_vm1, %v889_v28, 0.0 }
  0x71   :  { %v191_v8 = vadd.f32 %v190_v56, %v189_v0  ;;  %v275_v56 = vmul.f32 %v770_v1, %v770_v1  ;;  %v372_v4 = vadd.f32 %v371_v52, %v370_v59  ;;  %v375_v62 = vsel %vm98_vm1, %v274_v50, 0.0 }
  0x72   :  { %v212_v1 = vsel %vm98_vm1, %v896_v31, 0.0  ;;  %v284_v59 = vmul.f32 %v833_v5, %v833_v5  ;;  %v287_v5 = vmul.f32 %v854_v13, %v854_v13  ;;  %v290_v13 = vmul.f32 %v875_v22, %v875_v22 }
  0x73   :  { %v193_v14 = vadd.f32 %v192_v63, %v191_v8  ;;  %v276_v63 = vmul.f32 %v777_v9, %v777_v9  ;;  %v374_v3 = vadd.f32 %v373_v57, %v372_v4  ;;  %v377_v2 = vsel %vm98_vm1, %v275_v56, 0.0 }
  0x74   :  { %v214_v9 = vsel %vm98_vm1, %v903_v34, 0.0  ;;  %v285_v57 = vmul.f32 %v840_v7, %v840_v7  ;;  %v288_v7 = vmul.f32 %v861_v16, %v861_v16 }
  0x75   :  { %v195_v21 = vadd.f32 %v194_v6, %v193_v14  ;;  %v277_v6 = vmul.f32 %v784_v17, %v784_v17  ;;  %v376_v10 = vadd.f32 %v375_v62, %v374_v3  ;;  %v379_v12 = vsel %vm98_vm1, %v276_v63, 0.0 }
  0x76   :  { %v216_v17 = vsel %vm98_vm1, %v910_v37, 0.0  ;;  %v395_v63 = vsel %vm98_vm1, %v284_v59, 0.0  ;;  %v397_v3 = vsel %vm98_vm1, %v285_v57, 0.0 }
  0x77   :  { %v197_v29 = vadd.f32 %v196_v11, %v195_v21  ;;  %v278_v11 = vmul.f32 %v791_v24, %v791_v24  ;;  %v378_v23 = vadd.f32 %v377_v2, %v376_v10  ;;  %v381_v20 = vsel %vm98_vm1, %v277_v6, 0.0 }
  0x78   :  { %v218_v24 = vsel %vm98_vm1, %v917_v40, 0.0 }
  0x79   :  { %v199_v36 = vadd.f32 %v198_v18, %v197_v29  ;;  %v279_v18 = vmul.f32 %v798_v32, %v798_v32  ;;  %v380_v30 = vadd.f32 %v379_v12, %v378_v23  ;;  %v383_v27 = vsel %vm98_vm1, %v278_v11, 0.0 }
  0x7a   :  { %v220_v32 = vsel %vm98_vm1, %v924_v43, 0.0  ;;  %v403_v23 = vsel %vm98_vm1, %v288_v7, 0.0 }
  0x7b   :  { %v201_v44 = vadd.f32 %v200_v26, %v199_v36  ;;  %v280_v26 = vmul.f32 %v805_v39, %v805_v39  ;;  %v382_v38 = vadd.f32 %v381_v20, %v380_v30  ;;  %v385_v35 = vsel %vm98_vm1, %v279_v18, 0.0 }
  0x7c   :  { %v222_v39 = vsel %vm98_vm1, %v931_v46, 0.0  ;;  %v291_v18 = vmul.f32 %v882_v25, %v882_v25  ;;  %v292_v30 = vmul.f32 %v889_v28, %v889_v28 }
  0x7d   :  { %v203_v51 = vadd.f32 %v202_v33, %v201_v44  ;;  %v281_v33 = vmul.f32 %v812_v47, %v812_v47  ;;  %v384_v45 = vadd.f32 %v383_v27, %v382_v38  ;;  %v387_v42 = vsel %vm98_vm1, %v280_v26, 0.0 }
  0x7e   :  { %v224_v47 = vsel %vm98_vm1, %v938_v49, 0.0  ;;  %v293_v26 = vmul.f32 %v896_v31, %v896_v31  ;;  %v409_v27 = vsel %vm98_vm1, %v291_v18, 0.0 }
  0x7f   :  { %v205_v58 = vadd.f32 %v204_v41, %v203_v51  ;;  %v282_v41 = vmul.f32 %v819_v54, %v819_v54  ;;  %v386_v53 = vadd.f32 %v385_v35, %v384_v45  ;;  %v389_v50 = vsel %vm98_vm1, %v281_v33, 0.0 }
  0x81   :  { %v207_v0 = vadd.f32 %v206_v48, %v205_v58  ;;  %v283_v48 = vmul.f32 %v826_v60, %v826_v60  ;;  %v388_v58 = vadd.f32 %v387_v42, %v386_v53  ;;  %v391_v54 = vsel %vm98_vm1, %v282_v41, 0.0 }
  0x82   :  { %v286_v60 = vmul.f32 %v847_v15, %v847_v15  ;;  %v289_v15 = vmul.f32 %v868_v19, %v868_v19 }
  0x83   :  { %v209_v8 = vadd.f32 %v208_v55, %v207_v0  ;;  %v390_v56 = vadd.f32 %v389_v50, %v388_v58  ;;  %v393_v0 = vsel %vm98_vm1, %v283_v48, 0.0 }
  0x84   :  { %v399_v2 = vsel %vm98_vm1, %v286_v60, 0.0  ;;  %v405_v20 = vsel %vm98_vm1, %v289_v15, 0.0 }
  0x85   :  { %v211_v14 = vadd.f32 %v210_v61, %v209_v8  ;;  %v392_v61 = vadd.f32 %v391_v54, %v390_v56 }
  0x87   :  { %v213_v21 = vadd.f32 %v212_v1, %v211_v14  ;;  %v394_v8 = vadd.f32 %v393_v0, %v392_v61 }
  0x89   :  { %v215_v29 = vadd.f32 %v214_v9, %v213_v21  ;;  %v396_v6 = vadd.f32 %v395_v63, %v394_v8  ;;  %v401_v9 = vsel %vm98_vm1, %v287_v5, 0.0  ;;  %v97_v21 = vld [vmem:[#allocation5] sm:$0x1] }
  0x8b   :  { %v217_v36 = vadd.f32 %v216_v17, %v215_v29  ;;  %v398_v10 = vadd.f32 %v397_v3, %v396_v6 }
  0x8d   :  { %v219_v44 = vadd.f32 %v218_v24, %v217_v36  ;;  %v400_v12 = vadd.f32 %v399_v2, %v398_v10  ;;  %v407_v24 = vsel %vm98_vm1, %v290_v13, 0.0 }
  0x8f   :  { %v221_v51 = vadd.f32 %v220_v32, %v219_v44  ;;  %v402_v17 = vadd.f32 %v401_v9, %v400_v12 }
  0x91   :  { %v223_v52 = vadd.f32 %v222_v39, %v221_v51  ;;  %v404_v29 = vadd.f32 %v403_v23, %v402_v17 }
  0x93   :  { %v225_v55 = vadd.f32 %v224_v47, %v223_v52  ;;  %v406_v22 = vadd.f32 %v405_v20, %v404_v29 }
  0x95   :  { %v226_v4 = vrot.slane %v225_v55, 4 }
  0x97   :  { %v227_v62 = vadd.f32 %v226_v4, %v225_v55 }
  0x99   :  { %v228_v1 = vrot.slane %v227_v62, 2 }
  0x9b   :  { %v229_v14 = vadd.f32 %v228_v1, %v227_v62 }
  0x9d   :  { %v230_v11 = vrot.slane %v229_v14, 1 }
  0x9f   :  { %v231_v16 = vadd.f32 %v230_v11, %v229_v14 }
  0xa1   :  { %v232_v19 = vadd.f32 %v231_v16, %v97_v21 }
  0xa3   :  { %234 = vst.msk [vmem:[#allocation5] sm:$0x1] %vm30_vm0, %v232_v19 }
  0xa4   :  { %503 = shalt.err (!%p500_p12)
}
  0xa5   :  { %s504_s28 = scalar_lea.hbm %s1022_s1, 16 }
  0xa6   :  { %p505_p13 = scmp.ne.s32.totalorder %s1022_s1, %s504_s28  ;;  %p508_p0 = scmp.lt.u32.totalorder %s504_s28, %s1022_s1 }
  0xa8   :  { %p510_p1 = pnand %p508_p0, %p505_p13 }
  0xaa   :  { %513 = shalt.err (!%p510_p1)
}
  0xab   :  { %444 = dma.vmem_to_hbm [thread:$0]  %s442_s23, 16, %s1022_s1, [#allocation4]   ;;  %v408_v25 = vadd.f32 %v407_v24, %v406_v22  ;;  %v294_v28 = vmul.f32 %v903_v34, %v903_v34  ;;  %v411_v31 = vsel %vm98_vm1, %v292_v30, 0.0  ;;  %v295_v38 = vmul.f32 %v910_v37, %v910_v37  ;;  %v235_v57 = vld [vmem:[#allocation6] sm:$0x1] }
  0xac   :  { %v413_v32 = vsel %vm98_vm1, %v293_v26, 0.0  ;;  %v296_v35 = vmul.f32 %v917_v40, %v917_v40  ;;  %v297_v39 = vmul.f32 %v924_v43, %v924_v43  ;;  %v298_v42 = vmul.f32 %v931_v46, %v931_v46  ;;  %s547_s1 = smov [#allocation6]  }
  0xad   :  { %v410_v36 = vadd.f32 %v409_v27, %v408_v25  ;;  %v415_v44 = vsel %vm98_vm1, %v294_v28, 0.0  ;;  %v417_v34 = vsel %vm98_vm1, %v295_v38, 0.0  ;;  %v299_v53 = vmul.f32 %v938_v49, %v938_v49  ;;  %s451_s7 = sshll.u32 %s547_s1, 4  ;;  %s452_s7 = int_to_ptr.vmem [resolvable:$true] %s451_s7 }
  0xae   :  { %v419_v37 = vsel %vm98_vm1, %v296_v35, 0.0  ;;  %v421_v40 = vsel %vm98_vm1, %v297_v39, 0.0  ;;  %v423_v48 = vsel %vm98_vm1, %v298_v42, 0.0  ;;  %s514_s8 = scalar_lea.vmem %s452_s7, 16  ;;  %s518_s9 = scalar_lea.vmem %s452_s7, 32 }
  0xaf   :  { %v412_v33 = vadd.f32 %v411_v31, %v410_v36  ;;  %v425_v43 = vsel %vm98_vm1, %v299_v53, 0.0  ;;  %p515_p2 = scmp.ne.s32.totalorder %s452_s7, %s514_s8  ;;  %p519_p3 = scmp.lt.s32.totalorder %s452_s7, %s452_s7 }
  0xb0   :  { %p520_p4 = scmp.lt.s32.totalorder %s518_s9, %s514_s8 }
  0xb1   :  { %v414_v45 = vadd.f32 %v413_v32, %v412_v33 }
  0xb2   :  { %p521_p5 = por %p520_p4, %p519_p3 }
  0xb3   :  { %v416_v41 = vadd.f32 %v415_v44, %v414_v45 }
  0xb4   :  { %p522_p6 = pnand %p521_p5, %p515_p2 }
  0xb5   :  { %v418_v51 = vadd.f32 %v417_v34, %v416_v41 }
  0xb7   :  { %v420_v47 = vadd.f32 %v419_v37, %v418_v51 }
  0xb9   :  { %v422_v50 = vadd.f32 %v421_v40, %v420_v47 }
  0xbb   :  { %v424_v52 = vadd.f32 %v423_v48, %v422_v50 }
  0xbd   :  { %v426_v58 = vadd.f32 %v425_v43, %v424_v52 }
  0xbf   :  { %v427_v59 = vrot.slane %v426_v58, 4 }
  0xc1   :  { %v428_v54 = vadd.f32 %v427_v59, %v426_v58 }
  0xc3   :  { %v429_v55 = vrot.slane %v428_v54, 2 }
  0xc5   :  { %v430_v46 = vadd.f32 %v429_v55, %v428_v54 }
  0xc7   :  { %v431_v56 = vrot.slane %v430_v46, 1 }
  0xc9   :  { %v432_v0 = vadd.f32 %v431_v56, %v430_v46 }
  0xcb   :  { %v433_v49 = vadd.f32 %v432_v0, %v235_v57 }
  0xcd   :  { %434 = vst.msk [vmem:[#allocation6] sm:$0x1] %vm30_vm0, %v433_v49 }
  0xce   :  { %525 = shalt.err (!%p522_p6)
}
  0xcf   :  { %s526_s12 = scalar_lea.hbm %s1023_s2, 16 }
  0xd0   :  { %p527_p7 = scmp.ne.s32.totalorder %s1023_s2, %s526_s12  ;;  %p530_p8 = scmp.lt.u32.totalorder %s526_s12, %s1023_s2 }
  0xd2   :  { %p532_p9 = pnand %p530_p8, %p527_p7 }
  0xd4   :  { %535 = shalt.err (!%p532_p9)
}
  0xd5   :  { %454 = dma.vmem_to_hbm [thread:$0]  %s452_s7, 16, %s1023_s2, [#allocation7]  }
  0xd6   :  { %538 = dma.done.wait [#allocation4], 16  }
  0xd7   :  { %539 = vsyncadd [#allocation4], 4294967280 }
  0xd8   :  { %540 = dma.done.wait [#allocation7], 16  }
  0xd9   :  { %541 = vsyncadd [#allocation7], 4294967280 }
  0xda   :  { %461 = vsyncpa [#allocation3], 1 }
  0xdb   :  { %462 = vsyncpa [#allocation4], 1 }
  0xdc   :  { %463 = vsyncpa [#allocation7], 1 }

// kernel: preact_bottleneck.5
= control target key start
LH: loop header
LB: loop body
LE: loop exit
PB: predicated region body
PF: predicated region fallthrough
CT: control target
= control target key end

     0   :  { %13 = vsyncpa [#allocation3], 0  ;;  %s3473_s0 = inlined_call_operand.hbm [shape: f32[512,4], index: 0, kind: input, shape index: {}]   ;;  %s3474_s1 = inlined_call_operand.hbm [shape: f32[1,4], index: 1, kind: input, shape index: {}]   ;;  %s3475_s2 = inlined_call_operand.hbm [shape: f32[1,4], index: 2, kind: input, shape index: {}]   ;;  %s3476_s3 = inlined_call_operand.hbm [shape: bf16[4,128], index: 3, kind: input, shape index: {}]   ;;  %s3477_s4 = inlined_call_operand.hbm [shape: bf16[4,128], index: 4, kind: input, shape index: {}]   ;;  %s3478_s5 = inlined_call_operand.hbm [shape: f32[512,128], index: 5, kind: output, shape index: {0}]   ;;  %s3479_s6 = inlined_call_operand.hbm [shape: f32[1,128], index: 6, kind: output, shape index: {1}]   ;;  %s3480_s7 = inlined_call_operand.hbm [shape: f32[1,128], index: 7, kind: output, shape index: {2}]  }
   0x1   :  { %14 = vsyncpa [#allocation6], 0 }
   0x2   :  { %15 = vsyncpa [#allocation9], 0 }
   0x3   :  { %16 = vsyncpa [#allocation4], 0 }
   0x4   :  { %17 = vsyncpa [#allocation13], 0  ;;  %s2731_s24 = smov [#allocation5]   ;;  %s2732_s26 = smov [#allocation8]  }
   0x5   :  { %s36_s25 = sshll.u32 %s2731_s24, 4  ;;  %s56_s27 = sshll.u32 %s2732_s26, 4  ;;  %s37_s25 = int_to_ptr.vmem [resolvable:$true] %s36_s25  ;;  %s57_s27 = int_to_ptr.vmem [resolvable:$true] %s56_s27 }
   0x6   :  { %s2545_s30 = scalar_lea.hbm %s3474_s1, 16 }
   0x7   :  { %p2546_p0 = scmp.ne.s32.totalorder %s3474_s1, %s2545_s30  ;;  %p2549_p1 = scmp.lt.u32.totalorder %s2545_s30, %s3474_s1 }
   0x9   :  { %p2551_p2 = pnand %p2549_p1, %p2546_p0 }
   0xb   :  { %2554 = shalt.err (!%p2551_p2)
}
   0xc   :  { %s2555_s12 = scalar_lea.vmem %s37_s25, 16  ;;  %s2559_s13 = scalar_lea.vmem %s37_s25, 32 }
   0xd   :  { %p2556_p3 = scmp.ne.s32.totalorder %s37_s25, %s2555_s12  ;;  %p2560_p4 = scmp.lt.s32.totalorder %s37_s25, %s37_s25 }
   0xe   :  { %p2561_p5 = scmp.lt.s32.totalorder %s2559_s13, %s2555_s12 }
  0x10   :  { %p2562_p6 = por %p2561_p5, %p2560_p4 }
  0x12   :  { %p2563_p7 = pnand %p2562_p6, %p2556_p3 }
  0x14   :  { %2566 = shalt.err (!%p2563_p7)
}
  0x15   :  { %39 = dma.hbm_to_vmem [thread:$0]  %s3474_s1, 16, %s37_s25, [#allocation6]  }
  0x16   :  { %s2567_s18 = scalar_lea.hbm %s3476_s3, 32 }
  0x17   :  { %p2568_p8 = scmp.ne.s32.totalorder %s3476_s3, %s2567_s18  ;;  %p2571_p9 = scmp.lt.u32.totalorder %s2567_s18, %s3476_s3 }
  0x19   :  { %p2573_p10 = pnand %p2571_p9, %p2568_p8 }
  0x1b   :  { %2576 = shalt.err (!%p2573_p10)
}
  0x1c   :  { %s2577_s23 = scalar_lea.vmem %s57_s27, 32  ;;  %p2582_p12 = scmp.lt.s32.totalorder %s57_s27, %s57_s27 }
  0x1d   :  { %p2578_p11 = scmp.ne.s32.totalorder %s57_s27, %s2577_s23  ;;  %p2583_p13 = scmp.lt.s32.totalorder %s2577_s23, %s2577_s23 }
  0x1f   :  { %p2584_p0 = por %p2583_p13, %p2582_p12 }
  0x21   :  { %p2585_p1 = pnand %p2584_p0, %p2578_p11 }
  0x23   :  { %2588 = shalt.err (!%p2585_p1)
}
  0x24   :  { %59 = dma.hbm_to_vmem [thread:$0]  %s3476_s3, 32, %s57_s27, [#allocation9]  }
  0x25   :  { %s2733_s25 = smov [#allocation2]   ;;  %s2589_s30 = scalar_lea.hbm %s3473_s0, 8192 }
  0x26   :  { %s23_s26 = sshll.u32 %s2733_s25, 4  ;;  %p2590_p2 = scmp.ne.s32.totalorder %s3473_s0, %s2589_s30  ;;  %s24_s26 = int_to_ptr.vmem [resolvable:$true] %s23_s26 }
  0x27   :  { %p2593_p3 = scmp.lt.u32.totalorder %s2589_s30, %s3473_s0 }
  0x29   :  { %p2595_p4 = pnand %p2593_p3, %p2590_p2 }
  0x2b   :  { %2598 = shalt.err (!%p2595_p4)
}
  0x2c   :  { %s2599_s12 = scalar_lea.vmem %s24_s26, 8192  ;;  %p2604_p6 = scmp.lt.s32.totalorder %s24_s26, %s24_s26 }
  0x2d   :  { %p2600_p5 = scmp.ne.s32.totalorder %s24_s26, %s2599_s12  ;;  %p2605_p7 = scmp.lt.s32.totalorder %s2599_s12, %s2599_s12 }
  0x2f   :  { %p2606_p8 = por %p2605_p7, %p2604_p6 }
  0x31   :  { %p2607_p9 = pnand %p2606_p8, %p2600_p5 }
  0x33   :  { %2610 = shalt.err (!%p2607_p9)
}
  0x34   :  { %s2734_s3 = smov 128   ;;  %s2735_s27 = smov 8  }
  0x35   :  { %29 = dma.hbm_to_vmem [thread:$0]  %s3473_s0, 8192, %s24_s26, [#allocation3], %s2734_s3, %s2734_s3, %s2735_s27  }
  0x36   :  { %s2736_s15 = smov [#allocation7]   ;;  %s2737_s17 = smov [#allocation10]  }
  0x37   :  { %s46_s16 = sshll.u32 %s2736_s15, 4  ;;  %s66_s18 = sshll.u32 %s2737_s17, 4  ;;  %s47_s16 = int_to_ptr.vmem [resolvable:$true] %s46_s16  ;;  %s67_s18 = int_to_ptr.vmem [resolvable:$true] %s66_s18 }
  0x38   :  { %s2611_s21 = scalar_lea.hbm %s3475_s2, 16 }
  0x39   :  { %p2612_p10 = scmp.ne.s32.totalorder %s3475_s2, %s2611_s21  ;;  %p2615_p11 = scmp.lt.u32.totalorder %s2611_s21, %s3475_s2 }
  0x3b   :  { %p2617_p12 = pnand %p2615_p11, %p2612_p10 }
  0x3d   :  { %2620 = shalt.err (!%p2617_p12)
}
  0x3e   :  { %s2621_s0 = scalar_lea.vmem %s47_s16, 16  ;;  %s2625_s25 = scalar_lea.vmem %s47_s16, 32 }
  0x3f   :  { %p2622_p13 = scmp.ne.s32.totalorder %s47_s16, %s2621_s0  ;;  %p2626_p0 = scmp.lt.s32.totalorder %s47_s16, %s47_s16 }
  0x40   :  { %p2627_p1 = scmp.lt.s32.totalorder %s2625_s25, %s2621_s0 }
  0x42   :  { %p2628_p2 = por %p2627_p1, %p2626_p0 }
  0x44   :  { %p2629_p3 = pnand %p2628_p2, %p2622_p13 }
  0x46   :  { %2632 = shalt.err (!%p2629_p3)
}
  0x47   :  { %49 = dma.hbm_to_vmem [thread:$0]  %s3475_s2, 16, %s47_s16, [#allocation6]  }
  0x48   :  { %s2633_s8 = scalar_lea.hbm %s3477_s4, 32 }
  0x49   :  { %p2634_p4 = scmp.ne.s32.totalorder %s3477_s4, %s2633_s8  ;;  %p2637_p5 = scmp.lt.u32.totalorder %s2633_s8, %s3477_s4 }
  0x4b   :  { %p2639_p6 = pnand %p2637_p5, %p2634_p4 }
  0x4d   :  { %2642 = shalt.err (!%p2639_p6)
}
  0x4e   :  { %s2643_s13 = scalar_lea.vmem %s67_s18, 32  ;;  %p2648_p8 = scmp.lt.s32.totalorder %s67_s18, %s67_s18 }
  0x4f   :  { %p2644_p7 = scmp.ne.s32.totalorder %s67_s18, %s2643_s13  ;;  %p2649_p9 = scmp.lt.s32.totalorder %s2643_s13, %s2643_s13 }
  0x51   :  { %p2650_p10 = por %p2649_p9, %p2648_p8 }
  0x53   :  { %p2651_p11 = pnand %p2650_p10, %p2644_p7 }
  0x55   :  { %2654 = shalt.err (!%p2651_p11)
}
  0x56   :  { %69 = dma.hbm_to_vmem [thread:$0]  %s3477_s4, 32, %s67_s18, [#allocation9]  }
  0x57   :  { %2721 = dma.done.wait [#allocation3], 8192  }
  0x58   :  { %2722 = vsyncadd [#allocation3], 4294959104 }
  0x59   :  { %2723 = dma.done.wait [#allocation6], 32  }
  0x5a   :  { %2724 = vsyncadd [#allocation6], 4294967264 }
  0x5b   :  { %2725 = dma.done.wait [#allocation9], 64  }
  0x5c   :  { %2726 = vsyncadd [#allocation9], 4294967232  ;;  %vm653_vm0 = vcmask 1041408   ;;  %v362_v0 = vld [vmem:[#allocation8] sm:$0x3]  ;;  %v93_v2 = vld [vmem:[#allocation2 + $0x8] sm:$0xff] }
  0x5d   :  { %v92_v1 = vld [vmem:[#allocation2] sm:$0xff]  ;;  %2531 = vmatprep.subr.msk.bf16.mxu0 %vm653_vm0, %v362_v0  ;;  %v2847_v3 = vsel %vm653_vm0, %v362_v0, 0  ;;  %v94_v6 = vld [vmem:[#allocation2 + $0x10] sm:$0xff]  ;;  %2530 = vmatprep.subr.msk.bf16.mxu1 %vm653_vm0, %v362_v0  ;;  %v95_v9 = vld [vmem:[#allocation2 + $0x18] sm:$0xff]  ;;  %vm556_vm1 = vcmask 31744   ;;  %s2739_s4 = smov [#allocation11]  }
  0x5e   :  { %v2849_v4 = vld [vmem:[#allocation5] ss:$0 sm:$0xff]  ;;  %v2851_v5 = vld [vmem:[#allocation7] ss:$0 sm:$0xff]  ;;  %2269 = vmatpush3.bf16.msra.mxu0 %v2847_v3  ;;  %2203 = vmatpush3.bf16.msra.mxu1 %v2847_v3  ;;  %v363_v11 = vld [vmem:[#allocation10] sm:$0x3] }
  0x5f   :  { %v163_v7 = vmul.f32 %v2849_v4, %v92_v1  ;;  %v164_v8 = vmul.f32 %v2849_v4, %v93_v2  ;;  %v165_v10 = vmul.f32 %v2849_v4, %v94_v6  ;;  %v96_v12 = vld [vmem:[#allocation2 + $0x20] sm:$0xff]  ;;  %v166_v13 = vmul.f32 %v2849_v4, %v95_v9  ;;  %2532 = vmatprep.subr.msk.bf16.mxu1 %vm653_vm0, %v362_v0  ;;  %v97_v15 = vld [vmem:[#allocation2 + $0x28] sm:$0xff]  ;;  %v98_v17 = vld [vmem:[#allocation2 + $0x30] sm:$0xff]  ;;  %s1964_s15 = sshll.u32 %s2739_s4, 4  ;;  %s1965_s15 = int_to_ptr.vmem [resolvable:$true] %s1964_s15 }
  0x60   :  { %2533 = vmatprep.subr.msk.bf16.mxu0 %vm653_vm0, %v363_v11  ;;  %v1332_v14 = vsel %vm653_vm0, %v363_v11, 0  ;;  %v167_v16 = vmul.f32 %v2849_v4, %v96_v12  ;;  %v99_v18 = vld [vmem:[#allocation2 + $0x38] sm:$0xff]  ;;  %v168_v22 = vmul.f32 %v2849_v4, %v97_v15  ;;  %v169_v25 = vmul.f32 %v2849_v4, %v98_v17  ;;  %v100_v27 = vld [vmem:[#allocation2 + $0x40] sm:$0xff]  ;;  %v101_v28 = vld [vmem:[#allocation2 + $0x48] sm:$0xff]  ;;  %s2655_s16 = scalar_lea.vmem %s1965_s15, 8192  ;;  %p2660_p13 = scmp.lt.s32.totalorder %s1965_s15, %s1965_s15 }
  0x61   :  { %v234_v19 = vadd.f32 %v2851_v5, %v163_v7  ;;  %v235_v20 = vadd.f32 %v2851_v5, %v164_v8  ;;  %v236_v21 = vadd.f32 %v2851_v5, %v165_v10  ;;  %v237_v23 = vadd.f32 %v2851_v5, %v166_v13  ;;  %v102_v33 = vld [vmem:[#allocation2 + $0x50] sm:$0xff]  ;;  %v103_v62 = vld [vmem:[#allocation2 + $0x58] sm:$0xff]  ;;  %v104_v63 = vld [vmem:[#allocation2 + $0x60] sm:$0xff]  ;;  %p2656_p12 = scmp.ne.s32.totalorder %s1965_s15, %s2655_s16  ;;  %p2661_p0 = scmp.lt.s32.totalorder %s2655_s16, %s2655_s16 }
  0x62   :  { %v238_v24 = vadd.f32 %v2851_v5, %v167_v16  ;;  %v170_v26 = vmul.f32 %v2849_v4, %v99_v18  ;;  %v239_v32 = vadd.f32 %v2851_v5, %v168_v22  ;;  %v240_v36 = vadd.f32 %v2851_v5, %v169_v25  ;;  %v105_v7 = vld [vmem:[#allocation2 + $0x68] sm:$0xff]  ;;  %v106_v8 = vld [vmem:[#allocation2 + $0x70] sm:$0xff]  ;;  %v107_v13 = vld [vmem:[#allocation2 + $0x78] sm:$0xff] }
  0x63   :  { %v298_v29 = vmax.f32 %v234_v19, 0.0  ;;  %v299_v30 = vmax.f32 %v235_v20, 0.0  ;;  %v300_v31 = vmax.f32 %v236_v21, 0.0  ;;  %v301_v34 = vmax.f32 %v237_v23, 0.0  ;;  %v108_v22 = vld [vmem:[#allocation2 + $0x80] sm:$0xff]  ;;  %p2662_p1 = por %p2661_p0, %p2660_p13 }
  0x64   :  { %v302_v35 = vmax.f32 %v238_v24, 0.0  ;;  %v241_v37 = vadd.f32 %v2851_v5, %v170_v26  ;;  %v303_v39 = vmax.f32 %v239_v32, 0.0  ;;  %v171_v40 = vmul.f32 %v2849_v4, %v100_v27 }
  0x65   :  { %v2875_v38 = vpack.c.bf16 %v299_v30, %v298_v29  ;;  %v172_v41 = vmul.f32 %v2849_v4, %v101_v28  ;;  %v2879_v42 = vpack.c.bf16 %v301_v34, %v300_v31  ;;  %v304_v43 = vmax.f32 %v240_v36, 0.0  ;;  %v111_v36 = vld [vmem:[#allocation2 + $0x98] sm:$0xff]  ;;  %p2663_p2 = pnand %p2662_p1, %p2656_p12 }
  0x66   :  { %v305_v44 = vmax.f32 %v241_v37, 0.0  ;;  %v173_v45 = vmul.f32 %v2849_v4, %v102_v33  ;;  %v2886_v48 = vpack.c.bf16 %v303_v39, %v302_v35  ;;  %v242_v49 = vadd.f32 %v2851_v5, %v171_v40 }
  0x67   :  { %2270 = vmatprep.mubr.msk.bf16.mxu0 %vm556_vm1, %v2875_v38  ;;  %v396_v46 = vunpack.c.l.bf16 %v2875_v38  ;;  %v397_v47 = vunpack.c.h.bf16 %v2875_v38  ;;  %v398_v50 = vunpack.c.l.bf16 %v2879_v42  ;;  %v399_v51 = vunpack.c.h.bf16 %v2879_v42 }
  0x68   :  { %2271 = vmatmul.mubr.msk.bf16.vlgmr.msra.gmra.mrb[0].mxu0 %vm556_vm1, %v2879_v42  ;;  %v2893_v52 = vpack.c.bf16 %v305_v44, %v304_v43  ;;  %v243_v53 = vadd.f32 %v2851_v5, %v172_v41  ;;  %v400_v56 = vunpack.c.l.bf16 %v2886_v48  ;;  %v401_v57 = vunpack.c.h.bf16 %v2886_v48 }
  0x69   :  { %v460_v54 = vsub.f32 %v298_v29, %v396_v46  ;;  %v461_v55 = vsub.f32 %v299_v30, %v397_v47  ;;  %2335 = vmatpush3.bf16.msra.mxu0 %v1332_v14  ;;  %2274 = vmatprep.mubr.msk.bf16.mxu0 %vm556_vm1, %v2886_v48  ;;  %v462_v58 = vsub.f32 %v300_v31, %v398_v50  ;;  %v306_v6 = vmax.f32 %v242_v49, 0.0  ;;  %v109_v30 = vld [vmem:[#allocation2 + $0x88] sm:$0xff] }
  0x6a   :  { %v463_v59 = vsub.f32 %v301_v34, %v399_v51  ;;  %v402_v60 = vunpack.c.l.bf16 %v2893_v52  ;;  %v403_v61 = vunpack.c.h.bf16 %v2893_v52  ;;  %v464_v1 = vsub.f32 %v302_v35, %v400_v56  ;;  %v110_v35 = vld [vmem:[#allocation2 + $0x90] sm:$0xff] }
  0x6b   :  { %v524_v0 = vpack.c.bf16 %v461_v55, %v460_v54  ;;  %v465_v2 = vsub.f32 %v303_v39, %v401_v57  ;;  %v307_v12 = vmax.f32 %v243_v53, 0.0  ;;  %v174_v15 = vmul.f32 %v2849_v4, %v103_v62 }
  0x6c   :  { %v525_v9 = vpack.c.bf16 %v463_v59, %v462_v58  ;;  %v466_v10 = vsub.f32 %v304_v43, %v402_v60  ;;  %v467_v11 = vsub.f32 %v305_v44, %v403_v61  ;;  %v244_v16 = vadd.f32 %v2851_v5, %v173_v45 }
  0x6d   :  { %2204 = vmatprep.mubr.msk.bf16.mxu1 %vm556_vm1, %v524_v0  ;;  %v526_v14 = vpack.c.bf16 %v465_v2, %v464_v1  ;;  %v175_v17 = vmul.f32 %v2849_v4, %v104_v63  ;;  %v2907_v19 = vpack.c.bf16 %v307_v12, %v306_v6  ;;  %v176_v20 = vmul.f32 %v2849_v4, %v105_v7  ;;  %v112_v63 = vld [vmem:[#allocation2 + $0xa0] sm:$0xff]  ;;  %v113_v7 = vld [vmem:[#allocation2 + $0xa8] sm:$0xff] }
  0x6e   :  { %2205 = vmatmul.mubr.msk.bf16.vlgmr.msra.gmra.mrb[0].mxu1 %vm556_vm1, %v525_v9  ;;  %v527_v18 = vpack.c.bf16 %v467_v11, %v466_v10  ;;  %v177_v21 = vmul.f32 %v2849_v4, %v106_v8  ;;  %v245_v23 = vadd.f32 %v2851_v5, %v174_v15  ;;  %v308_v24 = vmax.f32 %v244_v16, 0.0  ;;  %v114_v8 = vld [vmem:[#allocation2 + $0xb0] sm:$0xff]  ;;  %v115_v9 = vld [vmem:[#allocation2 + $0xb8] sm:$0xff] }
  0x6f   :  { %2401 = vmatpush3.bf16.msra.mxu1 %v2847_v3  ;;  %2208 = vmatprep.mubr.msk.bf16.mxu1 %vm556_vm1, %v526_v14  ;;  %v246_v25 = vadd.f32 %v2851_v5, %v175_v17  ;;  %v178_v26 = vmul.f32 %v2849_v4, %v107_v13  ;;  %v404_v27 = vunpack.c.l.bf16 %v2907_v19  ;;  %v405_v28 = vunpack.c.h.bf16 %v2907_v19  ;;  %v116_v17 = vld [vmem:[#allocation2 + $0xc0] sm:$0xff] }
  0x70   :  { %2275 = vmatmul.mubr.msk.bf16.gmra.mrb[4].mxu0 %vm556_vm1, %v2893_v52  ;;  %v247_v29 = vadd.f32 %v2851_v5, %v176_v20  ;;  %v2922_v3 = vadd.f32 %v2851_v5, %v177_v21  ;;  %v309_v31 = vmax.f32 %v245_v23, 0.0  ;;  %v179_v34 = vmul.f32 %v2849_v4, %v108_v22 }
  0x71   :  { %2278 = vmatprep.mubr.msk.bf16.mxu0 %vm556_vm1, %v2907_v19  ;;  %v310_v32 = vmax.f32 %v246_v25, 0.0  ;;  %v249_v33 = vadd.f32 %v2851_v5, %v178_v26  ;;  %v468_v37 = vsub.f32 %v306_v6, %v404_v27  ;;  %v469_v39 = vsub.f32 %v307_v12, %v405_v28 }
  0x72   :  { %v311_v40 = vmax.f32 %v247_v29, 0.0  ;;  %v312_v41 = vmax.f32 %v2922_v3, 0.0  ;;  %v2929_v43 = vpack.c.bf16 %v309_v31, %v308_v24  ;;  %v180_v45 = vmul.f32 %v2849_v4, %v109_v30  ;;  %v117_v3 = vld [vmem:[#allocation2 + $0xc8] sm:$0xff] }
  0x73   :  { %v313_v44 = vmax.f32 %v249_v33, 0.0  ;;  %v250_v46 = vadd.f32 %v2851_v5, %v179_v34  ;;  %v528_v47 = vpack.c.bf16 %v469_v39, %v468_v37  ;;  %v181_v50 = vmul.f32 %v2849_v4, %v110_v35  ;;  %v118_v35 = vld [vmem:[#allocation2 + $0xd0] sm:$0xff] }
  0x74   :  { %v2933_v49 = vpack.c.bf16 %v311_v40, %v310_v32  ;;  %v182_v51 = vmul.f32 %v2849_v4, %v111_v36  ;;  %v406_v53 = vunpack.c.l.bf16 %v2929_v43  ;;  %v407_v54 = vunpack.c.h.bf16 %v2929_v43 }
  0x75   :  { %v2939_v55 = vpack.c.bf16 %v313_v44, %v312_v41  ;;  %v251_v56 = vadd.f32 %v2851_v5, %v180_v45  ;;  %v314_v59 = vmax.f32 %v250_v46, 0.0  ;;  %v252_v60 = vadd.f32 %v2851_v5, %v181_v50 }
  0x76   :  { %2209 = vmatmul.mubr.msk.bf16.gmra.mrb[4].mxu1 %vm556_vm1, %v527_v18  ;;  %v408_v57 = vunpack.c.l.bf16 %v2933_v49  ;;  %v409_v58 = vunpack.c.h.bf16 %v2933_v49  ;;  %v470_v61 = vsub.f32 %v308_v24, %v406_v53  ;;  %v471_v62 = vsub.f32 %v309_v31, %v407_v54 }
  0x77   :  { %2212 = vmatprep.mubr.msk.bf16.mxu1 %vm556_vm1, %v528_v47  ;;  %v315_v2 = vmax.f32 %v251_v56, 0.0  ;;  %v253_v6 = vadd.f32 %v2851_v5, %v182_v51  ;;  %v410_v10 = vunpack.c.l.bf16 %v2939_v55  ;;  %v411_v11 = vunpack.c.h.bf16 %v2939_v55 }
  0x78   :  { %2279 = vmatmul.mubr.msk.bf16.gmra.mrb[8].mxu0 %vm556_vm1, %v2929_v43  ;;  %v472_v0 = vsub.f32 %v310_v32, %v408_v57  ;;  %v473_v1 = vsub.f32 %v311_v40, %v409_v58  ;;  %v316_v12 = vmax.f32 %v252_v60, 0.0  ;;  %v529_v13 = vpack.c.bf16 %v471_v62, %v470_v61  ;;  %v119_v40 = vld [vmem:[#allocation2 + $0xd8] sm:$0xff]  ;;  %v121_v62 = vld [vmem:[#allocation2 + $0xe8] sm:$0xff] }
  0x79   :  { %2282 = vmatprep.mubr.msk.bf16.mxu0 %vm556_vm1, %v2933_v49  ;;  %v2954_v14 = vpack.c.bf16 %v315_v2, %v314_v59  ;;  %v317_v15 = vmax.f32 %v253_v6, 0.0  ;;  %v183_v16 = vmul.f32 %v2849_v4, %v112_v63  ;;  %v184_v20 = vmul.f32 %v2849_v4, %v113_v7 }
  0x7a   :  { %v530_v18 = vpack.c.bf16 %v473_v1, %v472_v0  ;;  %v185_v21 = vmul.f32 %v2849_v4, %v114_v8  ;;  %v186_v22 = vmul.f32 %v2849_v4, %v115_v9  ;;  %v187_v30 = vmul.f32 %v2849_v4, %v116_v17  ;;  %v123_v17 = vld [vmem:[#allocation2 + $0xf8] sm:$0xff] }
  0x7b   :  { %v2960_v23 = vpack.c.bf16 %v317_v15, %v316_v12  ;;  %v412_v24 = vunpack.c.l.bf16 %v2954_v14  ;;  %v413_v25 = vunpack.c.h.bf16 %v2954_v14  ;;  %v254_v26 = vadd.f32 %v2851_v5, %v183_v16  ;;  %v122_v16 = vld [vmem:[#allocation2 + $0xf0] sm:$0xff] }
  0x7c   :  { %v255_v27 = vadd.f32 %v2851_v5, %v184_v20  ;;  %v2967_v28 = vadd.f32 %v2851_v5, %v185_v21  ;;  %v2970_v29 = vadd.f32 %v2851_v5, %v186_v22  ;;  %v474_v31 = vsub.f32 %v312_v41, %v410_v10  ;;  %v125_v22 = vld [vmem:[#allocation2 + $0x108] sm:$0xff] }
  0x7d   :  { %v475_v32 = vsub.f32 %v313_v44, %v411_v11  ;;  %v476_v33 = vsub.f32 %v314_v59, %v412_v24  ;;  %v477_v34 = vsub.f32 %v315_v2, %v413_v25  ;;  %v414_v36 = vunpack.c.l.bf16 %v2960_v23  ;;  %v120_v44 = vld [vmem:[#allocation2 + $0xe0] sm:$0xff] }
  0x7e   :  { %2213 = vmatmul.mubr.msk.bf16.gmra.mrb[8].mxu1 %vm556_vm1, %v529_v13  ;;  %v318_v37 = vmax.f32 %v254_v26, 0.0  ;;  %v319_v39 = vmax.f32 %v255_v27, 0.0  ;;  %v415_v45 = vunpack.c.h.bf16 %v2960_v23  ;;  %v320_v46 = vmax.f32 %v2967_v28, 0.0 }
  0x7f   :  { %2216 = vmatprep.mubr.msk.bf16.mxu1 %vm556_vm1, %v530_v18  ;;  %v188_v41 = vmul.f32 %v2849_v4, %v117_v3  ;;  %v321_v50 = vmax.f32 %v2970_v29, 0.0  ;;  %v258_v51 = vadd.f32 %v2851_v5, %v187_v30  ;;  %v189_v53 = vmul.f32 %v2849_v4, %v118_v35  ;;  %v124_v18 = vld [vmem:[#allocation2 + $0x100] sm:$0xff] }
  0x80   :  { %2283 = vmatmul.mubr.msk.bf16.gmra.mrb[12].mxu0 %vm556_vm1, %v2939_v55  ;;  %v2983_v47 = vpack.c.bf16 %v319_v39, %v318_v37  ;;  %v531_v54 = vpack.c.bf16 %v475_v32, %v474_v31  ;;  %v532_v56 = vpack.c.bf16 %v477_v34, %v476_v33  ;;  %v190_v58 = vmul.f32 %v2849_v4, %v119_v40  ;;  %v127_v40 = vld [vmem:[#allocation2 + $0x118] sm:$0xff] }
  0x81   :  { %2286 = vmatprep.mubr.msk.bf16.mxu0 %vm556_vm1, %v2954_v14  ;;  %v259_v57 = vadd.f32 %v2851_v5, %v188_v41  ;;  %v478_v59 = vsub.f32 %v316_v12, %v414_v36  ;;  %v191_v63 = vmul.f32 %v2849_v4, %v120_v44  ;;  %v322_v0 = vmax.f32 %v258_v51, 0.0 }
  0x82   :  { %v416_v60 = vunpack.c.l.bf16 %v2983_v47  ;;  %v417_v61 = vunpack.c.h.bf16 %v2983_v47  ;;  %v2994_v2 = vadd.f32 %v2851_v5, %v189_v53  ;;  %v2997_v6 = vadd.f32 %v2851_v5, %v190_v58  ;;  %v128_v53 = vld [vmem:[#allocation2 + $0x120] sm:$0xff] }
  0x83   :  { %v323_v1 = vmax.f32 %v259_v57, 0.0  ;;  %v479_v7 = vsub.f32 %v317_v15, %v415_v45  ;;  %v2999_v8 = vpack.c.bf16 %v321_v50, %v320_v46  ;;  %v192_v12 = vmul.f32 %v2849_v4, %v121_v62 }
  0x84   :  { %v480_v9 = vsub.f32 %v318_v37, %v416_v60  ;;  %v481_v10 = vsub.f32 %v319_v39, %v417_v61  ;;  %v3007_v13 = vadd.f32 %v2851_v5, %v191_v63  ;;  %v324_v15 = vmax.f32 %v2994_v2, 0.0  ;;  %v126_v39 = vld [vmem:[#allocation2 + $0x110] sm:$0xff] }
  0x85   :  { %v3002_v11 = vpack.c.bf16 %v323_v1, %v322_v0  ;;  %v325_v20 = vmax.f32 %v2997_v6, 0.0  ;;  %v263_v21 = vadd.f32 %v2851_v5, %v192_v12  ;;  %v533_v24 = vpack.c.bf16 %v479_v7, %v478_v59 }
  0x86   :  { %2217 = vmatmul.mubr.msk.bf16.gmra.mrb[12].mxu1 %vm556_vm1, %v531_v54  ;;  %v534_v25 = vpack.c.bf16 %v481_v10, %v480_v9  ;;  %v418_v26 = vunpack.c.l.bf16 %v2999_v8  ;;  %v419_v27 = vunpack.c.h.bf16 %v2999_v8  ;;  %v193_v29 = vmul.f32 %v2849_v4, %v122_v16  ;;  %v129_v54 = vld [vmem:[#allocation2 + $0x128] sm:$0xff] }
  0x87   :  { %2220 = vmatprep.mubr.msk.bf16.mxu1 %vm556_vm1, %v532_v56  ;;  %v420_v28 = vunpack.c.l.bf16 %v3002_v11  ;;  %v194_v3 = vmul.f32 %v2849_v4, %v123_v17  ;;  %v195_v30 = vmul.f32 %v2849_v4, %v124_v18  ;;  %v421_v31 = vunpack.c.h.bf16 %v3002_v11 }
  0x88   :  { %2287 = vmatmul.mubr.msk.bf16.gmra.mrb[16].mxu0 %vm556_vm1, %v2960_v23  ;;  %v326_v32 = vmax.f32 %v3007_v13, 0.0  ;;  %v327_v33 = vmax.f32 %v263_v21, 0.0  ;;  %v196_v34 = vmul.f32 %v2849_v4, %v125_v22  ;;  %v3025_v35 = vpack.c.bf16 %v325_v20, %v324_v15 }
  0x89   :  { %2290 = vmatprep.mubr.msk.bf16.mxu0 %vm556_vm1, %v2983_v47  ;;  %v482_v36 = vsub.f32 %v320_v46, %v418_v26  ;;  %v483_v37 = vsub.f32 %v321_v50, %v419_v27  ;;  %v3029_v45 = vadd.f32 %v2851_v5, %v193_v29  ;;  %v3032_v41 = vadd.f32 %v2851_v5, %v194_v3  ;;  %v132_v3 = vld [vmem:[#allocation2 + $0x140] sm:$0xff] }
  0x8a   :  { %v3035_v44 = vadd.f32 %v2851_v5, %v195_v30  ;;  %v3038_v51 = vadd.f32 %v2851_v5, %v196_v34  ;;  %v484_v46 = vsub.f32 %v322_v0, %v420_v28  ;;  %v485_v50 = vsub.f32 %v323_v1, %v421_v31  ;;  %v133_v30 = vld [vmem:[#allocation2 + $0x148] sm:$0xff] }
  0x8b   :  { %v3041_v56 = vpack.c.bf16 %v327_v33, %v326_v32  ;;  %v422_v57 = vunpack.c.l.bf16 %v3025_v35  ;;  %v423_v58 = vunpack.c.h.bf16 %v3025_v35  ;;  %v197_v59 = vmul.f32 %v2849_v4, %v126_v39 }
  0x8c   :  { %v198_v60 = vmul.f32 %v2849_v4, %v127_v40  ;;  %v535_v61 = vpack.c.bf16 %v483_v37, %v482_v36  ;;  %v199_v62 = vmul.f32 %v2849_v4, %v128_v53  ;;  %v200_v63 = vmul.f32 %v2849_v4, %v129_v54 }
  0x8d   :  { %v328_v0 = vmax.f32 %v3029_v45, 0.0  ;;  %v329_v1 = vmax.f32 %v3032_v41, 0.0  ;;  %v330_v2 = vmax.f32 %v3035_v44, 0.0  ;;  %v331_v6 = vmax.f32 %v3038_v51, 0.0 }
  0x8e   :  { %2221 = vmatmul.mubr.msk.bf16.gmra.mrb[16].mxu1 %vm556_vm1, %v533_v24  ;;  %v536_v7 = vpack.c.bf16 %v485_v50, %v484_v46  ;;  %v424_v9 = vunpack.c.l.bf16 %v3041_v56  ;;  %v425_v10 = vunpack.c.h.bf16 %v3041_v56  ;;  %v486_v12 = vsub.f32 %v324_v15, %v422_v57  ;;  %v130_v15 = vld [vmem:[#allocation2 + $0x130] sm:$0xff]  ;;  %v135_v57 = vld [vmem:[#allocation2 + $0x158] sm:$0xff] }
  0x8f   :  { %2224 = vmatprep.mubr.msk.bf16.mxu1 %vm556_vm1, %v534_v25  ;;  %v487_v13 = vsub.f32 %v325_v20, %v423_v58  ;;  %v3060_v16 = vadd.f32 %v2851_v5, %v197_v59  ;;  %v3063_v17 = vadd.f32 %v2851_v5, %v198_v60  ;;  %v3066_v18 = vadd.f32 %v2851_v5, %v199_v62  ;;  %v131_v20 = vld [vmem:[#allocation2 + $0x138] sm:$0xff]  ;;  %v134_v50 = vld [vmem:[#allocation2 + $0x150] sm:$0xff] }
  0x90   :  { %2291 = vmatmul.mubr.msk.bf16.gmra.mrb[20].mxu0 %vm556_vm1, %v2999_v8  ;;  %v3069_v21 = vadd.f32 %v2851_v5, %v200_v63  ;;  %v3072_v22 = vpack.c.bf16 %v329_v1, %v328_v0  ;;  %v3074_v24 = vpack.c.bf16 %v331_v6, %v330_v2  ;;  %v488_v25 = vsub.f32 %v326_v32, %v424_v9 }
  0x91   :  { %2294 = vmatprep.mubr.msk.bf16.mxu0 %vm556_vm1, %v3002_v11  ;;  %v489_v26 = vsub.f32 %v327_v33, %v425_v10  ;;  %v537_v27 = vpack.c.bf16 %v487_v13, %v486_v12  ;;  %v332_v28 = vmax.f32 %v3060_v16, 0.0  ;;  %v333_v29 = vmax.f32 %v3063_v17, 0.0 }
  0x92   :  { %v334_v31 = vmax.f32 %v3066_v18, 0.0  ;;  %v335_v34 = vmax.f32 %v3069_v21, 0.0  ;;  %v201_v32 = vmul.f32 %v2849_v4, %v130_v15  ;;  %v202_v33 = vmul.f32 %v2849_v4, %v131_v20 }
  0x93   :  { %v426_v36 = vunpack.c.l.bf16 %v3072_v22  ;;  %v427_v37 = vunpack.c.h.bf16 %v3072_v22  ;;  %v428_v39 = vunpack.c.l.bf16 %v3074_v24  ;;  %v429_v40 = vunpack.c.h.bf16 %v3074_v24 }
  0x94   :  { %v538_v45 = vpack.c.bf16 %v489_v26, %v488_v25  ;;  %v203_v41 = vmul.f32 %v2849_v4, %v132_v3  ;;  %v204_v44 = vmul.f32 %v2849_v4, %v133_v30  ;;  %v3093_v51 = vpack.c.bf16 %v333_v29, %v332_v28 }
  0x95   :  { %v3095_v53 = vpack.c.bf16 %v335_v34, %v334_v31  ;;  %v3098_v54 = vadd.f32 %v2851_v5, %v201_v32  ;;  %v3101_v46 = vadd.f32 %v2851_v5, %v202_v33  ;;  %v490_v58 = vsub.f32 %v328_v0, %v426_v36  ;;  %v138_v36 = vld [vmem:[#allocation2 + $0x170] sm:$0xff] }
  0x96   :  { %2225 = vmatmul.mubr.msk.bf16.gmra.mrb[20].mxu1 %vm556_vm1, %v535_v61  ;;  %v491_v59 = vsub.f32 %v329_v1, %v427_v37  ;;  %v492_v60 = vsub.f32 %v330_v2, %v428_v39  ;;  %v493_v61 = vsub.f32 %v331_v6, %v429_v40  ;;  %v3106_v62 = vadd.f32 %v2851_v5, %v203_v41  ;;  %v136_v2 = vld [vmem:[#allocation2 + $0x160] sm:$0xff]  ;;  %v137_v6 = vld [vmem:[#allocation2 + $0x168] sm:$0xff]  ;;  %v139_v40 = vld [vmem:[#allocation2 + $0x178] sm:$0xff] }
  0x97   :  { %2228 = vmatprep.mubr.msk.bf16.mxu1 %vm556_vm1, %v536_v7  ;;  %v3109_v63 = vadd.f32 %v2851_v5, %v204_v44  ;;  %v430_v7 = vunpack.c.l.bf16 %v3093_v51  ;;  %v431_v9 = vunpack.c.h.bf16 %v3093_v51  ;;  %v205_v0 = vmul.f32 %v2849_v4, %v134_v50 }
  0x98   :  { %2295 = vmatmul.mubr.msk.bf16.gmra.mrb[24].mxu0 %vm556_vm1, %v3025_v35  ;;  %v206_v1 = vmul.f32 %v2849_v4, %v135_v57  ;;  %v432_v10 = vunpack.c.l.bf16 %v3095_v53  ;;  %v433_v12 = vunpack.c.h.bf16 %v3095_v53  ;;  %v336_v13 = vmax.f32 %v3098_v54, 0.0 }
  0x99   :  { %2298 = vmatprep.mubr.msk.bf16.mxu0 %vm556_vm1, %v3041_v56  ;;  %v337_v16 = vmax.f32 %v3101_v46, 0.0  ;;  %v539_v17 = vpack.c.bf16 %v491_v59, %v490_v58  ;;  %v540_v18 = vpack.c.bf16 %v493_v61, %v492_v60  ;;  %v338_v21 = vmax.f32 %v3106_v62, 0.0 }
  0x9a   :  { %v339_v15 = vmax.f32 %v3109_v63, 0.0  ;;  %v207_v20 = vmul.f32 %v2849_v4, %v136_v2  ;;  %v208_v25 = vmul.f32 %v2849_v4, %v137_v6  ;;  %v494_v26 = vsub.f32 %v332_v28, %v430_v7 }
  0x9b   :  { %v495_v3 = vsub.f32 %v333_v29, %v431_v9  ;;  %v496_v30 = vsub.f32 %v334_v31, %v432_v10  ;;  %v497_v32 = vsub.f32 %v335_v34, %v433_v12  ;;  %v3133_v33 = vpack.c.bf16 %v337_v16, %v336_v13  ;;  %v141_v29 = vld [vmem:[#allocation2 + $0x188] sm:$0xff]  ;;  %v142_v9 = vld [vmem:[#allocation2 + $0x190] sm:$0xff]  ;;  %v144_v12 = vld [vmem:[#allocation2 + $0x1a0] sm:$0xff] }
  0x9c   :  { %v3137_v37 = vpack.c.bf16 %v339_v15, %v338_v21  ;;  %v3140_v28 = vadd.f32 %v2851_v5, %v207_v20  ;;  %v3143_v39 = vadd.f32 %v2851_v5, %v208_v25  ;;  %v209_v50 = vmul.f32 %v2849_v4, %v138_v36 }
  0x9d   :  { %v541_v41 = vpack.c.bf16 %v495_v3, %v494_v26  ;;  %v542_v44 = vpack.c.bf16 %v497_v32, %v496_v30  ;;  %v434_v54 = vunpack.c.l.bf16 %v3133_v33  ;;  %v435_v46 = vunpack.c.h.bf16 %v3133_v33 }
  0x9e   :  { %2229 = vmatmul.mubr.msk.bf16.gmra.mrb[24].mxu1 %vm556_vm1, %v537_v27  ;;  %v3131_v27 = vadd.f32 %v2851_v5, %v206_v1  ;;  %v210_v57 = vmul.f32 %v2849_v4, %v139_v40  ;;  %v436_v59 = vunpack.c.l.bf16 %v3137_v37  ;;  %v437_v60 = vunpack.c.h.bf16 %v3137_v37 }
  0x9f   :  { %2232 = vmatprep.mubr.msk.bf16.mxu1 %vm556_vm1, %v538_v45  ;;  %v140_v45 = vld [vmem:[#allocation2 + $0x180] sm:$0xff]  ;;  %v342_v61 = vmax.f32 %v3140_v28, 0.0  ;;  %v498_v63 = vsub.f32 %v336_v13, %v434_v54  ;;  %v499_v7 = vsub.f32 %v337_v16, %v435_v46  ;;  %v3165_v1 = vadd.f32 %v2851_v5, %v209_v50 }
  0xa0   :  { %2299 = vmatmul.mubr.msk.bf16.gmra.mrb[28].mxu0 %vm556_vm1, %v3072_v22  ;;  %v341_v34 = vmax.f32 %v3131_v27, 0.0  ;;  %v211_v58 = vmul.f32 %v2849_v4, %v140_v45  ;;  %v3168_v2 = vadd.f32 %v2851_v5, %v210_v57  ;;  %v500_v13 = vsub.f32 %v338_v21, %v436_v59 }
  0xa1   :  { %2336 = vmatprep.mubr.msk.bf16.mxu0 %vm556_vm1, %v2875_v38  ;;  %v3128_v38 = vadd.f32 %v2851_v5, %v205_v0  ;;  %v143_v0 = vld [vmem:[#allocation2 + $0x198] sm:$0xff]  ;;  %v501_v16 = vsub.f32 %v339_v15, %v437_v60  ;;  %v213_v26 = vmul.f32 %v2849_v4, %v142_v9  ;;  %v543_v27 = vpack.c.bf16 %v499_v7, %v498_v63  ;;  %v148_v60 = vld [vmem:[#allocation2 + $0x1c0] sm:$0xff]  ;;  %v149_v63 = vld [vmem:[#allocation2 + $0x1c8] sm:$0xff] }
  0xa2   :  { %v3171_v6 = vadd.f32 %v2851_v5, %v211_v58  ;;  %v215_v21 = vmul.f32 %v2849_v4, %v144_v12  ;;  %v344_v3 = vmax.f32 %v3165_v1, 0.0 }
  0xa3   :  { %v340_v31 = vmax.f32 %v3128_v38, 0.0  ;;  %v214_v38 = vmul.f32 %v2849_v4, %v143_v0  ;;  %v544_v36 = vpack.c.bf16 %v501_v16, %v500_v13 }
  0xa4   :  { %v346_v30 = vmax.f32 %v3171_v6, 0.0 }
  0xa5   :  { %v3161_v62 = vpack.c.bf16 %v341_v34, %v340_v31 }
  0xa6   :  { %2233 = vmatmul.mubr.msk.bf16.gmra.mrb[28].mxu1 %vm556_vm1, %v539_v17  ;;  %v145_v17 = vld [vmem:[#allocation2 + $0x1a8] sm:$0xff] }
  0xa7   :  { %2236 = vmatprep.mubr.msk.bf16.mxu1 %vm556_vm1, %v540_v18  ;;  %v438_v20 = vunpack.c.l.bf16 %v3161_v62  ;;  %v439_v25 = vunpack.c.h.bf16 %v3161_v62  ;;  %v216_v15 = vmul.f32 %v2849_v4, %v145_v17 }
  0xa8   :  { %2337 = vmatmul.mubr.msk.bf16.vlgmr.msra.gmra.mrb[0].mxu0 %vm556_vm1, %v2879_v42  ;;  %v212_v42 = vmul.f32 %v2849_v4, %v141_v29  ;;  %v3199_v29 = vadd.f32 %v2851_v5, %v214_v38 }
  0xa9   :  { %2340 = vmatprep.mubr.msk.bf16.mxu0 %vm556_vm1, %v2886_v48  ;;  %v343_v48 = vmax.f32 %v3143_v39, 0.0  ;;  %v502_v40 = vsub.f32 %v340_v31, %v438_v20  ;;  %v503_v45 = vsub.f32 %v341_v34, %v439_v25  ;;  %v146_v31 = vld [vmem:[#allocation2 + $0x1b0] sm:$0xff]  ;;  %v147_v34 = vld [vmem:[#allocation2 + $0x1b8] sm:$0xff] }
  0xaa   :  { %v3174_v10 = vadd.f32 %v2851_v5, %v212_v42  ;;  %v349_v59 = vmax.f32 %v3199_v29, 0.0 }
  0xab   :  { %v3177_v18 = vpack.c.bf16 %v343_v48, %v342_v61  ;;  %v545_v58 = vpack.c.bf16 %v503_v45, %v502_v40  ;;  %v152_v40 = vld [vmem:[#allocation2 + $0x1e0] sm:$0xff] }
  0xac   :  { %v347_v32 = vmax.f32 %v3174_v10, 0.0  ;;  %v219_v10 = vmul.f32 %v2849_v4, %v148_v60 }
  0xad   :  { %v440_v28 = vunpack.c.l.bf16 %v3177_v18  ;;  %v441_v39 = vunpack.c.h.bf16 %v3177_v18 }
  0xae   :  { %2237 = vmatmul.mubr.msk.bf16.gmra.mrb[32].mxu1 %vm556_vm1, %v541_v41  ;;  %v3202_v41 = vadd.f32 %v2851_v5, %v215_v21  ;;  %v3210_v46 = vpack.c.bf16 %v347_v32, %v346_v30 }
  0xaf   :  { %2240 = vmatprep.mubr.msk.bf16.mxu1 %vm556_vm1, %v542_v44  ;;  %v3205_v44 = vadd.f32 %v2851_v5, %v216_v15  ;;  %v504_v50 = vsub.f32 %v342_v61, %v440_v28  ;;  %v505_v57 = vsub.f32 %v343_v48, %v441_v39  ;;  %v217_v61 = vmul.f32 %v2849_v4, %v146_v31  ;;  %v150_v15 = vld [vmem:[#allocation2 + $0x1d0] sm:$0xff] }
  0xb0   :  { %2341 = vmatmul.mubr.msk.bf16.gmra.mrb[4].mxu0 %vm556_vm1, %v2893_v52  ;;  %v345_v52 = vmax.f32 %v3168_v2, 0.0  ;;  %v350_v7 = vmax.f32 %v3202_v41, 0.0  ;;  %v218_v48 = vmul.f32 %v2849_v4, %v147_v34  ;;  %v444_v1 = vunpack.c.l.bf16 %v3210_v46 }
  0xb1   :  { %2344 = vmatprep.mubr.msk.bf16.mxu0 %vm556_vm1, %v2907_v19  ;;  %v3196_v19 = vadd.f32 %v2851_v5, %v213_v26  ;;  %v351_v9 = vmax.f32 %v3205_v44, 0.0  ;;  %v445_v2 = vunpack.c.h.bf16 %v3210_v46  ;;  %v546_v6 = vpack.c.bf16 %v505_v57, %v504_v50 }
  0xb2   :  { %v3208_v54 = vpack.c.bf16 %v345_v52, %v344_v3  ;;  %v288_v13 = vadd.f32 %v2851_v5, %v217_v61  ;;  %v289_v16 = vadd.f32 %v2851_v5, %v218_v48  ;;  %v508_v26 = vsub.f32 %v346_v30, %v444_v1 }
  0xb3   :  { %v348_v42 = vmax.f32 %v3196_v19, 0.0  ;;  %v3231_v17 = vpack.c.bf16 %v351_v9, %v350_v7  ;;  %v509_v38 = vsub.f32 %v347_v32, %v445_v2  ;;  %v221_v41 = vmul.f32 %v2849_v4, %v150_v15 }
  0xb4   :  { %v443_v0 = vunpack.c.h.bf16 %v3208_v54  ;;  %v352_v32 = vmax.f32 %v288_v13, 0.0  ;;  %v353_v45 = vmax.f32 %v289_v16, 0.0  ;;  %v223_v34 = vmul.f32 %v2849_v4, %v152_v40 }
  0xb5   :  { %v3229_v12 = vpack.c.bf16 %v349_v59, %v348_v42  ;;  %v449_v30 = vunpack.c.h.bf16 %v3231_v17  ;;  %v548_v29 = vpack.c.bf16 %v509_v38, %v508_v26  ;;  %v292_v61 = vadd.f32 %v2851_v5, %v221_v41 }
  0xb6   :  { %2241 = vmatmul.mubr.msk.bf16.gmra.mrb[36].mxu1 %vm556_vm1, %v543_v27  ;;  %v507_v25 = vsub.f32 %v345_v52, %v443_v0  ;;  %v290_v27 = vadd.f32 %v2851_v5, %v219_v10  ;;  %v448_v52 = vunpack.c.l.bf16 %v3231_v17  ;;  %v294_v0 = vadd.f32 %v2851_v5, %v223_v34 }
  0xb7   :  { %2244 = vmatprep.mubr.msk.bf16.mxu1 %vm556_vm1, %v544_v36  ;;  %v151_v36 = vld [vmem:[#allocation2 + $0x1d8] sm:$0xff]  ;;  %v446_v28 = vunpack.c.l.bf16 %v3229_v12  ;;  %v447_v39 = vunpack.c.h.bf16 %v3229_v12  ;;  %v513_v60 = vsub.f32 %v351_v9, %v449_v30  ;;  %v356_v10 = vmax.f32 %v292_v61, 0.0 }
  0xb8   :  { %2345 = vmatmul.mubr.msk.bf16.gmra.mrb[8].mxu0 %vm556_vm1, %v2929_v43  ;;  %v442_v43 = vunpack.c.l.bf16 %v3208_v54  ;;  %v354_v44 = vmax.f32 %v290_v27, 0.0 }
  0xb9   :  { %2348 = vmatprep.mubr.msk.bf16.mxu0 %vm556_vm1, %v2933_v49  ;;  %v220_v49 = vmul.f32 %v2849_v4, %v149_v63  ;;  %v510_v57 = vsub.f32 %v348_v42, %v446_v28  ;;  %v3251_v63 = vpack.c.bf16 %v353_v45, %v352_v32  ;;  %v154_v42 = vld [vmem:[#allocation2 + $0x1f0] sm:$0xff] }
  0xba   :  { %v506_v20 = vsub.f32 %v344_v3, %v442_v43  ;;  %v153_v3 = vld [vmem:[#allocation2 + $0x1e8] sm:$0xff]  ;;  %v225_v13 = vmul.f32 %v2849_v4, %v154_v42 }
  0xbb   :  { %v291_v21 = vadd.f32 %v2851_v5, %v220_v49  ;;  %v224_v50 = vmul.f32 %v2849_v4, %v153_v3  ;;  %v450_v2 = vunpack.c.l.bf16 %v3251_v63 }
  0xbc   :  { %v547_v19 = vpack.c.bf16 %v507_v25, %v506_v20 }
  0xbd   :  { %v355_v31 = vmax.f32 %v291_v21, 0.0  ;;  %v295_v1 = vadd.f32 %v2851_v5, %v224_v50  ;;  %v514_v38 = vsub.f32 %v352_v32, %v450_v2  ;;  %v296_v21 = vadd.f32 %v2851_v5, %v225_v13 }
  0xbe   :  { %2245 = vmatmul.mubr.msk.bf16.gmra.mrb[40].mxu1 %vm556_vm1, %v545_v58  ;;  %v512_v58 = vsub.f32 %v350_v7, %v448_v52 }
  0xbf   :  { %2248 = vmatprep.mubr.msk.bf16.mxu1 %vm556_vm1, %v546_v6  ;;  %v3257_v43 = vpack.c.bf16 %v355_v31, %v354_v44  ;;  %v451_v6 = vunpack.c.h.bf16 %v3251_v63  ;;  %v359_v26 = vmax.f32 %v295_v1, 0.0  ;;  %v360_v52 = vmax.f32 %v296_v21, 0.0 }
  0xc0   :  { %2349 = vmatmul.mubr.msk.bf16.gmra.mrb[12].mxu0 %vm556_vm1, %v2939_v55  ;;  %v222_v55 = vmul.f32 %v2849_v4, %v151_v36  ;;  %v550_v9 = vpack.c.bf16 %v513_v60, %v512_v58 }
  0xc1   :  { %2352 = vmatprep.mubr.msk.bf16.mxu0 %vm556_vm1, %v2954_v14  ;;  %v511_v14 = vsub.f32 %v349_v59, %v447_v39  ;;  %v155_v59 = vld [vmem:[#allocation2 + $0x1f8] sm:$0xff]  ;;  %v452_v20 = vunpack.c.l.bf16 %v3257_v43  ;;  %v453_v25 = vunpack.c.h.bf16 %v3257_v43  ;;  %v515_v27 = vsub.f32 %v353_v45, %v451_v6 }
  0xc2   :  { %v293_v48 = vadd.f32 %v2851_v5, %v222_v55  ;;  %v226_v16 = vmul.f32 %v2849_v4, %v155_v59 }
  0xc3   :  { %v549_v7 = vpack.c.bf16 %v511_v14, %v510_v57  ;;  %v516_v36 = vsub.f32 %v354_v44, %v452_v20  ;;  %v517_v4 = vsub.f32 %v355_v31, %v453_v25  ;;  %v551_v39 = vpack.c.bf16 %v515_v27, %v514_v38 }
  0xc4   :  { %v357_v49 = vmax.f32 %v293_v48, 0.0  ;;  %v297_v15 = vadd.f32 %v2851_v5, %v226_v16 }
  0xc5   :  { %v552_v32 = vpack.c.bf16 %v517_v4, %v516_v36 }
  0xc6   :  { %2249 = vmatmul.mubr.msk.bf16.gmra.mrb[44].mxu1 %vm556_vm1, %v547_v19  ;;  %v361_v30 = vmax.f32 %v297_v15, 0.0 }
  0xc7   :  { %2252 = vmatprep.mubr.msk.bf16.mxu1 %vm556_vm1, %v548_v29 }
  0xc8   :  { %2353 = vmatmul.mubr.msk.bf16.gmra.mrb[16].mxu0 %vm556_vm1, %v2960_v23  ;;  %v358_v23 = vmax.f32 %v294_v0, 0.0  ;;  %v395_v41 = vpack.c.bf16 %v361_v30, %v360_v52 }
  0xc9   :  { %2356 = vmatprep.mubr.msk.bf16.mxu0 %vm556_vm1, %v2983_v47  ;;  %v3272_v47 = vpack.c.bf16 %v357_v49, %v356_v10 }
  0xca   :  { %v394_v28 = vpack.c.bf16 %v359_v26, %v358_v23  ;;  %v458_v44 = vunpack.c.l.bf16 %v395_v41  ;;  %v459_v31 = vunpack.c.h.bf16 %v395_v41 }
  0xcb   :  { %v454_v40 = vunpack.c.l.bf16 %v3272_v47  ;;  %v455_v3 = vunpack.c.h.bf16 %v3272_v47 }
  0xcc   :  { %v456_v5 = vunpack.c.l.bf16 %v394_v28  ;;  %v457_v45 = vunpack.c.h.bf16 %v394_v28  ;;  %v522_v50 = vsub.f32 %v360_v52, %v458_v44  ;;  %v523_v57 = vsub.f32 %v361_v30, %v459_v31 }
  0xcd   :  { %v518_v19 = vsub.f32 %v356_v10, %v454_v40  ;;  %v519_v29 = vsub.f32 %v357_v49, %v455_v3 }
  0xce   :  { %2253 = vmatmul.mubr.msk.bf16.gmra.mrb[48].mxu1 %vm556_vm1, %v549_v7  ;;  %v521_v55 = vsub.f32 %v359_v26, %v457_v45 }
  0xcf   :  { %2256 = vmatprep.mubr.msk.bf16.mxu1 %vm556_vm1, %v550_v9 }
  0xd0   :  { %2357 = vmatmul.mubr.msk.bf16.gmra.mrb[20].mxu0 %vm556_vm1, %v2999_v8  ;;  %v520_v8 = vsub.f32 %v358_v23, %v456_v5 }
  0xd1   :  { %2360 = vmatprep.mubr.msk.bf16.mxu0 %vm556_vm1, %v3002_v11  ;;  %v553_v11 = vpack.c.bf16 %v519_v29, %v518_v19 }
  0xd2   :  { %v554_v34 = vpack.c.bf16 %v521_v55, %v520_v8 }
  0xd6   :  { %2257 = vmatmul.mubr.msk.bf16.gmra.mrb[52].mxu1 %vm556_vm1, %v551_v39 }
  0xd7   :  { %2260 = vmatprep.mubr.msk.bf16.mxu1 %vm556_vm1, %v552_v32 }
  0xd8   :  { %2361 = vmatmul.mubr.msk.bf16.gmra.mrb[24].mxu0 %vm556_vm1, %v3025_v35  ;;  %v555_v35 = vpack.c.bf16 %v523_v57, %v522_v50 }
  0xd9   :  { %2364 = vmatprep.mubr.msk.bf16.mxu0 %vm556_vm1, %v3041_v56 }
  0xde   :  { %2261 = vmatmul.mubr.msk.bf16.gmra.mrb[56].mxu1 %vm556_vm1, %v553_v11 }
  0xdf   :  { %2264 = vmatprep.mubr.msk.bf16.mxu1 %vm556_vm1, %v554_v34 }
  0xe0   :  { %2365 = vmatmul.mubr.msk.bf16.gmra.mrb[28].mxu0 %vm556_vm1, %v3072_v22 }
  0xe1   :  { %2368 = vmatprep.mubr.msk.bf16.mxu0 %vm556_vm1, %v3074_v24 }
  0xe6   :  { %2265 = vmatmul.mubr.msk.bf16.gmra.mrb[60].mxu1 %vm556_vm1, %v555_v35  ;;  %v2738_v35 = vmov 0.0  }
  0xe7   :  { %2302 = vmatprep.mubr.msk.bf16.mxu1 %vm556_vm1, %v3074_v24  ;;  %90 = vst [vmem:[#allocation12] sm:$0x1] %v2738_v35  ;;  %91 = vst [vmem:[#allocation14] sm:$0x1] %v2738_v35 }
  0xe8   :  { %2369 = vmatmul.mubr.msk.bf16.gmra.mrb[32].mxu0 %vm556_vm1, %v3093_v51 }
  0xe9   :  { %2372 = vmatprep.mubr.msk.bf16.mxu0 %vm556_vm1, %v3095_v53 }
  0xee   :  { %2303 = vmatmul.mubr.msk.bf16.vlgmr.msra.gmra.mrb[32].mxu1 %vm556_vm1, %v3093_v51 }
  0xef   :  { %2306 = vmatprep.mubr.msk.bf16.mxu1 %vm556_vm1, %v3095_v53 }
  0xf0   :  { %2373 = vmatmul.mubr.msk.bf16.gmra.mrb[36].mxu0 %vm556_vm1, %v3133_v33 }
  0xf1   :  { %2376 = vmatprep.mubr.msk.bf16.mxu0 %vm556_vm1, %v3137_v37 }
  0xf6   :  { %2307 = vmatmul.mubr.msk.bf16.gmra.mrb[36].mxu1 %vm556_vm1, %v3133_v33 }
  0xf7   :  { %2310 = vmatprep.mubr.msk.bf16.mxu1 %vm556_vm1, %v3137_v37 }
  0xf8   :  { %2377 = vmatmul.mubr.msk.bf16.gmra.mrb[40].mxu0 %vm556_vm1, %v3161_v62 }
  0xf9   :  { %2380 = vmatprep.mubr.msk.bf16.mxu0 %vm556_vm1, %v3177_v18 }
  0xfe   :  { %2311 = vmatmul.mubr.msk.bf16.gmra.mrb[40].mxu1 %vm556_vm1, %v3161_v62 }
  0xff   :  { %2314 = vmatprep.mubr.msk.bf16.mxu1 %vm556_vm1, %v3177_v18 }
 0x100   :  { %2381 = vmatmul.mubr.msk.bf16.gmra.mrb[44].mxu0 %vm556_vm1, %v3208_v54 }
 0x101   :  { %2384 = vmatprep.mubr.msk.bf16.mxu0 %vm556_vm1, %v3210_v46 }
 0x106   :  { %2315 = vmatmul.mubr.msk.bf16.gmra.mrb[44].mxu1 %vm556_vm1, %v3208_v54 }
 0x107   :  { %2318 = vmatprep.mubr.msk.bf16.mxu1 %vm556_vm1, %v3210_v46 }
 0x108   :  { %2385 = vmatmul.mubr.msk.bf16.gmra.mrb[48].mxu0 %vm556_vm1, %v3229_v12 }
 0x109   :  { %2388 = vmatprep.mubr.msk.bf16.mxu0 %vm556_vm1, %v3231_v17 }
 0x10e   :  { %2319 = vmatmul.mubr.msk.bf16.gmra.mrb[48].mxu1 %vm556_vm1, %v3229_v12 }
 0x10f   :  { %2322 = vmatprep.mubr.msk.bf16.mxu1 %vm556_vm1, %v3231_v17 }
 0x110   :  { %2389 = vmatmul.mubr.msk.bf16.gmra.mrb[52].mxu0 %vm556_vm1, %v3251_v63 }
 0x111   :  { %2392 = vmatprep.mubr.msk.bf16.mxu0 %vm556_vm1, %v3257_v43 }
 0x116   :  { %2323 = vmatmul.mubr.msk.bf16.gmra.mrb[52].mxu1 %vm556_vm1, %v3251_v63 }
 0x117   :  { %2326 = vmatprep.mubr.msk.bf16.mxu1 %vm556_vm1, %v3257_v43 }
 0x118   :  { %2393 = vmatmul.mubr.msk.bf16.gmra.mrb[56].mxu0 %vm556_vm1, %v3272_v47 }
 0x119   :  { %2396 = vmatprep.mubr.msk.bf16.mxu0 %vm556_vm1, %v394_v28 }
 0x11e   :  { %2327 = vmatmul.mubr.msk.bf16.gmra.mrb[56].mxu1 %vm556_vm1, %v3272_v47 }
 0x11f   :  { %2330 = vmatprep.mubr.msk.bf16.mxu1 %vm556_vm1, %v394_v28 }
 0x120   :  { %2397 = vmatmul.mubr.msk.bf16.gmra.mrb[60].mxu0 %vm556_vm1, %v395_v41 }
 0x126   :  { %2331 = vmatmul.mubr.msk.bf16.gmra.mrb[60].mxu1 %vm556_vm1, %v395_v41 }
 0x141   :  { %v2206_v56 = vpop.f32.mrb[0].mxu1 }
 0x142   :  { %v691_v22 = vpop.f32.mrb[1].mxu1 }
 0x143   :  { %v2207_v24 = vpop.f32.mrb[2].mxu1 }
 0x144   :  { %v694_v51 = vpop.f32.mrb[3].mxu1 }
 0x149   :  { %v2210_v53 = vpop.f32.mrb[4].mxu1 }
 0x14a   :  { %v707_v33 = vpop.f32.mrb[5].mxu1 }
 0x14b   :  { %v2211_v37 = vpop.f32.mrb[6].mxu1 }
 0x14c   :  { %v710_v62 = vpop.f32.mrb[7].mxu1 }
 0x151   :  { %v3354_v18 = vpop.f32.mrb[8].mxu1 }
 0x152   :  { %v3356_v54 = vpop.f32.mrb[9].mxu1 }
 0x153   :  { %v3358_v46 = vpop.f32.mrb[10].mxu1 }
 0x154   :  { %v3360_v12 = vpop.f32.mrb[11].mxu1 }
 0x159   :  { %v3362_v17 = vpop.f32.mrb[12].mxu1 }
 0x15a   :  { %v3364_v14 = vpop.f32.mrb[13].mxu1 }
 0x15b   :  { %v3366_v58 = vpop.f32.mrb[14].mxu1 }
 0x15c   :  { %v3368_v60 = vpop.f32.mrb[15].mxu1 }
 0x161   :  { %v3370_v63 = vpop.f32.mrb[16].mxu1 }
 0x162   :  { %v3372_v61 = vpop.f32.mrb[17].mxu1 }
 0x163   :  { %v3374_v48 = vpop.f32.mrb[18].mxu1 }
 0x164   :  { %v3376_v43 = vpop.f32.mrb[19].mxu1 }
 0x169   :  { %v3378_v0 = vpop.f32.mrb[20].mxu1 }
 0x16a   :  { %v3380_v1 = vpop.f32.mrb[21].mxu1 }
 0x16b   :  { %v3382_v42 = vpop.f32.mrb[22].mxu1 }
 0x16c   :  { %v3384_v59 = vpop.f32.mrb[23].mxu1 }
 0x171   :  { %v3386_v7 = vpop.f32.mrb[24].mxu1 }
 0x172   :  { %v3388_v9 = vpop.f32.mrb[25].mxu1 }
 0x173   :  { %v3390_v2 = vpop.f32.mrb[26].mxu1 }
 0x174   :  { %v3392_v6 = vpop.f32.mrb[27].mxu1 }
 0x179   :  { %v3394_v10 = vpop.f32.mrb[28].mxu1 }
 0x17a   :  { %v3396_v49 = vpop.f32.mrb[29].mxu1 }
 0x17b   :  { %v3398_v13 = vpop.f32.mrb[30].mxu1  ;;  %v2338_v16 = vpop.f32.mrb[0].mxu0 }
 0x17c   :  { %v2402_v20 = vadd.f32 %v2338_v16, %v2206_v56  ;;  %v3400_v25 = vpop.f32.mrb[31].mxu1  ;;  %v1368_v23 = vpop.f32.mrb[1].mxu0 }
 0x17d   :  { %v2403_v26 = vadd.f32 %v1368_v23, %v691_v22  ;;  %v2339_v38 = vpop.f32.mrb[2].mxu0 }
 0x17e   :  { %1689 = vst [vmem:[#allocation11 + $0x10] sm:$0xff] %v2402_v20  ;;  %v2404_v27 = vadd.f32 %v2339_v38, %v2207_v24  ;;  %v1371_v47 = vpop.f32.mrb[3].mxu0  ;;  %v1826_v28 = vmul.f32 %v2402_v20, %v2402_v20 }
 0x17f   :  { %1687 = vst [vmem:[#allocation11] sm:$0xff] %v2403_v26  ;;  %v2405_v21 = vadd.f32 %v1371_v47, %v694_v51  ;;  %v1824_v15 = vmul.f32 %v2403_v26, %v2403_v26 }
 0x180   :  { %1690 = vst [vmem:[#allocation11 + $0x18] sm:$0xff] %v2404_v27  ;;  %v1827_v32 = vmul.f32 %v2404_v27, %v2404_v27 }
 0x181   :  { %1688 = vst [vmem:[#allocation11 + $0x8] sm:$0xff] %v2405_v21  ;;  %v1752_v36 = vadd.f32 %v2405_v21, %v2403_v26  ;;  %v1825_v4 = vmul.f32 %v2405_v21, %v2405_v21 }
 0x183   :  { %v1753_v39 = vadd.f32 %v2402_v20, %v1752_v36  ;;  %v1888_v40 = vadd.f32 %v1825_v4, %v1824_v15  ;;  %v2342_v3 = vpop.f32.mrb[4].mxu0 }
 0x184   :  { %v2406_v52 = vadd.f32 %v2342_v3, %v2210_v53  ;;  %v1384_v30 = vpop.f32.mrb[5].mxu0 }
 0x185   :  { %v1889_v5 = vadd.f32 %v1888_v40, %v1826_v28  ;;  %v2407_v45 = vadd.f32 %v1384_v30, %v707_v33  ;;  %v1754_v19 = vadd.f32 %v2404_v27, %v1753_v39  ;;  %v2343_v29 = vpop.f32.mrb[6].mxu0 }
 0x186   :  { %1693 = vst [vmem:[#allocation11 + $0x30] sm:$0xff] %v2406_v52  ;;  %v2408_v41 = vadd.f32 %v2343_v29, %v2211_v37  ;;  %v1387_v8 = vpop.f32.mrb[7].mxu0  ;;  %v1830_v56 = vmul.f32 %v2406_v52, %v2406_v52 }
 0x187   :  { %1691 = vst [vmem:[#allocation11 + $0x20] sm:$0xff] %v2407_v45  ;;  %v1755_v55 = vadd.f32 %v2407_v45, %v1754_v19  ;;  %v1828_v11 = vmul.f32 %v2407_v45, %v2407_v45  ;;  %v1890_v44 = vadd.f32 %v1889_v5, %v1827_v32  ;;  %v2409_v31 = vadd.f32 %v1387_v8, %v710_v62 }
 0x188   :  { %1694 = vst [vmem:[#allocation11 + $0x38] sm:$0xff] %v2408_v41  ;;  %v1831_v37 = vmul.f32 %v2408_v41, %v2408_v41 }
 0x189   :  { %v1891_v34 = vadd.f32 %v1890_v44, %v1828_v11  ;;  %1692 = vst [vmem:[#allocation11 + $0x28] sm:$0xff] %v2409_v31  ;;  %v1756_v50 = vadd.f32 %v2409_v31, %v1755_v55  ;;  %v1829_v57 = vmul.f32 %v2409_v31, %v2409_v31 }
 0x18b   :  { %v1757_v22 = vadd.f32 %v2406_v52, %v1756_v50  ;;  %v1892_v24 = vadd.f32 %v1891_v34, %v1829_v57  ;;  %v2346_v51 = vpop.f32.mrb[8].mxu0 }
 0x18c   :  { %v2410_v53 = vadd.f32 %v2346_v51, %v3354_v18  ;;  %v1400_v33 = vpop.f32.mrb[9].mxu0 }
 0x18d   :  { %v1893_v16 = vadd.f32 %v1892_v24, %v1830_v56  ;;  %v2411_v20 = vadd.f32 %v1400_v33, %v3356_v54  ;;  %v1758_v62 = vadd.f32 %v2408_v41, %v1757_v22  ;;  %v2347_v23 = vpop.f32.mrb[10].mxu0 }
 0x18e   :  { %1697 = vst [vmem:[#allocation11 + $0x50] sm:$0xff] %v2410_v53  ;;  %v2412_v26 = vadd.f32 %v2347_v23, %v3358_v46  ;;  %v1403_v38 = vpop.f32.mrb[11].mxu0  ;;  %v1834_v28 = vmul.f32 %v2410_v53, %v2410_v53 }
 0x18f   :  { %1695 = vst [vmem:[#allocation11 + $0x40] sm:$0xff] %v2411_v20  ;;  %v1759_v27 = vadd.f32 %v2411_v20, %v1758_v62  ;;  %v1832_v47 = vmul.f32 %v2411_v20, %v2411_v20  ;;  %v1894_v21 = vadd.f32 %v1893_v16, %v1831_v37  ;;  %v2413_v15 = vadd.f32 %v1403_v38, %v3360_v12 }
 0x190   :  { %1698 = vst [vmem:[#allocation11 + $0x58] sm:$0xff] %v2412_v26  ;;  %v1835_v46 = vmul.f32 %v2412_v26, %v2412_v26 }
 0x191   :  { %v1895_v36 = vadd.f32 %v1894_v21, %v1832_v47  ;;  %1696 = vst [vmem:[#allocation11 + $0x48] sm:$0xff] %v2413_v15  ;;  %v1760_v18 = vadd.f32 %v2413_v15, %v1759_v27  ;;  %v1833_v4 = vmul.f32 %v2413_v15, %v2413_v15 }
 0x193   :  { %v1761_v39 = vadd.f32 %v2410_v53, %v1760_v18  ;;  %v1896_v54 = vadd.f32 %v1895_v36, %v1833_v4  ;;  %v2350_v40 = vpop.f32.mrb[12].mxu0 }
 0x194   :  { %v2414_v3 = vadd.f32 %v2350_v40, %v3362_v17  ;;  %v1416_v52 = vpop.f32.mrb[13].mxu0 }
 0x195   :  { %v1897_v30 = vadd.f32 %v1896_v54, %v1834_v28  ;;  %v2415_v32 = vadd.f32 %v1416_v52, %v3364_v14  ;;  %v1762_v5 = vadd.f32 %v2412_v26, %v1761_v39  ;;  %v2351_v45 = vpop.f32.mrb[14].mxu0 }
 0x196   :  { %1701 = vst [vmem:[#allocation11 + $0x70] sm:$0xff] %v2414_v3  ;;  %v2416_v12 = vadd.f32 %v2351_v45, %v3366_v58  ;;  %v1419_v19 = vpop.f32.mrb[15].mxu0  ;;  %v1838_v31 = vmul.f32 %v2414_v3, %v2414_v3 }
 0x197   :  { %1699 = vst [vmem:[#allocation11 + $0x60] sm:$0xff] %v2415_v32  ;;  %v1763_v29 = vadd.f32 %v2415_v32, %v1762_v5  ;;  %v1836_v41 = vmul.f32 %v2415_v32, %v2415_v32  ;;  %v1898_v8 = vadd.f32 %v1897_v30, %v1835_v46  ;;  %v2417_v55 = vadd.f32 %v1419_v19, %v3368_v60 }
 0x198   :  { %1702 = vst [vmem:[#allocation11 + $0x78] sm:$0xff] %v2416_v12  ;;  %v1839_v58 = vmul.f32 %v2416_v12, %v2416_v12 }
 0x199   :  { %v1899_v11 = vadd.f32 %v1898_v8, %v1836_v41  ;;  %1700 = vst [vmem:[#allocation11 + $0x68] sm:$0xff] %v2417_v55  ;;  %v1764_v17 = vadd.f32 %v2417_v55, %v1763_v29  ;;  %v1837_v44 = vmul.f32 %v2417_v55, %v2417_v55 }
 0x19b   :  { %v1765_v34 = vadd.f32 %v2414_v3, %v1764_v17  ;;  %v1900_v14 = vadd.f32 %v1899_v11, %v1837_v44  ;;  %v2354_v50 = vpop.f32.mrb[16].mxu0 }
 0x19c   :  { %v2418_v57 = vadd.f32 %v2354_v50, %v3370_v63  ;;  %v1432_v35 = vpop.f32.mrb[17].mxu0 }
 0x19d   :  { %v1901_v56 = vadd.f32 %v1900_v14, %v1838_v31  ;;  %v2419_v22 = vadd.f32 %v1432_v35, %v3372_v61  ;;  %v1766_v24 = vadd.f32 %v2416_v12, %v1765_v34  ;;  %v2355_v51 = vpop.f32.mrb[18].mxu0 }
 0x19e   :  { %1705 = vst [vmem:[#allocation11 + $0x90] sm:$0xff] %v2418_v57  ;;  %v2420_v60 = vadd.f32 %v2355_v51, %v3374_v48  ;;  %v1435_v53 = vpop.f32.mrb[19].mxu0  ;;  %v1842_v26 = vmul.f32 %v2418_v57, %v2418_v57 }
 0x19f   :  { %1703 = vst [vmem:[#allocation11 + $0x80] sm:$0xff] %v2419_v22  ;;  %v1767_v33 = vadd.f32 %v2419_v22, %v1766_v24  ;;  %v1840_v37 = vmul.f32 %v2419_v22, %v2419_v22  ;;  %v1902_v16 = vadd.f32 %v1901_v56, %v1839_v58  ;;  %v2421_v20 = vadd.f32 %v1435_v53, %v3376_v43 }
 0x1a0   :  { %1706 = vst [vmem:[#allocation11 + $0x98] sm:$0xff] %v2420_v60  ;;  %v1843_v48 = vmul.f32 %v2420_v60, %v2420_v60 }
 0x1a1   :  { %v1903_v62 = vadd.f32 %v1902_v16, %v1840_v37  ;;  %1704 = vst [vmem:[#allocation11 + $0x88] sm:$0xff] %v2421_v20  ;;  %v1768_v63 = vadd.f32 %v2421_v20, %v1767_v33  ;;  %v1841_v23 = vmul.f32 %v2421_v20, %v2421_v20 }
 0x1a3   :  { %v1769_v38 = vadd.f32 %v2418_v57, %v1768_v63  ;;  %v1904_v61 = vadd.f32 %v1903_v62, %v1841_v23  ;;  %v2358_v27 = vpop.f32.mrb[20].mxu0 }
 0x1a4   :  { %v2422_v47 = vadd.f32 %v2358_v27, %v3378_v0  ;;  %v1448_v21 = vpop.f32.mrb[21].mxu0 }
 0x1a5   :  { %v1905_v15 = vadd.f32 %v1904_v61, %v1842_v26  ;;  %v2423_v36 = vadd.f32 %v1448_v21, %v3380_v1  ;;  %v1770_v18 = vadd.f32 %v2420_v60, %v1769_v38  ;;  %v2359_v4 = vpop.f32.mrb[22].mxu0 }
 0x1a6   :  { %1709 = vst [vmem:[#allocation11 + $0xb0] sm:$0xff] %v2422_v47  ;;  %v2424_v43 = vadd.f32 %v2359_v4, %v3382_v42  ;;  %v1451_v28 = vpop.f32.mrb[23].mxu0  ;;  %v1846_v30 = vmul.f32 %v2422_v47, %v2422_v47 }
 0x1a7   :  { %1707 = vst [vmem:[#allocation11 + $0xa0] sm:$0xff] %v2423_v36  ;;  %v1771_v39 = vadd.f32 %v2423_v36, %v1770_v18  ;;  %v1844_v54 = vmul.f32 %v2423_v36, %v2423_v36  ;;  %v1906_v40 = vadd.f32 %v1905_v15, %v1843_v48  ;;  %v2425_v3 = vadd.f32 %v1451_v28, %v3384_v59 }
 0x1a8   :  { %1710 = vst [vmem:[#allocation11 + $0xb8] sm:$0xff] %v2424_v43  ;;  %v1847_v42 = vmul.f32 %v2424_v43, %v2424_v43 }
 0x1a9   :  { %v1907_v52 = vadd.f32 %v1906_v40, %v1844_v54  ;;  %1708 = vst [vmem:[#allocation11 + $0xa8] sm:$0xff] %v2425_v3  ;;  %v1772_v0 = vadd.f32 %v2425_v3, %v1771_v39  ;;  %v1845_v46 = vmul.f32 %v2425_v3, %v2425_v3 }
 0x1ab   :  { %v1773_v32 = vadd.f32 %v2422_v47, %v1772_v0  ;;  %v1908_v1 = vadd.f32 %v1907_v52, %v1845_v46  ;;  %v2362_v5 = vpop.f32.mrb[24].mxu0 }
 0x1ac   :  { %v2426_v45 = vadd.f32 %v2362_v5, %v3386_v7  ;;  %v1464_v12 = vpop.f32.mrb[25].mxu0 }
 0x1ad   :  { %v1909_v19 = vadd.f32 %v1908_v1, %v1846_v30  ;;  %v2427_v29 = vadd.f32 %v1464_v12, %v3388_v9  ;;  %v1774_v41 = vadd.f32 %v2424_v43, %v1773_v32  ;;  %v2363_v8 = vpop.f32.mrb[26].mxu0 }
 0x1ae   :  { %1713 = vst [vmem:[#allocation11 + $0xd0] sm:$0xff] %v2426_v45  ;;  %v2428_v59 = vadd.f32 %v2363_v8, %v3390_v2  ;;  %v1467_v55 = vpop.f32.mrb[27].mxu0  ;;  %v1850_v50 = vmul.f32 %v2426_v45, %v2426_v45 }
 0x1af   :  { %1711 = vst [vmem:[#allocation11 + $0xc0] sm:$0xff] %v2427_v29  ;;  %v1775_v11 = vadd.f32 %v2427_v29, %v1774_v41  ;;  %v1848_v17 = vmul.f32 %v2427_v29, %v2427_v29  ;;  %v1910_v44 = vadd.f32 %v1909_v19, %v1847_v42  ;;  %v2429_v31 = vadd.f32 %v1467_v55, %v3392_v6 }
 0x1b0   :  { %1714 = vst [vmem:[#allocation11 + $0xd8] sm:$0xff] %v2428_v59  ;;  %v1851_v2 = vmul.f32 %v2428_v59, %v2428_v59 }
 0x1b1   :  { %v1911_v34 = vadd.f32 %v1910_v44, %v1848_v17  ;;  %1712 = vst [vmem:[#allocation11 + $0xc8] sm:$0xff] %v2429_v31  ;;  %v1776_v7 = vadd.f32 %v2429_v31, %v1775_v11  ;;  %v1849_v14 = vmul.f32 %v2429_v31, %v2429_v31 }
 0x1b3   :  { %v1777_v57 = vadd.f32 %v2426_v45, %v1776_v7  ;;  %v1912_v9 = vadd.f32 %v1911_v34, %v1849_v14  ;;  %v2366_v35 = vpop.f32.mrb[28].mxu0 }
 0x1b4   :  { %v2430_v58 = vadd.f32 %v2366_v35, %v3394_v10  ;;  %v1480_v56 = vpop.f32.mrb[29].mxu0 }
 0x1b5   :  { %v1913_v22 = vadd.f32 %v1912_v9, %v1850_v50  ;;  %v2431_v24 = vadd.f32 %v1480_v56, %v3396_v49  ;;  %v1778_v51 = vadd.f32 %v2428_v59, %v1777_v57  ;;  %v2367_v60 = vpop.f32.mrb[30].mxu0 }
 0x1b6   :  { %1717 = vst [vmem:[#allocation11 + $0xf0] sm:$0xff] %v2430_v58  ;;  %v2432_v6 = vadd.f32 %v2367_v60, %v3398_v13  ;;  %v1483_v53 = vpop.f32.mrb[31].mxu0  ;;  %v1854_v23 = vmul.f32 %v2430_v58, %v2430_v58 }
 0x1b7   :  { %1715 = vst [vmem:[#allocation11 + $0xe0] sm:$0xff] %v2431_v24  ;;  %v1779_v33 = vadd.f32 %v2431_v24, %v1778_v51  ;;  %v1852_v37 = vmul.f32 %v2431_v24, %v2431_v24  ;;  %v1914_v16 = vadd.f32 %v1913_v22, %v1851_v2  ;;  %v2433_v20 = vadd.f32 %v1483_v53, %v3400_v25 }
 0x1b8   :  { %1718 = vst [vmem:[#allocation11 + $0xf8] sm:$0xff] %v2432_v6  ;;  %v1855_v27 = vmul.f32 %v2432_v6, %v2432_v6 }
 0x1b9   :  { %v1915_v62 = vadd.f32 %v1914_v16, %v1852_v37  ;;  %1716 = vst [vmem:[#allocation11 + $0xe8] sm:$0xff] %v2433_v20  ;;  %v1780_v10 = vadd.f32 %v2433_v20, %v1779_v33  ;;  %v1853_v63 = vmul.f32 %v2433_v20, %v2433_v20 }
 0x1bb   :  { %v1781_v26 = vadd.f32 %v2430_v58, %v1780_v10  ;;  %v1916_v49 = vadd.f32 %v1915_v62, %v1853_v63  ;;  %v2370_v38 = vpop.f32.mrb[32].mxu0 }
 0x1bc   :  { %v1496_v61 = vpop.f32.mrb[33].mxu0 }
 0x1bd   :  { %v1917_v47 = vadd.f32 %v1916_v49, %v1854_v23  ;;  %v2371_v13 = vpop.f32.mrb[34].mxu0  ;;  %v1782_v21 = vadd.f32 %v2432_v6, %v1781_v26 }
 0x1be   :  { %v1499_v48 = vpop.f32.mrb[35].mxu0 }
 0x1bf   :  { %v1918_v15 = vadd.f32 %v1917_v47, %v1855_v27 }
 0x1c1   :  { %v2304_v36 = vpop.f32.mrb[32].mxu1 }
 0x1c2   :  { %v2434_v18 = vadd.f32 %v2370_v38, %v2304_v36  ;;  %v1204_v4 = vpop.f32.mrb[33].mxu1 }
 0x1c3   :  { %v2435_v25 = vadd.f32 %v1496_v61, %v1204_v4  ;;  %v2305_v43 = vpop.f32.mrb[34].mxu1  ;;  %v2374_v28 = vpop.f32.mrb[36].mxu0 }
 0x1c4   :  { %1721 = vst [vmem:[#allocation11 + $0x110] sm:$0xff] %v2434_v18  ;;  %v2436_v39 = vadd.f32 %v2371_v13, %v2305_v43  ;;  %v1207_v54 = vpop.f32.mrb[35].mxu1  ;;  %v1512_v40 = vpop.f32.mrb[37].mxu0  ;;  %v1858_v45 = vmul.f32 %v2434_v18, %v2434_v18 }
 0x1c5   :  { %1719 = vst [vmem:[#allocation11 + $0x100] sm:$0xff] %v2435_v25  ;;  %v1783_v3 = vadd.f32 %v2435_v25, %v1782_v21  ;;  %v1856_v52 = vmul.f32 %v2435_v25, %v2435_v25  ;;  %v2437_v0 = vadd.f32 %v1499_v48, %v1207_v54  ;;  %v2375_v46 = vpop.f32.mrb[38].mxu0 }
 0x1c6   :  { %1722 = vst [vmem:[#allocation11 + $0x118] sm:$0xff] %v2436_v39  ;;  %v1515_v30 = vpop.f32.mrb[39].mxu0  ;;  %v1859_v8 = vmul.f32 %v2436_v39, %v2436_v39 }
 0x1c7   :  { %v1919_v32 = vadd.f32 %v1918_v15, %v1856_v52  ;;  %1720 = vst [vmem:[#allocation11 + $0x108] sm:$0xff] %v2437_v0  ;;  %v1784_v1 = vadd.f32 %v2437_v0, %v1783_v3  ;;  %v1857_v5 = vmul.f32 %v2437_v0, %v2437_v0 }
 0x1c9   :  { %v1785_v12 = vadd.f32 %v2434_v18, %v1784_v1  ;;  %v1920_v42 = vadd.f32 %v1919_v32, %v1857_v5  ;;  %v2308_v19 = vpop.f32.mrb[36].mxu1 }
 0x1ca   :  { %v2438_v29 = vadd.f32 %v2374_v28, %v2308_v19  ;;  %v1220_v41 = vpop.f32.mrb[37].mxu1 }
 0x1cb   :  { %v1921_v59 = vadd.f32 %v1920_v42, %v1858_v45  ;;  %v2439_v55 = vadd.f32 %v1512_v40, %v1220_v41  ;;  %v1786_v11 = vadd.f32 %v2436_v39, %v1785_v12  ;;  %v2309_v17 = vpop.f32.mrb[38].mxu1  ;;  %v2378_v44 = vpop.f32.mrb[40].mxu0 }
 0x1cc   :  { %1725 = vst [vmem:[#allocation11 + $0x130] sm:$0xff] %v2438_v29  ;;  %v2440_v31 = vadd.f32 %v2375_v46, %v2309_v17  ;;  %v1223_v34 = vpop.f32.mrb[39].mxu1  ;;  %v1528_v7 = vpop.f32.mrb[41].mxu0  ;;  %v1862_v24 = vmul.f32 %v2438_v29, %v2438_v29 }
 0x1cd   :  { %1723 = vst [vmem:[#allocation11 + $0x120] sm:$0xff] %v2439_v55  ;;  %v1787_v14 = vadd.f32 %v2439_v55, %v1786_v11  ;;  %v1860_v50 = vmul.f32 %v2439_v55, %v2439_v55  ;;  %v1922_v57 = vadd.f32 %v1921_v59, %v1859_v8  ;;  %v2441_v9 = vadd.f32 %v1515_v30, %v1223_v34  ;;  %v2379_v35 = vpop.f32.mrb[42].mxu0 }
 0x1ce   :  { %1726 = vst [vmem:[#allocation11 + $0x138] sm:$0xff] %v2440_v31  ;;  %v1531_v58 = vpop.f32.mrb[43].mxu0  ;;  %v1863_v37 = vmul.f32 %v2440_v31, %v2440_v31 }
 0x1cf   :  { %v1923_v56 = vadd.f32 %v1922_v57, %v1860_v50  ;;  %1724 = vst [vmem:[#allocation11 + $0x128] sm:$0xff] %v2441_v9  ;;  %v1788_v2 = vadd.f32 %v2441_v9, %v1787_v14  ;;  %v1861_v22 = vmul.f32 %v2441_v9, %v2441_v9 }
 0x1d1   :  { %v1789_v51 = vadd.f32 %v2438_v29, %v1788_v2  ;;  %v1924_v60 = vadd.f32 %v1923_v56, %v1861_v22  ;;  %v2312_v6 = vpop.f32.mrb[40].mxu1 }
 0x1d2   :  { %v2442_v53 = vadd.f32 %v2378_v44, %v2312_v6  ;;  %v1236_v33 = vpop.f32.mrb[41].mxu1 }
 0x1d3   :  { %v1925_v16 = vadd.f32 %v1924_v60, %v1862_v24  ;;  %v2443_v20 = vadd.f32 %v1528_v7, %v1236_v33  ;;  %v1790_v62 = vadd.f32 %v2440_v31, %v1789_v51  ;;  %v2313_v10 = vpop.f32.mrb[42].mxu1  ;;  %v2382_v63 = vpop.f32.mrb[44].mxu0 }
 0x1d4   :  { %1729 = vst [vmem:[#allocation11 + $0x150] sm:$0xff] %v2442_v53  ;;  %v2444_v23 = vadd.f32 %v2379_v35, %v2313_v10  ;;  %v1239_v26 = vpop.f32.mrb[43].mxu1  ;;  %v1544_v49 = vpop.f32.mrb[45].mxu0  ;;  %v1866_v18 = vmul.f32 %v2442_v53, %v2442_v53 }
 0x1d5   :  { %1727 = vst [vmem:[#allocation11 + $0x140] sm:$0xff] %v2443_v20  ;;  %v1791_v38 = vadd.f32 %v2443_v20, %v1790_v62  ;;  %v1864_v61 = vmul.f32 %v2443_v20, %v2443_v20  ;;  %v1926_v27 = vadd.f32 %v1925_v16, %v1863_v37  ;;  %v2445_v47 = vadd.f32 %v1531_v58, %v1239_v26  ;;  %v2383_v13 = vpop.f32.mrb[46].mxu0 }
 0x1d6   :  { %1730 = vst [vmem:[#allocation11 + $0x158] sm:$0xff] %v2444_v23  ;;  %v1547_v21 = vpop.f32.mrb[47].mxu0  ;;  %v1867_v54 = vmul.f32 %v2444_v23, %v2444_v23 }
 0x1d7   :  { %v1927_v48 = vadd.f32 %v1926_v27, %v1864_v61  ;;  %1728 = vst [vmem:[#allocation11 + $0x148] sm:$0xff] %v2445_v47  ;;  %v1792_v15 = vadd.f32 %v2445_v47, %v1791_v38  ;;  %v1865_v36 = vmul.f32 %v2445_v47, %v2445_v47 }
 0x1d9   :  { %v1793_v4 = vadd.f32 %v2442_v53, %v1792_v15  ;;  %v1928_v25 = vadd.f32 %v1927_v48, %v1865_v36  ;;  %v2316_v43 = vpop.f32.mrb[44].mxu1 }
 0x1da   :  { %v2446_v28 = vadd.f32 %v2382_v63, %v2316_v43  ;;  %v1252_v39 = vpop.f32.mrb[45].mxu1 }
 0x1db   :  { %v1929_v40 = vadd.f32 %v1928_v25, %v1866_v18  ;;  %v2447_v3 = vadd.f32 %v1544_v49, %v1252_v39  ;;  %v1794_v52 = vadd.f32 %v2444_v23, %v1793_v4  ;;  %v2317_v0 = vpop.f32.mrb[46].mxu1  ;;  %v2386_v46 = vpop.f32.mrb[48].mxu0 }
 0x1dc   :  { %1733 = vst [vmem:[#allocation11 + $0x170] sm:$0xff] %v2446_v28  ;;  %v2448_v30 = vadd.f32 %v2383_v13, %v2317_v0  ;;  %v1255_v32 = vpop.f32.mrb[47].mxu1  ;;  %v1560_v1 = vpop.f32.mrb[49].mxu0  ;;  %v1870_v55 = vmul.f32 %v2446_v28, %v2446_v28 }
 0x1dd   :  { %1731 = vst [vmem:[#allocation11 + $0x160] sm:$0xff] %v2447_v3  ;;  %v1795_v5 = vadd.f32 %v2447_v3, %v1794_v52  ;;  %v1868_v45 = vmul.f32 %v2447_v3, %v2447_v3  ;;  %v1930_v12 = vadd.f32 %v1929_v40, %v1867_v54  ;;  %v2449_v42 = vadd.f32 %v1547_v21, %v1255_v32  ;;  %v2387_v19 = vpop.f32.mrb[50].mxu0 }
 0x1de   :  { %1734 = vst [vmem:[#allocation11 + $0x178] sm:$0xff] %v2448_v30  ;;  %v1563_v29 = vpop.f32.mrb[51].mxu0  ;;  %v1871_v7 = vmul.f32 %v2448_v30, %v2448_v30 }
 0x1df   :  { %v1931_v41 = vadd.f32 %v1930_v12, %v1868_v45  ;;  %1732 = vst [vmem:[#allocation11 + $0x168] sm:$0xff] %v2449_v42  ;;  %v1796_v8 = vadd.f32 %v2449_v42, %v1795_v5  ;;  %v1869_v59 = vmul.f32 %v2449_v42, %v2449_v42 }
 0x1e1   :  { %v1797_v11 = vadd.f32 %v2446_v28, %v1796_v8  ;;  %v1932_v17 = vadd.f32 %v1931_v41, %v1869_v59  ;;  %v2320_v44 = vpop.f32.mrb[48].mxu1 }
 0x1e2   :  { %v2450_v31 = vadd.f32 %v2386_v46, %v2320_v44  ;;  %v1268_v34 = vpop.f32.mrb[49].mxu1 }
 0x1e3   :  { %v1933_v14 = vadd.f32 %v1932_v17, %v1870_v55  ;;  %v2451_v50 = vadd.f32 %v1560_v1, %v1268_v34  ;;  %v1798_v57 = vadd.f32 %v2448_v30, %v1797_v11  ;;  %v2321_v9 = vpop.f32.mrb[50].mxu1  ;;  %v2390_v35 = vpop.f32.mrb[52].mxu0 }
 0x1e4   :  { %1737 = vst [vmem:[#allocation11 + $0x190] sm:$0xff] %v2450_v31  ;;  %v2452_v58 = vadd.f32 %v2387_v19, %v2321_v9  ;;  %v1271_v56 = vpop.f32.mrb[51].mxu1  ;;  %v1576_v2 = vpop.f32.mrb[53].mxu0  ;;  %v1874_v20 = vmul.f32 %v2450_v31, %v2450_v31 }
 0x1e5   :  { %1735 = vst [vmem:[#allocation11 + $0x180] sm:$0xff] %v2451_v50  ;;  %v1799_v22 = vadd.f32 %v2451_v50, %v1798_v57  ;;  %v1872_v24 = vmul.f32 %v2451_v50, %v2451_v50  ;;  %v1934_v51 = vadd.f32 %v1933_v14, %v1871_v7  ;;  %v2453_v60 = vadd.f32 %v1563_v29, %v1271_v56  ;;  %v2391_v6 = vpop.f32.mrb[54].mxu0 }
 0x1e6   :  { %1738 = vst [vmem:[#allocation11 + $0x198] sm:$0xff] %v2452_v58  ;;  %v1579_v53 = vpop.f32.mrb[55].mxu0  ;;  %v1875_v49 = vmul.f32 %v2452_v58, %v2452_v58 }
 0x1e7   :  { %v1935_v33 = vadd.f32 %v1934_v51, %v1872_v24  ;;  %1736 = vst [vmem:[#allocation11 + $0x188] sm:$0xff] %v2453_v60  ;;  %v1800_v37 = vadd.f32 %v2453_v60, %v1799_v22  ;;  %v1873_v16 = vmul.f32 %v2453_v60, %v2453_v60 }
 0x1e9   :  { %v1801_v62 = vadd.f32 %v2450_v31, %v1800_v37  ;;  %v1936_v10 = vadd.f32 %v1935_v33, %v1873_v16  ;;  %v2324_v63 = vpop.f32.mrb[52].mxu1 }
 0x1ea   :  { %v2454_v23 = vadd.f32 %v2390_v35, %v2324_v63  ;;  %v1284_v26 = vpop.f32.mrb[53].mxu1 }
 0x1eb   :  { %v1937_v38 = vadd.f32 %v1936_v10, %v1874_v20  ;;  %v2455_v61 = vadd.f32 %v1576_v2, %v1284_v26  ;;  %v1802_v27 = vadd.f32 %v2452_v58, %v1801_v62  ;;  %v2325_v47 = vpop.f32.mrb[54].mxu1  ;;  %v2394_v13 = vpop.f32.mrb[56].mxu0 }
 0x1ec   :  { %1741 = vst [vmem:[#allocation11 + $0x1b0] sm:$0xff] %v2454_v23  ;;  %v2456_v21 = vadd.f32 %v2391_v6, %v2325_v47  ;;  %v1287_v48 = vpop.f32.mrb[55].mxu1  ;;  %v1592_v15 = vpop.f32.mrb[57].mxu0  ;;  %v1878_v3 = vmul.f32 %v2454_v23, %v2454_v23 }
 0x1ed   :  { %1739 = vst [vmem:[#allocation11 + $0x1a0] sm:$0xff] %v2455_v61  ;;  %v1803_v36 = vadd.f32 %v2455_v61, %v1802_v27  ;;  %v1876_v18 = vmul.f32 %v2455_v61, %v2455_v61  ;;  %v1938_v4 = vadd.f32 %v1937_v38, %v1875_v49  ;;  %v2457_v25 = vadd.f32 %v1579_v53, %v1287_v48  ;;  %v2395_v43 = vpop.f32.mrb[58].mxu0 }
 0x1ee   :  { %1742 = vst [vmem:[#allocation11 + $0x1b8] sm:$0xff] %v2456_v21  ;;  %v1595_v28 = vpop.f32.mrb[59].mxu0  ;;  %v1879_v1 = vmul.f32 %v2456_v21, %v2456_v21 }
 0x1ef   :  { %v1939_v39 = vadd.f32 %v1938_v4, %v1876_v18  ;;  %1740 = vst [vmem:[#allocation11 + $0x1a8] sm:$0xff] %v2457_v25  ;;  %v1804_v54 = vadd.f32 %v2457_v25, %v1803_v36  ;;  %v1877_v40 = vmul.f32 %v2457_v25, %v2457_v25 }
 0x1f1   :  { %v1805_v52 = vadd.f32 %v2454_v23, %v1804_v54  ;;  %v1940_v0 = vadd.f32 %v1939_v39, %v1877_v40  ;;  %v2328_v46 = vpop.f32.mrb[56].mxu1 }
 0x1f2   :  { %v2458_v30 = vadd.f32 %v2394_v13, %v2328_v46  ;;  %v1300_v32 = vpop.f32.mrb[57].mxu1 }
 0x1f3   :  { %v1941_v5 = vadd.f32 %v1940_v0, %v1878_v3  ;;  %v2459_v45 = vadd.f32 %v1592_v15, %v1300_v32  ;;  %v1806_v12 = vadd.f32 %v2456_v21, %v1805_v52  ;;  %v2329_v42 = vpop.f32.mrb[58].mxu1  ;;  %v2398_v19 = vpop.f32.mrb[60].mxu0 }
 0x1f4   :  { %1745 = vst [vmem:[#allocation11 + $0x1d0] sm:$0xff] %v2458_v30  ;;  %v2460_v29 = vadd.f32 %v2395_v43, %v2329_v42  ;;  %v1303_v41 = vpop.f32.mrb[59].mxu1  ;;  %v1608_v8 = vpop.f32.mrb[61].mxu0  ;;  %v1882_v50 = vmul.f32 %v2458_v30, %v2458_v30 }
 0x1f5   :  { %1743 = vst [vmem:[#allocation11 + $0x1c0] sm:$0xff] %v2459_v45  ;;  %v1807_v59 = vadd.f32 %v2459_v45, %v1806_v12  ;;  %v1880_v55 = vmul.f32 %v2459_v45, %v2459_v45  ;;  %v1942_v11 = vadd.f32 %v1941_v5, %v1879_v1  ;;  %v2461_v17 = vadd.f32 %v1595_v28, %v1303_v41  ;;  %v2399_v44 = vpop.f32.mrb[62].mxu0 }
 0x1f6   :  { %1746 = vst [vmem:[#allocation11 + $0x1d8] sm:$0xff] %v2460_v29  ;;  %v1611_v31 = vpop.f32.mrb[63].mxu0  ;;  %v1883_v2 = vmul.f32 %v2460_v29, %v2460_v29 }
 0x1f7   :  { %v1943_v34 = vadd.f32 %v1942_v11, %v1880_v55  ;;  %1744 = vst [vmem:[#allocation11 + $0x1c8] sm:$0xff] %v2461_v17  ;;  %v1808_v7 = vadd.f32 %v2461_v17, %v1807_v59  ;;  %v1881_v14 = vmul.f32 %v2461_v17, %v2461_v17 }
 0x1f9   :  { %v1809_v57 = vadd.f32 %v2458_v30, %v1808_v7  ;;  %v1944_v9 = vadd.f32 %v1943_v34, %v1881_v14  ;;  %v2332_v35 = vpop.f32.mrb[60].mxu1 }
 0x1fa   :  { %v2462_v58 = vadd.f32 %v2398_v19, %v2332_v35  ;;  %v1316_v56 = vpop.f32.mrb[61].mxu1 }
 0x1fb   :  { %v1945_v22 = vadd.f32 %v1944_v9, %v1882_v50  ;;  %v2463_v24 = vadd.f32 %v1608_v8, %v1316_v56  ;;  %v1810_v51 = vadd.f32 %v2460_v29, %v1809_v57  ;;  %v2333_v60 = vpop.f32.mrb[62].mxu1 }
 0x1fc   :  { %1749 = vst [vmem:[#allocation11 + $0x1f0] sm:$0xff] %v2462_v58  ;;  %v2464_v6 = vadd.f32 %v2399_v44, %v2333_v60  ;;  %v1319_v53 = vpop.f32.mrb[63].mxu1 }
 0x1fd   :  { %1747 = vst [vmem:[#allocation11 + $0x1e0] sm:$0xff] %v2463_v24  ;;  %v1811_v33 = vadd.f32 %v2463_v24, %v1810_v51  ;;  %v1884_v37 = vmul.f32 %v2463_v24, %v2463_v24  ;;  %v1946_v16 = vadd.f32 %v1945_v22, %v1883_v2  ;;  %v2465_v20 = vadd.f32 %v1611_v31, %v1319_v53 }
 0x1fe   :  { %1750 = vst [vmem:[#allocation11 + $0x1f8] sm:$0xff] %v2464_v6 }
 0x1ff   :  { %v1947_v62 = vadd.f32 %v1946_v16, %v1884_v37  ;;  %1748 = vst [vmem:[#allocation11 + $0x1e8] sm:$0xff] %v2465_v20  ;;  %v1812_v10 = vadd.f32 %v2465_v20, %v1811_v33  ;;  %v1885_v63 = vmul.f32 %v2465_v20, %v2465_v20 }
 0x200   :  { %2666 = shalt.err (!%p2663_p2)
}
 0x201   :  { %s2667_s19 = scalar_lea.hbm %s3478_s5, 8192 }
 0x202   :  { %p2668_p3 = scmp.ne.s32.totalorder %s3478_s5, %s2667_s19  ;;  %p2671_p4 = scmp.lt.u32.totalorder %s2667_s19, %s3478_s5 }
 0x204   :  { %p2673_p5 = pnand %p2671_p4, %p2668_p3 }
 0x206   :  { %2676 = shalt.err (!%p2673_p5)
}
 0x207   :  { %1970 = dma.vmem_to_hbm [thread:$0]  %s1965_s15, 8192, %s3478_s5, [#allocation4], %s2734_s3, %s2734_s3, %s2735_s27   ;;  %v1886_v23 = vmul.f32 %v2462_v58, %v2462_v58  ;;  %v1813_v26 = vadd.f32 %v2462_v58, %v1812_v10  ;;  %v1948_v49 = vadd.f32 %v1947_v62, %v1885_v63  ;;  %v1887_v38 = vmul.f32 %v2464_v6, %v2464_v6  ;;  %v1751_v28 = vld [vmem:[#allocation12] sm:$0x1]  ;;  %v1823_v40 = vld [vmem:[#allocation14] sm:$0x1] }
 0x208   :  { %s2740_s0 = smov [#allocation12]   ;;  %s2741_s5 = smov [#allocation14]  }
 0x209   :  { %v1814_v61 = vadd.f32 %v2464_v6, %v1813_v26  ;;  %v1949_v27 = vadd.f32 %v1948_v49, %v1886_v23  ;;  %s1977_s25 = sshll.u32 %s2740_s0, 4  ;;  %s1987_s3 = sshll.u32 %s2741_s5, 4  ;;  %s1978_s25 = int_to_ptr.vmem [resolvable:$true] %s1977_s25  ;;  %s3441_s3 = int_to_ptr.vmem [resolvable:$true] %s1987_s3 }
 0x20a   :  { %s2677_s27 = scalar_lea.vmem %s1978_s25, 16  ;;  %s2681_s26 = scalar_lea.vmem %s1978_s25, 32 }
 0x20b   :  { %v1815_v47 = vrot.slane %v1814_v61, 4  ;;  %v1950_v13 = vadd.f32 %v1949_v27, %v1887_v38  ;;  %p2678_p6 = scmp.ne.s32.totalorder %s1978_s25, %s2677_s27  ;;  %p2682_p7 = scmp.lt.s32.totalorder %s1978_s25, %s1978_s25 }
 0x20c   :  { %p2683_p8 = scmp.lt.s32.totalorder %s2681_s26, %s2677_s27 }
 0x20d   :  { %v1816_v21 = vadd.f32 %v1815_v47, %v1814_v61  ;;  %v1951_v48 = vrot.slane %v1950_v13, 4 }
 0x20e   :  { %p2684_p9 = por %p2683_p8, %p2682_p7 }
 0x20f   :  { %v1952_v15 = vadd.f32 %v1951_v48, %v1950_v13  ;;  %v1817_v36 = vrot.slane %v1816_v21, 2 }
 0x210   :  { %p2685_p10 = pnand %p2684_p9, %p2678_p6 }
 0x211   :  { %v1818_v18 = vadd.f32 %v1817_v36, %v1816_v21  ;;  %v1953_v4 = vrot.slane %v1952_v15, 2 }
 0x213   :  { %v1819_v25 = vrot.slane %v1818_v18, 1  ;;  %v1954_v43 = vadd.f32 %v1953_v4, %v1952_v15 }
 0x215   :  { %v1820_v39 = vadd.f32 %v1819_v25, %v1818_v18  ;;  %v1955_v54 = vrot.slane %v1954_v43, 1 }
 0x217   :  { %v1821_v3 = vadd.f32 %v1820_v39, %v1751_v28  ;;  %v1956_v52 = vadd.f32 %v1955_v54, %v1954_v43 }
 0x219   :  { %1822 = vst [vmem:[#allocation12] sm:$0x1] %v1821_v3  ;;  %v1957_v0 = vadd.f32 %v1956_v52, %v1823_v40 }
 0x21a   :  { %2688 = shalt.err (!%p2685_p10)
}
 0x21b   :  { %s2689_s30 = scalar_lea.hbm %s3479_s6, 16 }
 0x21c   :  { %p2690_p11 = scmp.ne.s32.totalorder %s3479_s6, %s2689_s30  ;;  %p2693_p12 = scmp.lt.u32.totalorder %s2689_s30, %s3479_s6 }
 0x21e   :  { %p2695_p13 = pnand %p2693_p12, %p2690_p11 }
 0x220   :  { %2698 = shalt.err (!%p2695_p13)
}
 0x221   :  { %1980 = dma.vmem_to_hbm [thread:$0]  %s1978_s25, 16, %s3479_s6, [#allocation13]   ;;  %1958 = vst [vmem:[#allocation14] sm:$0x1] %v1957_v0 }
 0x222   :  { %s2699_s2 = scalar_lea.vmem %s3441_s3, 16  ;;  %s2703_s14 = scalar_lea.vmem %s3441_s3, 32 }
 0x223   :  { %p2700_p0 = scmp.ne.s32.totalorder %s3441_s3, %s2699_s2  ;;  %p2704_p1 = scmp.lt.s32.totalorder %s3441_s3, %s3441_s3 }
 0x224   :  { %p2705_p2 = scmp.lt.s32.totalorder %s2703_s14, %s2699_s2 }
 0x226   :  { %p2706_p3 = por %p2705_p2, %p2704_p1 }
 0x228   :  { %p2707_p4 = pnand %p2706_p3, %p2700_p0 }
 0x22a   :  { %2710 = shalt.err (!%p2707_p4)
}
 0x22b   :  { %s2711_s16 = scalar_lea.hbm %s3480_s7, 16 }
 0x22c   :  { %p2712_p5 = scmp.ne.s32.totalorder %s3480_s7, %s2711_s16  ;;  %p2715_p6 = scmp.lt.u32.totalorder %s2711_s16, %s3480_s7 }
 0x22e   :  { %p2717_p7 = pnand %p2715_p6, %p2712_p5 }
 0x230   :  { %2720 = shalt.err (!%p2717_p7)
}
 0x231   :  { %1990 = dma.vmem_to_hbm [thread:$0]  %s3441_s3, 16, %s3480_s7, [#allocation13]  }
 0x232   :  { %2727 = dma.done.wait [#allocation4], 8192  }
 0x233   :  { %2728 = vsyncadd [#allocation4], 4294959104 }
 0x234   :  { %2729 = dma.done.wait [#allocation13], 32  }
 0x235   :  { %2730 = vsyncadd [#allocation13], 4294967264 }
 0x236   :  { %2000 = vsyncpa [#allocation3], 1 }
 0x237   :  { %2001 = vsyncpa [#allocation6], 1 }
 0x238   :  { %2002 = vsyncpa [#allocation9], 1 }
 0x239   :  { %2003 = vsyncpa [#allocation4], 1 }
 0x23a   :  { %2004 = vsyncpa [#allocation13], 1 }

// kernel: preact_bottleneck.7
= control target key start
LH: loop header
LB: loop body
LE: loop exit
PB: predicated region body
PF: predicated region fallthrough
CT: control target
= control target key end

     0   :  { %15 = vsyncpa [#allocation3], 0  ;;  %s2391_s0 = inlined_call_operand.hbm [shape: f32[128,128], index: 0, kind: input, shape index: {}]   ;;  %s2392_s1 = inlined_call_operand.hbm [shape: f32[1,128], index: 1, kind: input, shape index: {}]   ;;  %s2393_s2 = inlined_call_operand.hbm [shape: f32[1,128], index: 2, kind: input, shape index: {}]   ;;  %s2394_s3 = inlined_call_operand.hbm [shape: bf16[128,128], index: 3, kind: input, shape index: {}]   ;;  %s2395_s4 = inlined_call_operand.hbm [shape: bf16[128,128], index: 4, kind: input, shape index: {}]   ;;  %s2396_s5 = inlined_call_operand.hbm [shape: f32[128,4], index: 5, kind: input, shape index: {}]   ;;  %s2397_s6 = inlined_call_operand.hbm [shape: f32[1,4], index: 6, kind: input, shape index: {}]   ;;  %s2398_s7 = inlined_call_operand.hbm [shape: f32[1,4], index: 7, kind: input, shape index: {}]   ;;  %s2399_s8 = inlined_call_operand.hbm [shape: bf16[4,128], index: 8, kind: input, shape index: {}]   ;;  %s2400_s9 = inlined_call_operand.hbm [shape: bf16[4,128], index: 9, kind: input, shape index: {}]   ;;  %s2401_s10 = inlined_call_operand.hbm [shape: f32[128,128], index: 10, kind: output, shape index: {}]  }
   0x1   :  { %16 = vsyncpa [#allocation6], 0 }
   0x2   :  { %17 = vsyncpa [#allocation9], 0 }
   0x3   :  { %18 = vsyncpa [#allocation12], 0 }
   0x4   :  { %19 = vsyncpa [#allocation15], 0 }
   0x5   :  { %20 = vsyncpa [#allocation18], 0 }
   0x6   :  { %21 = vsyncpa [#allocation4], 0  ;;  %s1906_s13 = smov [#allocation5]   ;;  %s1907_s15 = smov [#allocation8]  }
   0x7   :  { %s40_s14 = sshll.u32 %s1906_s13, 4  ;;  %s59_s16 = sshll.u32 %s1907_s15, 4  ;;  %s41_s14 = int_to_ptr.vmem [resolvable:$true] %s40_s14  ;;  %s1976_s16 = int_to_ptr.vmem [resolvable:$true] %s59_s16 }
   0x8   :  { %s1650_s19 = scalar_lea.hbm %s2392_s1, 16 }
   0x9   :  { %p1651_p0 = scmp.ne.s32.totalorder %s2392_s1, %s1650_s19  ;;  %p1654_p1 = scmp.lt.u32.totalorder %s1650_s19, %s2392_s1 }
   0xb   :  { %p1656_p2 = pnand %p1654_p1, %p1651_p0 }
   0xd   :  { %1659 = shalt.err (!%p1656_p2)
}
   0xe   :  { %s1660_s24 = scalar_lea.vmem %s41_s14, 16  ;;  %s1664_s25 = scalar_lea.vmem %s41_s14, 32 }
   0xf   :  { %p1661_p3 = scmp.ne.s32.totalorder %s41_s14, %s1660_s24  ;;  %p1665_p4 = scmp.lt.s32.totalorder %s41_s14, %s41_s14 }
  0x10   :  { %p1666_p5 = scmp.lt.s32.totalorder %s1664_s25, %s1660_s24 }
  0x12   :  { %p1667_p6 = por %p1666_p5, %p1665_p4 }
  0x14   :  { %p1668_p7 = pnand %p1667_p6, %p1661_p3 }
  0x16   :  { %1671 = shalt.err (!%p1668_p7)
}
  0x17   :  { %43 = dma.hbm_to_vmem [thread:$0]  %s2392_s1, 16, %s41_s14, [#allocation6]  }
  0x18   :  { %s1672_s30 = scalar_lea.hbm %s2394_s3, 1024 }
  0x19   :  { %p1673_p8 = scmp.ne.s32.totalorder %s2394_s3, %s1672_s30  ;;  %p1676_p9 = scmp.lt.u32.totalorder %s1672_s30, %s2394_s3 }
  0x1b   :  { %p1678_p10 = pnand %p1676_p9, %p1673_p8 }
  0x1d   :  { %1681 = shalt.err (!%p1678_p10)
}
  0x1e   :  { %s1682_s17 = scalar_lea.vmem %s1976_s16, 1024  ;;  %p1687_p12 = scmp.lt.s32.totalorder %s1976_s16, %s1976_s16 }
  0x1f   :  { %p1683_p11 = scmp.ne.s32.totalorder %s1976_s16, %s1682_s17  ;;  %p1688_p13 = scmp.lt.s32.totalorder %s1682_s17, %s1682_s17 }
  0x21   :  { %p1689_p0 = por %p1688_p13, %p1687_p12 }
  0x23   :  { %p1690_p1 = pnand %p1689_p0, %p1683_p11 }
  0x25   :  { %1693 = shalt.err (!%p1690_p1)
}
  0x26   :  { %s1908_s1 = smov 64   ;;  %s1909_s14 = smov 4  }
  0x27   :  { %65 = dma.hbm_to_vmem [thread:$0]  %s2394_s3, 1024, %s1976_s16, [#allocation9], %s1908_s1, %s1908_s1, %s1909_s14  }
  0x28   :  { %s1910_s20 = smov [#allocation11]   ;;  %s1911_s22 = smov [#allocation14]  }
  0x29   :  { %s83_s21 = sshll.u32 %s1910_s20, 4  ;;  %s106_s23 = sshll.u32 %s1911_s22, 4  ;;  %s84_s21 = int_to_ptr.vmem [resolvable:$true] %s83_s21  ;;  %s2010_s23 = int_to_ptr.vmem [resolvable:$true] %s106_s23 }
  0x2a   :  { %s1694_s26 = scalar_lea.hbm %s2396_s5, 2048 }
  0x2b   :  { %p1695_p2 = scmp.ne.s32.totalorder %s2396_s5, %s1694_s26  ;;  %p1698_p3 = scmp.lt.u32.totalorder %s1694_s26, %s2396_s5 }
  0x2d   :  { %p1700_p4 = pnand %p1698_p3, %p1695_p2 }
  0x2f   :  { %1703 = shalt.err (!%p1700_p4)
}
  0x30   :  { %s1704_s3 = scalar_lea.vmem %s84_s21, 2048  ;;  %p1709_p6 = scmp.lt.s32.totalorder %s84_s21, %s84_s21 }
  0x31   :  { %p1705_p5 = scmp.ne.s32.totalorder %s84_s21, %s1704_s3  ;;  %p1710_p7 = scmp.lt.s32.totalorder %s1704_s3, %s1704_s3 }
  0x33   :  { %p1711_p8 = por %p1710_p7, %p1709_p6 }
  0x35   :  { %p1712_p9 = pnand %p1711_p8, %p1705_p5 }
  0x37   :  { %1715 = shalt.err (!%p1712_p9)
}
  0x38   :  { %s1912_s16 = smov 128   ;;  %s1913_s11 = smov 8  }
  0x39   :  { %89 = dma.hbm_to_vmem [thread:$0]  %s2396_s5, 2048, %s84_s21, [#allocation12], %s1912_s16, %s1912_s16, %s1913_s11  }
  0x3a   :  { %s1716_s18 = scalar_lea.hbm %s2398_s7, 16 }
  0x3b   :  { %p1717_p10 = scmp.ne.s32.totalorder %s2398_s7, %s1716_s18  ;;  %p1720_p11 = scmp.lt.u32.totalorder %s1716_s18, %s2398_s7 }
  0x3d   :  { %p1722_p12 = pnand %p1720_p11, %p1717_p10 }
  0x3f   :  { %1725 = shalt.err (!%p1722_p12)
}
  0x40   :  { %s1726_s25 = scalar_lea.vmem %s2010_s23, 16  ;;  %s1730_s5 = scalar_lea.vmem %s2010_s23, 32 }
  0x41   :  { %p1727_p13 = scmp.ne.s32.totalorder %s2010_s23, %s1726_s25  ;;  %p1731_p0 = scmp.lt.s32.totalorder %s2010_s23, %s2010_s23 }
  0x42   :  { %p1732_p1 = scmp.lt.s32.totalorder %s1730_s5, %s1726_s25 }
  0x44   :  { %p1733_p2 = por %p1732_p1, %p1731_p0 }
  0x46   :  { %p1734_p3 = pnand %p1733_p2, %p1727_p13 }
  0x48   :  { %1737 = shalt.err (!%p1734_p3)
}
  0x49   :  { %109 = dma.hbm_to_vmem [thread:$0]  %s2398_s7, 16, %s2010_s23, [#allocation15]  }
  0x4a   :  { %s1914_s27 = smov [#allocation2]   ;;  %s1915_s29 = smov [#allocation7]  }
  0x4b   :  { %s27_s28 = sshll.u32 %s1914_s27, 4  ;;  %s50_s30 = sshll.u32 %s1915_s29, 4  ;;  %s28_s28 = int_to_ptr.vmem [resolvable:$true] %s27_s28  ;;  %s51_s30 = int_to_ptr.vmem [resolvable:$true] %s50_s30 }
  0x4c   :  { %s1738_s13 = scalar_lea.hbm %s2391_s0, 2048 }
  0x4d   :  { %p1739_p4 = scmp.ne.s32.totalorder %s2391_s0, %s1738_s13  ;;  %p1742_p5 = scmp.lt.u32.totalorder %s1738_s13, %s2391_s0 }
  0x4f   :  { %p1744_p6 = pnand %p1742_p5, %p1739_p4 }
  0x51   :  { %1747 = shalt.err (!%p1744_p6)
}
  0x52   :  { %s1748_s7 = scalar_lea.vmem %s28_s28, 2048  ;;  %p1753_p8 = scmp.lt.s32.totalorder %s28_s28, %s28_s28 }
  0x53   :  { %p1749_p7 = scmp.ne.s32.totalorder %s28_s28, %s1748_s7  ;;  %p1754_p9 = scmp.lt.s32.totalorder %s1748_s7, %s1748_s7 }
  0x55   :  { %p1755_p10 = por %p1754_p9, %p1753_p8 }
  0x57   :  { %p1756_p11 = pnand %p1755_p10, %p1749_p7 }
  0x59   :  { %1759 = shalt.err (!%p1756_p11)
}
  0x5a   :  { %33 = dma.hbm_to_vmem [thread:$0]  %s2391_s0, 2048, %s28_s28, [#allocation3], %s1912_s16, %s1912_s16, %s1913_s11  }
  0x5b   :  { %s1760_s25 = scalar_lea.hbm %s2393_s2, 16 }
  0x5c   :  { %p1761_p12 = scmp.ne.s32.totalorder %s2393_s2, %s1760_s25  ;;  %p1764_p13 = scmp.lt.u32.totalorder %s1760_s25, %s2393_s2 }
  0x5e   :  { %p1766_p0 = pnand %p1764_p13, %p1761_p12 }
  0x60   :  { %1769 = shalt.err (!%p1766_p0)
}
  0x61   :  { %s1770_s29 = scalar_lea.vmem %s51_s30, 16  ;;  %s1774_s3 = scalar_lea.vmem %s51_s30, 32 }
  0x62   :  { %p1771_p1 = scmp.ne.s32.totalorder %s51_s30, %s1770_s29  ;;  %p1775_p2 = scmp.lt.s32.totalorder %s51_s30, %s51_s30 }
  0x63   :  { %p1776_p3 = scmp.lt.s32.totalorder %s1774_s3, %s1770_s29 }
  0x65   :  { %p1777_p4 = por %p1776_p3, %p1775_p2 }
  0x67   :  { %p1778_p5 = pnand %p1777_p4, %p1771_p1 }
  0x69   :  { %1781 = shalt.err (!%p1778_p5)
}
  0x6a   :  { %53 = dma.hbm_to_vmem [thread:$0]  %s2393_s2, 16, %s51_s30, [#allocation6]  }
  0x6b   :  { %s1916_s12 = smov [#allocation10]   ;;  %s1917_s15 = smov [#allocation13]  }
  0x6c   :  { %s71_s13 = sshll.u32 %s1916_s12, 4  ;;  %s96_s17 = sshll.u32 %s1917_s15, 4  ;;  %s72_s13 = int_to_ptr.vmem [resolvable:$true] %s71_s13  ;;  %s97_s17 = int_to_ptr.vmem [resolvable:$true] %s96_s17 }
  0x6d   :  { %s1782_s7 = scalar_lea.hbm %s2395_s4, 1024 }
  0x6e   :  { %p1783_p6 = scmp.ne.s32.totalorder %s2395_s4, %s1782_s7  ;;  %p1786_p7 = scmp.lt.u32.totalorder %s1782_s7, %s2395_s4 }
  0x70   :  { %p1788_p8 = pnand %p1786_p7, %p1783_p6 }
  0x72   :  { %1791 = shalt.err (!%p1788_p8)
}
  0x73   :  { %s1792_s2 = scalar_lea.vmem %s72_s13, 1024  ;;  %p1797_p10 = scmp.lt.s32.totalorder %s72_s13, %s72_s13 }
  0x74   :  { %p1793_p9 = scmp.ne.s32.totalorder %s72_s13, %s1792_s2  ;;  %p1798_p11 = scmp.lt.s32.totalorder %s1792_s2, %s1792_s2 }
  0x76   :  { %p1799_p12 = por %p1798_p11, %p1797_p10 }
  0x78   :  { %p1800_p13 = pnand %p1799_p12, %p1793_p9 }
  0x7a   :  { %1803 = shalt.err (!%p1800_p13)
}
  0x7b   :  { %77 = dma.hbm_to_vmem [thread:$0]  %s2395_s4, 1024, %s72_s13, [#allocation9], %s1908_s1, %s1908_s1, %s1909_s14  }
  0x7c   :  { %s1804_s26 = scalar_lea.hbm %s2397_s6, 16 }
  0x7d   :  { %p1805_p0 = scmp.ne.s32.totalorder %s2397_s6, %s1804_s26  ;;  %p1808_p1 = scmp.lt.u32.totalorder %s1804_s26, %s2397_s6 }
  0x7f   :  { %p1810_p2 = pnand %p1808_p1, %p1805_p0 }
  0x81   :  { %1813 = shalt.err (!%p1810_p2)
}
  0x82   :  { %s1814_s28 = scalar_lea.vmem %s97_s17, 16  ;;  %s1818_s12 = scalar_lea.vmem %s97_s17, 32 }
  0x83   :  { %p1815_p3 = scmp.ne.s32.totalorder %s97_s17, %s1814_s28  ;;  %p1819_p4 = scmp.lt.s32.totalorder %s97_s17, %s97_s17 }
  0x84   :  { %p1820_p5 = scmp.lt.s32.totalorder %s1818_s12, %s1814_s28 }
  0x86   :  { %p1821_p6 = por %p1820_p5, %p1819_p4 }
  0x88   :  { %p1822_p7 = pnand %p1821_p6, %p1815_p3 }
  0x8a   :  { %1825 = shalt.err (!%p1822_p7)
}
  0x8b   :  { %99 = dma.hbm_to_vmem [thread:$0]  %s2397_s6, 16, %s97_s17, [#allocation12]  }
  0x8c   :  { %s1918_s14 = smov [#allocation16]   ;;  %s1919_s15 = smov [#allocation17]  }
  0x8d   :  { %s116_s13 = sshll.u32 %s1918_s14, 4  ;;  %s126_s18 = sshll.u32 %s1919_s15, 4  ;;  %s117_s13 = int_to_ptr.vmem [resolvable:$true] %s116_s13  ;;  %s127_s18 = int_to_ptr.vmem [resolvable:$true] %s126_s18 }
  0x8e   :  { %s1826_s23 = scalar_lea.hbm %s2399_s8, 32 }
  0x8f   :  { %p1827_p8 = scmp.ne.s32.totalorder %s2399_s8, %s1826_s23  ;;  %p1830_p9 = scmp.lt.u32.totalorder %s1826_s23, %s2399_s8 }
  0x91   :  { %p1832_p10 = pnand %p1830_p9, %p1827_p8 }
  0x93   :  { %1835 = shalt.err (!%p1832_p10)
}
  0x94   :  { %s1836_s6 = scalar_lea.vmem %s117_s13, 32  ;;  %p1841_p12 = scmp.lt.s32.totalorder %s117_s13, %s117_s13 }
  0x95   :  { %p1837_p11 = scmp.ne.s32.totalorder %s117_s13, %s1836_s6  ;;  %p1842_p13 = scmp.lt.s32.totalorder %s1836_s6, %s1836_s6 }
  0x97   :  { %p1843_p0 = por %p1842_p13, %p1841_p12 }
  0x99   :  { %p1844_p1 = pnand %p1843_p0, %p1837_p11 }
  0x9b   :  { %1847 = shalt.err (!%p1844_p1)
}
  0x9c   :  { %119 = dma.hbm_to_vmem [thread:$0]  %s2399_s8, 32, %s117_s13, [#allocation15]  }
  0x9d   :  { %s1848_s21 = scalar_lea.hbm %s2400_s9, 32 }
  0x9e   :  { %p1849_p2 = scmp.ne.s32.totalorder %s2400_s9, %s1848_s21  ;;  %p1852_p3 = scmp.lt.u32.totalorder %s1848_s21, %s2400_s9 }
  0xa0   :  { %p1854_p4 = pnand %p1852_p3, %p1849_p2 }
  0xa2   :  { %1857 = shalt.err (!%p1854_p4)
}
  0xa3   :  { %s1858_s0 = scalar_lea.vmem %s127_s18, 32  ;;  %p1863_p6 = scmp.lt.s32.totalorder %s127_s18, %s127_s18 }
  0xa4   :  { %p1859_p5 = scmp.ne.s32.totalorder %s127_s18, %s1858_s0  ;;  %p1864_p7 = scmp.lt.s32.totalorder %s1858_s0, %s1858_s0 }
  0xa6   :  { %p1865_p8 = por %p1864_p7, %p1863_p6 }
  0xa8   :  { %p1866_p9 = pnand %p1865_p8, %p1859_p5 }
  0xaa   :  { %1869 = shalt.err (!%p1866_p9)
}
  0xab   :  { %129 = dma.hbm_to_vmem [thread:$0]  %s2400_s9, 32, %s127_s18, [#allocation18]  }
  0xac   :  { %1892 = dma.done.wait [#allocation3], 2048  }
  0xad   :  { %1893 = vsyncadd [#allocation3], 4294965248 }
  0xae   :  { %1894 = dma.done.wait [#allocation6], 32  }
  0xaf   :  { %1895 = vsyncadd [#allocation6], 4294967264 }
  0xb0   :  { %1896 = dma.done.wait [#allocation9], 2048  }
  0xb1   :  { %1897 = vsyncadd [#allocation9], 4294965248 }
  0xb2   :  { %1898 = dma.done.wait [#allocation12], 2064  }
  0xb3   :  { %1899 = vsyncadd [#allocation12], 4294965232 }
  0xb4   :  { %1900 = dma.done.wait [#allocation15], 48  }
  0xb5   :  { %1901 = vsyncadd [#allocation15], 4294967248 }
  0xb6   :  { %1902 = dma.done.wait [#allocation18], 32  }
  0xb7   :  { %1903 = vsyncadd [#allocation18], 4294967264  ;;  %v2123_v0 = vld [vmem:[#allocation8] sm:$0xff]   ;;  %v2125_v1 = vld [vmem:[#allocation8 + $0x8] sm:$0xff]   ;;  %vm875_vm0 = vcmask 1041408   ;;  %vm850_vm1 = vcmask 31744  }
  0xb8   :  { %1386 = vmatprep.subr.bf16.mxu1 %v2123_v0  ;;  %v800_v2 = vld [vmem:[#allocation16] sm:$0x3]  ;;  %v2130_v3 = vld [vmem:[#allocation8 + $0x10] sm:$0xff]   ;;  %v240_v6 = vld [vmem:[#allocation11 + $0x8] sm:$0xff]  ;;  %s1920_s9 = smov [#allocation19]  }
  0xb9   :  { %1387 = vmatpush3.bf16.msra.mxu1 %v2123_v0  ;;  %1616 = vmatprep.subr.msk.bf16.mxu0 %vm875_vm0, %v800_v2  ;;  %v2134_v4 = vsel %vm875_vm0, %v800_v2, 0  ;;  %v239_v5 = vld [vmem:[#allocation11] sm:$0xff]  ;;  %v241_v9 = vld [vmem:[#allocation11 + $0x10] sm:$0xff]  ;;  %v242_v12 = vld [vmem:[#allocation11 + $0x18] sm:$0xff]  ;;  %s1250_s12 = sshll.u32 %s1920_s9, 4  ;;  %s1251_s12 = int_to_ptr.vmem [resolvable:$true] %s1250_s12 }
  0xba   :  { %1388 = vmatprep.subr.bf16.mxu1 %v2125_v1  ;;  %1483 = vmatpush3.bf16.msra.mxu0 %v2134_v4  ;;  %v2137_v7 = vld [vmem:[#allocation13] ss:$0 sm:$0xff]  ;;  %v2139_v8 = vld [vmem:[#allocation14] ss:$0 sm:$0xff]  ;;  %v2148_v15 = vld [vmem:[#allocation8 + $0x18] sm:$0xff]   ;;  %s1870_s4 = scalar_lea.vmem %s1251_s12, 2048  ;;  %p1875_p11 = scmp.lt.s32.totalorder %s1251_s12, %s1251_s12 }
  0xbb   :  { %v262_v10 = vmul.f32 %v2137_v7, %v239_v5  ;;  %v263_v11 = vmul.f32 %v2137_v7, %v240_v6  ;;  %v264_v13 = vmul.f32 %v2137_v7, %v241_v9  ;;  %1617 = vmatprep.subr.msk.bf16.mxu0 %vm875_vm0, %v800_v2  ;;  %v265_v14 = vmul.f32 %v2137_v7, %v242_v12  ;;  %v243_v19 = vld [vmem:[#allocation11 + $0x20] sm:$0xff]  ;;  %v244_v20 = vld [vmem:[#allocation11 + $0x28] sm:$0xff]  ;;  %v245_v24 = vld [vmem:[#allocation11 + $0x30] sm:$0xff]  ;;  %p1871_p10 = scmp.ne.s32.totalorder %s1251_s12, %s1870_s4  ;;  %p1876_p12 = scmp.lt.s32.totalorder %s1870_s4, %s1870_s4 }
  0xbc   :  { %v266_v22 = vmul.f32 %v2137_v7, %v243_v19  ;;  %v267_v23 = vmul.f32 %v2137_v7, %v244_v20  ;;  %v246_v25 = vld [vmem:[#allocation11 + $0x38] sm:$0xff]  ;;  %v268_v29 = vmul.f32 %v2137_v7, %v245_v24  ;;  %v2164_v35 = vld [vmem:[#allocation8 + $0x20] sm:$0xff]   ;;  %v248_v42 = vld [vmem:[#allocation11 + $0x48] sm:$0xff] }
  0xbd   :  { %1389 = vmatpush3.bf16.msra.mxu1 %v2125_v1  ;;  %v285_v16 = vadd.f32 %v2139_v8, %v262_v10  ;;  %v286_v17 = vadd.f32 %v2139_v8, %v263_v11  ;;  %v287_v18 = vadd.f32 %v2139_v8, %v264_v13  ;;  %v288_v21 = vadd.f32 %v2139_v8, %v265_v14  ;;  %v247_v37 = vld [vmem:[#allocation11 + $0x40] sm:$0xff]  ;;  %v2179_v53 = vld [vmem:[#allocation8 + $0x28] sm:$0xff]   ;;  %v249_v56 = vld [vmem:[#allocation11 + $0x50] sm:$0xff]  ;;  %p1877_p13 = por %p1876_p12, %p1875_p11 }
  0xbe   :  { %1390 = vmatprep.subr.bf16.mxu1 %v2130_v3  ;;  %v289_v31 = vadd.f32 %v2139_v8, %v266_v22  ;;  %v290_v32 = vadd.f32 %v2139_v8, %v267_v23  ;;  %v269_v33 = vmul.f32 %v2137_v7, %v246_v25  ;;  %v291_v36 = vadd.f32 %v2139_v8, %v268_v29  ;;  %v250_v61 = vld [vmem:[#allocation11 + $0x58] sm:$0xff]  ;;  %v162_v9 = vld [vmem:[#allocation2 + $0x8] sm:$0xff]  ;;  %v2191_v14 = vld [vmem:[#allocation8 + $0x30] sm:$0xff]  }
  0xbf   :  { %v301_v26 = vmax.f32 %v285_v16, 0.0  ;;  %v302_v27 = vmax.f32 %v286_v17, 0.0  ;;  %v303_v28 = vmax.f32 %v287_v18, 0.0  ;;  %v304_v30 = vmax.f32 %v288_v21, 0.0  ;;  %v161_v6 = vld [vmem:[#allocation2] sm:$0xff]  ;;  %v163_v22 = vld [vmem:[#allocation2 + $0x10] sm:$0xff]  ;;  %p1878_p0 = pnand %p1877_p13, %p1871_p10 }
  0xc0   :  { %v305_v39 = vmax.f32 %v289_v31, 0.0  ;;  %v306_v40 = vmax.f32 %v290_v32, 0.0  ;;  %v292_v41 = vadd.f32 %v2139_v8, %v269_v33  ;;  %v307_v45 = vmax.f32 %v291_v36, 0.0  ;;  %v2188_v10 = vld [vmem:[#allocation5] ss:$0 sm:$0xff]  ;;  %v164_v33 = vld [vmem:[#allocation2 + $0x18] sm:$0xff] }
  0xc1   :  { %1391 = vmatpush3.bf16.msra.mxu1 %v2130_v3  ;;  %v2162_v34 = vpack.c.bf16 %v302_v27, %v301_v26  ;;  %v2167_v38 = vpack.c.bf16 %v304_v30, %v303_v28  ;;  %v270_v46 = vmul.f32 %v2137_v7, %v247_v37  ;;  %v271_v54 = vmul.f32 %v2137_v7, %v248_v42  ;;  %v2199_v21 = vld [vmem:[#allocation7] ss:$0 sm:$0xff] }
  0xc2   :  { %1392 = vmatprep.subr.bf16.mxu1 %v2148_v15  ;;  %v2176_v49 = vpack.c.bf16 %v306_v40, %v305_v39  ;;  %v308_v50 = vmax.f32 %v292_v41, 0.0  ;;  %v272_v16 = vmul.f32 %v2137_v7, %v249_v56  ;;  %v273_v20 = vmul.f32 %v2137_v7, %v250_v61  ;;  %v251_v41 = vld [vmem:[#allocation11 + $0x60] sm:$0xff] }
  0xc3   :  { %v810_v43 = vunpack.c.l.bf16 %v2162_v34  ;;  %v811_v44 = vunpack.c.h.bf16 %v2162_v34  ;;  %v812_v47 = vunpack.c.l.bf16 %v2167_v38  ;;  %v813_v48 = vunpack.c.h.bf16 %v2167_v38 }
  0xc4   :  { %v293_v55 = vadd.f32 %v2139_v8, %v270_v46  ;;  %v814_v59 = vunpack.c.l.bf16 %v2176_v49  ;;  %v815_v60 = vunpack.c.h.bf16 %v2176_v49  ;;  %v2185_v63 = vpack.c.bf16 %v308_v50, %v307_v45 }
  0xc5   :  { %1393 = vmatpush3.bf16.msra.mxu1 %v2148_v15  ;;  %v826_v51 = vsub.f32 %v301_v26, %v810_v43  ;;  %v827_v52 = vsub.f32 %v302_v27, %v811_v44  ;;  %v828_v57 = vsub.f32 %v303_v28, %v812_v47  ;;  %v829_v58 = vsub.f32 %v304_v30, %v813_v48  ;;  %v2205_v27 = vld [vmem:[#allocation17] sm:$0x3]  ;;  %v2207_v30 = vld [vmem:[#allocation8 + $0x38] sm:$0xff]  }
  0xc6   :  { %1394 = vmatprep.subr.bf16.mxu1 %v2164_v35  ;;  %v294_v2 = vadd.f32 %v2139_v8, %v271_v54  ;;  %v309_v5 = vmax.f32 %v293_v55, 0.0  ;;  %v830_v12 = vsub.f32 %v305_v39, %v814_v59  ;;  %v831_v13 = vsub.f32 %v306_v40, %v815_v60  ;;  %v253_v60 = vld [vmem:[#allocation11 + $0x70] sm:$0xff] }
  0xc7   :  { %v842_v62 = vpack.c.bf16 %v827_v52, %v826_v51  ;;  %v843_v11 = vpack.c.bf16 %v829_v58, %v828_v57  ;;  %v816_v17 = vunpack.c.l.bf16 %v2185_v63  ;;  %v817_v18 = vunpack.c.h.bf16 %v2185_v63 }
  0xc8   :  { %v310_v19 = vmax.f32 %v294_v2, 0.0  ;;  %v844_v23 = vpack.c.bf16 %v831_v13, %v830_v12  ;;  %v295_v24 = vadd.f32 %v2139_v8, %v272_v16  ;;  %v184_v25 = vmul.f32 %v2188_v10, %v161_v6  ;;  %v254_v13 = vld [vmem:[#allocation11 + $0x78] sm:$0xff] }
  0xc9   :  { %1395 = vmatpush3.bf16.msra.mxu1 %v2164_v35  ;;  %1484 = vmatprep.mubr.msk.bf16.mxu0 %vm850_vm1, %v842_v62  ;;  %v185_v26 = vmul.f32 %v2188_v10, %v162_v9  ;;  %v832_v28 = vsub.f32 %v307_v45, %v816_v17  ;;  %v833_v29 = vsub.f32 %v308_v50, %v817_v18  ;;  %v252_v45 = vld [vmem:[#allocation11 + $0x68] sm:$0xff]  ;;  %v165_v16 = vld [vmem:[#allocation2 + $0x20] sm:$0xff] }
  0xca   :  { %1396 = vmatprep.subr.bf16.mxu1 %v2179_v53  ;;  %1485 = vmatmul.mubr.msk.bf16.vlgmr.msra.gmra.mrb[0].mxu0 %vm850_vm1, %v843_v11  ;;  %v2209_v31 = vpack.c.bf16 %v310_v19, %v309_v5  ;;  %v296_v32 = vadd.f32 %v2139_v8, %v273_v20  ;;  %v311_v36 = vmax.f32 %v295_v24, 0.0  ;;  %v207_v37 = vadd.f32 %v2199_v21, %v184_v25 }
  0xcb   :  { %1501 = vmatpush3.bf16.msra.mxu0 %v2134_v4  ;;  %1488 = vmatprep.mubr.msk.bf16.mxu0 %vm850_vm1, %v844_v23  ;;  %v208_v39 = vadd.f32 %v2199_v21, %v185_v26  ;;  %v186_v40 = vmul.f32 %v2188_v10, %v163_v22  ;;  %v845_v42 = vpack.c.bf16 %v833_v29, %v832_v28  ;;  %v166_v26 = vld [vmem:[#allocation2 + $0x28] sm:$0xff] }
  0xcc   :  { %v818_v43 = vunpack.c.l.bf16 %v2209_v31  ;;  %v819_v44 = vunpack.c.h.bf16 %v2209_v31  ;;  %v312_v4 = vmax.f32 %v296_v32, 0.0  ;;  %1618 = vmatprep.subr.msk.bf16.mxu0 %vm875_vm0, %v2205_v27  ;;  %v223_v46 = vmax.f32 %v207_v37, 0.0 }
  0xcd   :  { %1397 = vmatpush3.bf16.msra.mxu1 %v2179_v53  ;;  %v224_v47 = vmax.f32 %v208_v39, 0.0  ;;  %v187_v48 = vmul.f32 %v2188_v10, %v164_v33  ;;  %v209_v50 = vadd.f32 %v2199_v21, %v186_v40  ;;  %v274_v55 = vmul.f32 %v2137_v7, %v251_v41  ;;  %v167_v41 = vld [vmem:[#allocation2 + $0x30] sm:$0xff] }
  0xce   :  { %1398 = vmatprep.subr.bf16.mxu1 %v2191_v14  ;;  %v834_v51 = vsub.f32 %v309_v5, %v818_v43  ;;  %v835_v52 = vsub.f32 %v310_v19, %v819_v44  ;;  %v2225_v54 = vpack.c.bf16 %v312_v4, %v311_v36  ;;  %v275_v59 = vmul.f32 %v2137_v7, %v252_v45 }
  0xcf   :  { %v2229_v56 = vpack.c.bf16 %v224_v47, %v223_v46  ;;  %v210_v57 = vadd.f32 %v2199_v21, %v187_v48  ;;  %v225_v58 = vmax.f32 %v209_v50, 0.0  ;;  %v297_v5 = vadd.f32 %v2139_v8, %v274_v55  ;;  %v169_v50 = vld [vmem:[#allocation2 + $0x40] sm:$0xff] }
  0xd0   :  { %v846_v61 = vpack.c.bf16 %v835_v52, %v834_v51  ;;  %v820_v62 = vunpack.c.l.bf16 %v2225_v54  ;;  %v821_v2 = vunpack.c.h.bf16 %v2225_v54  ;;  %v298_v12 = vadd.f32 %v2139_v8, %v275_v59  ;;  %v171_v59 = vld [vmem:[#allocation2 + $0x50] sm:$0xff] }
  0xd1   :  { %1399 = vmatpush3.bf16.msra.mxu1 %v2191_v14  ;;  %v357_v6 = vunpack.c.l.bf16 %v2229_v56  ;;  %v358_v9 = vunpack.c.h.bf16 %v2229_v56  ;;  %v226_v11 = vmax.f32 %v210_v57, 0.0  ;;  %v313_v19 = vmax.f32 %v297_v5, 0.0  ;;  %v170_v57 = vld [vmem:[#allocation2 + $0x48] sm:$0xff] }
  0xd2   :  { %1400 = vmatprep.subr.bf16.mxu1 %v2207_v30  ;;  %1489 = vmatmul.mubr.msk.bf16.gmra.mrb[4].mxu0 %vm850_vm1, %v845_v42  ;;  %v836_v17 = vsub.f32 %v311_v36, %v820_v62  ;;  %v837_v18 = vsub.f32 %v312_v4, %v821_v2  ;;  %v276_v20 = vmul.f32 %v2137_v7, %v253_v60  ;;  %v314_v25 = vmax.f32 %v298_v12, 0.0 }
  0xd3   :  { %1492 = vmatprep.mubr.msk.bf16.mxu0 %vm850_vm1, %v846_v61  ;;  %v373_v22 = vsub.f32 %v223_v46, %v357_v6  ;;  %v374_v23 = vsub.f32 %v224_v47, %v358_v9  ;;  %v2244_v24 = vpack.c.bf16 %v226_v11, %v225_v58  ;;  %v277_v29 = vmul.f32 %v2137_v7, %v254_v13  ;;  %v168_v7 = vld [vmem:[#allocation2 + $0x38] sm:$0xff] }
  0xd4   :  { %v847_v28 = vpack.c.bf16 %v837_v18, %v836_v17  ;;  %v299_v32 = vadd.f32 %v2139_v8, %v276_v20  ;;  %v188_v33 = vmul.f32 %v2188_v10, %v165_v16  ;;  %v2252_v40 = vpack.c.bf16 %v314_v25, %v313_v19 }
  0xd5   :  { %1401 = vmatpush3.bf16.msra.mxu1 %v2207_v30  ;;  %v389_v36 = vpack.c.bf16 %v374_v23, %v373_v22  ;;  %v359_v37 = vunpack.c.l.bf16 %v2244_v24  ;;  %v360_v39 = vunpack.c.h.bf16 %v2244_v24  ;;  %v300_v42 = vadd.f32 %v2139_v8, %v277_v29 }
  0xd6   :  { %1418 = vmatprep.subr.bf16.mxu1 %v2123_v0  ;;  %v315_v43 = vmax.f32 %v299_v32, 0.0  ;;  %v189_v44 = vmul.f32 %v2188_v10, %v166_v26  ;;  %v211_v4 = vadd.f32 %v2199_v21, %v188_v33  ;;  %v822_v47 = vunpack.c.l.bf16 %v2252_v40 }
  0xd7   :  { %1402 = vmatprep.mubr.bf16.mxu1 %v389_v36  ;;  %v375_v45 = vsub.f32 %v225_v58, %v359_v37  ;;  %v376_v46 = vsub.f32 %v226_v11, %v360_v39  ;;  %v823_v48 = vunpack.c.h.bf16 %v2252_v40  ;;  %v316_v51 = vmax.f32 %v300_v42, 0.0  ;;  %v172_v11 = vld [vmem:[#allocation2 + $0x58] sm:$0xff]  ;;  %v173_v42 = vld [vmem:[#allocation2 + $0x60] sm:$0xff] }
  0xd8   :  { %v212_v52 = vadd.f32 %v2199_v21, %v189_v44  ;;  %v227_v55 = vmax.f32 %v211_v4, 0.0  ;;  %v190_v8 = vmul.f32 %v2188_v10, %v167_v41  ;;  %v838_v61 = vsub.f32 %v313_v19, %v822_v47  ;;  %v174_v44 = vld [vmem:[#allocation2 + $0x68] sm:$0xff] }
  0xd9   :  { %v390_v60 = vpack.c.bf16 %v376_v46, %v375_v45  ;;  %v839_v62 = vsub.f32 %v314_v25, %v823_v48  ;;  %v191_v58 = vmul.f32 %v2188_v10, %v168_v7  ;;  %v2263_v2 = vpack.c.bf16 %v316_v51, %v315_v43 }
  0xda   :  { %1493 = vmatmul.mubr.msk.bf16.gmra.mrb[8].mxu0 %vm850_vm1, %v847_v28  ;;  %v228_v5 = vmax.f32 %v212_v52, 0.0  ;;  %v213_v6 = vadd.f32 %v2199_v21, %v190_v8  ;;  %v192_v9 = vmul.f32 %v2188_v10, %v169_v50  ;;  %v193_v16 = vmul.f32 %v2188_v10, %v170_v57  ;;  %v175_v8 = vld [vmem:[#allocation2 + $0x70] sm:$0xff] }
  0xdb   :  { %1403 = vmatmul.mubr.bf16.vlgmr.msra.gmra.mrb[0].mxu1 %v390_v60  ;;  %v848_v12 = vpack.c.bf16 %v839_v62, %v838_v61  ;;  %v214_v13 = vadd.f32 %v2199_v21, %v191_v58  ;;  %v194_v17 = vmul.f32 %v2188_v10, %v171_v59  ;;  %v824_v18 = vunpack.c.l.bf16 %v2263_v2 }
  0xdc   :  { %1419 = vmatpush3.bf16.msra.mxu1 %v2123_v0  ;;  %v825_v19 = vunpack.c.h.bf16 %v2263_v2  ;;  %v2273_v20 = vpack.c.bf16 %v228_v5, %v227_v55  ;;  %v229_v22 = vmax.f32 %v213_v6, 0.0  ;;  %v215_v25 = vadd.f32 %v2199_v21, %v192_v9  ;;  %v176_v6 = vld [vmem:[#allocation2 + $0x78] sm:$0xff] }
  0xdd   :  { %1420 = vmatprep.subr.bf16.mxu1 %v2125_v1  ;;  %1496 = vmatprep.mubr.msk.bf16.mxu0 %vm850_vm1, %v848_v12  ;;  %v230_v23 = vmax.f32 %v214_v13, 0.0  ;;  %v216_v26 = vadd.f32 %v2199_v21, %v193_v16  ;;  %v195_v28 = vmul.f32 %v2188_v10, %v172_v11  ;;  %v840_v29 = vsub.f32 %v315_v43, %v824_v18 }
  0xde   :  { %v841_v0 = vsub.f32 %v316_v51, %v825_v19  ;;  %v361_v32 = vunpack.c.l.bf16 %v2273_v20  ;;  %v362_v33 = vunpack.c.h.bf16 %v2273_v20  ;;  %v231_v37 = vmax.f32 %v215_v25, 0.0 }
  0xdf   :  { %v2282_v36 = vpack.c.bf16 %v230_v23, %v229_v22  ;;  %v232_v39 = vmax.f32 %v216_v26, 0.0  ;;  %v217_v41 = vadd.f32 %v2199_v21, %v194_v17  ;;  %v218_v43 = vadd.f32 %v2199_v21, %v195_v28 }
  0xe0   :  { %1421 = vmatpush3.bf16.msra.mxu1 %v2125_v1  ;;  %v849_v4 = vpack.c.bf16 %v841_v0, %v840_v29  ;;  %v377_v7 = vsub.f32 %v227_v55, %v361_v32  ;;  %v378_v45 = vsub.f32 %v228_v5, %v362_v33  ;;  %v196_v1 = vmul.f32 %v2188_v10, %v173_v42 }
  0xe1   :  { %v363_v46 = vunpack.c.l.bf16 %v2282_v36  ;;  %v364_v47 = vunpack.c.h.bf16 %v2282_v36  ;;  %1422 = vmatprep.subr.bf16.mxu1 %v2130_v3  ;;  %v2290_v48 = vpack.c.bf16 %v232_v39, %v231_v37  ;;  %v233_v50 = vmax.f32 %v217_v41, 0.0 }
  0xe2   :  { %1497 = vmatmul.mubr.msk.bf16.gmra.mrb[12].mxu0 %vm850_vm1, %v849_v4  ;;  %v391_v51 = vpack.c.bf16 %v378_v45, %v377_v7  ;;  %v234_v52 = vmax.f32 %v218_v43, 0.0  ;;  %v197_v55 = vmul.f32 %v2188_v10, %v174_v44  ;;  %v219_v58 = vadd.f32 %v2199_v21, %v196_v1  ;;  %v1642_v45 = vld [vmem:[#allocation10] sm:$0xff]  }
  0xe3   :  { %v379_v57 = vsub.f32 %v229_v22, %v363_v46  ;;  %v380_v59 = vsub.f32 %v230_v23, %v364_v47  ;;  %1502 = vmatprep.mubr.msk.bf16.mxu0 %vm850_vm1, %v2162_v34  ;;  %v365_v60 = vunpack.c.l.bf16 %v2290_v48  ;;  %v366_v61 = vunpack.c.h.bf16 %v2290_v48  ;;  %v1646_v43 = vld [vmem:[#allocation10 + $0x20] sm:$0xff]   ;;  %v1647_v46 = vld [vmem:[#allocation10 + $0x28] sm:$0xff]  }
  0xe4   :  { %1406 = vmatprep.mubr.bf16.mxu1 %v391_v51  ;;  %1423 = vmatpush3.bf16.msra.mxu1 %v2130_v3  ;;  %v2300_v62 = vpack.c.bf16 %v234_v52, %v233_v50  ;;  %v220_v5 = vadd.f32 %v2199_v21, %v197_v55  ;;  %v198_v13 = vmul.f32 %v2188_v10, %v175_v8  ;;  %v235_v18 = vmax.f32 %v219_v58, 0.0 }
  0xe5   :  { %v392_v9 = vpack.c.bf16 %v380_v59, %v379_v57  ;;  %1424 = vmatprep.subr.bf16.mxu1 %v2148_v15  ;;  %v381_v11 = vsub.f32 %v231_v37, %v365_v60  ;;  %v382_v12 = vsub.f32 %v232_v39, %v366_v61  ;;  %v199_v22 = vmul.f32 %v2188_v10, %v176_v6 }
  0xe6   :  { %v367_v16 = vunpack.c.l.bf16 %v2300_v62  ;;  %v368_v17 = vunpack.c.h.bf16 %v2300_v62  ;;  %v236_v3 = vmax.f32 %v220_v5, 0.0  ;;  %v221_v23 = vadd.f32 %v2199_v21, %v198_v13 }
  0xe7   :  { %1407 = vmatmul.mubr.bf16.gmra.mrb[4].mxu1 %v392_v9  ;;  %v393_v19 = vpack.c.bf16 %v382_v12, %v381_v11  ;;  %v1098_v29 = vsel %vm875_vm0, %v2205_v27, 0  ;;  %v222_v0 = vadd.f32 %v2199_v21, %v199_v22 }
  0xe8   :  { %1425 = vmatpush3.bf16.msra.mxu1 %v2148_v15  ;;  %v383_v25 = vsub.f32 %v233_v50, %v367_v16  ;;  %v384_v26 = vsub.f32 %v234_v52, %v368_v17  ;;  %v2311_v28 = vpack.c.bf16 %v236_v3, %v235_v18  ;;  %v237_v32 = vmax.f32 %v221_v23, 0.0 }
  0xe9   :  { %1410 = vmatprep.mubr.bf16.mxu1 %v393_v19  ;;  %1426 = vmatprep.subr.bf16.mxu1 %v2164_v35  ;;  %v238_v37 = vmax.f32 %v222_v0, 0.0 }
  0xea   :  { %1503 = vmatmul.mubr.msk.bf16.vlgmr.msra.gmra.mrb[0].mxu0 %vm850_vm1, %v2167_v38  ;;  %v369_v10 = vunpack.c.l.bf16 %v2311_v28  ;;  %v370_v15 = vunpack.c.h.bf16 %v2311_v28  ;;  %v394_v33 = vpack.c.bf16 %v384_v26, %v383_v25 }
  0xeb   :  { %1506 = vmatprep.mubr.msk.bf16.mxu0 %vm850_vm1, %v2176_v49  ;;  %1519 = vmatpush3.bf16.msra.mxu0 %v1098_v29  ;;  %v2325_v21 = vpack.c.bf16 %v238_v37, %v237_v32 }
  0xec   :  { %1427 = vmatpush3.bf16.msra.mxu1 %v2164_v35  ;;  %v385_v27 = vsub.f32 %v235_v18, %v369_v10  ;;  %v386_v39 = vsub.f32 %v236_v3, %v370_v15 }
  0xed   :  { %1428 = vmatprep.subr.bf16.mxu1 %v2179_v53  ;;  %v371_v42 = vunpack.c.l.bf16 %v2325_v21  ;;  %v372_v44 = vunpack.c.h.bf16 %v2325_v21 }
  0xee   :  { %v395_v41 = vpack.c.bf16 %v386_v39, %v385_v27 }
  0xef   :  { %1411 = vmatmul.mubr.bf16.gmra.mrb[8].mxu1 %v394_v33  ;;  %v387_v4 = vsub.f32 %v237_v32, %v371_v42  ;;  %v388_v7 = vsub.f32 %v238_v37, %v372_v44 }
  0xf0   :  { %1429 = vmatpush3.bf16.msra.mxu1 %v2179_v53  ;;  %1414 = vmatprep.mubr.bf16.mxu1 %v395_v41  ;;  %v1643_v53 = vld [vmem:[#allocation10 + $0x8] sm:$0xff]  }
  0xf1   :  { %1430 = vmatprep.subr.bf16.mxu1 %v2191_v14  ;;  %v396_v35 = vpack.c.bf16 %v388_v7, %v387_v4 }
  0xf2   :  { %1507 = vmatmul.mubr.msk.bf16.gmra.mrb[4].mxu0 %vm850_vm1, %v2185_v63 }
  0xf3   :  { %1510 = vmatprep.mubr.msk.bf16.mxu0 %vm850_vm1, %v2209_v31 }
  0xf4   :  { %1431 = vmatpush3.bf16.msra.mxu1 %v2191_v14  ;;  %v1644_v14 = vld [vmem:[#allocation10 + $0x10] sm:$0xff]  }
  0xf5   :  { %1432 = vmatprep.subr.bf16.mxu1 %v2207_v30 }
  0xf7   :  { %1415 = vmatmul.mubr.bf16.gmra.mrb[12].mxu1 %v396_v35 }
  0xf8   :  { %1433 = vmatpush3.bf16.msra.mxu1 %v2207_v30  ;;  %1434 = vmatprep.mubr.bf16.mxu1 %v2229_v56  ;;  %v1645_v30 = vld [vmem:[#allocation10 + $0x18] sm:$0xff]  }
  0xf9   :  { %1450 = vmatprep.subr.bf16.mxu1 %v1642_v45 }
  0xfa   :  { %1511 = vmatmul.mubr.msk.bf16.gmra.mrb[8].mxu0 %vm850_vm1, %v2225_v54 }
  0xfb   :  { %1514 = vmatprep.mubr.msk.bf16.mxu0 %vm850_vm1, %v2252_v40 }
  0xff   :  { %1435 = vmatmul.mubr.bf16.vlgmr.msra.gmra.mrb[0].mxu1 %v2244_v24 }
 0x100   :  { %1451 = vmatpush3.bf16.msra.mxu1 %v1642_v45  ;;  %1438 = vmatprep.mubr.bf16.mxu1 %v2273_v20 }
 0x101   :  { %1452 = vmatprep.subr.bf16.mxu1 %v1643_v53 }
 0x102   :  { %1515 = vmatmul.mubr.msk.bf16.gmra.mrb[12].mxu0 %vm850_vm1, %v2263_v2 }
 0x103   :  { %1520 = vmatprep.mubr.msk.bf16.mxu0 %vm850_vm1, %v2162_v34  ;;  %v1648_v34 = vld [vmem:[#allocation10 + $0x30] sm:$0xff]  }
 0x104   :  { %1453 = vmatpush3.bf16.msra.mxu1 %v1643_v53 }
 0x105   :  { %1454 = vmatprep.subr.bf16.mxu1 %v1644_v14 }
 0x107   :  { %1439 = vmatmul.mubr.bf16.gmra.mrb[4].mxu1 %v2282_v36 }
 0x108   :  { %1455 = vmatpush3.bf16.msra.mxu1 %v1644_v14  ;;  %1442 = vmatprep.mubr.bf16.mxu1 %v2290_v48 }
 0x109   :  { %1456 = vmatprep.subr.bf16.mxu1 %v1645_v30 }
 0x10a   :  { %1521 = vmatmul.mubr.msk.bf16.vlgmr.msra.gmra.mrb[0].mxu0 %vm850_vm1, %v2167_v38  ;;  %v1649_v38 = vld [vmem:[#allocation10 + $0x38] sm:$0xff]  }
 0x10b   :  { %1524 = vmatprep.mubr.msk.bf16.mxu0 %vm850_vm1, %v2176_v49 }
 0x10c   :  { %1457 = vmatpush3.bf16.msra.mxu1 %v1645_v30 }
 0x10d   :  { %1458 = vmatprep.subr.bf16.mxu1 %v1646_v43 }
 0x10f   :  { %1443 = vmatmul.mubr.bf16.gmra.mrb[8].mxu1 %v2300_v62 }
 0x110   :  { %1459 = vmatpush3.bf16.msra.mxu1 %v1646_v43  ;;  %1446 = vmatprep.mubr.bf16.mxu1 %v2311_v28 }
 0x111   :  { %1460 = vmatprep.subr.bf16.mxu1 %v1647_v46 }
 0x112   :  { %1525 = vmatmul.mubr.msk.bf16.gmra.mrb[4].mxu0 %vm850_vm1, %v2185_v63 }
 0x113   :  { %1528 = vmatprep.mubr.msk.bf16.mxu0 %vm850_vm1, %v2209_v31 }
 0x114   :  { %1461 = vmatpush3.bf16.msra.mxu1 %v1647_v46 }
 0x115   :  { %1462 = vmatprep.subr.bf16.mxu1 %v1648_v34 }
 0x117   :  { %1447 = vmatmul.mubr.bf16.gmra.mrb[12].mxu1 %v2325_v21 }
 0x118   :  { %1463 = vmatpush3.bf16.msra.mxu1 %v1648_v34  ;;  %1466 = vmatprep.mubr.bf16.mxu1 %v2229_v56 }
 0x119   :  { %1464 = vmatprep.subr.bf16.mxu1 %v1649_v38 }
 0x11a   :  { %1529 = vmatmul.mubr.msk.bf16.gmra.mrb[8].mxu0 %vm850_vm1, %v2225_v54 }
 0x11b   :  { %1532 = vmatprep.mubr.msk.bf16.mxu0 %vm850_vm1, %v2252_v40 }
 0x11c   :  { %1465 = vmatpush3.bf16.msra.mxu1 %v1649_v38 }
 0x11f   :  { %1467 = vmatmul.mubr.bf16.vlgmr.msra.gmra.mrb[0].mxu1 %v2244_v24 }
 0x120   :  { %1470 = vmatprep.mubr.bf16.mxu1 %v2273_v20 }
 0x122   :  { %1533 = vmatmul.mubr.msk.bf16.gmra.mrb[12].mxu0 %vm850_vm1, %v2263_v2 }
 0x127   :  { %1471 = vmatmul.mubr.bf16.gmra.mrb[4].mxu1 %v2282_v36 }
 0x128   :  { %1474 = vmatprep.mubr.bf16.mxu1 %v2290_v48 }
 0x12f   :  { %1475 = vmatmul.mubr.bf16.gmra.mrb[8].mxu1 %v2300_v62 }
 0x130   :  { %1478 = vmatprep.mubr.bf16.mxu1 %v2311_v28 }
 0x137   :  { %1479 = vmatmul.mubr.bf16.gmra.mrb[12].mxu1 %v2325_v21 }
 0x1dd   :  { %v1522_v49 = vpop.f32.mrb[0].mxu0 }
 0x1de   :  { %v1134_v63 = vpop.f32.mrb[1].mxu0 }
 0x1df   :  { %v1523_v31 = vpop.f32.mrb[2].mxu0 }
 0x1e0   :  { %v1137_v54 = vpop.f32.mrb[3].mxu0 }
 0x1e5   :  { %v1526_v56 = vpop.f32.mrb[4].mxu0 }
 0x1e6   :  { %v1150_v24 = vpop.f32.mrb[5].mxu0 }
 0x1e7   :  { %v1527_v40 = vpop.f32.mrb[6].mxu0 }
 0x1e8   :  { %v1153_v20 = vpop.f32.mrb[7].mxu0 }
 0x1ed   :  { %v1530_v47 = vpop.f32.mrb[8].mxu0 }
 0x1ee   :  { %v1166_v2 = vpop.f32.mrb[9].mxu0 }
 0x1ef   :  { %v1531_v50 = vpop.f32.mrb[10].mxu0 }
 0x1f0   :  { %v1169_v36 = vpop.f32.mrb[11].mxu0 }
 0x1f2   :  { %v1468_v51 = vpop.f32.mrb[0].mxu1 }
 0x1f3   :  { %v1536_v48 = vadd.f32 %v1522_v49, %v1468_v51  ;;  %v721_v52 = vpop.f32.mrb[1].mxu1 }
 0x1f4   :  { %v1537_v1 = vadd.f32 %v1134_v63, %v721_v52  ;;  %v1469_v55 = vpop.f32.mrb[2].mxu1 }
 0x1f5   :  { %1231 = vst [vmem:[#allocation19 + $0x10] sm:$0xff] %v1536_v48  ;;  %v1538_v8 = vadd.f32 %v1523_v31, %v1469_v55  ;;  %v724_v57 = vpop.f32.mrb[3].mxu1  ;;  %v1534_v59 = vpop.f32.mrb[12].mxu0 }
 0x1f6   :  { %1229 = vst [vmem:[#allocation19] sm:$0xff] %v1537_v1  ;;  %v1539_v60 = vadd.f32 %v1137_v54, %v724_v57  ;;  %v1182_v61 = vpop.f32.mrb[13].mxu0 }
 0x1f7   :  { %1232 = vst [vmem:[#allocation19 + $0x18] sm:$0xff] %v1538_v8  ;;  %v1535_v62 = vpop.f32.mrb[14].mxu0 }
 0x1f8   :  { %1230 = vst [vmem:[#allocation19 + $0x8] sm:$0xff] %v1539_v60  ;;  %v1185_v58 = vpop.f32.mrb[15].mxu0 }
 0x1fa   :  { %v1472_v5 = vpop.f32.mrb[4].mxu1 }
 0x1fb   :  { %v1540_v6 = vadd.f32 %v1526_v56, %v1472_v5  ;;  %v737_v9 = vpop.f32.mrb[5].mxu1 }
 0x1fc   :  { %v1541_v11 = vadd.f32 %v1150_v24, %v737_v9  ;;  %v1473_v12 = vpop.f32.mrb[6].mxu1 }
 0x1fd   :  { %1235 = vst [vmem:[#allocation19 + $0x30] sm:$0xff] %v1540_v6  ;;  %v1542_v13 = vadd.f32 %v1527_v40, %v1473_v12  ;;  %v740_v16 = vpop.f32.mrb[7].mxu1 }
 0x1fe   :  { %1233 = vst [vmem:[#allocation19 + $0x20] sm:$0xff] %v1541_v11  ;;  %v1543_v17 = vadd.f32 %v1153_v20, %v740_v16 }
 0x1ff   :  { %1236 = vst [vmem:[#allocation19 + $0x38] sm:$0xff] %v1542_v13 }
 0x200   :  { %1234 = vst [vmem:[#allocation19 + $0x28] sm:$0xff] %v1543_v17 }
 0x202   :  { %v1476_v18 = vpop.f32.mrb[8].mxu1 }
 0x203   :  { %v1544_v3 = vadd.f32 %v1530_v47, %v1476_v18  ;;  %v753_v19 = vpop.f32.mrb[9].mxu1 }
 0x204   :  { %v1545_v22 = vadd.f32 %v1166_v2, %v753_v19  ;;  %v1477_v23 = vpop.f32.mrb[10].mxu1 }
 0x205   :  { %1239 = vst [vmem:[#allocation19 + $0x50] sm:$0xff] %v1544_v3  ;;  %v1546_v25 = vadd.f32 %v1531_v50, %v1477_v23  ;;  %v756_v26 = vpop.f32.mrb[11].mxu1 }
 0x206   :  { %1237 = vst [vmem:[#allocation19 + $0x40] sm:$0xff] %v1545_v22  ;;  %v1547_v28 = vadd.f32 %v1169_v36, %v756_v26 }
 0x207   :  { %1240 = vst [vmem:[#allocation19 + $0x58] sm:$0xff] %v1546_v25 }
 0x208   :  { %1238 = vst [vmem:[#allocation19 + $0x48] sm:$0xff] %v1547_v28 }
 0x20a   :  { %v1480_v29 = vpop.f32.mrb[12].mxu1 }
 0x20b   :  { %v1548_v0 = vadd.f32 %v1534_v59, %v1480_v29  ;;  %v769_v32 = vpop.f32.mrb[13].mxu1 }
 0x20c   :  { %v1549_v10 = vadd.f32 %v1182_v61, %v769_v32  ;;  %v1481_v15 = vpop.f32.mrb[14].mxu1 }
 0x20d   :  { %1243 = vst [vmem:[#allocation19 + $0x70] sm:$0xff] %v1548_v0  ;;  %v1550_v33 = vadd.f32 %v1535_v62, %v1481_v15  ;;  %v772_v37 = vpop.f32.mrb[15].mxu1 }
 0x20e   :  { %1241 = vst [vmem:[#allocation19 + $0x60] sm:$0xff] %v1549_v10  ;;  %v1551_v27 = vadd.f32 %v1185_v58, %v772_v37 }
 0x20f   :  { %1244 = vst [vmem:[#allocation19 + $0x78] sm:$0xff] %v1550_v33 }
 0x210   :  { %1242 = vst [vmem:[#allocation19 + $0x68] sm:$0xff] %v1551_v27 }
 0x211   :  { %1881 = shalt.err (!%p1878_p0)
}
 0x212   :  { %s1882_s13 = scalar_lea.hbm %s2401_s10, 2048 }
 0x213   :  { %p1883_p1 = scmp.ne.s32.totalorder %s2401_s10, %s1882_s13  ;;  %p1886_p2 = scmp.lt.u32.totalorder %s1882_s13, %s2401_s10 }
 0x215   :  { %p1888_p3 = pnand %p1886_p2, %p1883_p1 }
 0x217   :  { %1891 = shalt.err (!%p1888_p3)
}
 0x218   :  { %1256 = dma.vmem_to_hbm [thread:$0]  %s1251_s12, 2048, %s2401_s10, [#allocation4], %s1912_s16, %s1912_s16, %s1913_s11  }
 0x219   :  { %1904 = dma.done.wait [#allocation4], 2048  }
 0x21a   :  { %1905 = vsyncadd [#allocation4], 4294965248 }
 0x21b   :  { %1260 = vsyncpa [#allocation3], 1 }
 0x21c   :  { %1261 = vsyncpa [#allocation6], 1 }
 0x21d   :  { %1262 = vsyncpa [#allocation9], 1 }
 0x21e   :  { %1263 = vsyncpa [#allocation12], 1 }
 0x21f   :  { %1264 = vsyncpa [#allocation15], 1 }
 0x220   :  { %1265 = vsyncpa [#allocation18], 1 }
 0x221   :  { %1266 = vsyncpa [#allocation4], 1 }

// kernel: preact_bottleneck.6
= control target key start
LH: loop header
LB: loop body
LE: loop exit
PB: predicated region body
PF: predicated region fallthrough
CT: control target
= control target key end

     0   :  { %s6353_s0 = inlined_call_operand.hbm [shape: f32[2,16,16,128], index: 0, kind: input, shape index: {}]   ;;  %s6354_s1 = inlined_call_operand.hbm [shape: f32[1,128], index: 1, kind: input, shape index: {}]   ;;  %s6355_s2 = inlined_call_operand.hbm [shape: f32[1,128], index: 2, kind: input, shape index: {}]   ;;  %s6356_s3 = inlined_call_operand.hbm [shape: bf16[3,384,128], index: 3, kind: input, shape index: {}]   ;;  %s6357_s4 = inlined_call_operand.hbm [shape: bf16[3,384,128], index: 4, kind: input, shape index: {}]   ;;  %s6358_s5 = inlined_call_operand.hbm [shape: f32[2,8,8,128], index: 5, kind: output, shape index: {0}]   ;;  %s6359_s6 = inlined_call_operand.hbm [shape: f32[1,128], index: 6, kind: output, shape index: {1}]   ;;  %s6360_s7 = inlined_call_operand.hbm [shape: f32[1,128], index: 7, kind: output, shape index: {2}]  }
   0x1   :  { %6371 = sst [smem:[#allocation24_spill]] %s6354_s1 }
   0x2   :  { %13 = vsyncpa [#allocation4], 0 }
   0x3   :  { %15 = vsyncpa [#allocation4 + $0x1], 0 }
   0x4   :  { %16 = vsyncpa [#allocation7], 0 }
   0x5   :  { %17 = vsyncpa [#allocation10], 0 }
   0x6   :  { %18 = vsyncpa [#allocation5], 0 }
   0x7   :  { %20 = vsyncpa [#allocation5 + $0x1], 0 }
   0x8   :  { %21 = vsyncpa [#allocation14], 0  ;;  %s5311_s24 = smov 0   ;;  %s5313_s25 = smov 0  }
   0x9   :  { %s5315_s26 = smov 0   ;;  %s5317_s27 = smov 0  }
   0xa   :  { %s5319_s28 = smov 0   ;;  %s5321_s29 = smov 0  }
   0xb LB: > { %6372 = sst [smem:[#allocation21_spill]] %s5234_s24  ;;  %s3628_s30 = sadd.s32 4294967295, %s5254_s29   ;;  %s5254_s29 = sphi %s5321_s29, %s27_s29   ;;  %s5250_s28 = sphi %s5319_s28, %s6400_s28   ;;  %s5246_s27 = sphi %s5317_s27, %s6399_s27   ;;  %s5242_s26 = sphi %s5315_s26, %s6398_s26   ;;  %s5238_s25 = sphi %s5313_s25, %s6397_s25   ;;  %s5234_s24 = sphi %s5311_s24, %s6396_s24  }
   0xc   : > { %s3629_s8 = sadd.s32 4294967294, %s5254_s29   ;;  %p59_p0 = scmp.ne.s32.totalorder %s5238_s25, %s5234_s24 }
   0xd   : > { %p5345_p1 = scmp.eq.s32.totalorder %s3628_s30, 0  ;;  %p5349_p2 = scmp.eq.s32.totalorder %s3628_s30, 1 }
   0xe   : > { %p175_p3 = scmp.eq.s32.totalorder %s3629_s8, 1  ;;  %p3630_p5 = scmp.ge.s32.totalorder %s5254_s29, 1 }
   0xf   : > { %s6373_s9 = scalar_select %p5345_p1, 1, 0 }
  0x10   : > { %s6374_s10 = scalar_select %p5349_p2, 1, 0 }
  0x11   : > { %p5355_p4 = por %p5345_p1, %p59_p0  ;;  %p5360_p6 = por %p175_p3, %p59_p0 }
  0x12   : > { %p224_p7 = scmp.lt.s32.totalorder %s5254_s29, 3  ;;  %s5256_s14 = smov [#allocation6]  }
  0x13   : > { %s6375_s11 = scalar_select %p5355_p4, 1, 0 }
  0x14   : > { %s6376_s12 = scalar_select %p5360_p6, 1, 0 }
  0x15   : > { %p5365_p8 = pnand %p3630_p5, %p224_p7  ;;  %s237_s15 = sshll.u32 %s5256_s14, 4  ;;  %s238_s15 = int_to_ptr.vmem [resolvable:$true] %s237_s15 }
  0x16   : > { %6377 = sst [smem:[#allocation22_spill]] %s6376_s12  ;;  %s5257_s16 = smov [#allocation9]  }
  0x17   : > { %s6378_s13 = scalar_select %p5365_p8, 1, 0 }
  0x18   : > { %p4724_p10 = pneg %p5365_p8  ;;  %s258_s17 = sshll.u32 %s5257_s16, 4  ;;  %s5378_s17 = int_to_ptr.vmem [resolvable:$true] %s258_s17 }
  0x19   : > { %s5258_s19 = smov [#allocation8]   ;;  %s6380_s1 = sld [smem:[#allocation24_spill]] }
  0x1a   : > { %p5374_p11 = pnand %p4724_p10, %p5345_p1  ;;  %s5380_s20 = sshll.u32 %s5258_s19, 4  ;;  %s249_s20 = int_to_ptr.vmem [resolvable:$true] %s5380_s20 }
  0x1c   : > { %p5390_p13 = pneg %p5374_p11 }
  0x1f   : > { %s4966_s23 = scalar_lea.hbm %s6380_s1, 16 }
  0x20   : > { %p4967_p12 = scmp.ne.s32.totalorder %s6380_s1, %s4966_s23  ;;  %p4973_p5 = scmp.lt.u32.totalorder %s4966_s23, %s6380_s1 }
  0x22   : > { %p4969_p0 = pnand %p5390_p13, %p4967_p12 }
  0x24   : > { %p4970_p3 = pneg %p4969_p0 }
  0x26   : > { %p4975_p7 = pnand %p4973_p5, %p4970_p3 }
  0x28   : > { %4978 = shalt.err (!%p4975_p7)
}
  0x29   : > { %s4979_s21 = scalar_lea.vmem %s238_s15, 16  ;;  %s4986_s22 = scalar_lea.vmem %s238_s15, 32 }
  0x2a   : > { %p4980_p10 = scmp.ne.s32.totalorder %s238_s15, %s4979_s21  ;;  %p4987_p1 = scmp.lt.s32.totalorder %s238_s15, %s238_s15 }
  0x2b   : > { %p4988_p4 = scmp.lt.s32.totalorder %s4986_s22, %s4979_s21 }
  0x2c   : > { %p4982_p9 = pnand %p4980_p10, %p5390_p13 }
  0x2d   : > { %p4989_p8 = por %p4988_p4, %p4987_p1 }
  0x2e   : > { %p4983_p6 = pneg %p4982_p9 }
  0x30   : > { %p4990_p2 = pnand %p4989_p8, %p4983_p6 }
  0x32   : > { %4993 = shalt.err (!%p4990_p2)
}
  0x33   : > { %4727 = dma.hbm_to_vmem [thread:$0]  (!%p5374_p11), %s6380_s1, 16, %s238_s15, [#allocation7]  }
  0x34   : > { %s4994_s19 = scalar_lea.hbm %s6356_s3, 9216 }
  0x35   : > { %p4995_p9 = scmp.ne.s32.totalorder %s6356_s3, %s4994_s19  ;;  %p5001_p2 = scmp.lt.u32.totalorder %s4994_s19, %s6356_s3 }
  0x37   : > { %p4997_p12 = pnand %p4995_p9, %p5390_p13 }
  0x39   : > { %p4998_p1 = pneg %p4997_p12 }
  0x3b   : > { %p5003_p4 = pnand %p5001_p2, %p4998_p1 }
  0x3d   : > { %5006 = shalt.err (!%p5003_p4)
}
  0x3e   : > { %s5007_s15 = scalar_lea.vmem %s5378_s17, 9216  ;;  %p5015_p3 = scmp.lt.s32.totalorder %s5378_s17, %s5378_s17 }
  0x3f   : > { %p5008_p6 = scmp.ne.s32.totalorder %s5378_s17, %s5007_s15  ;;  %p5016_p5 = scmp.lt.s32.totalorder %s5007_s15, %s5007_s15 }
  0x41   : > { %p5010_p8 = pnand %p5008_p6, %p5390_p13  ;;  %p5017_p7 = por %p5016_p5, %p5015_p3 }
  0x43   : > { %p5011_p0 = pneg %p5010_p8 }
  0x45   : > { %p5018_p10 = pnand %p5017_p7, %p5011_p0 }
  0x47   : > { %5021 = shalt.err (!%p5018_p10)
}
  0x48   : > { %s6368_s24 = smov 64   ;;  %s5260_s12 = smov 4  }
  0x49   : > { %4733 = dma.hbm_to_vmem [thread:$0]  (!%p5374_p11), %s6356_s3, 9216, %s5378_s17, [#allocation10], %s6368_s24, %s6368_s24, %s5260_s12  }
  0x4a   : > { %s5022_s19 = scalar_lea.hbm %s6355_s2, 16 }
  0x4b   : > { %p5023_p9 = scmp.ne.s32.totalorder %s6355_s2, %s5022_s19  ;;  %p5029_p2 = scmp.lt.u32.totalorder %s5022_s19, %s6355_s2 }
  0x4d   : > { %p5025_p12 = pnand %p5023_p9, %p5390_p13 }
  0x4f   : > { %p5026_p1 = pneg %p5025_p12 }
  0x51   : > { %p5031_p4 = pnand %p5029_p2, %p5026_p1 }
  0x53   : > { %5034 = shalt.err (!%p5031_p4)
}
  0x54   : > { %s5035_s30 = scalar_lea.vmem %s249_s20, 16  ;;  %s5042_s17 = scalar_lea.vmem %s249_s20, 32 }
  0x55   : > { %p5036_p6 = scmp.ne.s32.totalorder %s249_s20, %s5035_s30  ;;  %p5043_p3 = scmp.lt.s32.totalorder %s249_s20, %s249_s20 }
  0x56   : > { %p5044_p5 = scmp.lt.s32.totalorder %s5042_s17, %s5035_s30 }
  0x57   : > { %p5038_p8 = pnand %p5036_p6, %p5390_p13 }
  0x58   : > { %p5045_p7 = por %p5044_p5, %p5043_p3 }
  0x59   : > { %p5039_p0 = pneg %p5038_p8 }
  0x5b   : > { %p5046_p10 = pnand %p5045_p7, %p5039_p0 }
  0x5d   : > { %5049 = shalt.err (!%p5046_p10)
}
  0x5e   : > { %4730 = dma.hbm_to_vmem [thread:$0]  (!%p5374_p11), %s6355_s2, 16, %s249_s20, [#allocation7]  }
  0x5f   : > { %s5261_s1 = smov [#allocation11]   ;;  %s5050_s22 = scalar_lea.hbm %s6357_s4, 9216 }
  0x60   : > { %s271_s16 = sshll.u32 %s5261_s1, 4  ;;  %p5051_p9 = scmp.ne.s32.totalorder %s6357_s4, %s5050_s22  ;;  %s272_s16 = int_to_ptr.vmem [resolvable:$true] %s271_s16 }
  0x61   : > { %p5057_p2 = scmp.lt.u32.totalorder %s5050_s22, %s6357_s4 }
  0x62   : > { %p5053_p12 = pnand %p5051_p9, %p5390_p13 }
  0x64   : > { %p5054_p1 = pneg %p5053_p12 }
  0x66   : > { %p5059_p4 = pnand %p5057_p2, %p5054_p1 }
  0x68   : > { %5062 = shalt.err (!%p5059_p4)
}
  0x69   : > { %s5063_s20 = scalar_lea.vmem %s272_s16, 9216  ;;  %p5071_p3 = scmp.lt.s32.totalorder %s272_s16, %s272_s16 }
  0x6a   : > { %p5064_p6 = scmp.ne.s32.totalorder %s272_s16, %s5063_s20  ;;  %p5072_p5 = scmp.lt.s32.totalorder %s5063_s20, %s5063_s20 }
  0x6c   : > { %p5066_p8 = pnand %p5064_p6, %p5390_p13  ;;  %p5073_p7 = por %p5072_p5, %p5071_p3 }
  0x6e   : > { %p5067_p0 = pneg %p5066_p8 }
  0x70   : > { %p5074_p10 = pnand %p5073_p7, %p5067_p0 }
  0x72   : > { %5077 = shalt.err (!%p5074_p10)
}
  0x73   : > { %s6382_s24 = smov 64   ;;  %s39_s14 = sadd.s32 1, %s5250_s28 }
  0x74   : > { %4736 = dma.hbm_to_vmem [thread:$0]  (!%p5374_p11), %s6357_s4, 9216, %s272_s16, [#allocation10], %s6382_s24, %s6382_s24, %s5260_s12  }
  0x75   : > { %s46_s18 = sadd.s32 1, %s5242_s26  ;;  %p41_p13 = scmp.ge.s32.totalorder %s39_s14, 2 }
  0x76   : > { %p53_p9 = scmp.ne.s32.totalorder %s5242_s26, %s5238_s25  ;;  %p54_p12 = scmp.eq.s32.totalorder %s5254_s29, 0 }
  0x77   : > { %p4749_p1 = scmp.lt.s32.totalorder %s5254_s29, 2  ;;  %s6402_s14 = smov (%p41_p13, %s39_s14), 0 }
  0x78   : > { %p55_p2 = por %p54_p12, %p53_p9  ;;  %p6383_p4 = scmp.ne.s32.totalorder %s6374_s10, 0 }
  0x79   : > { %s43_s19 = ssub.s32 %s5250_s28, %s6402_s14  ;;  %s285_s21 = sand.u32 1, %s5242_s26  }
  0x7a   : > { %p5482_p6 = por %p6383_p4, %p53_p9  ;;  %p44_p8 = scmp.eq.s32.totalorder %s43_s19, 0 }
  0x7b   : > { %s3636_s12 = sshll.u32 %s285_s21, 8  ;;  %s3873_s16 = sshll.u32 %s5250_s28, 12 }
  0x7c   : > { %s5491_s22 = scalar_select %p44_p8, %s5242_s26, %s46_s18  }
  0x7d   : > { %s5496_s17 = scalar_lea.hbm %s6353_s0, %s3873_s16  ;;  %s289_s20 = scalar_lea.vmem [#allocation3], %s3636_s12 }
  0x7e   : > { %s296_s24 = sshll.u32 %s289_s20, 4  ;;  %p5500_p11 = pnand %p4749_p1, %p55_p2  ;;  %s5504_s24 = int_to_ptr.vmem [resolvable:$true] %s296_s24 }
  0x7f   : > { %s5506_s23 = scalar_lea.sflag [#allocation4], %s285_s21  ;;  %s5078_s18 = scalar_lea.hbm %s5496_s17, 4096 }
  0x80   : > { %p5079_p0 = scmp.ne.s32.totalorder %s5496_s17, %s5078_s18  ;;  %p5080_p3 = pneg %p5500_p11 }
  0x81   : > { %s5083_s16 = scalar_lea.hbm %s6353_s0, 8192  ;;  %p5084_p10 = scmp.lt.u32.totalorder %s5496_s17, %s6353_s0 }
  0x82   : > { %p5081_p5 = pnand %p5080_p3, %p5079_p0  ;;  %p5085_p13 = scmp.lt.u32.totalorder %s5083_s16, %s5078_s18 }
  0x83   : > { %p5087_p12 = scmp.lt.u32.totalorder %s5078_s18, %s5496_s17 }
  0x84   : > { %p5082_p7 = pneg %p5081_p5  ;;  %p5086_p9 = por %p5085_p13, %p5084_p10 }
  0x86   : > { %p5088_p1 = por %p5087_p12, %p5086_p9 }
  0x88   : > { %p5089_p2 = pnand %p5088_p1, %p5082_p7 }
  0x8a   : > { %5092 = shalt.err (!%p5089_p2)
}
  0x8b   : > { %s5093_s21 = scalar_lea.vmem %s5504_s24, 4096  ;;  %s5262_s20 = smov [#allocation3]  }
  0x8c   : > { %p5094_p4 = scmp.ne.s32.totalorder %s5504_s24, %s5093_s21  ;;  %s5098_s19 = sshll.u32 %s5262_s20, 4  ;;  %s5099_s19 = int_to_ptr.vmem [resolvable:$false] %s5098_s19 }
  0x8d   : > { %s5100_s12 = scalar_lea.vmem %s5099_s19, 8192  ;;  %p5101_p5 = scmp.lt.s32.totalorder %s5504_s24, %s5099_s19 }
  0x8e   : > { %p5096_p8 = pnand %p5094_p4, %p5080_p3  ;;  %p5102_p10 = scmp.lt.s32.totalorder %s5100_s12, %s5093_s21 }
  0x90   : > { %p5097_p0 = pneg %p5096_p8  ;;  %p5103_p13 = por %p5102_p10, %p5101_p5 }
  0x92   : > { %p5104_p9 = pnand %p5103_p13, %p5097_p0 }
  0x94   : > { %5107 = shalt.err (!%p5104_p9)
}
  0x95   : > { %s5263_s18 = smov 128   ;;  %s5264_s16 = smov 8  }
  0x96   : > { %4740 = dma.hbm_to_vmem [thread:$0]  (!%p5500_p11), %s5496_s17, 4096, %s5504_s24, %s5506_s23, %s5263_s18, %s5263_s18, %s5264_s16  }
  0x97   : > { %p6386_p3 = scmp.ne.s32.totalorder %s6378_s13, 0 }
  0x99   : > { %308 = sbr.rel (%p6386_p3) target bundleno = 804 (0x324), region = 40 }
  0xa0   : > { %s5537_s15 = sand.u32 1, %s5238_s25   ;;  %p6387_p7 = scmp.ne.s32.totalorder %s6375_s11, 0 }
  0xa1   : > { %s3640_s30 = sshll.u32 %s5537_s15, 8  ;;  %s311_s21 = scalar_lea.sflag [#allocation4], %s5537_s15 }
  0xa2   : > { %s5541_s20 = scalar_lea.vmem [#allocation3], %s3640_s30 }
  0xa3   : > { %5213 = dma.done.wait (%p6387_p7), %s311_s21, 4096  }
  0xa4   : > { %5215 = vsyncadd (%p6387_p7), %s311_s21, 4294963200  ;;  %p6388_p11 = scmp.ne.s32.totalorder %s6373_s9, 0 }
  0xa6   : > { %5217 = dma.done.wait (%p6388_p11), [#allocation7], 32  }
  0xa7   : > { %5219 = vsyncadd (%p6388_p11), [#allocation7], 4294967264 }
  0xa8   : > { %5221 = dma.done.wait (%p6388_p11), [#allocation10], 18432  }
  0xa9   : > { %5223 = vsyncadd (%p6388_p11), [#allocation10], 4294948864  ;;  %s3645_s13 = sshll.u32 %s5537_s15, 6  ;;  %p363_p12 = scmp.eq.s32.totalorder %s5246_s27, 0 }
  0xaa   : > { %s5557_s17 = scalar_lea.vmem [#allocation12], %s3645_s13  ;;  %v5265_v0 = vmov (%p363_p12), 0.0  }
  0xab   : > { %368 = sbr.rel (!%p363_p12) target bundleno = 198 (0xc6), region = 64  ;;  %369 = vst [vmem:[#allocation2] sm:$0xff] (%p363_p12), %v5265_v0  ;;  %370 = vst [vmem:[#allocation2 + $0x8] sm:$0xff] (%p363_p12), %v5265_v0 }
  0xac   : > { %371 = vst [vmem:[#allocation2 + $0x10] sm:$0x3] (%p363_p12), %v5265_v0  ;;  %372 = vst [vmem:[#allocation2 + $0x18] sm:$0xff] (%p363_p12), %v5265_v0 }
  0xad   : > { %373 = vst [vmem:[#allocation2 + $0x20] sm:$0xff] (%p363_p12), %v5265_v0  ;;  %374 = vst [vmem:[#allocation2 + $0x28] sm:$0x3] (%p363_p12), %v5265_v0 }
  0xae   : > { %375 = vst [vmem:[#allocation2 + $0x30] sm:$0xff] (%p363_p12), %v5265_v0  ;;  %376 = vst [vmem:[#allocation2 + $0x38] sm:$0xff] (%p363_p12), %v5265_v0 }
  0xaf   : > { %377 = vst [vmem:[#allocation2 + $0x40] sm:$0x3] (%p363_p12), %v5265_v0  ;;  %378 = vst [vmem:[#allocation2 + $0x48] sm:$0xff] (%p363_p12), %v5265_v0 }
  0xb0   : > { %379 = vst [vmem:[#allocation2 + $0x50] sm:$0xff] (%p363_p12), %v5265_v0  ;;  %380 = vst [vmem:[#allocation2 + $0x58] sm:$0x3] (%p363_p12), %v5265_v0 }
  0xb1   : > { %381 = vst [vmem:[#allocation2 + $0x60] sm:$0xff] (%p363_p12), %v5265_v0  ;;  %382 = vst [vmem:[#allocation2 + $0x68] sm:$0xff] (%p363_p12), %v5265_v0 }
  0xb2   : > { %383 = vst [vmem:[#allocation2 + $0x70] sm:$0x3] %v5265_v0  ;;  %384 = vst [vmem:[#allocation2 + $0x78] sm:$0xff] %v5265_v0 }
  0xb3   : > { %385 = vst [vmem:[#allocation2 + $0x80] sm:$0xff] %v5265_v0  ;;  %386 = vst [vmem:[#allocation2 + $0x88] sm:$0x3] %v5265_v0 }
  0xb4   : > { %387 = vst [vmem:[#allocation2 + $0x90] sm:$0xff] %v5265_v0  ;;  %388 = vst [vmem:[#allocation2 + $0x98] sm:$0xff] %v5265_v0 }
  0xb5   : > { %389 = vst [vmem:[#allocation2 + $0xa0] sm:$0x3] %v5265_v0  ;;  %390 = vst [vmem:[#allocation2 + $0xa8] sm:$0xff] %v5265_v0 }
  0xb6   : > { %391 = vst [vmem:[#allocation2 + $0xb0] sm:$0xff] %v5265_v0  ;;  %392 = vst [vmem:[#allocation2 + $0xb8] sm:$0x3] %v5265_v0 }
  0xb7   : > { %393 = vst [vmem:[#allocation2 + $0xc0] sm:$0xff] %v5265_v0  ;;  %394 = vst [vmem:[#allocation2 + $0xc8] sm:$0xff] %v5265_v0 }
  0xb8   : > { %395 = vst [vmem:[#allocation2 + $0xd0] sm:$0x3] %v5265_v0  ;;  %396 = vst [vmem:[#allocation2 + $0xd8] sm:$0xff] %v5265_v0 }
  0xb9   : > { %397 = vst [vmem:[#allocation2 + $0xe0] sm:$0xff] %v5265_v0  ;;  %398 = vst [vmem:[#allocation2 + $0xe8] sm:$0x3] %v5265_v0 }
  0xba   : > { %399 = vst [vmem:[#allocation2 + $0xf0] sm:$0xff] %v5265_v0  ;;  %400 = vst [vmem:[#allocation2 + $0xf8] sm:$0xff] %v5265_v0 }
  0xbb   : > { %401 = vst [vmem:[#allocation2 + $0x100] sm:$0x3] %v5265_v0  ;;  %402 = vst [vmem:[#allocation2 + $0x108] sm:$0xff] %v5265_v0 }
  0xbc   : > { %403 = vst [vmem:[#allocation2 + $0x110] sm:$0xff] %v5265_v0  ;;  %404 = vst [vmem:[#allocation2 + $0x118] sm:$0x3] %v5265_v0 }
  0xbd   : > { %405 = vst [vmem:[#allocation2 + $0x120] sm:$0xff] %v5265_v0  ;;  %406 = vst [vmem:[#allocation2 + $0x128] sm:$0xff] %v5265_v0 }
  0xbe   : > { %407 = vst [vmem:[#allocation2 + $0x130] sm:$0x3] %v5265_v0  ;;  %408 = vst [vmem:[#allocation2 + $0x138] sm:$0xff] %v5265_v0 }
  0xbf   : > { %409 = vst [vmem:[#allocation2 + $0x140] sm:$0xff] %v5265_v0  ;;  %410 = vst [vmem:[#allocation2 + $0x148] sm:$0x3] %v5265_v0 }
  0xc0   : > { %411 = vst [vmem:[#allocation2 + $0x150] sm:$0xff] %v5265_v0  ;;  %412 = vst [vmem:[#allocation2 + $0x158] sm:$0xff] %v5265_v0 }
  0xc1   : > { %413 = vst [vmem:[#allocation2 + $0x160] sm:$0x3] %v5265_v0  ;;  %414 = vst [vmem:[#allocation2 + $0x168] sm:$0xff] %v5265_v0 }
  0xc2   : > { %415 = vst [vmem:[#allocation2 + $0x170] sm:$0xff] %v5265_v0  ;;  %416 = vst [vmem:[#allocation2 + $0x178] sm:$0x3] %v5265_v0 }
  0xc3   : > { %417 = vst [vmem:[#allocation2 + $0x180] sm:$0xff] %v5265_v0  ;;  %418 = vst [vmem:[#allocation2 + $0x188] sm:$0xff] %v5265_v0 }
  0xc4   : > { %419 = vst [vmem:[#allocation2 + $0x190] sm:$0x3] %v5265_v0  ;;  %423 = vst [vmem:[#allocation13] sm:$0x1] %v5265_v0 }
  0xc5   : > { %424 = vst [vmem:[#allocation15] sm:$0x1] %v5265_v0 }
  0xc6 PF: > { %v5559_v1 = vld [vmem:[#allocation9 + $0x40] sm:$0xff]   ;;  %v5567_v4 = vld [vmem:[#allocation9 + $0x48] sm:$0xff]   ;;  %v5577_v7 = vld [vmem:[#allocation9 + $0x50] sm:$0xff]   ;;  %s3875_s9 = sshll.u32 %s5246_s27, 10  ;;  %s3407_s11 = sshll.u32 %s5557_s17, 4  ;;  %s6254_s11 = int_to_ptr.vmem [resolvable:$true] %s3407_s11 }
  0xc7   : > { %v5561_v2 = vld [vmem:[#allocation9 + $0x80] sm:$0xff]   ;;  %3876 = vmatprep.subr.bf16.mxu0 %v5559_v1  ;;  %v5571_v5 = vld [vmem:[#allocation9 + $0x88] sm:$0xff]   ;;  %v5579_v8 = vld [vmem:[#allocation9 + $0x90] sm:$0xff]   ;;  %s6252_s23 = scalar_lea.hbm %s6358_s5, %s3875_s9  ;;  %s3392_s27 = scalar_lea.sflag [#allocation5], %s5537_s15 }
  0xc8   : > { %v5564_v3 = vld [vmem:[#allocation9] sm:$0xff]   ;;  %4344 = vmatprep.subr.bf16.mxu1 %v5561_v2  ;;  %v5574_v6 = vld [vmem:[#allocation9 + $0x8] sm:$0xff]   ;;  %v5583_v9 = vld [vmem:[#allocation9 + $0x10] sm:$0xff]   ;;  %s5108_s19 = scalar_lea.vmem %s6254_s11, 1024  ;;  %s5266_s12 = smov [#allocation12]  }
  0xc9   : > { %3877 = vmatpush3.bf16.msra.mxu0 %v5564_v3  ;;  %4345 = vmatpush3.bf16.msra.mxu1 %v5561_v2  ;;  %v5587_v10 = vld [vmem:[#allocation9 + $0x58] sm:$0xff]   ;;  %v5595_v13 = vld [vmem:[#allocation9 + $0x60] sm:$0xff]   ;;  %v5605_v16 = vld [vmem:[#allocation9 + $0x68] sm:$0xff]   ;;  %p5109_p1 = scmp.ne.s32.totalorder %s6254_s11, %s5108_s19  ;;  %s5112_s18 = sshll.u32 %s5266_s12, 4  ;;  %s5113_s18 = int_to_ptr.vmem [resolvable:$false] %s5112_s18 }
  0xca   : > { %3878 = vmatprep.subr.bf16.mxu0 %v5567_v4  ;;  %4346 = vmatprep.subr.bf16.mxu1 %v5571_v5  ;;  %v5589_v11 = vld [vmem:[#allocation9 + $0x98] sm:$0xff]   ;;  %v5599_v14 = vld [vmem:[#allocation9 + $0xa0] sm:$0xff]   ;;  %v5609_v17 = vld [vmem:[#allocation9 + $0xa8] sm:$0xff]   ;;  %s5114_s16 = scalar_lea.vmem %s5113_s18, 2048  ;;  %p5115_p8 = scmp.lt.s32.totalorder %s6254_s11, %s5113_s18 }
  0xcb   : > { %v5591_v12 = vld [vmem:[#allocation9 + $0x18] sm:$0xff]   ;;  %v5601_v15 = vld [vmem:[#allocation9 + $0x20] sm:$0xff]   ;;  %v5611_v18 = vld [vmem:[#allocation9 + $0x28] sm:$0xff]   ;;  %p5110_p2 = pnand %p5109_p1, %p5482_p6  ;;  %p5116_p0 = scmp.lt.s32.totalorder %s5114_s16, %s5108_s19 }
  0xcc   : > { %v5615_v19 = vld [vmem:[#allocation9 + $0x70] sm:$0xff]   ;;  %v5625_v22 = vld [vmem:[#allocation6] ss:$0 sm:$0xff]  ;;  %v5627_v23 = vld [vmem:[#allocation8] ss:$0 sm:$0xff] }
  0xcd   : > { %3879 = vmatpush3.bf16.msra.mxu0 %v5574_v6  ;;  %4347 = vmatpush3.bf16.msra.mxu1 %v5571_v5  ;;  %v5619_v20 = vld [vmem:[#allocation9 + $0xb0] sm:$0xff]   ;;  %6389 = vst [vmem:[#allocation23_spill] sm:$0xff] %v5627_v23  ;;  %v5632_v25 = vld [vmem:[#allocation9 + $0x78] sm:$0xff]   ;;  %p5111_p4 = pneg %p5110_p2  ;;  %p5117_p5 = por %p5116_p0, %p5115_p8 }
  0xce   : > { %3880 = vmatprep.subr.bf16.mxu0 %v5577_v7  ;;  %4348 = vmatprep.subr.bf16.mxu1 %v5579_v8  ;;  %v5621_v21 = vld [vmem:[#allocation9 + $0x30] sm:$0xff]   ;;  %v5634_v26 = vld [vmem:[#allocation9 + $0xb8] sm:$0xff]  }
  0xcf   : > { %v432_v24 = vld [vmem:[%s5541_s20 + $0x10] sm:$0xff]  ;;  %v433_v27 = vld [vmem:[%s5541_s20 + $0x18] sm:$0xff]  ;;  %p5118_p10 = pnand %p5117_p5, %p5111_p4 }
  0xd0   : > { %v470_v28 = vmul.f32 %v5625_v22, %v432_v24  ;;  %v5638_v29 = vld [vmem:[#allocation9 + $0x38] sm:$0xff]   ;;  %v471_v30 = vmul.f32 %v5625_v22, %v433_v27  ;;  %v436_v31 = vld [vmem:[%s5541_s20 + $0x30] sm:$0xff] }
  0xd1   : > { %3881 = vmatpush3.bf16.msra.mxu0 %v5583_v9  ;;  %4349 = vmatpush3.bf16.msra.mxu1 %v5579_v8  ;;  %v437_v32 = vld [vmem:[%s5541_s20 + $0x38] sm:$0xff]  ;;  %v440_v34 = vld [vmem:[%s5541_s20 + $0x50] sm:$0xff]  ;;  %v474_v36 = vmul.f32 %v5625_v22, %v436_v31 }
  0xd2   : > { %3882 = vmatprep.subr.bf16.mxu0 %v5587_v10  ;;  %4350 = vmatprep.subr.bf16.mxu1 %v5589_v11  ;;  %v508_v33 = vadd.f32 %v5627_v23, %v470_v28  ;;  %v441_v35 = vld [vmem:[%s5541_s20 + $0x58] sm:$0xff]  ;;  %v475_v37 = vmul.f32 %v5625_v22, %v437_v32  ;;  %v444_v38 = vld [vmem:[%s5541_s20 + $0x70] sm:$0xff]  ;;  %v509_v39 = vadd.f32 %v5627_v23, %v471_v30 }
  0xd3   : > { %v478_v40 = vmul.f32 %v5625_v22, %v440_v34  ;;  %v479_v41 = vmul.f32 %v5625_v22, %v441_v35  ;;  %v445_v42 = vld [vmem:[%s5541_s20 + $0x78] sm:$0xff]  ;;  %v448_v43 = vld [vmem:[%s5541_s20 + $0x90] sm:$0xff]  ;;  %v512_v46 = vadd.f32 %v5627_v23, %v474_v36  ;;  %v482_v48 = vmul.f32 %v5625_v22, %v444_v38 }
  0xd4   : > { %v449_v44 = vld [vmem:[%s5541_s20 + $0x98] sm:$0xff]  ;;  %v540_v45 = vmax.f32 %v508_v33, 0.0  ;;  %v513_v47 = vadd.f32 %v5627_v23, %v475_v37  ;;  %v541_v49 = vmax.f32 %v509_v39, 0.0  ;;  %v483_v52 = vmul.f32 %v5625_v22, %v445_v42  ;;  %v452_v53 = vld [vmem:[%s5541_s20 + $0xb0] sm:$0xff] }
  0xd5   : > { %3883 = vmatpush3.bf16.msra.mxu0 %v5591_v12  ;;  %4351 = vmatpush3.bf16.msra.mxu1 %v5589_v11  ;;  %v516_v50 = vadd.f32 %v5627_v23, %v478_v40  ;;  %v517_v51 = vadd.f32 %v5627_v23, %v479_v41  ;;  %v544_v54 = vmax.f32 %v512_v46, 0.0  ;;  %v486_v56 = vmul.f32 %v5625_v22, %v448_v43  ;;  %v453_v58 = vld [vmem:[%s5541_s20 + $0xb8] sm:$0xff]  ;;  %v456_v59 = vld [vmem:[%s5541_s20 + $0xd0] sm:$0xff] }
  0xd6   : > { %3884 = vmatprep.subr.bf16.mxu0 %v5595_v13  ;;  %4352 = vmatprep.subr.bf16.mxu1 %v5599_v14  ;;  %573 = vst [vmem:[#allocation2 + $0x31] sm:$0xff] %v540_v45  ;;  %v545_v55 = vmax.f32 %v513_v47, 0.0  ;;  %v487_v57 = vmul.f32 %v5625_v22, %v449_v44  ;;  %574 = vst [vmem:[#allocation2 + $0x39] sm:$0xff] %v541_v49  ;;  %v520_v62 = vadd.f32 %v5627_v23, %v482_v48  ;;  %v457_v31 = vld [vmem:[%s5541_s20 + $0xd8] sm:$0xff] }
  0xd7   : > { %v548_v60 = vmax.f32 %v516_v50, 0.0  ;;  %v549_v61 = vmax.f32 %v517_v51, 0.0  ;;  %v521_v63 = vadd.f32 %v5627_v23, %v483_v52  ;;  %577 = vst [vmem:[#allocation2 + $0x61] sm:$0xff] %v544_v54  ;;  %v524_v0 = vadd.f32 %v5627_v23, %v486_v56  ;;  %v606_v34 = vld [vmem:[#allocation2] ss:$2 sm:$0xff] }
  0xd8   : > { %578 = vst [vmem:[#allocation2 + $0x69] sm:$0xff] %v545_v55  ;;  %v525_v24 = vadd.f32 %v5627_v23, %v487_v57  ;;  %v490_v27 = vmul.f32 %v5625_v22, %v452_v53  ;;  %v552_v28 = vmax.f32 %v520_v62, 0.0  ;;  %v491_v32 = vmul.f32 %v5625_v22, %v453_v58  ;;  %v3664_v38 = vld [vmem:[#allocation2 + $0x2] ss:$2 sm:$0xff] }
  0xd9   : > { %3885 = vmatpush3.bf16.msra.mxu0 %v5601_v15  ;;  %4353 = vmatpush3.bf16.msra.mxu1 %v5599_v14  ;;  %581 = vst [vmem:[#allocation2 + $0x91] sm:$0xff] %v548_v60  ;;  %582 = vst [vmem:[#allocation2 + $0x99] sm:$0xff] %v549_v61  ;;  %v553_v30 = vmax.f32 %v521_v63, 0.0  ;;  %v494_v33 = vmul.f32 %v5625_v22, %v456_v59  ;;  %v556_v35 = vmax.f32 %v524_v0, 0.0 }
  0xda   : > { %3886 = vmatprep.subr.bf16.mxu0 %v5605_v16  ;;  %4354 = vmatprep.subr.bf16.mxu1 %v5609_v17  ;;  %v557_v36 = vmax.f32 %v525_v24, 0.0  ;;  %v528_v37 = vadd.f32 %v5627_v23, %v490_v27  ;;  %585 = vst [vmem:[#allocation2 + $0xc1] sm:$0xff] %v552_v28  ;;  %v529_v39 = vadd.f32 %v5627_v23, %v491_v32 }
  0xdb   : > { %586 = vst [vmem:[#allocation2 + $0xc9] sm:$0xff] %v553_v30  ;;  %v532_v40 = vadd.f32 %v5627_v23, %v494_v33  ;;  %589 = vst [vmem:[#allocation2 + $0xf1] sm:$0xff] %v556_v35  ;;  %v495_v41 = vmul.f32 %v5625_v22, %v457_v31 }
  0xdc   : > { %590 = vst [vmem:[#allocation2 + $0xf9] sm:$0xff] %v557_v36  ;;  %v560_v42 = vmax.f32 %v528_v37, 0.0  ;;  %v561_v43 = vmax.f32 %v529_v39, 0.0 }
  0xdd   : > { %3887 = vmatpush3.bf16.msra.mxu0 %v5611_v18  ;;  %4355 = vmatpush3.bf16.msra.mxu1 %v5609_v17  ;;  %v564_v44 = vmax.f32 %v532_v40, 0.0  ;;  %v3657_v45 = vld [vmem:[#allocation2 + $0x31] ss:$2 sm:$0xff]  ;;  %v3649_v46 = vld [vmem:[#allocation2 + $0x30] ss:$2 sm:$0xff]  ;;  %v533_v55 = vadd.f32 %v5627_v23, %v495_v41 }
  0xde   : > { %3888 = vmatprep.subr.bf16.mxu0 %v5615_v19  ;;  %4356 = vmatprep.subr.bf16.mxu1 %v5619_v20  ;;  %v3665_v47 = vld [vmem:[#allocation2 + $0x32] ss:$2 sm:$0xff]  ;;  %593 = vst [vmem:[#allocation2 + $0x121] sm:$0xff] %v560_v42  ;;  %v5688_v49 = vpack.c.bf16 %v3649_v46, %v606_v34  ;;  %594 = vst [vmem:[#allocation2 + $0x129] sm:$0xff] %v561_v43 }
  0xdf   : > { %v5690_v50 = vpack.c.bf16 %v3665_v47, %v3664_v38  ;;  %v3666_v51 = vld [vmem:[#allocation2 + $0x62] ss:$2 sm:$0xff]  ;;  %v3658_v52 = vld [vmem:[#allocation2 + $0x61] ss:$2 sm:$0xff]  ;;  %597 = vst [vmem:[#allocation2 + $0x151] sm:$0xff] %v564_v44 }
  0xe0   : > { %v3667_v53 = vld [vmem:[#allocation2 + $0x92] ss:$2 sm:$0xff]  ;;  %v3659_v54 = vld [vmem:[#allocation2 + $0x91] ss:$2 sm:$0xff]  ;;  %v761_v58 = vunpack.c.l.bf16 %v5688_v49  ;;  %v764_v59 = vunpack.c.h.bf16 %v5688_v49 }
  0xe1   : > { %3889 = vmatpush3.bf16.msra.mxu0 %v5621_v21  ;;  %4357 = vmatpush3.bf16.msra.mxu1 %v5619_v20  ;;  %v763_v60 = vunpack.c.l.bf16 %v5690_v50  ;;  %v766_v61 = vunpack.c.h.bf16 %v5690_v50  ;;  %v5699_v62 = vpack.c.bf16 %v3667_v53, %v3666_v51  ;;  %v5701_v63 = vpack.c.bf16 %v3659_v54, %v3658_v52  ;;  %v3650_v0 = vld [vmem:[#allocation2 + $0x60] ss:$2 sm:$0xff]  ;;  %v3651_v24 = vld [vmem:[#allocation2 + $0x90] ss:$2 sm:$0xff] }
  0xe2   : > { %3890 = vmatprep.subr.bf16.mxu0 %v5632_v25  ;;  %4358 = vmatprep.subr.bf16.mxu1 %v5634_v26  ;;  %v785_v30 = vsub.f32 %v606_v34, %v761_v58  ;;  %v788_v31 = vsub.f32 %v3649_v46, %v764_v59  ;;  %v3660_v32 = vld [vmem:[#allocation2 + $0xc1] ss:$2 sm:$0xff]  ;;  %v3652_v35 = vld [vmem:[#allocation2 + $0xc0] ss:$2 sm:$0xff]  ;;  %v5707_v46 = vpack.c.bf16 %v3651_v24, %v3650_v0 }
  0xe3   : > { %v3661_v33 = vld [vmem:[#allocation2 + $0xf1] ss:$2 sm:$0xff]  ;;  %v787_v36 = vsub.f32 %v3664_v38, %v763_v60  ;;  %v790_v37 = vsub.f32 %v3665_v47, %v766_v61  ;;  %v769_v39 = vunpack.c.l.bf16 %v5699_v62  ;;  %v772_v40 = vunpack.c.h.bf16 %v5699_v62  ;;  %v3653_v41 = vld [vmem:[#allocation2 + $0xf0] ss:$2 sm:$0xff] }
  0xe4   : > { %v809_v43 = vpack.c.bf16 %v788_v31, %v785_v30  ;;  %v768_v44 = vunpack.c.l.bf16 %v5701_v63  ;;  %v771_v23 = vunpack.c.h.bf16 %v5701_v63  ;;  %v5711_v58 = vpack.c.bf16 %v3653_v41, %v3652_v35  ;;  %v3669_v59 = vld [vmem:[#allocation2 + $0xf2] ss:$2 sm:$0xff] }
  0xe5   : > { %3891 = vmatpush3.bf16.msra.mxu0 %v5638_v29  ;;  %4359 = vmatpush3.bf16.msra.mxu1 %v5634_v26  ;;  %v796_v34 = vsub.f32 %v3667_v53, %v772_v40  ;;  %v767_v61 = vunpack.c.l.bf16 %v5707_v46 }
  0xe6   : > { %3928 = vmatprep.subr.bf16.mxu0 %v5559_v1  ;;  %4368 = vmatprep.subr.bf16.mxu1 %v5561_v2  ;;  %v3656_v1 = vld [vmem:[#allocation2 + $0x1] ss:$2 sm:$0xff]  ;;  %v792_v38 = vsub.f32 %v3658_v52, %v768_v44  ;;  %v795_v47 = vsub.f32 %v3659_v54, %v771_v23 }
  0xe7   : > { %v5686_v48 = vpack.c.bf16 %v3657_v45, %v3656_v1  ;;  %v791_v52 = vsub.f32 %v3650_v0, %v767_v61 }
  0xe8   : > { %v813_v53 = vpack.c.bf16 %v795_v47, %v792_v38 }
  0xe9   : > { %v762_v56 = vunpack.c.l.bf16 %v5686_v48  ;;  %v765_v57 = vunpack.c.h.bf16 %v5686_v48 }
  0xeb   : > { %v786_v27 = vsub.f32 %v3656_v1, %v762_v56  ;;  %v789_v28 = vsub.f32 %v3657_v45, %v765_v57  ;;  %v811_v1 = vpack.c.bf16 %v790_v37, %v787_v36  ;;  %v793_v45 = vsub.f32 %v3666_v51, %v769_v39  ;;  %v3668_v56 = vld [vmem:[#allocation2 + $0xc2] ss:$2 sm:$0xff] }
  0xec   : > { %v5709_v57 = vpack.c.bf16 %v3661_v33, %v3660_v32  ;;  %v565_v51 = vmax.f32 %v533_v55, 0.0  ;;  %v5719_v30 = vpack.c.bf16 %v3669_v59, %v3668_v56  ;;  %v776_v36 = vunpack.c.h.bf16 %v5711_v58 }
  0xed   : > { %v810_v42 = vpack.c.bf16 %v789_v28, %v786_v27  ;;  %4360 = vmatprep.mubr.bf16.mxu1 %v811_v1  ;;  %v814_v60 = vpack.c.bf16 %v796_v34, %v793_v45  ;;  %v770_v27 = vunpack.c.h.bf16 %v5707_v46 }
  0xee   : > { %v774_v28 = vunpack.c.l.bf16 %v5709_v57  ;;  %v777_v23 = vunpack.c.h.bf16 %v5709_v57  ;;  %598 = vst [vmem:[#allocation2 + $0x159] sm:$0xff] %v565_v51  ;;  %v775_v39 = vunpack.c.l.bf16 %v5719_v30 }
  0xef   : > { %997 = vmatprep.mubr.bf16.mxu0 %v810_v42  ;;  %4361 = vmatmul.mubr.bf16.vlgmr.msra.gmra.mrb[0].mxu1 %v814_v60  ;;  %v794_v54 = vsub.f32 %v3651_v24, %v770_v27  ;;  %v3662_v24 = vld [vmem:[#allocation2 + $0x121] ss:$2 sm:$0xff]  ;;  %v800_v42 = vsub.f32 %v3653_v41, %v776_v36  ;;  %v439_v36 = vld [vmem:[%s5541_s20 + $0x48] sm:$0xff] }
  0xf0   : > { %998 = vmatmul.mubr.bf16.vlgmr.msra.gmra.mrb[0].mxu0 %v809_v43  ;;  %4369 = vmatpush3.bf16.msra.mxu1 %v5561_v2  ;;  %v798_v31 = vsub.f32 %v3660_v32, %v774_v28  ;;  %v801_v55 = vsub.f32 %v3661_v33, %v777_v23  ;;  %v3654_v2 = vld [vmem:[#allocation2 + $0x120] ss:$2 sm:$0xff]  ;;  %v799_v32 = vsub.f32 %v3668_v56, %v775_v39  ;;  %v434_v28 = vld [vmem:[%s5541_s20 + $0x20] sm:$0xff]  ;;  %v435_v23 = vld [vmem:[%s5541_s20 + $0x28] sm:$0xff] }
  0xf1   : > { %3929 = vmatpush3.bf16.msra.mxu0 %v5564_v3  ;;  %1005 = vmatprep.mubr.bf16.mxu0 %v813_v53  ;;  %v773_v3 = vunpack.c.l.bf16 %v5711_v58  ;;  %v812_v37 = vpack.c.bf16 %v794_v54, %v791_v52  ;;  %v3670_v43 = vld [vmem:[#allocation2 + $0x122] ss:$2 sm:$0xff]  ;;  %v443_v39 = vld [vmem:[%s5541_s20 + $0x68] sm:$0xff] }
  0xf2   : > { %3930 = vmatprep.subr.bf16.mxu0 %v5567_v4  ;;  %4370 = vmatprep.subr.bf16.mxu1 %v5571_v5  ;;  %v778_v4 = vunpack.c.h.bf16 %v5719_v30  ;;  %v816_v0 = vpack.c.bf16 %v801_v55, %v798_v31  ;;  %v438_v31 = vld [vmem:[%s5541_s20 + $0x40] sm:$0xff]  ;;  %v472_v55 = vmul.f32 %v5625_v22, %v434_v28 }
  0xf3   : > { %v797_v40 = vsub.f32 %v3652_v35, %v773_v3  ;;  %v473_v3 = vmul.f32 %v5625_v22, %v435_v23 }
  0xf4   : > { %v802_v33 = vsub.f32 %v3669_v59, %v778_v4  ;;  %4371 = vmatpush3.bf16.msra.mxu1 %v5571_v5  ;;  %v476_v4 = vmul.f32 %v5625_v22, %v438_v31 }
  0xf5   : > { %3931 = vmatpush3.bf16.msra.mxu0 %v5574_v6  ;;  %4372 = vmatprep.subr.bf16.mxu1 %v5579_v8  ;;  %v3663_v6 = vld [vmem:[#allocation2 + $0x151] ss:$2 sm:$0xff]  ;;  %v3655_v1 = vld [vmem:[#allocation2 + $0x150] ss:$2 sm:$0xff]  ;;  %v815_v35 = vpack.c.bf16 %v800_v42, %v797_v40  ;;  %v477_v40 = vmul.f32 %v5625_v22, %v439_v36 }
  0xf6   : > { %3932 = vmatprep.subr.bf16.mxu0 %v5577_v7  ;;  %v817_v44 = vpack.c.bf16 %v802_v33, %v799_v32  ;;  %v3671_v45 = vld [vmem:[#allocation2 + $0x152] ss:$2 sm:$0xff]  ;;  %v5733_v7 = vpack.c.bf16 %v3663_v6, %v3662_v24  ;;  %v5735_v34 = vpack.c.bf16 %v3655_v1, %v3654_v2 }
  0xf7   : > { %v5737_v5 = vpack.c.bf16 %v3671_v45, %v3670_v43  ;;  %v4856_v42 = vld [vmem:[#allocation11 + $0x60] sm:$0xff]  }
  0xf8   : > { %1006 = vmatmul.mubr.bf16.gmra.mrb[4].mxu0 %v812_v37  ;;  %4364 = vmatprep.mubr.bf16.mxu1 %v817_v44  ;;  %v783_v41 = vunpack.c.h.bf16 %v5733_v7  ;;  %v779_v56 = vunpack.c.l.bf16 %v5735_v34  ;;  %v442_v37 = vld [vmem:[%s5541_s20 + $0x60] sm:$0xff] }
  0xf9   : > { %3933 = vmatpush3.bf16.msra.mxu0 %v5583_v9  ;;  %1013 = vmatprep.mubr.bf16.mxu0 %v816_v0  ;;  %v780_v9 = vunpack.c.l.bf16 %v5733_v7  ;;  %v781_v38 = vunpack.c.l.bf16 %v5737_v5  ;;  %v784_v47 = vunpack.c.h.bf16 %v5737_v5  ;;  %v4854_v0 = vld [vmem:[#allocation11 + $0x98] sm:$0xff]  }
  0xfa   : > { %3934 = vmatprep.subr.bf16.mxu0 %v5587_v10  ;;  %4373 = vmatpush3.bf16.msra.mxu1 %v5579_v8  ;;  %v782_v10 = vunpack.c.h.bf16 %v5735_v34  ;;  %v807_v59 = vsub.f32 %v3663_v6, %v783_v41  ;;  %v803_v51 = vsub.f32 %v3654_v2, %v779_v56  ;;  %v6390_v2 = vld [vmem:[#allocation23_spill] sm:$0xff]  ;;  %v480_v6 = vmul.f32 %v5625_v22, %v442_v37 }
  0xfb   : > { %4374 = vmatprep.subr.bf16.mxu1 %v5589_v11  ;;  %v804_v8 = vsub.f32 %v3662_v24, %v780_v9  ;;  %v805_v60 = vsub.f32 %v3670_v43, %v781_v38  ;;  %v808_v61 = vsub.f32 %v3671_v45, %v784_v47  ;;  %v4855_v24 = vld [vmem:[#allocation11 + $0x18] sm:$0xff]   ;;  %v510_v43 = vadd.f32 %v6390_v2, %v472_v55  ;;  %v447_v45 = vld [vmem:[%s5541_s20 + $0x88] sm:$0xff] }
  0xfc   : > { %v806_v53 = vsub.f32 %v3655_v1, %v782_v10  ;;  %v511_v44 = vadd.f32 %v6390_v2, %v473_v3  ;;  %v446_v1 = vld [vmem:[%s5541_s20 + $0x80] sm:$0xff]  ;;  %v481_v56 = vmul.f32 %v5625_v22, %v443_v39  ;;  %v514_v10 = vadd.f32 %v6390_v2, %v476_v4  ;;  %v451_v47 = vld [vmem:[%s5541_s20 + $0xa8] sm:$0xff] }
  0xfd   : > { %3935 = vmatpush3.bf16.msra.mxu0 %v5591_v12  ;;  %v819_v27 = vpack.c.bf16 %v807_v59, %v804_v8  ;;  %v820_v12 = vpack.c.bf16 %v808_v61, %v805_v60  ;;  %v450_v38 = vld [vmem:[%s5541_s20 + $0xa0] sm:$0xff]  ;;  %v542_v59 = vmax.f32 %v510_v43, 0.0  ;;  %v515_v61 = vadd.f32 %v6390_v2, %v477_v40  ;;  %v4861_v3 = vld [vmem:[#allocation11 + $0x28] sm:$0xff]   ;;  %v4864_v40 = vld [vmem:[#allocation11 + $0x30] sm:$0xff]  }
  0xfe   : > { %3936 = vmatprep.subr.bf16.mxu0 %v5595_v13  ;;  %4375 = vmatpush3.bf16.msra.mxu1 %v5589_v11  ;;  %v818_v13 = vpack.c.bf16 %v806_v53, %v803_v51  ;;  %v4844_v11 = vld [vmem:[#allocation11 + $0x40] sm:$0xff]   ;;  %v543_v60 = vmax.f32 %v511_v44, 0.0  ;;  %v4859_v53 = vld [vmem:[#allocation11 + $0x68] sm:$0xff]   ;;  %v4865_v44 = vld [vmem:[#allocation11 + $0x78] sm:$0xff]  }
  0xff   : > { %4376 = vmatprep.subr.bf16.mxu1 %v5599_v14  ;;  %4365 = vmatmul.mubr.bf16.gmra.mrb[4].mxu1 %v820_v12  ;;  %v4858_v8 = vld [vmem:[#allocation11 + $0x20] sm:$0xff]   ;;  %v519_v12 = vadd.f32 %v6390_v2, %v481_v56  ;;  %575 = vst [vmem:[#allocation2 + $0x49] sm:$0xff] %v542_v59  ;;  %v5842_v59 = vld [vmem:[#allocation9 + $0x148] sm:$0xff]  }
 0x100   : > { %1014 = vmatmul.mubr.bf16.gmra.mrb[8].mxu0 %v815_v35  ;;  %4384 = vmatprep.mubr.bf16.mxu1 %v5690_v50  ;;  %v5794_v35 = vld [vmem:[#allocation11 + $0xa0] sm:$0xff]   ;;  %576 = vst [vmem:[#allocation2 + $0x51] sm:$0xff] %v543_v60 }
 0x101   : > { %3937 = vmatpush3.bf16.msra.mxu0 %v5601_v15  ;;  %1021 = vmatprep.mubr.bf16.mxu0 %v819_v27  ;;  %v4846_v15 = vld [vmem:[#allocation11] sm:$0xff]   ;;  %v518_v27 = vadd.f32 %v6390_v2, %v480_v6 }
 0x102   : > { %3938 = vmatprep.subr.bf16.mxu0 %v5605_v16  ;;  %4377 = vmatpush3.bf16.msra.mxu1 %v5599_v14  ;;  %v4845_v14 = vld [vmem:[#allocation11 + $0x80] sm:$0xff]   ;;  %v4847_v16 = vld [vmem:[#allocation11 + $0x48] sm:$0xff]  }
 0x103   : > { %4378 = vmatprep.subr.bf16.mxu1 %v5609_v17  ;;  %v454_v51 = vld [vmem:[%s5541_s20 + $0xc0] sm:$0xff] }
 0x104   : > { %v5830_v56 = vld [vmem:[#allocation9 + $0x100] sm:$0xff]  }
 0x105   : > { %3939 = vmatpush3.bf16.msra.mxu0 %v5611_v18  ;;  %v4849_v18 = vld [vmem:[#allocation11 + $0x8] sm:$0xff]  }
 0x106   : > { %3940 = vmatprep.subr.bf16.mxu0 %v5615_v19  ;;  %4379 = vmatpush3.bf16.msra.mxu1 %v5609_v17  ;;  %v4848_v17 = vld [vmem:[#allocation11 + $0x88] sm:$0xff]   ;;  %v4850_v19 = vld [vmem:[#allocation11 + $0x50] sm:$0xff]  }
 0x107   : > { %4380 = vmatprep.subr.bf16.mxu1 %v5619_v20 }
 0x108   : > { %1022 = vmatmul.mubr.bf16.gmra.mrb[12].mxu0 %v818_v13  ;;  %v546_v13 = vmax.f32 %v514_v10, 0.0 }
 0x109   : > { %3941 = vmatpush3.bf16.msra.mxu0 %v5621_v21  ;;  %1127 = vmatprep.mubr.bf16.mxu0 %v5686_v48  ;;  %v4852_v21 = vld [vmem:[#allocation11 + $0x10] sm:$0xff]  }
 0x10a   : > { %3942 = vmatprep.subr.bf16.mxu0 %v5632_v25  ;;  %4381 = vmatpush3.bf16.msra.mxu1 %v5619_v20  ;;  %v4851_v20 = vld [vmem:[#allocation11 + $0x90] sm:$0xff]   ;;  %v4853_v25 = vld [vmem:[#allocation11 + $0x58] sm:$0xff]   ;;  %579 = vst [vmem:[#allocation2 + $0x79] sm:$0xff] %v546_v13 }
 0x10b   : > { %4382 = vmatprep.subr.bf16.mxu1 %v5634_v26  ;;  %v5863_v13 = vld [vmem:[#allocation9 + $0x118] sm:$0xff]  }
 0x10d   : > { %3943 = vmatpush3.bf16.msra.mxu0 %v5638_v29  ;;  %v431_v29 = vld [vmem:[%s5541_s20 + $0x8] sm:$0xff] }
 0x10e   : > { %3980 = vmatprep.subr.bf16.mxu0 %v4844_v11  ;;  %4383 = vmatpush3.bf16.msra.mxu1 %v5634_v26  ;;  %v430_v26 = vld [vmem:[%s5541_s20] sm:$0xff]  ;;  %v469_v54 = vmul.f32 %v5625_v22, %v431_v29  ;;  %v484_v11 = vmul.f32 %v5625_v22, %v446_v1  ;;  %v4860_v29 = vld [vmem:[#allocation11 + $0xa8] sm:$0xff]  }
 0x10f   : > { %4392 = vmatprep.subr.bf16.mxu1 %v4845_v14  ;;  %v468_v52 = vmul.f32 %v5625_v22, %v430_v26  ;;  %v492_v26 = vmul.f32 %v5625_v22, %v454_v51  ;;  %v4866_v1 = vld [vmem:[#allocation11 + $0xb8] sm:$0xff]   ;;  %v5856_v51 = vld [vmem:[#allocation9 + $0x150] sm:$0xff]  }
 0x110   : > { %1128 = vmatmul.mubr.bf16.vlgmr.msra.gmra.mrb[16].mxu0 %v5688_v49  ;;  %v507_v33 = vadd.f32 %v6390_v2, %v469_v54 }
 0x111   : > { %3981 = vmatpush3.bf16.msra.mxu0 %v4846_v15  ;;  %1135 = vmatprep.mubr.bf16.mxu0 %v5701_v63  ;;  %v506_v32 = vadd.f32 %v6390_v2, %v468_v52  ;;  %v547_v15 = vmax.f32 %v515_v61, 0.0  ;;  %v530_v55 = vadd.f32 %v6390_v2, %v492_v26  ;;  %v5848_v61 = vld [vmem:[#allocation9 + $0xc8] sm:$0xff]  }
 0x112   : > { %4385 = vmatmul.mubr.bf16.vlgmr.msra.gmra.mrb[0].mxu1 %v5699_v62  ;;  %3982 = vmatprep.subr.bf16.mxu0 %v4847_v16  ;;  %v539_v41 = vmax.f32 %v507_v33, 0.0  ;;  %v550_v16 = vmax.f32 %v518_v27, 0.0  ;;  %v4863_v33 = vld [vmem:[#allocation11 + $0xb0] sm:$0xff]   ;;  %v5894_v26 = vld [vmem:[#allocation9 + $0x168] sm:$0xff]  }
 0x113   : > { %4393 = vmatpush3.bf16.msra.mxu1 %v4845_v14  ;;  %4388 = vmatprep.mubr.bf16.mxu1 %v5719_v30  ;;  %v538_v9 = vmax.f32 %v506_v32, 0.0  ;;  %v485_v14 = vmul.f32 %v5625_v22, %v447_v45  ;;  %580 = vst [vmem:[#allocation2 + $0x81] sm:$0xff] %v547_v15  ;;  %v459_v32 = vld [vmem:[%s5541_s20 + $0xe8] sm:$0xff]  ;;  %v5852_v27 = vld [vmem:[#allocation9 + $0x110] sm:$0xff]  }
 0x114   : > { %4394 = vmatprep.subr.bf16.mxu1 %v4848_v17  ;;  %572 = vst [vmem:[#allocation2 + $0x21] sm:$0xff] %v539_v41  ;;  %583 = vst [vmem:[#allocation2 + $0xa9] sm:$0xff] %v550_v16  ;;  %v497_v6 = vmul.f32 %v5625_v22, %v459_v32  ;;  %v5881_v16 = vld [vmem:[#allocation9 + $0x160] sm:$0xff]  }
 0x115   : > { %3983 = vmatpush3.bf16.msra.mxu0 %v4849_v18  ;;  %571 = vst [vmem:[#allocation2 + $0x19] sm:$0xff] %v538_v9  ;;  %v489_v18 = vmul.f32 %v5625_v22, %v451_v47  ;;  %v3737_v9 = vld [vmem:[#allocation2 + $0x4a] ss:$2 sm:$0xff] }
 0x116   : > { %3984 = vmatprep.subr.bf16.mxu0 %v4850_v19  ;;  %v551_v19 = vmax.f32 %v519_v12, 0.0  ;;  %v535_v10 = vadd.f32 %v6390_v2, %v497_v6  ;;  %v5837_v47 = vld [vmem:[#allocation9 + $0xc0] sm:$0xff]  }
 0x117   : > { %4395 = vmatpush3.bf16.msra.mxu1 %v4848_v17  ;;  %v488_v17 = vmul.f32 %v5625_v22, %v450_v38  ;;  %v527_v23 = vadd.f32 %v6390_v2, %v489_v18  ;;  %v5835_v38 = vld [vmem:[#allocation9 + $0x140] sm:$0xff]  }
 0x118   : > { %1136 = vmatmul.mubr.bf16.gmra.mrb[20].mxu0 %v5707_v46  ;;  %4396 = vmatprep.subr.bf16.mxu1 %v4851_v20  ;;  %584 = vst [vmem:[#allocation2 + $0xb1] sm:$0xff] %v551_v19  ;;  %v3721_v18 = vld [vmem:[#allocation2 + $0x48] ss:$2 sm:$0xff] }
 0x119   : > { %3985 = vmatpush3.bf16.msra.mxu0 %v4852_v21  ;;  %1143 = vmatprep.mubr.bf16.mxu0 %v5709_v57  ;;  %v523_v21 = vadd.f32 %v6390_v2, %v485_v14  ;;  %v526_v28 = vadd.f32 %v6390_v2, %v488_v17  ;;  %v559_v37 = vmax.f32 %v527_v23, 0.0 }
 0x11a   : > { %3986 = vmatprep.subr.bf16.mxu0 %v4853_v25  ;;  %4389 = vmatmul.mubr.bf16.gmra.mrb[4].mxu1 %v5737_v5  ;;  %v458_v25 = vld [vmem:[%s5541_s20 + $0xe0] sm:$0xff]  ;;  %v3730_v19 = vld [vmem:[#allocation2 + $0x79] ss:$2 sm:$0xff] }
 0x11b   : > { %4397 = vmatpush3.bf16.msra.mxu1 %v4851_v20  ;;  %4408 = vmatprep.mubr.bf16.mxu1 %v5690_v50  ;;  %v455_v50 = vld [vmem:[%s5541_s20 + $0xc8] sm:$0xff]  ;;  %v522_v20 = vadd.f32 %v6390_v2, %v484_v11  ;;  %v555_v31 = vmax.f32 %v523_v21, 0.0  ;;  %v558_v36 = vmax.f32 %v526_v28, 0.0  ;;  %v496_v39 = vmul.f32 %v5625_v22, %v458_v25  ;;  %592 = vst [vmem:[#allocation2 + $0x111] sm:$0xff] %v559_v37  ;;  %v5868_v11 = vld [vmem:[#allocation9 + $0x158] sm:$0xff]   ;;  %v5910_v37 = vld [vmem:[#allocation9 + $0x170] sm:$0xff]  }
 0x11c   : > { %4398 = vmatprep.subr.bf16.mxu1 %v4854_v0  ;;  %v493_v52 = vmul.f32 %v5625_v22, %v455_v50  ;;  %v3736_v45 = vld [vmem:[#allocation2 + $0x1a] ss:$2 sm:$0xff] }
 0x11d   : > { %3987 = vmatpush3.bf16.msra.mxu0 %v4855_v24  ;;  %v554_v54 = vmax.f32 %v522_v20, 0.0  ;;  %588 = vst [vmem:[#allocation2 + $0xe1] sm:$0xff] %v555_v31  ;;  %v562_v24 = vmax.f32 %v530_v55, 0.0  ;;  %591 = vst [vmem:[#allocation2 + $0x109] sm:$0xff] %v558_v36  ;;  %v5833_v22 = vpack.c.bf16 %v3737_v9, %v3736_v45  ;;  %v5876_v50 = vld [vmem:[#allocation9 + $0x120] sm:$0xff]   ;;  %v5897_v28 = vld [vmem:[#allocation9 + $0xe8] sm:$0xff]  }
 0x11e   : > { %3988 = vmatprep.subr.bf16.mxu0 %v4856_v42  ;;  %v531_v4 = vadd.f32 %v6390_v2, %v493_v52  ;;  %v534_v42 = vadd.f32 %v6390_v2, %v496_v39  ;;  %v3720_v17 = vld [vmem:[#allocation2 + $0x18] ss:$2 sm:$0xff] }
 0x11f   : > { %4399 = vmatpush3.bf16.msra.mxu1 %v4854_v0  ;;  %v4862_v0 = vld [vmem:[#allocation11 + $0x70] sm:$0xff]   ;;  %587 = vst [vmem:[#allocation2 + $0xd9] sm:$0xff] %v554_v54  ;;  %595 = vst [vmem:[#allocation2 + $0x139] sm:$0xff] %v562_v24  ;;  %v1677_v2 = vunpack.c.l.bf16 %v5833_v22  ;;  %v1680_v60 = vunpack.c.h.bf16 %v5833_v22  ;;  %v5901_v52 = vpack.c.bf16 %v3721_v18, %v3720_v17 }
 0x120   : > { %1144 = vmatmul.mubr.bf16.gmra.mrb[24].mxu0 %v5711_v58  ;;  %4400 = vmatprep.subr.bf16.mxu1 %v5794_v35  ;;  %v563_v43 = vmax.f32 %v531_v4, 0.0  ;;  %v566_v41 = vmax.f32 %v534_v42, 0.0  ;;  %v3738_v25 = vld [vmem:[#allocation2 + $0x7a] ss:$2 sm:$0xff] }
 0x121   : > { %3989 = vmatpush3.bf16.msra.mxu0 %v4858_v8  ;;  %1151 = vmatprep.mubr.bf16.mxu0 %v5733_v7  ;;  %v5840_v8 = vld [vmem:[#allocation9 + $0x108] sm:$0xff]   ;;  %v1704_v12 = vsub.f32 %v3737_v9, %v1680_v60  ;;  %v5905_v31 = vld [vmem:[#allocation9 + $0x130] sm:$0xff]   ;;  %v1675_v32 = vunpack.c.l.bf16 %v5901_v52 }
 0x122   : > { %3990 = vmatprep.subr.bf16.mxu0 %v4859_v53  ;;  %596 = vst [vmem:[#allocation2 + $0x141] sm:$0xff] %v563_v43  ;;  %599 = vst [vmem:[#allocation2 + $0x169] sm:$0xff] %v566_v41  ;;  %v1701_v53 = vsub.f32 %v3736_v45, %v1677_v2  ;;  %v5915_v39 = vld [vmem:[#allocation9 + $0xf0] sm:$0xff]  }
 0x123   : > { %4401 = vmatpush3.bf16.msra.mxu1 %v5794_v35  ;;  %v4867_v35 = vld [vmem:[#allocation11 + $0x38] sm:$0xff]   ;;  %v3722_v4 = vld [vmem:[#allocation2 + $0x78] ss:$2 sm:$0xff]  ;;  %v1699_v2 = vsub.f32 %v3720_v17, %v1675_v32 }
 0x124   : > { %4402 = vmatprep.subr.bf16.mxu1 %v4860_v29  ;;  %v1725_v14 = vpack.c.bf16 %v1704_v12, %v1701_v53  ;;  %v3741_v54 = vld [vmem:[#allocation2 + $0x10a] ss:$2 sm:$0xff]  ;;  %v3733_v6 = vld [vmem:[#allocation2 + $0x109] ss:$2 sm:$0xff] }
 0x125   : > { %3991 = vmatpush3.bf16.msra.mxu0 %v4861_v3  ;;  %v5940_v12 = vld [vmem:[#allocation9 + $0xf8] sm:$0xff]  }
 0x126   : > { %3992 = vmatprep.subr.bf16.mxu0 %v4862_v0  ;;  %v3740_v23 = vld [vmem:[#allocation2 + $0xda] ss:$2 sm:$0xff] }
 0x127   : > { %4403 = vmatpush3.bf16.msra.mxu1 %v4860_v29  ;;  %v3731_v29 = vld [vmem:[#allocation2 + $0xa9] ss:$2 sm:$0xff]  ;;  %v3723_v0 = vld [vmem:[#allocation2 + $0xa8] ss:$2 sm:$0xff]  ;;  %v5917_v24 = vpack.c.bf16 %v3741_v54, %v3740_v23  ;;  %v3724_v17 = vld [vmem:[#allocation2 + $0xd8] ss:$2 sm:$0xff] }
 0x128   : > { %1152 = vmatmul.mubr.bf16.gmra.mrb[28].mxu0 %v5735_v34  ;;  %4404 = vmatprep.subr.bf16.mxu1 %v4863_v33  ;;  %v5907_v36 = vpack.c.bf16 %v3731_v29, %v3730_v19  ;;  %v5937_v53 = vpack.c.bf16 %v3723_v0, %v3722_v4 }
 0x129   : > { %3993 = vmatpush3.bf16.msra.mxu0 %v4864_v40  ;;  %1401 = vmatprep.mubr.bf16.mxu0 %v5686_v48  ;;  %v567_v48 = vmax.f32 %v535_v10, 0.0  ;;  %v3732_v40 = vld [vmem:[#allocation2 + $0xd9] ss:$2 sm:$0xff]  ;;  %v3742_v9 = vld [vmem:[#allocation2 + $0x13a] ss:$2 sm:$0xff]  ;;  %v1692_v41 = vunpack.c.h.bf16 %v5917_v24 }
 0x12a   : > { %3994 = vmatprep.subr.bf16.mxu0 %v4865_v44  ;;  %v1682_v43 = vunpack.c.l.bf16 %v5907_v36  ;;  %v1685_v44 = vunpack.c.h.bf16 %v5907_v36  ;;  %v1681_v32 = vunpack.c.l.bf16 %v5937_v53 }
 0x12b   : > { %4405 = vmatpush3.bf16.msra.mxu1 %v4863_v33  ;;  %600 = vst [vmem:[#allocation2 + $0x171] sm:$0xff] %v567_v48  ;;  %v1678_v33 = vunpack.c.h.bf16 %v5901_v52  ;;  %v5935_v48 = vld [vmem:[#allocation9 + $0x178] sm:$0xff]  }
 0x12c   : > { %4406 = vmatprep.subr.bf16.mxu1 %v4866_v1 }
 0x12d   : > { %3995 = vmatpush3.bf16.msra.mxu0 %v4867_v35  ;;  %v1689_v35 = vunpack.c.l.bf16 %v5917_v24  ;;  %v1702_v60 = vsub.f32 %v3721_v18, %v1678_v33 }
 0x12e   : > { %4032 = vmatprep.subr.bf16.mxu0 %v5830_v56 }
 0x12f   : > { %4407 = vmatpush3.bf16.msra.mxu1 %v4866_v1  ;;  %v1713_v18 = vsub.f32 %v3740_v23, %v1689_v35 }
 0x130   : > { %1402 = vmatmul.mubr.bf16.vlgmr.msra.gmra.mrb[32].mxu0 %v5688_v49  ;;  %4416 = vmatprep.subr.bf16.mxu1 %v5835_v38  ;;  %v5859_v49 = vld [vmem:[#allocation9 + $0xd0] sm:$0xff]  }
 0x131   : > { %4033 = vmatpush3.bf16.msra.mxu0 %v5837_v47  ;;  %1409 = vmatprep.mubr.bf16.mxu0 %v5701_v63  ;;  %v3728_v63 = vld [vmem:[#allocation2 + $0x19] ss:$2 sm:$0xff] }
 0x132   : > { %4409 = vmatmul.mubr.bf16.vlgmr.msra.gmra.mrb[0].mxu1 %v5699_v62  ;;  %4034 = vmatprep.subr.bf16.mxu0 %v5840_v8  ;;  %v3729_v62 = vld [vmem:[#allocation2 + $0x49] ss:$2 sm:$0xff]  ;;  %v3743_v10 = vld [vmem:[#allocation2 + $0x16a] ss:$2 sm:$0xff] }
 0x133   : > { %4417 = vmatpush3.bf16.msra.mxu1 %v5835_v38  ;;  %4412 = vmatprep.mubr.bf16.mxu1 %v5719_v30  ;;  %v5872_v30 = vld [vmem:[#allocation9 + $0xd8] sm:$0xff]   ;;  %v5878_v15 = vpack.c.bf16 %v3729_v62, %v3728_v63 }
 0x134   : > { %4418 = vmatprep.subr.bf16.mxu1 %v5842_v59 }
 0x135   : > { %4035 = vmatpush3.bf16.msra.mxu0 %v5848_v61  ;;  %v1676_v20 = vunpack.c.l.bf16 %v5878_v15  ;;  %v1679_v21 = vunpack.c.h.bf16 %v5878_v15 }
 0x136   : > { %4036 = vmatprep.subr.bf16.mxu0 %v5852_v27 }
 0x137   : > { %4419 = vmatpush3.bf16.msra.mxu1 %v5842_v59  ;;  %v1700_v55 = vsub.f32 %v3728_v63, %v1676_v20  ;;  %v1703_v3 = vsub.f32 %v3729_v62, %v1679_v21  ;;  %v1706_v63 = vsub.f32 %v3730_v19, %v1682_v43  ;;  %v1709_v62 = vsub.f32 %v3731_v29, %v1685_v44  ;;  %v3725_v29 = vld [vmem:[#allocation2 + $0x108] ss:$2 sm:$0xff] }
 0x138   : > { %1410 = vmatmul.mubr.bf16.gmra.mrb[36].mxu0 %v5707_v46  ;;  %4420 = vmatprep.subr.bf16.mxu1 %v5856_v51  ;;  %v5885_v46 = vld [vmem:[#allocation9 + $0xe0] sm:$0xff]   ;;  %v5945_v21 = vpack.c.bf16 %v3743_v10, %v3742_v9  ;;  %v1684_v19 = vunpack.c.h.bf16 %v5937_v53 }
 0x139   : > { %4037 = vmatpush3.bf16.msra.mxu0 %v5859_v49  ;;  %1417 = vmatprep.mubr.bf16.mxu0 %v5709_v57  ;;  %v5888_v57 = vld [vmem:[#allocation9 + $0x128] sm:$0xff]   ;;  %v1724_v42 = vpack.c.bf16 %v1703_v3, %v1700_v55  ;;  %v1716_v55 = vsub.f32 %v3741_v54, %v1692_v41  ;;  %v1723_v3 = vpack.c.bf16 %v1702_v60, %v1699_v2  ;;  %v3735_v54 = vld [vmem:[#allocation2 + $0x169] ss:$2 sm:$0xff] }
 0x13a   : > { %4038 = vmatprep.subr.bf16.mxu0 %v5863_v13  ;;  %4413 = vmatmul.mubr.bf16.gmra.mrb[4].mxu1 %v5737_v5  ;;  %v3739_v5 = vld [vmem:[#allocation2 + $0xaa] ss:$2 sm:$0xff]  ;;  %v1727_v33 = vpack.c.bf16 %v1709_v62, %v1706_v63  ;;  %v1695_v43 = vunpack.c.l.bf16 %v5945_v21  ;;  %v1698_v44 = vunpack.c.h.bf16 %v5945_v21  ;;  %v1708_v35 = vsub.f32 %v3723_v0, %v1684_v19 }
 0x13b   : > { %4421 = vmatpush3.bf16.msra.mxu1 %v5856_v51  ;;  %4432 = vmatprep.mubr.bf16.mxu1 %v1725_v14  ;;  %v5942_v14 = vpack.c.bf16 %v3733_v6, %v3732_v40  ;;  %v5959_v41 = vpack.c.bf16 %v3725_v29, %v3724_v17 }
 0x13c   : > { %4422 = vmatprep.subr.bf16.mxu1 %v5868_v11  ;;  %v1719_v63 = vsub.f32 %v3742_v9, %v1695_v43  ;;  %v1722_v62 = vsub.f32 %v3743_v10, %v1698_v44  ;;  %v3727_v9 = vld [vmem:[#allocation2 + $0x168] ss:$2 sm:$0xff] }
 0x13d   : > { %4039 = vmatpush3.bf16.msra.mxu0 %v5872_v30  ;;  %v1687_v0 = vunpack.c.l.bf16 %v5959_v41  ;;  %v4905_v43 = vld [vmem:[#allocation11 + $0x160] sm:$0xff]  }
 0x13e   : > { %4040 = vmatprep.subr.bf16.mxu0 %v5876_v50  ;;  %v4906_v44 = vld [vmem:[#allocation11 + $0xe0] sm:$0xff]  }
 0x13f   : > { %4423 = vmatpush3.bf16.msra.mxu1 %v5868_v11  ;;  %v1711_v10 = vsub.f32 %v3724_v17, %v1687_v0  ;;  %v3809_v0 = vld [vmem:[#allocation2 + $0x62] ss:$2 sm:$0xff] }
 0x140   : > { %1418 = vmatmul.mubr.bf16.gmra.mrb[40].mxu0 %v5711_v58  ;;  %4424 = vmatprep.subr.bf16.mxu1 %v5881_v16  ;;  %v5912_v58 = vpack.c.bf16 %v3739_v5, %v3738_v25 }
 0x141   : > { %4041 = vmatpush3.bf16.msra.mxu0 %v5885_v46  ;;  %1425 = vmatprep.mubr.bf16.mxu0 %v5733_v7  ;;  %v5920_v7 = vld [vmem:[#allocation9 + $0x138] sm:$0xff]  }
 0x142   : > { %4042 = vmatprep.subr.bf16.mxu0 %v5888_v57  ;;  %v1683_v1 = vunpack.c.l.bf16 %v5912_v58  ;;  %v1686_v45 = vunpack.c.h.bf16 %v5912_v58 }
 0x143   : > { %4425 = vmatpush3.bf16.msra.mxu1 %v5881_v16 }
 0x144   : > { %4426 = vmatprep.subr.bf16.mxu1 %v5894_v26  ;;  %v1710_v20 = vsub.f32 %v3739_v5, %v1686_v45  ;;  %v1691_v5 = vunpack.c.h.bf16 %v5942_v14  ;;  %v1705_v45 = vsub.f32 %v3722_v4, %v1681_v32  ;;  %v461_v32 = vld [vmem:[%s5541_s20 + $0xf8] sm:$0xff] }
 0x145   : > { %4043 = vmatpush3.bf16.msra.mxu0 %v5897_v28 }
 0x146   : > { %4044 = vmatprep.subr.bf16.mxu0 %v5905_v31  ;;  %v1715_v2 = vsub.f32 %v3733_v6, %v1691_v5  ;;  %v1726_v4 = vpack.c.bf16 %v1708_v35, %v1705_v45  ;;  %v4908_v45 = vld [vmem:[#allocation11 + $0x168] sm:$0xff]  }
 0x147   : > { %4427 = vmatpush3.bf16.msra.mxu1 %v5894_v26  ;;  %v4909_v35 = vld [vmem:[#allocation11 + $0xe8] sm:$0xff]  }
 0x148   : > { %1426 = vmatmul.mubr.bf16.gmra.mrb[44].mxu0 %v5735_v34  ;;  %4428 = vmatprep.subr.bf16.mxu1 %v5910_v37  ;;  %v1707_v34 = vsub.f32 %v3738_v25, %v1683_v1  ;;  %v1688_v25 = vunpack.c.l.bf16 %v5942_v14  ;;  %v1731_v1 = vpack.c.bf16 %v1716_v55, %v1713_v18 }
 0x149   : > { %4045 = vmatpush3.bf16.msra.mxu0 %v5915_v39  ;;  %1911 = vmatprep.mubr.bf16.mxu0 %v1724_v42  ;;  %v3734_v42 = vld [vmem:[#allocation2 + $0x139] ss:$2 sm:$0xff] }
 0x14a   : > { %4046 = vmatprep.subr.bf16.mxu0 %v5920_v7  ;;  %v1728_v23 = vpack.c.bf16 %v1710_v20, %v1707_v34  ;;  %v5962_v60 = vpack.c.bf16 %v3735_v54, %v3734_v42 }
 0x14b   : > { %4429 = vmatpush3.bf16.msra.mxu1 %v5910_v37 }
 0x14c   : > { %4430 = vmatprep.subr.bf16.mxu1 %v5935_v48  ;;  %v1694_v6 = vunpack.c.l.bf16 %v5962_v60  ;;  %v1697_v34 = vunpack.c.h.bf16 %v5962_v60 }
 0x14d   : > { %4047 = vmatpush3.bf16.msra.mxu0 %v5940_v12 }
 0x14e   : > { %4084 = vmatprep.subr.bf16.mxu0 %v5830_v56  ;;  %v1712_v56 = vsub.f32 %v3732_v40, %v1688_v25  ;;  %v1718_v18 = vsub.f32 %v3734_v42, %v1694_v6  ;;  %v1721_v55 = vsub.f32 %v3735_v54, %v1697_v34  ;;  %v4965_v25 = vld [vmem:[#allocation8] ss:$0 sm:$0xff]  ;;  %v4904_v54 = vld [vmem:[#allocation11 + $0x120] sm:$0xff]  }
 0x14f   : > { %4431 = vmatpush3.bf16.msra.mxu1 %v5935_v48  ;;  %v6021_v34 = vld [vmem:[#allocation9 + $0x200] sm:$0xff]  }
 0x150   : > { %1912 = vmatmul.mubr.bf16.vlgmr.msra.gmra.mrb[48].mxu0 %v1723_v3  ;;  %4440 = vmatprep.subr.bf16.mxu1 %v5835_v38  ;;  %v1730_v40 = vpack.c.bf16 %v1715_v2, %v1712_v56  ;;  %v4910_v56 = vld [vmem:[#allocation11 + $0x130] sm:$0xff]  }
 0x151   : > { %4085 = vmatpush3.bf16.msra.mxu0 %v5837_v47  ;;  %1919 = vmatprep.mubr.bf16.mxu0 %v1727_v33  ;;  %v1690_v47 = vunpack.c.h.bf16 %v5959_v41  ;;  %v4912_v2 = vld [vmem:[#allocation11 + $0xf0] sm:$0xff]  }
 0x152   : > { %4433 = vmatmul.mubr.bf16.vlgmr.msra.gmra.mrb[0].mxu1 %v1728_v23  ;;  %4086 = vmatprep.subr.bf16.mxu0 %v5840_v8  ;;  %v3726_v8 = vld [vmem:[#allocation2 + $0x138] ss:$2 sm:$0xff]  ;;  %v4903_v23 = vld [vmem:[#allocation11 + $0xd8] sm:$0xff]  }
 0x153   : > { %4441 = vmatpush3.bf16.msra.mxu1 %v5835_v38  ;;  %4436 = vmatprep.mubr.bf16.mxu1 %v1731_v1  ;;  %v1734_v38 = vpack.c.bf16 %v1722_v62, %v1719_v63  ;;  %v1714_v20 = vsub.f32 %v3725_v29, %v1690_v47  ;;  %v4907_v1 = vld [vmem:[#allocation11 + $0x128] sm:$0xff]   ;;  %v4913_v63 = vld [vmem:[#allocation11 + $0x138] sm:$0xff]  }
 0x154   : > { %4442 = vmatprep.subr.bf16.mxu1 %v5842_v59  ;;  %v4914_v62 = vld [vmem:[#allocation11 + $0x178] sm:$0xff]  }
 0x155   : > { %4087 = vmatpush3.bf16.msra.mxu0 %v5848_v61  ;;  %v5975_v61 = vpack.c.bf16 %v3727_v9, %v3726_v8  ;;  %v4915_v47 = vld [vmem:[#allocation11 + $0xf8] sm:$0xff]  }
 0x156   : > { %4088 = vmatprep.subr.bf16.mxu0 %v5852_v27  ;;  %v1729_v27 = vpack.c.bf16 %v1714_v20, %v1711_v10  ;;  %v6032_v10 = vld [vmem:[#allocation9 + $0x208] sm:$0xff]  }
 0x157   : > { %4443 = vmatpush3.bf16.msra.mxu1 %v5842_v59  ;;  %v460_v59 = vld [vmem:[%s5541_s20 + $0xf0] sm:$0xff]  ;;  %v1693_v17 = vunpack.c.l.bf16 %v5975_v61  ;;  %v1696_v3 = vunpack.c.h.bf16 %v5975_v61 }
 0x158   : > { %1920 = vmatmul.mubr.bf16.gmra.mrb[52].mxu0 %v1726_v4  ;;  %4444 = vmatprep.subr.bf16.mxu1 %v5856_v51  ;;  %v3808_v4 = vld [vmem:[#allocation2 + $0x32] ss:$2 sm:$0xff] }
 0x159   : > { %4089 = vmatpush3.bf16.msra.mxu0 %v5859_v49  ;;  %1927 = vmatprep.mubr.bf16.mxu0 %v1730_v40  ;;  %v1733_v49 = vpack.c.bf16 %v1721_v55, %v1718_v18  ;;  %v1717_v29 = vsub.f32 %v3726_v8, %v1693_v17  ;;  %v1720_v33 = vsub.f32 %v3727_v9, %v1696_v3  ;;  %v6017_v40 = vld [vmem:[#allocation9 + $0x1c0] sm:$0xff]   ;;  %v6026_v9 = vld [vmem:[#allocation9 + $0x1c8] sm:$0xff]   ;;  %v6040_v18 = vld [vmem:[#allocation9 + $0x1d0] sm:$0xff]  }
 0x15a   : > { %4090 = vmatprep.subr.bf16.mxu0 %v5863_v13  ;;  %4437 = vmatmul.mubr.bf16.gmra.mrb[4].mxu1 %v1734_v38  ;;  %v4964_v13 = vld [vmem:[#allocation6] ss:$0 sm:$0xff]  ;;  %v6019_v6 = vpack.c.bf16 %v3809_v0, %v3808_v4  ;;  %v6023_v8 = vld [vmem:[#allocation9 + $0x180] sm:$0xff]   ;;  %v6035_v20 = vld [vmem:[#allocation9 + $0x188] sm:$0xff]  }
 0x15b   : > { %4445 = vmatpush3.bf16.msra.mxu1 %v5856_v51  ;;  %4456 = vmatprep.mubr.bf16.mxu1 %v5833_v22  ;;  %v498_v19 = vmul.f32 %v4964_v13, %v460_v59  ;;  %v499_v51 = vmul.f32 %v4964_v13, %v461_v32  ;;  %v6045_v59 = vld [vmem:[#allocation9 + $0x210] sm:$0xff]   ;;  %v6059_v32 = vld [vmem:[#allocation9 + $0x198] sm:$0xff]   ;;  %v6065_v13 = vld [vmem:[#allocation9 + $0x1e0] sm:$0xff]  }
 0x15c   : > { %4446 = vmatprep.subr.bf16.mxu1 %v5868_v11  ;;  %v2591_v38 = vunpack.c.l.bf16 %v6019_v6  ;;  %v3801_v17 = vld [vmem:[#allocation2 + $0x61] ss:$2 sm:$0xff] }
 0x15d   : > { %4091 = vmatpush3.bf16.msra.mxu0 %v5872_v30  ;;  %v536_v30 = vadd.f32 %v4965_v25, %v498_v19  ;;  %v537_v5 = vadd.f32 %v4965_v25, %v499_v51  ;;  %v6073_v19 = vld [vmem:[#allocation9 + $0x1a0] sm:$0xff]  }
 0x15e   : > { %4092 = vmatprep.subr.bf16.mxu0 %v5876_v50  ;;  %v1732_v50 = vpack.c.bf16 %v1720_v33, %v1717_v29  ;;  %v3792_v29 = vld [vmem:[#allocation2 + $0x30] ss:$2 sm:$0xff]  ;;  %v3793_v33 = vld [vmem:[#allocation2 + $0x60] ss:$2 sm:$0xff]  ;;  %v3802_v25 = vld [vmem:[#allocation2 + $0x91] ss:$2 sm:$0xff] }
 0x15f   : > { %4447 = vmatpush3.bf16.msra.mxu1 %v5868_v11  ;;  %v568_v11 = vmax.f32 %v536_v30, 0.0  ;;  %v569_v42 = vmax.f32 %v537_v5, 0.0  ;;  %v3803_v30 = vld [vmem:[#allocation2 + $0xc1] ss:$2 sm:$0xff]  ;;  %v3810_v5 = vld [vmem:[#allocation2 + $0x92] ss:$2 sm:$0xff] }
 0x160   : > { %1928 = vmatmul.mubr.bf16.gmra.mrb[56].mxu0 %v1729_v27  ;;  %4448 = vmatprep.subr.bf16.mxu1 %v5881_v16  ;;  %v6048_v27 = vld [vmem:[#allocation9 + $0x190] sm:$0xff]  }
 0x161   : > { %4093 = vmatpush3.bf16.msra.mxu0 %v5885_v46  ;;  %1935 = vmatprep.mubr.bf16.mxu0 %v1733_v49  ;;  %601 = vst [vmem:[#allocation2 + $0x181] sm:$0xff] %v568_v11  ;;  %602 = vst [vmem:[#allocation2 + $0x189] sm:$0xff] %v569_v42  ;;  %v4893_v46 = vld [vmem:[#allocation11 + $0x140] sm:$0xff]   ;;  %v6083_v11 = vld [vmem:[#allocation9 + $0x228] sm:$0xff]   ;;  %v6085_v42 = vpack.c.bf16 %v3793_v33, %v3792_v29 }
 0x162   : > { %4094 = vmatprep.subr.bf16.mxu0 %v5888_v57  ;;  %v4894_v57 = vld [vmem:[#allocation11 + $0xc0] sm:$0xff]  }
 0x163   : > { %4449 = vmatpush3.bf16.msra.mxu1 %v5881_v16  ;;  %v4892_v16 = vld [vmem:[#allocation11 + $0x100] sm:$0xff]  }
 0x164   : > { %4450 = vmatprep.subr.bf16.mxu1 %v5894_v26 }
 0x165   : > { %4095 = vmatpush3.bf16.msra.mxu0 %v5897_v28  ;;  %v4896_v28 = vld [vmem:[#allocation11 + $0x148] sm:$0xff]  }
 0x166   : > { %4096 = vmatprep.subr.bf16.mxu0 %v5905_v31  ;;  %v4897_v31 = vld [vmem:[#allocation11 + $0xc8] sm:$0xff]  }
 0x167   : > { %4451 = vmatpush3.bf16.msra.mxu1 %v5894_v26  ;;  %v4895_v26 = vld [vmem:[#allocation11 + $0x108] sm:$0xff]  }
 0x168   : > { %1936 = vmatmul.mubr.bf16.gmra.mrb[60].mxu0 %v1732_v50  ;;  %4452 = vmatprep.subr.bf16.mxu1 %v5910_v37  ;;  %v3811_v50 = vld [vmem:[#allocation2 + $0xc2] ss:$2 sm:$0xff] }
 0x169   : > { %4097 = vmatpush3.bf16.msra.mxu0 %v5915_v39  ;;  %2041 = vmatprep.mubr.bf16.mxu0 %v5878_v15  ;;  %v4899_v39 = vld [vmem:[#allocation11 + $0x150] sm:$0xff]  }
 0x16a   : > { %4098 = vmatprep.subr.bf16.mxu0 %v5920_v7  ;;  %v4900_v7 = vld [vmem:[#allocation11 + $0xd0] sm:$0xff]  }
 0x16b   : > { %4453 = vmatpush3.bf16.msra.mxu1 %v5910_v37  ;;  %v4898_v37 = vld [vmem:[#allocation11 + $0x110] sm:$0xff]  }
 0x16c   : > { %4454 = vmatprep.subr.bf16.mxu1 %v5935_v48 }
 0x16d   : > { %4099 = vmatpush3.bf16.msra.mxu0 %v5940_v12  ;;  %v4902_v12 = vld [vmem:[#allocation11 + $0x158] sm:$0xff]  }
 0x16e   : > { %4136 = vmatprep.subr.bf16.mxu0 %v4892_v16  ;;  %v3812_v16 = vld [vmem:[#allocation2 + $0xf2] ss:$2 sm:$0xff] }
 0x16f   : > { %4455 = vmatpush3.bf16.msra.mxu1 %v5935_v48  ;;  %v4901_v48 = vld [vmem:[#allocation11 + $0x118] sm:$0xff]  }
 0x170   : > { %2042 = vmatmul.mubr.bf16.vlgmr.msra.gmra.mrb[64].mxu0 %v5901_v52  ;;  %4464 = vmatprep.subr.bf16.mxu1 %v4893_v46 }
 0x171   : > { %4137 = vmatpush3.bf16.msra.mxu0 %v4894_v57  ;;  %2049 = vmatprep.mubr.bf16.mxu0 %v5907_v36  ;;  %v6088_v57 = vld [vmem:[#allocation9 + $0x1a8] sm:$0xff]  }
 0x172   : > { %4457 = vmatmul.mubr.bf16.vlgmr.msra.gmra.mrb[0].mxu1 %v5912_v58  ;;  %4138 = vmatprep.subr.bf16.mxu0 %v4895_v26 }
 0x173   : > { %4465 = vmatpush3.bf16.msra.mxu1 %v4893_v46  ;;  %4460 = vmatprep.mubr.bf16.mxu1 %v5917_v24  ;;  %v3813_v46 = vld [vmem:[#allocation2 + $0x122] ss:$2 sm:$0xff] }
 0x174   : > { %4466 = vmatprep.subr.bf16.mxu1 %v4896_v28 }
 0x175   : > { %4139 = vmatpush3.bf16.msra.mxu0 %v4897_v31  ;;  %v6091_v31 = vpack.c.bf16 %v3803_v30, %v3802_v25 }
 0x176   : > { %4140 = vmatprep.subr.bf16.mxu0 %v4898_v37  ;;  %v6096_v37 = vpack.c.bf16 %v3811_v50, %v3810_v5 }
 0x177   : > { %4467 = vmatpush3.bf16.msra.mxu1 %v4896_v28 }
 0x178   : > { %2050 = vmatmul.mubr.bf16.gmra.mrb[68].mxu0 %v5937_v53  ;;  %4468 = vmatprep.subr.bf16.mxu1 %v4899_v39 }
 0x179   : > { %4141 = vmatpush3.bf16.msra.mxu0 %v4900_v7  ;;  %2057 = vmatprep.mubr.bf16.mxu0 %v5942_v14  ;;  %v6102_v7 = vld [vmem:[#allocation9 + $0x230] sm:$0xff]  }
 0x17a   : > { %4142 = vmatprep.subr.bf16.mxu0 %v4901_v48  ;;  %4461 = vmatmul.mubr.bf16.gmra.mrb[4].mxu1 %v5945_v21  ;;  %v2592_v48 = vunpack.c.h.bf16 %v6085_v42 }
 0x17b   : > { %4469 = vmatpush3.bf16.msra.mxu1 %v4899_v39  ;;  %4480 = vmatprep.mubr.bf16.mxu1 %v5833_v22  ;;  %v4911_v22 = vld [vmem:[#allocation11 + $0x170] sm:$0xff]   ;;  %v6099_v39 = vpack.c.bf16 %v3813_v46, %v3812_v16 }
 0x17c   : > { %4470 = vmatprep.subr.bf16.mxu1 %v4902_v12 }
 0x17d   : > { %4143 = vmatpush3.bf16.msra.mxu0 %v4903_v23 }
 0x17e   : > { %4144 = vmatprep.subr.bf16.mxu0 %v4904_v54  ;;  %v2596_v54 = vunpack.c.l.bf16 %v6091_v31 }
 0x17f   : > { %4471 = vmatpush3.bf16.msra.mxu1 %v4902_v12  ;;  %v6107_v12 = vld [vmem:[#allocation9 + $0x1b0] sm:$0xff]  }
 0x180   : > { %2058 = vmatmul.mubr.bf16.gmra.mrb[72].mxu0 %v5959_v41  ;;  %4472 = vmatprep.subr.bf16.mxu1 %v4905_v43 }
 0x181   : > { %4145 = vmatpush3.bf16.msra.mxu0 %v4906_v44  ;;  %2065 = vmatprep.mubr.bf16.mxu0 %v5962_v60  ;;  %v3794_v44 = vld [vmem:[#allocation2 + $0x90] ss:$2 sm:$0xff] }
 0x182   : > { %4146 = vmatprep.subr.bf16.mxu0 %v4907_v1  ;;  %v3795_v1 = vld [vmem:[#allocation2 + $0xc0] ss:$2 sm:$0xff] }
 0x183   : > { %4473 = vmatpush3.bf16.msra.mxu1 %v4905_v43  ;;  %v2599_v43 = vunpack.c.h.bf16 %v6091_v31 }
 0x184   : > { %4474 = vmatprep.subr.bf16.mxu1 %v4908_v45 }
 0x185   : > { %4147 = vmatpush3.bf16.msra.mxu0 %v4909_v35  ;;  %v2597_v35 = vunpack.c.l.bf16 %v6096_v37 }
 0x186   : > { %4148 = vmatprep.subr.bf16.mxu0 %v4910_v56  ;;  %v2600_v56 = vunpack.c.h.bf16 %v6096_v37 }
 0x187   : > { %4475 = vmatpush3.bf16.msra.mxu1 %v4908_v45  ;;  %v6112_v45 = vld [vmem:[#allocation9 + $0x1f8] sm:$0xff]  }
 0x188   : > { %2066 = vmatmul.mubr.bf16.gmra.mrb[76].mxu0 %v5975_v61  ;;  %4476 = vmatprep.subr.bf16.mxu1 %v4911_v22 }
 0x189   : > { %4149 = vmatpush3.bf16.msra.mxu0 %v4912_v2  ;;  %2315 = vmatprep.mubr.bf16.mxu0 %v5878_v15  ;;  %v2594_v15 = vunpack.c.h.bf16 %v6019_v6  ;;  %v3805_v2 = vld [vmem:[#allocation2 + $0x121] ss:$2 sm:$0xff] }
 0x18a   : > { %4150 = vmatprep.subr.bf16.mxu0 %v4913_v63  ;;  %v2603_v63 = vunpack.c.l.bf16 %v6099_v39 }
 0x18b   : > { %4477 = vmatpush3.bf16.msra.mxu1 %v4911_v22  ;;  %v2618_v55 = vsub.f32 %v3809_v0, %v2594_v15  ;;  %v3804_v22 = vld [vmem:[#allocation2 + $0xf1] ss:$2 sm:$0xff]  ;;  %v3815_v0 = vld [vmem:[#allocation2 + $0x182] ss:$2 sm:$0xff]  ;;  %v2616_v15 = vsub.f32 %v3793_v33, %v2592_v48 }
 0x18c   : > { %4478 = vmatprep.subr.bf16.mxu1 %v4914_v62  ;;  %v3797_v48 = vld [vmem:[#allocation2 + $0x120] ss:$2 sm:$0xff] }
 0x18d   : > { %4151 = vmatpush3.bf16.msra.mxu0 %v4915_v47  ;;  %v6121_v47 = vld [vmem:[#allocation9 + $0x238] sm:$0xff]  }
 0x18e   : > { %4188 = vmatprep.subr.bf16.mxu0 %v6017_v40 }
 0x18f   : > { %4479 = vmatpush3.bf16.msra.mxu1 %v4914_v62  ;;  %v2606_v62 = vunpack.c.h.bf16 %v6099_v39 }
 0x190   : > { %2316 = vmatmul.mubr.bf16.vlgmr.msra.gmra.mrb[80].mxu0 %v5901_v52  ;;  %4488 = vmatprep.subr.bf16.mxu1 %v6021_v34  ;;  %v2615_v52 = vsub.f32 %v3808_v4, %v2591_v38  ;;  %v3814_v4 = vld [vmem:[#allocation2 + $0x152] ss:$2 sm:$0xff] }
 0x191   : > { %4189 = vmatpush3.bf16.msra.mxu0 %v6023_v8  ;;  %2323 = vmatprep.mubr.bf16.mxu0 %v5907_v36  ;;  %v6051_v36 = vld [vmem:[#allocation9 + $0x1d8] sm:$0xff]   ;;  %v2630_v33 = vsub.f32 %v3813_v46, %v2606_v62 }
 0x192   : > { %4481 = vmatmul.mubr.bf16.vlgmr.msra.gmra.mrb[0].mxu1 %v5912_v58  ;;  %4190 = vmatprep.subr.bf16.mxu0 %v6026_v9  ;;  %v3800_v58 = vld [vmem:[#allocation2 + $0x31] ss:$2 sm:$0xff]  ;;  %v2639_v3 = vpack.c.bf16 %v2618_v55, %v2615_v52  ;;  %v6123_v52 = vpack.c.bf16 %v3795_v1, %v3794_v44 }
 0x193   : > { %4489 = vmatpush3.bf16.msra.mxu1 %v6021_v34  ;;  %4484 = vmatprep.mubr.bf16.mxu1 %v5917_v24  ;;  %v6056_v24 = vld [vmem:[#allocation9 + $0x218] sm:$0xff]   ;;  %v6062_v49 = vpack.c.bf16 %v3801_v17, %v3800_v58 }
 0x194   : > { %4490 = vmatprep.subr.bf16.mxu1 %v6032_v10  ;;  %v6126_v55 = vld [vmem:[#allocation9 + $0x1b8] sm:$0xff]  }
 0x195   : > { %4191 = vmatpush3.bf16.msra.mxu0 %v6035_v20  ;;  %v2593_v51 = vunpack.c.h.bf16 %v6062_v49  ;;  %v3806_v46 = vld [vmem:[#allocation2 + $0x151] ss:$2 sm:$0xff] }
 0x196   : > { %4192 = vmatprep.subr.bf16.mxu0 %v6040_v18 }
 0x197   : > { %4491 = vmatpush3.bf16.msra.mxu1 %v6032_v10  ;;  %v2617_v28 = vsub.f32 %v3801_v17, %v2593_v51  ;;  %v2623_v17 = vsub.f32 %v3803_v30, %v2599_v43  ;;  %v6131_v51 = vpack.c.bf16 %v3815_v0, %v3814_v4 }
 0x198   : > { %2324 = vmatmul.mubr.bf16.gmra.mrb[84].mxu0 %v5937_v53  ;;  %4492 = vmatprep.subr.bf16.mxu1 %v6045_v59  ;;  %v6070_v53 = vld [vmem:[#allocation9 + $0x220] sm:$0xff]  }
 0x199   : > { %4193 = vmatpush3.bf16.msra.mxu0 %v6048_v27  ;;  %2331 = vmatprep.mubr.bf16.mxu0 %v5942_v14  ;;  %v2590_v14 = vunpack.c.l.bf16 %v6062_v49  ;;  %v2612_v43 = vunpack.c.h.bf16 %v6131_v51 }
 0x19a   : > { %4194 = vmatprep.subr.bf16.mxu0 %v6051_v36  ;;  %4485 = vmatmul.mubr.bf16.gmra.mrb[4].mxu1 %v5945_v21  ;;  %v6078_v21 = vld [vmem:[#allocation9 + $0x1e8] sm:$0xff]  }
 0x19b   : > { %4493 = vmatpush3.bf16.msra.mxu1 %v6045_v59  ;;  %4504 = vmatprep.mubr.bf16.mxu1 %v2639_v3  ;;  %v2614_v26 = vsub.f32 %v3800_v58, %v2590_v14  ;;  %v2620_v58 = vsub.f32 %v3802_v25, %v2596_v54  ;;  %v6128_v3 = vpack.c.bf16 %v3805_v2, %v3804_v22  ;;  %v2598_v25 = vunpack.c.h.bf16 %v6123_v52 }
 0x19c   : > { %4494 = vmatprep.subr.bf16.mxu1 %v6056_v24  ;;  %v2624_v14 = vsub.f32 %v3811_v50, %v2600_v56  ;;  %v3796_v50 = vld [vmem:[#allocation2 + $0xf0] ss:$2 sm:$0xff]  ;;  %v2609_v54 = vunpack.c.l.bf16 %v6131_v51 }
 0x19d   : > { %4195 = vmatpush3.bf16.msra.mxu0 %v6059_v32  ;;  %v2638_v23 = vpack.c.bf16 %v2617_v28, %v2614_v26  ;;  %v2595_v28 = vunpack.c.l.bf16 %v6123_v52  ;;  %v2641_v30 = vpack.c.bf16 %v2623_v17, %v2620_v58  ;;  %v6145_v62 = vpack.c.bf16 %v3797_v48, %v3796_v50 }
 0x19e   : > { %4196 = vmatprep.subr.bf16.mxu0 %v6065_v13  ;;  %v2633_v58 = vsub.f32 %v3814_v4, %v2609_v54  ;;  %v2636_v17 = vsub.f32 %v3815_v0, %v2612_v43  ;;  %v3799_v4 = vld [vmem:[#allocation2 + $0x180] ss:$2 sm:$0xff] }
 0x19f   : > { %4495 = vmatpush3.bf16.msra.mxu1 %v6056_v24  ;;  %v2619_v56 = vsub.f32 %v3794_v44, %v2595_v28  ;;  %v4948_v43 = vld [vmem:[#allocation11 + $0x190] sm:$0xff]  }
 0x1a0   : > { %2332 = vmatmul.mubr.bf16.gmra.mrb[88].mxu0 %v5959_v41  ;;  %4496 = vmatprep.subr.bf16.mxu1 %v6070_v53  ;;  %v6094_v41 = vld [vmem:[#allocation9 + $0x1f0] sm:$0xff]  }
 0x1a1   : > { %4197 = vmatpush3.bf16.msra.mxu0 %v6073_v19  ;;  %2339 = vmatprep.mubr.bf16.mxu0 %v5962_v60  ;;  %v2589_v60 = vunpack.c.l.bf16 %v6085_v42 }
 0x1a2   : > { %4198 = vmatprep.subr.bf16.mxu0 %v6078_v21 }
 0x1a3   : > { %4497 = vmatpush3.bf16.msra.mxu1 %v6070_v53  ;;  %v2613_v38 = vsub.f32 %v3792_v29, %v2589_v60  ;;  %v2627_v29 = vsub.f32 %v3812_v16, %v2603_v63  ;;  %v2602_v60 = vunpack.c.l.bf16 %v6128_v3  ;;  %v2622_v63 = vsub.f32 %v3795_v1, %v2598_v25 }
 0x1a4   : > { %4498 = vmatprep.subr.bf16.mxu1 %v6083_v11  ;;  %v2601_v1 = vunpack.c.l.bf16 %v6145_v62 }
 0x1a5   : > { %4199 = vmatpush3.bf16.msra.mxu0 %v6088_v57  ;;  %v2637_v26 = vpack.c.bf16 %v2616_v15, %v2613_v38  ;;  %v2640_v44 = vpack.c.bf16 %v2622_v63, %v2619_v56  ;;  %v4949_v56 = vld [vmem:[#allocation11 + $0x1d8] sm:$0xff]  }
 0x1a6   : > { %4200 = vmatprep.subr.bf16.mxu0 %v6094_v41  ;;  %v2625_v0 = vsub.f32 %v3796_v50, %v2601_v1  ;;  %v4953_v1 = vld [vmem:[#allocation11 + $0x220] sm:$0xff]  }
 0x1a7   : > { %4499 = vmatpush3.bf16.msra.mxu1 %v6083_v11 }
 0x1a8   : > { %2340 = vmatmul.mubr.bf16.gmra.mrb[92].mxu0 %v5975_v61  ;;  %4500 = vmatprep.subr.bf16.mxu1 %v6102_v7  ;;  %v2621_v61 = vsub.f32 %v3810_v5, %v2597_v35  ;;  %v2605_v5 = vunpack.c.h.bf16 %v6128_v3  ;;  %v2645_v35 = vpack.c.bf16 %v2630_v33, %v2627_v29 }
 0x1a9   : > { %4201 = vmatpush3.bf16.msra.mxu0 %v6107_v12  ;;  %2825 = vmatprep.mubr.bf16.mxu0 %v2638_v23  ;;  %v3807_v23 = vld [vmem:[#allocation2 + $0x181] ss:$2 sm:$0xff] }
 0x1aa   : > { %4202 = vmatprep.subr.bf16.mxu0 %v6112_v45  ;;  %v2642_v16 = vpack.c.bf16 %v2624_v14, %v2621_v61  ;;  %v2629_v38 = vsub.f32 %v3805_v2, %v2605_v5  ;;  %v6148_v15 = vpack.c.bf16 %v3807_v23, %v3806_v46  ;;  %v4942_v5 = vld [vmem:[#allocation11 + $0x180] sm:$0xff]  }
 0x1ab   : > { %4501 = vmatpush3.bf16.msra.mxu1 %v6102_v7 }
 0x1ac   : > { %4502 = vmatprep.subr.bf16.mxu1 %v6121_v47  ;;  %v2608_v2 = vunpack.c.l.bf16 %v6148_v15  ;;  %v2611_v61 = vunpack.c.h.bf16 %v6148_v15 }
 0x1ad   : > { %4203 = vmatpush3.bf16.msra.mxu0 %v6126_v55 }
 0x1ae   : > { %4240 = vmatprep.subr.bf16.mxu0 %v6017_v40  ;;  %v2626_v40 = vsub.f32 %v3804_v22, %v2602_v60  ;;  %v2635_v33 = vsub.f32 %v3807_v23, %v2611_v61 }
 0x1af   : > { %4503 = vmatpush3.bf16.msra.mxu1 %v6121_v47 }
 0x1b0   : > { %2826 = vmatmul.mubr.bf16.vlgmr.msra.gmra.mrb[96].mxu0 %v2637_v26  ;;  %4512 = vmatprep.subr.bf16.mxu1 %v6021_v34  ;;  %v2644_v22 = vpack.c.bf16 %v2629_v38, %v2626_v40  ;;  %v4950_v40 = vld [vmem:[#allocation11 + $0x218] sm:$0xff]  }
 0x1b1   : > { %4241 = vmatpush3.bf16.msra.mxu0 %v6023_v8  ;;  %2833 = vmatprep.mubr.bf16.mxu0 %v2641_v30  ;;  %v2604_v8 = vunpack.c.h.bf16 %v6145_v62  ;;  %v4951_v38 = vld [vmem:[#allocation11 + $0x198] sm:$0xff]  }
 0x1b2   : > { %4505 = vmatmul.mubr.bf16.vlgmr.msra.gmra.mrb[0].mxu1 %v2642_v16  ;;  %4242 = vmatprep.subr.bf16.mxu0 %v6026_v9  ;;  %v3798_v9 = vld [vmem:[#allocation2 + $0x150] ss:$2 sm:$0xff] }
 0x1b3   : > { %4513 = vmatpush3.bf16.msra.mxu1 %v6021_v34  ;;  %4508 = vmatprep.mubr.bf16.mxu1 %v2645_v35  ;;  %v2648_v34 = vpack.c.bf16 %v2636_v17, %v2633_v58  ;;  %v2628_v14 = vsub.f32 %v3797_v48, %v2604_v8  ;;  %v6161_v29 = vpack.c.bf16 %v3799_v4, %v3798_v9  ;;  %v4945_v48 = vld [vmem:[#allocation11 + $0x188] sm:$0xff]   ;;  %v4952_v58 = vld [vmem:[#allocation11 + $0x1e0] sm:$0xff]  }
 0x1b4   : > { %4514 = vmatprep.subr.bf16.mxu1 %v6032_v10 }
 0x1b5   : > { %4243 = vmatpush3.bf16.msra.mxu0 %v6035_v20  ;;  %v2632_v20 = vsub.f32 %v3806_v46, %v2608_v2  ;;  %v2610_v26 = vunpack.c.h.bf16 %v6161_v29  ;;  %v4954_v2 = vld [vmem:[#allocation11 + $0x1a0] sm:$0xff]  }
 0x1b6   : > { %4244 = vmatprep.subr.bf16.mxu0 %v6040_v18  ;;  %v2607_v18 = vunpack.c.l.bf16 %v6161_v29 }
 0x1b7   : > { %4515 = vmatpush3.bf16.msra.mxu1 %v6032_v10  ;;  %v2643_v10 = vpack.c.bf16 %v2628_v14, %v2625_v0  ;;  %v4958_v0 = vld [vmem:[#allocation11 + $0x1f0] sm:$0xff]  }
 0x1b8   : > { %2834 = vmatmul.mubr.bf16.gmra.mrb[100].mxu0 %v2640_v44  ;;  %4516 = vmatprep.subr.bf16.mxu1 %v6045_v59 }
 0x1b9   : > { %4245 = vmatpush3.bf16.msra.mxu0 %v6048_v27  ;;  %2841 = vmatprep.mubr.bf16.mxu0 %v2644_v22  ;;  %v2647_v27 = vpack.c.bf16 %v2635_v33, %v2632_v20  ;;  %v4959_v33 = vld [vmem:[#allocation11 + $0x230] sm:$0xff]  }
 0x1ba   : > { %4246 = vmatprep.subr.bf16.mxu0 %v6051_v36  ;;  %4509 = vmatmul.mubr.bf16.gmra.mrb[4].mxu1 %v2648_v34  ;;  %v2634_v36 = vsub.f32 %v3799_v4, %v2610_v26  ;;  %v4956_v34 = vld [vmem:[#allocation11 + $0x228] sm:$0xff]   ;;  %v4960_v26 = vld [vmem:[#allocation11 + $0x1b0] sm:$0xff]  }
 0x1bb   : > { %4517 = vmatpush3.bf16.msra.mxu1 %v6045_v59  ;;  %4528 = vmatprep.mubr.bf16.mxu1 %v6019_v6  ;;  %v2631_v59 = vsub.f32 %v3798_v9, %v2607_v18  ;;  %v4955_v9 = vld [vmem:[#allocation11 + $0x1e8] sm:$0xff]  }
 0x1bc   : > { %4518 = vmatprep.subr.bf16.mxu1 %v6056_v24 }
 0x1bd   : > { %4247 = vmatpush3.bf16.msra.mxu0 %v6059_v32  ;;  %v2646_v32 = vpack.c.bf16 %v2634_v36, %v2631_v59  ;;  %v4961_v59 = vld [vmem:[#allocation11 + $0x1f8] sm:$0xff]  }
 0x1be   : > { %4248 = vmatprep.subr.bf16.mxu0 %v6065_v13 }
 0x1bf   : > { %4519 = vmatpush3.bf16.msra.mxu1 %v6056_v24 }
 0x1c0   : > { %2842 = vmatmul.mubr.bf16.gmra.mrb[104].mxu0 %v2643_v10  ;;  %4520 = vmatprep.subr.bf16.mxu1 %v6070_v53 }
 0x1c1   : > { %4249 = vmatpush3.bf16.msra.mxu0 %v6073_v19  ;;  %2849 = vmatprep.mubr.bf16.mxu0 %v2647_v27 }
 0x1c2   : > { %4250 = vmatprep.subr.bf16.mxu0 %v6078_v21 }
 0x1c3   : > { %4521 = vmatpush3.bf16.msra.mxu1 %v6070_v53  ;;  %v3892_v28 = vpop.f32.mrb[0].mxu0  ;;  %v4940_v53 = vld [vmem:[#allocation11 + $0x1c0] sm:$0xff]  }
 0x1c4   : > { %v3893_v25 = vpop.f32.mrb[1].mxu0  ;;  %4522 = vmatprep.subr.bf16.mxu1 %v6083_v11 }
 0x1c5   : > { %v6178_v13 = vadd.f32 %v3893_v25, %v3892_v28  ;;  %v3895_v24 = vpop.f32.mrb[2].mxu0  ;;  %4251 = vmatpush3.bf16.msra.mxu0 %v6088_v57  ;;  %v4962_v25 = vld [vmem:[#allocation11 + $0x238] sm:$0xff]  }
 0x1c6   : > { %v3896_v30 = vpop.f32.mrb[3].mxu0  ;;  %4252 = vmatprep.subr.bf16.mxu0 %v6094_v41  ;;  %v4941_v41 = vld [vmem:[#allocation11 + $0x200] sm:$0xff]  }
 0x1c7   : > { %4523 = vmatpush3.bf16.msra.mxu1 %v6083_v11  ;;  %v6183_v19 = vadd.f32 %v3896_v30, %v3895_v24  ;;  %v4963_v24 = vld [vmem:[#allocation11 + $0x1b8] sm:$0xff]  }
 0x1c8   : > { %2850 = vmatmul.mubr.bf16.gmra.mrb[108].mxu0 %v2646_v32  ;;  %4524 = vmatprep.subr.bf16.mxu1 %v6102_v7 }
 0x1c9   : > { %4253 = vmatpush3.bf16.msra.mxu0 %v6107_v12  ;;  %2955 = vmatprep.mubr.bf16.mxu0 %v6062_v49  ;;  %v4943_v12 = vld [vmem:[#allocation11 + $0x1c8] sm:$0xff]  }
 0x1ca   : > { %4254 = vmatprep.subr.bf16.mxu0 %v6112_v45 }
 0x1cb   : > { %4525 = vmatpush3.bf16.msra.mxu1 %v6102_v7  ;;  %v3898_v21 = vpop.f32.mrb[4].mxu0  ;;  %v4944_v7 = vld [vmem:[#allocation11 + $0x208] sm:$0xff]  }
 0x1cc   : > { %v3899_v57 = vpop.f32.mrb[5].mxu0  ;;  %4526 = vmatprep.subr.bf16.mxu1 %v6121_v47 }
 0x1cd   : > { %v6191_v11 = vadd.f32 %v3899_v57, %v3898_v21  ;;  %v3901_v60 = vpop.f32.mrb[6].mxu0  ;;  %4255 = vmatpush3.bf16.msra.mxu0 %v6126_v55  ;;  %v4946_v55 = vld [vmem:[#allocation11 + $0x1d0] sm:$0xff]  }
 0x1ce   : > { %v3902_v50 = vpop.f32.mrb[7].mxu0  ;;  %4292 = vmatprep.subr.bf16.mxu0 %v4940_v53 }
 0x1cf   : > { %4527 = vmatpush3.bf16.msra.mxu1 %v6121_v47  ;;  %v6195_v45 = vadd.f32 %v3902_v50, %v3901_v60  ;;  %v4947_v47 = vld [vmem:[#allocation11 + $0x210] sm:$0xff]  }
 0x1d0   : > { %2956 = vmatmul.mubr.bf16.vlgmr.msra.gmra.mrb[112].mxu0 %v6085_v42  ;;  %4536 = vmatprep.subr.bf16.mxu1 %v4941_v41 }
 0x1d1   : > { %4293 = vmatpush3.bf16.msra.mxu0 %v4942_v5  ;;  %2963 = vmatprep.mubr.bf16.mxu0 %v6091_v31 }
 0x1d2   : > { %4529 = vmatmul.mubr.bf16.vlgmr.msra.gmra.mrb[0].mxu1 %v6096_v37  ;;  %4294 = vmatprep.subr.bf16.mxu0 %v4943_v12 }
 0x1d3   : > { %4537 = vmatpush3.bf16.msra.mxu1 %v4941_v41  ;;  %v3904_v16 = vpop.f32.mrb[8].mxu0  ;;  %4532 = vmatprep.mubr.bf16.mxu1 %v6099_v39 }
 0x1d4   : > { %v3905_v46 = vpop.f32.mrb[9].mxu0  ;;  %4538 = vmatprep.subr.bf16.mxu1 %v4944_v7 }
 0x1d5   : > { %v6201_v23 = vadd.f32 %v3905_v46, %v3904_v16  ;;  %v3907_v54 = vpop.f32.mrb[10].mxu0  ;;  %4295 = vmatpush3.bf16.msra.mxu0 %v4945_v48 }
 0x1d6   : > { %v3908_v35 = vpop.f32.mrb[11].mxu0  ;;  %4296 = vmatprep.subr.bf16.mxu0 %v4946_v55 }
 0x1d7   : > { %4539 = vmatpush3.bf16.msra.mxu1 %v4944_v7  ;;  %v6203_v63 = vadd.f32 %v3908_v35, %v3907_v54 }
 0x1d8   : > { %2964 = vmatmul.mubr.bf16.gmra.mrb[116].mxu0 %v6123_v52  ;;  %4540 = vmatprep.subr.bf16.mxu1 %v4947_v47 }
 0x1d9   : > { %4297 = vmatpush3.bf16.msra.mxu0 %v4948_v43  ;;  %2971 = vmatprep.mubr.bf16.mxu0 %v6128_v3 }
 0x1da   : > { %4298 = vmatprep.subr.bf16.mxu0 %v4949_v56  ;;  %4533 = vmatmul.mubr.bf16.gmra.mrb[4].mxu1 %v6131_v51 }
 0x1db   : > { %4541 = vmatpush3.bf16.msra.mxu1 %v4947_v47  ;;  %v3910_v17 = vpop.f32.mrb[12].mxu0  ;;  %4552 = vmatprep.mubr.bf16.mxu1 %v6019_v6  ;;  %v4957_v6 = vld [vmem:[#allocation11 + $0x1a8] sm:$0xff]  }
 0x1dc   : > { %v3911_v44 = vpop.f32.mrb[13].mxu0  ;;  %4542 = vmatprep.subr.bf16.mxu1 %v4950_v40 }
 0x1dd   : > { %v6209_v8 = vadd.f32 %v3911_v44, %v3910_v17  ;;  %v3913_v22 = vpop.f32.mrb[14].mxu0  ;;  %4299 = vmatpush3.bf16.msra.mxu0 %v4951_v38 }
 0x1de   : > { %v3914_v61 = vpop.f32.mrb[15].mxu0  ;;  %4300 = vmatprep.subr.bf16.mxu0 %v4952_v58 }
 0x1df   : > { %4543 = vmatpush3.bf16.msra.mxu1 %v4950_v40  ;;  %v6211_v4 = vadd.f32 %v3914_v61, %v3913_v22 }
 0x1e0   : > { %2972 = vmatmul.mubr.bf16.gmra.mrb[120].mxu0 %v6145_v62  ;;  %4544 = vmatprep.subr.bf16.mxu1 %v4953_v1 }
 0x1e1   : > { %4301 = vmatpush3.bf16.msra.mxu0 %v4954_v2  ;;  %2979 = vmatprep.mubr.bf16.mxu0 %v6148_v15 }
 0x1e2   : > { %4302 = vmatprep.subr.bf16.mxu0 %v4955_v9 }
 0x1e3   : > { %4545 = vmatpush3.bf16.msra.mxu1 %v4953_v1  ;;  %v3944_v14 = vpop.f32.mrb[16].mxu0 }
 0x1e4   : > { %v3945_v20 = vpop.f32.mrb[17].mxu0  ;;  %4546 = vmatprep.subr.bf16.mxu1 %v4956_v34 }
 0x1e5   : > { %v3946_v10 = vadd.f32 %v3945_v20, %v3944_v14  ;;  %v3947_v18 = vpop.f32.mrb[18].mxu0  ;;  %4303 = vmatpush3.bf16.msra.mxu0 %v4957_v6 }
 0x1e6   : > { %v3948_v27 = vpop.f32.mrb[19].mxu0  ;;  %4304 = vmatprep.subr.bf16.mxu0 %v4958_v0 }
 0x1e7   : > { %v4569_v36 = vadd.f32 %v3946_v10, %v6178_v13  ;;  %4547 = vmatpush3.bf16.msra.mxu1 %v4956_v34  ;;  %v3949_v28 = vadd.f32 %v3948_v27, %v3947_v18 }
 0x1e8   : > { %2980 = vmatmul.mubr.bf16.gmra.mrb[124].mxu0 %v6161_v29  ;;  %4548 = vmatprep.subr.bf16.mxu1 %v4959_v33 }
 0x1e9   : > { %v4587_v32 = vadd.f32 %v3949_v28, %v6183_v19  ;;  %4305 = vmatpush3.bf16.msra.mxu0 %v4960_v26  ;;  %3229 = vmatprep.mubr.bf16.mxu0 %v6062_v49 }
 0x1ea   : > { %4306 = vmatprep.subr.bf16.mxu0 %v4961_v59 }
 0x1eb   : > { %4549 = vmatpush3.bf16.msra.mxu1 %v4959_v33  ;;  %v3950_v30 = vpop.f32.mrb[20].mxu0 }
 0x1ec   : > { %v3951_v53 = vpop.f32.mrb[21].mxu0  ;;  %4550 = vmatprep.subr.bf16.mxu1 %v4962_v25 }
 0x1ed   : > { %v3952_v21 = vadd.f32 %v3951_v53, %v3950_v30  ;;  %v3953_v57 = vpop.f32.mrb[22].mxu0  ;;  %4307 = vmatpush3.bf16.msra.mxu0 %v4963_v24 }
 0x1ee   : > { %v3954_v13 = vpop.f32.mrb[23].mxu0 }
 0x1ef   : > { %v4560_v41 = vadd.f32 %v3952_v21, %v6191_v11  ;;  %4551 = vmatpush3.bf16.msra.mxu1 %v4962_v25  ;;  %v3955_v60 = vadd.f32 %v3954_v13, %v3953_v57 }
 0x1f0   : > { %3230 = vmatmul.mubr.bf16.vlgmr.msra.gmra.mrb[128].mxu0 %v6085_v42 }
 0x1f1   : > { %v4578_v19 = vadd.f32 %v3955_v60, %v6195_v45  ;;  %3237 = vmatprep.mubr.bf16.mxu0 %v6091_v31 }
 0x1f2   : > { %4553 = vmatmul.mubr.bf16.vlgmr.msra.gmra.mrb[0].mxu1 %v6096_v37 }
 0x1f3   : > { %v3956_v49 = vpop.f32.mrb[24].mxu0  ;;  %4556 = vmatprep.mubr.bf16.mxu1 %v6099_v39 }
 0x1f4   : > { %v3957_v5 = vpop.f32.mrb[25].mxu0 }
 0x1f5   : > { %v3958_v50 = vadd.f32 %v3957_v5, %v3956_v49  ;;  %v3959_v12 = vpop.f32.mrb[26].mxu0 }
 0x1f6   : > { %v3960_v7 = vpop.f32.mrb[27].mxu0 }
 0x1f7   : > { %v4605_v48 = vadd.f32 %v3958_v50, %v6201_v23  ;;  %v3961_v11 = vadd.f32 %v3960_v7, %v3959_v12 }
 0x1f8   : > { %3238 = vmatmul.mubr.bf16.gmra.mrb[132].mxu0 %v6123_v52 }
 0x1f9   : > { %v4623_v42 = vadd.f32 %v3961_v11, %v6203_v63  ;;  %3245 = vmatprep.mubr.bf16.mxu0 %v6128_v3 }
 0x1fa   : > { %4557 = vmatmul.mubr.bf16.gmra.mrb[4].mxu1 %v6131_v51 }
 0x1fb   : > { %v3962_v31 = vpop.f32.mrb[28].mxu0 }
 0x1fc   : > { %v3963_v37 = vpop.f32.mrb[29].mxu0 }
 0x1fd   : > { %v3964_v45 = vadd.f32 %v3963_v37, %v3962_v31  ;;  %v3965_v55 = vpop.f32.mrb[30].mxu0 }
 0x1fe   : > { %v3966_v39 = vpop.f32.mrb[31].mxu0 }
 0x1ff   : > { %v4596_v16 = vadd.f32 %v3964_v45, %v6209_v8  ;;  %v3967_v46 = vadd.f32 %v3966_v39, %v3965_v55 }
 0x200   : > { %3246 = vmatmul.mubr.bf16.gmra.mrb[136].mxu0 %v6145_v62 }
 0x201   : > { %v4614_v47 = vadd.f32 %v3967_v46, %v6211_v4  ;;  %3253 = vmatprep.mubr.bf16.mxu0 %v6148_v15 }
 0x203   : > { %v3996_v52 = vpop.f32.mrb[32].mxu0 }
 0x204   : > { %v3997_v23 = vpop.f32.mrb[33].mxu0 }
 0x205   : > { %v3998_v54 = vadd.f32 %v3997_v23, %v3996_v52  ;;  %v3999_v3 = vpop.f32.mrb[34].mxu0 }
 0x206   : > { %v4000_v43 = vpop.f32.mrb[35].mxu0 }
 0x207   : > { %v4570_v51 = vadd.f32 %v4569_v36, %v3998_v54  ;;  %v4001_v35 = vadd.f32 %v4000_v43, %v3999_v3 }
 0x208   : > { %3254 = vmatmul.mubr.bf16.gmra.mrb[140].mxu0 %v6161_v29 }
 0x209   : > { %v4588_v56 = vadd.f32 %v4587_v32, %v4001_v35 }
 0x20b   : > { %v4002_v63 = vpop.f32.mrb[36].mxu0 }
 0x20c   : > { %v4003_v40 = vpop.f32.mrb[37].mxu0 }
 0x20d   : > { %v4004_v38 = vadd.f32 %v4003_v40, %v4002_v63  ;;  %v4005_v58 = vpop.f32.mrb[38].mxu0 }
 0x20e   : > { %v4006_v17 = vpop.f32.mrb[39].mxu0 }
 0x20f   : > { %v4561_v62 = vadd.f32 %v4560_v41, %v4004_v38  ;;  %v4007_v44 = vadd.f32 %v4006_v17, %v4005_v58 }
 0x211   : > { %v4579_v1 = vadd.f32 %v4578_v19, %v4007_v44 }
 0x213   : > { %v4008_v8 = vpop.f32.mrb[40].mxu0 }
 0x214   : > { %v4009_v15 = vpop.f32.mrb[41].mxu0 }
 0x215   : > { %v4010_v22 = vadd.f32 %v4009_v15, %v4008_v8  ;;  %v4011_v2 = vpop.f32.mrb[42].mxu0 }
 0x216   : > { %v4012_v61 = vpop.f32.mrb[43].mxu0 }
 0x217   : > { %v4606_v9 = vadd.f32 %v4605_v48, %v4010_v22  ;;  %v4013_v4 = vadd.f32 %v4012_v61, %v4011_v2 }
 0x219   : > { %v4624_v34 = vadd.f32 %v4623_v42, %v4013_v4 }
 0x21b   : > { %v4014_v6 = vpop.f32.mrb[44].mxu0 }
 0x21c   : > { %v4015_v0 = vpop.f32.mrb[45].mxu0 }
 0x21d   : > { %v4016_v29 = vadd.f32 %v4015_v0, %v4014_v6  ;;  %v4017_v14 = vpop.f32.mrb[46].mxu0 }
 0x21e   : > { %v4018_v20 = vpop.f32.mrb[47].mxu0 }
 0x21f   : > { %v4597_v33 = vadd.f32 %v4596_v16, %v4016_v29  ;;  %v4019_v10 = vadd.f32 %v4018_v20, %v4017_v14 }
 0x221   : > { %v4615_v18 = vadd.f32 %v4614_v47, %v4019_v10 }
 0x223   : > { %v4048_v26 = vpop.f32.mrb[48].mxu0 }
 0x224   : > { %v4049_v27 = vpop.f32.mrb[49].mxu0 }
 0x225   : > { %v4050_v59 = vadd.f32 %v4049_v27, %v4048_v26  ;;  %v4051_v36 = vpop.f32.mrb[50].mxu0 }
 0x226   : > { %v4052_v28 = vpop.f32.mrb[51].mxu0 }
 0x227   : > { %v4571_v25 = vadd.f32 %v4570_v51, %v4050_v59  ;;  %v4053_v32 = vadd.f32 %v4052_v28, %v4051_v36 }
 0x229   : > { %v4589_v24 = vadd.f32 %v4588_v56, %v4053_v32 }
 0x22b   : > { %v4054_v30 = vpop.f32.mrb[52].mxu0 }
 0x22c   : > { %v4055_v53 = vpop.f32.mrb[53].mxu0 }
 0x22d   : > { %v4056_v21 = vadd.f32 %v4055_v53, %v4054_v30  ;;  %v4057_v57 = vpop.f32.mrb[54].mxu0 }
 0x22e   : > { %v4058_v13 = vpop.f32.mrb[55].mxu0 }
 0x22f   : > { %v4562_v41 = vadd.f32 %v4561_v62, %v4056_v21  ;;  %v4059_v60 = vadd.f32 %v4058_v13, %v4057_v57 }
 0x231   : > { %v4580_v19 = vadd.f32 %v4579_v1, %v4059_v60 }
 0x233   : > { %v4060_v49 = vpop.f32.mrb[56].mxu0 }
 0x234   : > { %v4061_v5 = vpop.f32.mrb[57].mxu0 }
 0x235   : > { %v4062_v50 = vadd.f32 %v4061_v5, %v4060_v49  ;;  %v4063_v12 = vpop.f32.mrb[58].mxu0 }
 0x236   : > { %v4064_v7 = vpop.f32.mrb[59].mxu0 }
 0x237   : > { %v4607_v48 = vadd.f32 %v4606_v9, %v4062_v50  ;;  %v4065_v11 = vadd.f32 %v4064_v7, %v4063_v12 }
 0x239   : > { %v4625_v42 = vadd.f32 %v4624_v34, %v4065_v11 }
 0x23b   : > { %v4066_v31 = vpop.f32.mrb[60].mxu0 }
 0x23c   : > { %v4067_v37 = vpop.f32.mrb[61].mxu0 }
 0x23d   : > { %v4068_v45 = vadd.f32 %v4067_v37, %v4066_v31  ;;  %v4069_v55 = vpop.f32.mrb[62].mxu0 }
 0x23e   : > { %v4070_v39 = vpop.f32.mrb[63].mxu0 }
 0x23f   : > { %v4598_v16 = vadd.f32 %v4597_v33, %v4068_v45  ;;  %v4071_v46 = vadd.f32 %v4070_v39, %v4069_v55 }
 0x241   : > { %v4616_v47 = vadd.f32 %v4615_v18, %v4071_v46 }
 0x243   : > { %v4100_v52 = vpop.f32.mrb[64].mxu0 }
 0x244   : > { %v4101_v23 = vpop.f32.mrb[65].mxu0 }
 0x245   : > { %v4102_v54 = vadd.f32 %v4101_v23, %v4100_v52  ;;  %v4103_v3 = vpop.f32.mrb[66].mxu0 }
 0x246   : > { %v4104_v43 = vpop.f32.mrb[67].mxu0 }
 0x247   : > { %v4572_v51 = vadd.f32 %v4571_v25, %v4102_v54  ;;  %v4105_v35 = vadd.f32 %v4104_v43, %v4103_v3 }
 0x249   : > { %v4590_v56 = vadd.f32 %v4589_v24, %v4105_v35 }
 0x24b   : > { %v4106_v63 = vpop.f32.mrb[68].mxu0 }
 0x24c   : > { %v4107_v40 = vpop.f32.mrb[69].mxu0 }
 0x24d   : > { %v4108_v38 = vadd.f32 %v4107_v40, %v4106_v63  ;;  %v4109_v58 = vpop.f32.mrb[70].mxu0 }
 0x24e   : > { %v4110_v17 = vpop.f32.mrb[71].mxu0 }
 0x24f   : > { %v4563_v62 = vadd.f32 %v4562_v41, %v4108_v38  ;;  %v4111_v44 = vadd.f32 %v4110_v17, %v4109_v58 }
 0x251   : > { %v4581_v1 = vadd.f32 %v4580_v19, %v4111_v44 }
 0x253   : > { %v4112_v8 = vpop.f32.mrb[72].mxu0 }
 0x254   : > { %v4113_v15 = vpop.f32.mrb[73].mxu0 }
 0x255   : > { %v4114_v22 = vadd.f32 %v4113_v15, %v4112_v8  ;;  %v4115_v2 = vpop.f32.mrb[74].mxu0 }
 0x256   : > { %v4116_v61 = vpop.f32.mrb[75].mxu0 }
 0x257   : > { %v4608_v9 = vadd.f32 %v4607_v48, %v4114_v22  ;;  %v4117_v4 = vadd.f32 %v4116_v61, %v4115_v2 }
 0x259   : > { %v4626_v34 = vadd.f32 %v4625_v42, %v4117_v4 }
 0x25b   : > { %v4118_v6 = vpop.f32.mrb[76].mxu0 }
 0x25c   : > { %v4119_v0 = vpop.f32.mrb[77].mxu0 }
 0x25d   : > { %v4120_v29 = vadd.f32 %v4119_v0, %v4118_v6  ;;  %v4121_v14 = vpop.f32.mrb[78].mxu0 }
 0x25e   : > { %v4122_v20 = vpop.f32.mrb[79].mxu0 }
 0x25f   : > { %v4599_v33 = vadd.f32 %v4598_v16, %v4120_v29  ;;  %v4123_v10 = vadd.f32 %v4122_v20, %v4121_v14 }
 0x261   : > { %v4617_v18 = vadd.f32 %v4616_v47, %v4123_v10 }
 0x263   : > { %v4152_v26 = vpop.f32.mrb[80].mxu0 }
 0x264   : > { %v4153_v27 = vpop.f32.mrb[81].mxu0 }
 0x265   : > { %v4154_v59 = vadd.f32 %v4153_v27, %v4152_v26  ;;  %v4155_v36 = vpop.f32.mrb[82].mxu0 }
 0x266   : > { %v4156_v28 = vpop.f32.mrb[83].mxu0 }
 0x267   : > { %v4573_v25 = vadd.f32 %v4572_v51, %v4154_v59  ;;  %v4157_v32 = vadd.f32 %v4156_v28, %v4155_v36 }
 0x269   : > { %v4591_v24 = vadd.f32 %v4590_v56, %v4157_v32 }
 0x26b   : > { %v4158_v30 = vpop.f32.mrb[84].mxu0 }
 0x26c   : > { %v4159_v53 = vpop.f32.mrb[85].mxu0 }
 0x26d   : > { %v4160_v21 = vadd.f32 %v4159_v53, %v4158_v30  ;;  %v4161_v57 = vpop.f32.mrb[86].mxu0 }
 0x26e   : > { %v4162_v13 = vpop.f32.mrb[87].mxu0 }
 0x26f   : > { %v4564_v41 = vadd.f32 %v4563_v62, %v4160_v21  ;;  %v4163_v60 = vadd.f32 %v4162_v13, %v4161_v57 }
 0x271   : > { %v4582_v19 = vadd.f32 %v4581_v1, %v4163_v60 }
 0x273   : > { %v4164_v49 = vpop.f32.mrb[88].mxu0 }
 0x274   : > { %v4165_v5 = vpop.f32.mrb[89].mxu0 }
 0x275   : > { %v4166_v50 = vadd.f32 %v4165_v5, %v4164_v49  ;;  %v4167_v12 = vpop.f32.mrb[90].mxu0 }
 0x276   : > { %v4168_v7 = vpop.f32.mrb[91].mxu0 }
 0x277   : > { %v4609_v48 = vadd.f32 %v4608_v9, %v4166_v50  ;;  %v4169_v11 = vadd.f32 %v4168_v7, %v4167_v12 }
 0x279   : > { %v4627_v42 = vadd.f32 %v4626_v34, %v4169_v11 }
 0x27b   : > { %v4170_v31 = vpop.f32.mrb[92].mxu0 }
 0x27c   : > { %v4171_v37 = vpop.f32.mrb[93].mxu0 }
 0x27d   : > { %v4172_v45 = vadd.f32 %v4171_v37, %v4170_v31  ;;  %v4173_v55 = vpop.f32.mrb[94].mxu0 }
 0x27e   : > { %v4174_v39 = vpop.f32.mrb[95].mxu0 }
 0x27f   : > { %v4600_v16 = vadd.f32 %v4599_v33, %v4172_v45  ;;  %v4175_v46 = vadd.f32 %v4174_v39, %v4173_v55 }
 0x281   : > { %v4618_v47 = vadd.f32 %v4617_v18, %v4175_v46 }
 0x283   : > { %v4204_v52 = vpop.f32.mrb[96].mxu0 }
 0x284   : > { %v4205_v23 = vpop.f32.mrb[97].mxu0 }
 0x285   : > { %v4206_v54 = vadd.f32 %v4205_v23, %v4204_v52  ;;  %v4207_v3 = vpop.f32.mrb[98].mxu0 }
 0x286   : > { %v4208_v43 = vpop.f32.mrb[99].mxu0 }
 0x287   : > { %v4574_v51 = vadd.f32 %v4573_v25, %v4206_v54  ;;  %v4209_v35 = vadd.f32 %v4208_v43, %v4207_v3 }
 0x289   : > { %v4592_v56 = vadd.f32 %v4591_v24, %v4209_v35 }
 0x28b   : > { %v4210_v63 = vpop.f32.mrb[100].mxu0 }
 0x28c   : > { %v4211_v40 = vpop.f32.mrb[101].mxu0 }
 0x28d   : > { %v4212_v38 = vadd.f32 %v4211_v40, %v4210_v63  ;;  %v4213_v58 = vpop.f32.mrb[102].mxu0 }
 0x28e   : > { %v4214_v17 = vpop.f32.mrb[103].mxu0 }
 0x28f   : > { %v4565_v62 = vadd.f32 %v4564_v41, %v4212_v38  ;;  %v4215_v44 = vadd.f32 %v4214_v17, %v4213_v58 }
 0x291   : > { %v4583_v1 = vadd.f32 %v4582_v19, %v4215_v44 }
 0x293   : > { %v4216_v8 = vpop.f32.mrb[104].mxu0 }
 0x294   : > { %v4217_v15 = vpop.f32.mrb[105].mxu0 }
 0x295   : > { %v4218_v22 = vadd.f32 %v4217_v15, %v4216_v8  ;;  %v4219_v2 = vpop.f32.mrb[106].mxu0 }
 0x296   : > { %v4220_v61 = vpop.f32.mrb[107].mxu0 }
 0x297   : > { %v4610_v9 = vadd.f32 %v4609_v48, %v4218_v22  ;;  %v4221_v4 = vadd.f32 %v4220_v61, %v4219_v2 }
 0x299   : > { %v4628_v34 = vadd.f32 %v4627_v42, %v4221_v4 }
 0x29b   : > { %v4222_v6 = vpop.f32.mrb[108].mxu0 }
 0x29c   : > { %v4223_v0 = vpop.f32.mrb[109].mxu0 }
 0x29d   : > { %v4224_v29 = vadd.f32 %v4223_v0, %v4222_v6  ;;  %v4225_v14 = vpop.f32.mrb[110].mxu0 }
 0x29e   : > { %v4226_v20 = vpop.f32.mrb[111].mxu0 }
 0x29f   : > { %v4601_v33 = vadd.f32 %v4600_v16, %v4224_v29  ;;  %v4227_v10 = vadd.f32 %v4226_v20, %v4225_v14 }
 0x2a1   : > { %v4619_v18 = vadd.f32 %v4618_v47, %v4227_v10 }
 0x2a3   : > { %v4256_v26 = vpop.f32.mrb[112].mxu0 }
 0x2a4   : > { %v4257_v27 = vpop.f32.mrb[113].mxu0 }
 0x2a5   : > { %v4258_v59 = vadd.f32 %v4257_v27, %v4256_v26  ;;  %v4259_v36 = vpop.f32.mrb[114].mxu0 }
 0x2a6   : > { %v4260_v28 = vpop.f32.mrb[115].mxu0 }
 0x2a7   : > { %v4575_v25 = vadd.f32 %v4574_v51, %v4258_v59  ;;  %v4261_v32 = vadd.f32 %v4260_v28, %v4259_v36 }
 0x2a9   : > { %v4593_v24 = vadd.f32 %v4592_v56, %v4261_v32 }
 0x2ab   : > { %v4262_v30 = vpop.f32.mrb[116].mxu0 }
 0x2ac   : > { %v4263_v53 = vpop.f32.mrb[117].mxu0 }
 0x2ad   : > { %v4264_v21 = vadd.f32 %v4263_v53, %v4262_v30  ;;  %v4265_v57 = vpop.f32.mrb[118].mxu0 }
 0x2ae   : > { %v4266_v13 = vpop.f32.mrb[119].mxu0 }
 0x2af   : > { %v4566_v41 = vadd.f32 %v4565_v62, %v4264_v21  ;;  %v4267_v60 = vadd.f32 %v4266_v13, %v4265_v57 }
 0x2b1   : > { %v4584_v19 = vadd.f32 %v4583_v1, %v4267_v60 }
 0x2b3   : > { %v4268_v49 = vpop.f32.mrb[120].mxu0 }
 0x2b4   : > { %v4269_v5 = vpop.f32.mrb[121].mxu0 }
 0x2b5   : > { %v4270_v50 = vadd.f32 %v4269_v5, %v4268_v49  ;;  %v4271_v12 = vpop.f32.mrb[122].mxu0 }
 0x2b6   : > { %v4272_v7 = vpop.f32.mrb[123].mxu0 }
 0x2b7   : > { %v4611_v48 = vadd.f32 %v4610_v9, %v4270_v50  ;;  %v4273_v11 = vadd.f32 %v4272_v7, %v4271_v12 }
 0x2b9   : > { %v4629_v42 = vadd.f32 %v4628_v34, %v4273_v11 }
 0x2bb   : > { %v4274_v31 = vpop.f32.mrb[124].mxu0 }
 0x2bc   : > { %v4275_v37 = vpop.f32.mrb[125].mxu0 }
 0x2bd   : > { %v4276_v45 = vadd.f32 %v4275_v37, %v4274_v31  ;;  %v4277_v55 = vpop.f32.mrb[126].mxu0 }
 0x2be   : > { %v4278_v39 = vpop.f32.mrb[127].mxu0 }
 0x2bf   : > { %v6235_v16 = vadd.f32 %v4601_v33, %v4276_v45  ;;  %v4279_v46 = vadd.f32 %v4278_v39, %v4277_v55 }
 0x2c1   : > { %v6237_v47 = vadd.f32 %v4619_v18, %v4279_v46 }
 0x2c3   : > { %v4308_v52 = vpop.f32.mrb[128].mxu0 }
 0x2c4   : > { %v4309_v23 = vpop.f32.mrb[129].mxu0 }
 0x2c5   : > { %v4554_v54 = vpop.f32.mrb[0].mxu1  ;;  %v4310_v3 = vadd.f32 %v4309_v23, %v4308_v52  ;;  %v4311_v43 = vpop.f32.mrb[130].mxu0 }
 0x2c6   : > { %v3296_v51 = vpop.f32.mrb[1].mxu1  ;;  %v4312_v35 = vpop.f32.mrb[131].mxu0 }
 0x2c7   : > { %v4576_v56 = vadd.f32 %v4575_v25, %v4310_v3  ;;  %v4555_v63 = vpop.f32.mrb[2].mxu1  ;;  %v4313_v40 = vadd.f32 %v4312_v35, %v4311_v43 }
 0x2c8   : > { %v3299_v38 = vpop.f32.mrb[3].mxu1 }
 0x2c9   : > { %v4577_v58 = vadd.f32 %v4576_v56, %v3296_v51  ;;  %v4594_v17 = vadd.f32 %v4593_v24, %v4313_v40 }
 0x2cb   : > { %3343 = vst [vmem:[%s5557_s17] sm:$0xff] %v4577_v58  ;;  %v4595_v62 = vadd.f32 %v4594_v17, %v3299_v38  ;;  %v4314_v44 = vpop.f32.mrb[132].mxu0  ;;  %v3368_v8 = vmul.f32 %v4577_v58, %v4577_v58 }
 0x2cc   : > { %v4315_v1 = vpop.f32.mrb[133].mxu0 }
 0x2cd   : > { %3344 = vst [vmem:[%s5557_s17 + $0x8] sm:$0xff] %v4595_v62  ;;  %v3352_v15 = vadd.f32 %v4595_v62, %v4577_v58  ;;  %v3369_v22 = vmul.f32 %v4595_v62, %v4595_v62  ;;  %v4558_v2 = vpop.f32.mrb[4].mxu1  ;;  %v4316_v61 = vadd.f32 %v4315_v1, %v4314_v44  ;;  %v4317_v9 = vpop.f32.mrb[134].mxu0 }
 0x2ce   : > { %v3312_v4 = vpop.f32.mrb[5].mxu1  ;;  %v4318_v34 = vpop.f32.mrb[135].mxu0 }
 0x2cf   : > { %v3376_v6 = vadd.f32 %v3369_v22, %v3368_v8  ;;  %v4567_v0 = vadd.f32 %v4566_v41, %v4316_v61  ;;  %v4559_v29 = vpop.f32.mrb[6].mxu1  ;;  %v4319_v14 = vadd.f32 %v4318_v34, %v4317_v9 }
 0x2d0   : > { %v3315_v20 = vpop.f32.mrb[7].mxu1 }
 0x2d1   : > { %v4568_v33 = vadd.f32 %v4567_v0, %v4554_v54  ;;  %v4585_v10 = vadd.f32 %v4584_v19, %v4319_v14 }
 0x2d3   : > { %3345 = vst [vmem:[%s5557_s17 + $0x10] sm:$0xff] %v4568_v33  ;;  %v3353_v18 = vadd.f32 %v4568_v33, %v3352_v15  ;;  %v3370_v26 = vmul.f32 %v4568_v33, %v4568_v33  ;;  %v4586_v27 = vadd.f32 %v4585_v10, %v4555_v63  ;;  %v4320_v59 = vpop.f32.mrb[136].mxu0 }
 0x2d4   : > { %v4321_v36 = vpop.f32.mrb[137].mxu0 }
 0x2d5   : > { %v3377_v28 = vadd.f32 %v3376_v6, %v3370_v26  ;;  %3346 = vst [vmem:[%s5557_s17 + $0x18] sm:$0xff] %v4586_v27  ;;  %v3354_v25 = vadd.f32 %v4586_v27, %v3353_v18  ;;  %v3371_v32 = vmul.f32 %v4586_v27, %v4586_v27  ;;  %v4322_v24 = vadd.f32 %v4321_v36, %v4320_v59  ;;  %v4323_v30 = vpop.f32.mrb[138].mxu0 }
 0x2d6   : > { %v4324_v53 = vpop.f32.mrb[139].mxu0 }
 0x2d7   : > { %v3378_v21 = vadd.f32 %v3377_v28, %v3371_v32  ;;  %v4612_v57 = vadd.f32 %v4611_v48, %v4322_v24  ;;  %v4325_v13 = vadd.f32 %v4324_v53, %v4323_v30 }
 0x2d9   : > { %v4613_v41 = vadd.f32 %v4612_v57, %v3312_v4  ;;  %v4630_v60 = vadd.f32 %v4629_v42, %v4325_v13 }
 0x2db   : > { %3347 = vst [vmem:[%s5557_s17 + $0x20] sm:$0xff] %v4613_v41  ;;  %v3355_v19 = vadd.f32 %v4613_v41, %v3354_v25  ;;  %v3372_v49 = vmul.f32 %v4613_v41, %v4613_v41  ;;  %v4631_v5 = vadd.f32 %v4630_v60, %v3315_v20  ;;  %v4326_v50 = vpop.f32.mrb[140].mxu0 }
 0x2dc   : > { %v4327_v12 = vpop.f32.mrb[141].mxu0 }
 0x2dd   : > { %v3379_v7 = vadd.f32 %v3378_v21, %v3372_v49  ;;  %3348 = vst [vmem:[%s5557_s17 + $0x28] sm:$0xff] %v4631_v5  ;;  %v3356_v11 = vadd.f32 %v4631_v5, %v3355_v19  ;;  %v3373_v31 = vmul.f32 %v4631_v5, %v4631_v5  ;;  %v4328_v37 = vadd.f32 %v4327_v12, %v4326_v50  ;;  %v4329_v45 = vpop.f32.mrb[142].mxu0 }
 0x2de   : > { %v4330_v48 = vpop.f32.mrb[143].mxu0 }
 0x2df   : > { %v3380_v55 = vadd.f32 %v3379_v7, %v3373_v31  ;;  %v4603_v42 = vadd.f32 %v6235_v16, %v4328_v37  ;;  %v4331_v39 = vadd.f32 %v4330_v48, %v4329_v45 }
 0x2e1   : > { %v4604_v46 = vadd.f32 %v4603_v42, %v4558_v2  ;;  %v4621_v52 = vadd.f32 %v6237_v47, %v4331_v39 }
 0x2e3   : > { %3349 = vst [vmem:[%s5557_s17 + $0x30] sm:$0xff] %v4604_v46  ;;  %v3357_v23 = vadd.f32 %v4604_v46, %v3356_v11  ;;  %v3374_v16 = vmul.f32 %v4604_v46, %v4604_v46  ;;  %v4622_v54 = vadd.f32 %v4621_v52, %v4559_v29 }
 0x2e5   : > { %v3381_v3 = vadd.f32 %v3380_v55, %v3374_v16  ;;  %3350 = vst [vmem:[%s5557_s17 + $0x38] sm:$0xff] %v4622_v54  ;;  %v3358_v43 = vadd.f32 %v4622_v54, %v3357_v23  ;;  %v3375_v51 = vmul.f32 %v4622_v54, %v4622_v54 }
 0x2e6   : > { %5121 = shalt.err (!%p5118_p10)
}
 0x2e7   : > { %s5122_s30 = scalar_lea.hbm %s6252_s23, 1024  ;;  %s5126_s13 = scalar_lea.hbm %s6358_s5, 2048 }
 0x2e8   : > { %p5123_p13 = scmp.ne.s32.totalorder %s6252_s23, %s5122_s30  ;;  %p5127_p7 = scmp.lt.u32.totalorder %s6252_s23, %s6358_s5 }
 0x2e9   : > { %p5128_p11 = scmp.lt.u32.totalorder %s5126_s13, %s5122_s30  ;;  %p5130_p1 = scmp.lt.u32.totalorder %s5122_s30, %s6252_s23 }
 0x2ea   : > { %p5124_p9 = pnand %p5123_p13, %p5482_p6 }
 0x2eb   : > { %p5129_p12 = por %p5128_p11, %p5127_p7 }
 0x2ec   : > { %p5125_p3 = pneg %p5124_p9 }
 0x2ed   : > { %p5131_p2 = por %p5130_p1, %p5129_p12 }
 0x2ef   : > { %p5132_p4 = pnand %p5131_p2, %p5125_p3 }
 0x2f1   : > { %5135 = shalt.err (!%p5132_p4)
}
 0x2f2   : > { %s5267_s24 = smov 128   ;;  %s5268_s8 = smov 8   ;;  %v3382_v47 = vadd.f32 %v3381_v3, %v3375_v51  ;;  %v3359_v35 = vrot.slane %v3358_v43, 4  ;;  %v3351_v1 = vld [vmem:[#allocation13] sm:$0x1] }
 0x2f3   : > { %4714 = dma.vmem_to_hbm [thread:$0]  (%p5482_p6), %s6254_s11, 1024, %s6252_s23, %s3392_s27, %s5267_s24, %s5267_s24, %s5268_s8   ;;  %v3367_v22 = vld [vmem:[#allocation15] sm:$0x1] }
 0x2f4   : > { %v3360_v56 = vadd.f32 %v3359_v35, %v3358_v43  ;;  %v3383_v63 = vrot.slane %v3382_v47, 4  ;;  %s5269_s19 = smov [#allocation13]   ;;  %s5270_s1 = smov [#allocation15]  }
 0x2f5   : > { %s3421_s12 = sshll.u32 %s5269_s19, 4  ;;  %s3432_s15 = sshll.u32 %s5270_s1, 4  ;;  %s3422_s12 = int_to_ptr.vmem [resolvable:$true] %s3421_s12  ;;  %s6282_s15 = int_to_ptr.vmem [resolvable:$true] %s3432_s15 }
 0x2f6   : > { %v3361_v40 = vrot.slane %v3360_v56, 2  ;;  %v3384_v38 = vadd.f32 %v3383_v63, %v3382_v47  ;;  %s5136_s11 = scalar_lea.vmem %s3422_s12, 16  ;;  %p6391_p8 = scmp.ne.s32.totalorder %s6374_s10, 0 }
 0x2f7   : > { %p5137_p6 = scmp.ne.s32.totalorder %s3422_s12, %s5136_s11  ;;  %s5142_s23 = scalar_lea.vmem %s3422_s12, 32 }
 0x2f8   : > { %v3362_v58 = vadd.f32 %v3361_v40, %v3360_v56  ;;  %v3385_v17 = vrot.slane %v3384_v38, 2  ;;  %p5143_p10 = scmp.lt.s32.totalorder %s3422_s12, %s3422_s12  ;;  %p5144_p13 = scmp.lt.s32.totalorder %s5142_s23, %s5136_s11 }
 0x2f9   : > { %p5138_p0 = pnand %p5137_p6, %p6391_p8 }
 0x2fa   : > { %v3363_v62 = vrot.slane %v3362_v58, 1  ;;  %v3386_v44 = vadd.f32 %v3385_v17, %v3384_v38  ;;  %p5145_p9 = por %p5144_p13, %p5143_p10 }
 0x2fb   : > { %p5139_p5 = pneg %p5138_p0 }
 0x2fc   : > { %v3364_v8 = vadd.f32 %v3363_v62, %v3362_v58  ;;  %v3387_v15 = vrot.slane %v3386_v44, 1 }
 0x2fd   : > { %p5146_p3 = pnand %p5145_p9, %p5139_p5 }
 0x2fe   : > { %v3365_v2 = vadd.f32 %v3364_v8, %v3351_v1  ;;  %v3388_v61 = vadd.f32 %v3387_v15, %v3386_v44 }
 0x300   : > { %3366 = vst [vmem:[#allocation13] sm:$0x1] %v3365_v2  ;;  %v3389_v9 = vadd.f32 %v3388_v61, %v3367_v22 }
 0x301   : > { %5149 = shalt.err (!%p5146_p3)
}
 0x302   : > { %s5150_s16 = scalar_lea.hbm %s6359_s6, 16 }
 0x303   : > { %p5151_p7 = scmp.ne.s32.totalorder %s6359_s6, %s5150_s16  ;;  %p5156_p1 = scmp.lt.u32.totalorder %s5150_s16, %s6359_s6 }
 0x305   : > { %p5152_p11 = pnand %p5151_p7, %p6391_p8 }
 0x307   : > { %p5153_p12 = pneg %p5152_p11 }
 0x309   : > { %p5158_p2 = pnand %p5156_p1, %p5153_p12 }
 0x30b   : > { %5161 = shalt.err (!%p5158_p2)
}
 0x30c   : > { %4716 = dma.vmem_to_hbm [thread:$0]  (%p6391_p8), %s3422_s12, 16, %s6359_s6, [#allocation14]   ;;  %3390 = vst [vmem:[#allocation15] sm:$0x1] %v3389_v9 }
 0x30d   : > { %s5162_s24 = scalar_lea.vmem %s6282_s15, 16  ;;  %s5168_s8 = scalar_lea.vmem %s6282_s15, 32 }
 0x30e   : > { %p5163_p4 = scmp.ne.s32.totalorder %s6282_s15, %s5162_s24  ;;  %p5169_p5 = scmp.lt.s32.totalorder %s6282_s15, %s6282_s15 }
 0x30f   : > { %p5170_p10 = scmp.lt.s32.totalorder %s5168_s8, %s5162_s24 }
 0x310   : > { %p5164_p6 = pnand %p5163_p4, %p6391_p8 }
 0x311   : > { %p5171_p13 = por %p5170_p10, %p5169_p5 }
 0x312   : > { %p5165_p0 = pneg %p5164_p6 }
 0x314   : > { %p5172_p9 = pnand %p5171_p13, %p5165_p0 }
 0x316   : > { %5175 = shalt.err (!%p5172_p9)
}
 0x317   : > { %s5176_s11 = scalar_lea.hbm %s6360_s7, 16 }
 0x318   : > { %p5177_p3 = scmp.ne.s32.totalorder %s6360_s7, %s5176_s11  ;;  %p5182_p12 = scmp.lt.u32.totalorder %s5176_s11, %s6360_s7 }
 0x31a   : > { %p5178_p7 = pnand %p5177_p3, %p6391_p8 }
 0x31c   : > { %p5179_p11 = pneg %p5178_p7 }
 0x31e   : > { %p5184_p1 = pnand %p5182_p12, %p5179_p11 }
 0x320   : > { %5187 = shalt.err (!%p5184_p1)
}
 0x321   : > { %4718 = dma.vmem_to_hbm [thread:$0]  (%p6391_p8), %s6282_s15, 16, %s6360_s7, [#allocation14]  }
 0x322   : > { %5225 = dma.done.wait (%p6391_p8), [#allocation14], 32  }
 0x323   : > { %5227 = vsyncadd (%p6391_p8), [#allocation14], 4294967264 }
 0x324 PF: > { %s6392_s21 = sld [smem:[#allocation21_spill]]  ;;  %s6393_s20 = sld [smem:[#allocation22_spill]] }
 0x325   : > { %p6395_p4 = scmp.ge.s32.totalorder %s5254_s29, 2 }
 0x32a   : > { %s3452_s13 = sand.u32 1, %s6392_s21   ;;  %p6394_p2 = scmp.ne.s32.totalorder %s6393_s20, 0 }
 0x32b   : > { %s3453_s17 = scalar_lea.sflag [#allocation5], %s3452_s13 }
 0x32c   : > { %p4742_p6 = pnand %p6395_p4, %p6394_p2 }
 0x32e   : > { %5229 = dma.done.wait (!%p4742_p6), %s3453_s17, 1024  }
 0x32f   : > { %5231 = vsyncadd (!%p4742_p6), %s3453_s17, 4294966272  ;;  %s27_s29 = sadd.s32 1, %s5254_s29   ;;  %s6396_s24 = smov %s5238_s25 }
 0x330   : > { %p24_p0 = scmp.ge.s32.totalorder %s27_s29, 4   ;;  %s6397_s25 = smov %s5242_s26 }
 0x331   : > { %s6398_s26 = smov %s5491_s22  ;;  %s6399_s27 = smov %s5250_s28 }
 0x332   : > { %s6400_s28 = smov %s6402_s14  ;;  %26 = sbr.rel (!%p24_p0) target bundleno = 11 (0xb), region = 202 }
 0x339   :  { %3458 = vsyncpa [#allocation4], 1 }
 0x33a   :  { %3460 = vsyncpa [#allocation4 + $0x1], 1 }
 0x33b   :  { %3461 = vsyncpa [#allocation7], 1 }
 0x33c   :  { %3462 = vsyncpa [#allocation10], 1 }
 0x33d   :  { %3463 = vsyncpa [#allocation5], 1 }
 0x33e   :  { %3465 = vsyncpa [#allocation5 + $0x1], 1 }
 0x33f   :  { %3466 = vsyncpa [#allocation14], 1 }

</bundles_post_ra>
